<compile_context>
chip_gen: v6e
topology: v6e:2x2x1
jax: 0.10.0
libtpu: 0.0.40
codegen_flags: <defaults>
</compile_context>

<pallas_src>
import jax
import jax.numpy as jnp
from jax.experimental import pallas as pl
from jax.experimental.pallas import tpu as pltpu

EPS = 1e-5  # PyTorch LayerNorm default eps


def _layernorm(x, w, b):
    # single-pass: the two reductions (sum x, sum x^2) are independent -> shorter XLU chain.
    mu = jnp.mean(x, axis=-1, keepdims=True)
    ms = jnp.mean(x * x, axis=-1, keepdims=True)
    var = jnp.maximum(ms - mu * mu, 0.0)  # clamp: cancellation can make this slightly negative
    return (x - mu) * jax.lax.rsqrt(var + EPS) * w + b


def transformer_kernel(
    x_ref, w_emb_ref, b_emb_ref,
    enc_wa_ref, enc_w1_ref, enc_w2_ref, enc_ba_ref, enc_b1_ref, enc_b2_ref, enc_ln_ref,
    dec_wa_hbm, dec_ca_w_hbm, dec_w1_hbm, dec_w2_hbm,
    dec_ba_ref, dec_ca_b_ref, dec_b1_ref, dec_b2_ref, dec_ln_ref,
    final_ln_ref, w_fc_ref, b_fc_ref,
    out_ref,
    dec_wa_buf, dec_ca_w_buf, dec_w1_buf, dec_w2_buf, dma_sem,
):
    f32, bf16 = jnp.float32, jnp.bfloat16
    n_enc = enc_wa_ref.shape[0]
    n_dec = dec_ba_ref.shape[0]
    e = b_emb_ref.shape[-1]

    # Kick off the decoder-weight HBM->VMEM DMAs now; they stream in behind the encoder
    # compute instead of extending the exposed weight-DMA prologue (biggest win on v5e).
    dec_copies = [
        pltpu.make_async_copy(dec_wa_hbm, dec_wa_buf, dma_sem.at[0]),
        pltpu.make_async_copy(dec_ca_w_hbm, dec_ca_w_buf, dma_sem.at[1]),
        pltpu.make_async_copy(dec_w1_hbm, dec_w1_buf, dma_sem.at[2]),
        pltpu.make_async_copy(dec_w2_hbm, dec_w2_buf, dma_sem.at[3]),
    ]
    for cp in dec_copies:
        cp.start()

    def mm(a, w):  # bf16 MXU matmul, f32 accumulation
        return jnp.dot(a.astype(bf16), w, preferred_element_type=f32)

    def row(ref, i):  # static (1, width) slice of a lane-dense 2-D param stack
        return ref[i:i + 1, :]

    x = x_ref[...]                                              # (tb, D_in) f32

    # self.embedding
    emb = mm(x, w_emb_ref[...]) + b_emb_ref[...]                # (tb, e) f32

    # ---- encoder stack (post-norm; attention already folded to one linear) ----
    h = emb
    for l in range(n_enc):
        sa = mm(h, enc_wa_ref[l]) + row(enc_ba_ref, l)
        h = _layernorm(h + sa, row(enc_ln_ref, 4 * l + 0), row(enc_ln_ref, 4 * l + 1))
        ff = mm(jax.nn.relu(mm(h, enc_w1_ref[l]) + row(enc_b1_ref, l)),
                enc_w2_ref[l]) + row(enc_b2_ref, l)
        h = _layernorm(h + ff, row(enc_ln_ref, 4 * l + 2), row(enc_ln_ref, 4 * l + 3))
    # nn.Transformer's final encoder LayerNorm
    mem = _layernorm(h, row(final_ln_ref, 0), row(final_ln_ref, 1))

    # Decoder weights must have landed by now (the whole encoder ran since .start()).
    for cp in dec_copies:
        cp.wait()

    # ---- cross-attention depends only on `mem`: ALL n_dec projections fused into ONE matmul ----
    ca_all = jnp.dot(mem.astype(bf16), dec_ca_w_buf[...],
                     preferred_element_type=f32) + dec_ca_b_ref[...]       # (tb, n_dec*e)

    # ---- decoder stack (tgt = embedded x, post-norm) ----
    t = emb
    for l in range(n_dec):
        sa = mm(t, dec_wa_buf[l]) + row(dec_ba_ref, l)
        t = _layernorm(t + sa, row(dec_ln_ref, 6 * l + 0), row(dec_ln_ref, 6 * l + 1))
        t = _layernorm(t + ca_all[:, l * e:(l + 1) * e],
                       row(dec_ln_ref, 6 * l + 2), row(dec_ln_ref, 6 * l + 3))
        ff = mm(jax.nn.relu(mm(t, dec_w1_buf[l]) + row(dec_b1_ref, l)),
                dec_w2_buf[l]) + row(dec_b2_ref, l)
        t = _layernorm(t + ff, row(dec_ln_ref, 6 * l + 4), row(dec_ln_ref, 6 * l + 5))
    # nn.Transformer's final decoder LayerNorm
    t = _layernorm(t, row(final_ln_ref, 2), row(final_ln_ref, 3))

    # x.mean(dim=1) over a length-1 sequence is the identity; fc_out (N=1) as a VPU reduce.
    out_ref[...] = jnp.sum(t * w_fc_ref[...], axis=-1, keepdims=True) + b_fc_ref[...]


def _full_spec(a):
    # Whole (small) parameter array resident in VMEM for every grid step.
    return pl.BlockSpec(a.shape, lambda i, nd=a.ndim: (0,) * nd)


def _default_batch_tile(B):
    """grid=1 on single-TensorCore chips (v5e/v6e); split in two only where a second
    TensorCore exists to run the other half of the serial chain (v7x, v4/v5p megacore)."""
    multi_tc = False
    try:
        kind = jax.devices()[0].device_kind.lower()
        multi_tc = ("v7" in kind) or ("v4" in kind) or ("v5p" in kind)
    except Exception:
        pass
    if multi_tc and B >= 2 and B % 2 == 0:
        return B // 2
    return B


def transformer_regression_forward(x, p, tb=None):
    B, D_in = x.shape
    if tb is None:
        tb = _default_batch_tile(B)
    assert B % tb == 0

    n_dec = p["dec_w1"].shape[0]
    e = p["b_emb"].shape[-1]
    ffn = p["dec_w1"].shape[-1]

    vmem_args_a = [p["w_emb"], p["b_emb"],
                   p["enc_wa"], p["enc_w1"], p["enc_w2"],
                   p["enc_ba"], p["enc_b1"], p["enc_b2"], p["enc_ln"]]
    hbm_args = [p["dec_wa"], p["dec_ca_w"], p["dec_w1"], p["dec_w2"]]   # streamed manually
    vmem_args_b = [p["dec_ba"], p["dec_ca_b"], p["dec_b1"], p["dec_b2"], p["dec_ln"],
                   p["final_ln"], p["w_fc"], p["b_fc"]]

    in_specs = ([pl.BlockSpec((tb, D_in), lambda i: (i, 0))]
                + [_full_spec(a) for a in vmem_args_a]
                + [pl.BlockSpec(memory_space=pl.ANY) for _ in hbm_args]
                + [_full_spec(a) for a in vmem_args_b])

    scratch_shapes = [
        pltpu.VMEM((n_dec, e, e), jnp.bfloat16),        # decoder self-attn (folded)
        pltpu.VMEM((e, n_dec * e), jnp.bfloat16),       # fused cross-attn weights
        pltpu.VMEM((n_dec, e, ffn), jnp.bfloat16),      # decoder FFN w1
        pltpu.VMEM((n_dec, ffn, e), jnp.bfloat16),      # decoder FFN w2
        pltpu.SemaphoreType.DMA((4,)),
    ]

    return pl.pallas_call(
        transformer_kernel,
        out_shape=jax.ShapeDtypeStruct((B, 1), jnp.float32),
        grid=(B // tb,),
        in_specs=in_specs,
        out_specs=pl.BlockSpec((tb, 1), lambda i: (i, 0)),
        scratch_shapes=scratch_shapes,
        compiler_params=pltpu.CompilerParams(
            dimension_semantics=("parallel",),
            vmem_limit_bytes=32 << 20,   # weights ~1.4 MiB + 0.5 MiB scratch; 64 MiB = all of v7x VMEM
        ),
    )(x, *vmem_args_a, *hbm_args, *vmem_args_b)


# ----------------------------------------------------------------------------
# Parameter construction (PyTorch-style raw params) + folding/packing for the kernel
# ----------------------------------------------------------------------------
def init_raw_params(key, d_in, e, n_enc, n_dec, ffn):
    cnt = [0]

    def rnd(shape, scale=0.05):
        cnt[0] += 1
        return scale * jax.random.normal(jax.random.fold_in(key, cnt[0]), shape, dtype=jnp.float32)

    def one_plus(shape):
        return 1.0 + rnd(shape)

    enc = []
    for _ in range(n_enc):
        enc.append(dict(
            wv=rnd((e, e)), wo=rnd((e, e)), bv=rnd((e,)), bo=rnd((e,)),
            ln1_w=one_plus((e,)), ln1_b=rnd((e,)),
            w1=rnd((e, ffn)), b1=rnd((ffn,)), w2=rnd((ffn, e)), b2=rnd((e,)),
            ln2_w=one_plus((e,)), ln2_b=rnd((e,)),
        ))
    dec = []
    for _ in range(n_dec):
        dec.append(dict(
            s_wv=rnd((e, e)), s_wo=rnd((e, e)), s_bv=rnd((e,)), s_bo=rnd((e,)),
            ln1_w=one_plus((e,)), ln1_b=rnd((e,)),
            c_wv=rnd((e, e)), c_wo=rnd((e, e)), c_bv=rnd((e,)), c_bo=rnd((e,)),
            ln2_w=one_plus((e,)), ln2_b=rnd((e,)),
            w1=rnd((e, ffn)), b1=rnd((ffn,)), w2=rnd((ffn, e)), b2=rnd((e,)),
            ln3_w=one_plus((e,)), ln3_b=rnd((e,)),
        ))
    return dict(
        w_emb=rnd((d_in, e)), b_emb=rnd((e,)),
        enc=enc, dec=dec,
        enc_norm_w=one_plus((e,)), enc_norm_b=rnd((e,)),
        dec_norm_w=one_plus((e,)), dec_norm_b=rnd((e,)),
        w_fc=rnd((e, 1)), b_fc=rnd((1,)),
    )


def prepare_params(raw):
    """Fold V-proj@out-proj (exact at seq_len=1), fuse the n_dec cross-attn projections into one
    wide matrix, cast matmul weights to bf16, and repack small per-layer vectors lane-dense."""
    bf16, f32 = jnp.bfloat16, jnp.float32
    enc, dec = raw["enc"], raw["dec"]

    def fold_w(wv, wo):
        return wv @ wo

    def fold_b(bv, bo, wo):
        return bv @ wo + bo

    p = {}
    p["w_emb"] = raw["w_emb"].astype(bf16)
    p["b_emb"] = raw["b_emb"][None, :].astype(f32)

    p["enc_wa"] = jnp.stack([fold_w(l["wv"], l["wo"]) for l in enc]).astype(bf16)        # (n,e,e)
    p["enc_ba"] = jnp.stack([fold_b(l["bv"], l["bo"], l["wo"]) for l in enc])            # (n,e)
    p["enc_w1"] = jnp.stack([l["w1"] for l in enc]).astype(bf16)                         # (n,e,ffn)
    p["enc_b1"] = jnp.stack([l["b1"] for l in enc])                                      # (n,ffn)
    p["enc_w2"] = jnp.stack([l["w2"] for l in enc]).astype(bf16)                         # (n,ffn,e)
    p["enc_b2"] = jnp.stack([l["b2"] for l in enc])                                      # (n,e)
    p["enc_ln"] = jnp.stack(
        [jnp.stack([l["ln1_w"], l["ln1_b"], l["ln2_w"], l["ln2_b"]]) for l in enc]
    ).reshape(len(enc) * 4, -1)                                                          # (4n,e)

    # decoder self-attention (folded)
    p["dec_wa"] = jnp.stack([fold_w(l["s_wv"], l["s_wo"]) for l in dec]).astype(bf16)    # (n,e,e)
    p["dec_ba"] = jnp.stack([fold_b(l["s_bv"], l["s_bo"], l["s_wo"]) for l in dec])      # (n,e)
    # decoder cross-attention (folded + fused across layers into one wide matmul)
    p["dec_ca_w"] = jnp.concatenate(
        [fold_w(l["c_wv"], l["c_wo"]) for l in dec], axis=1).astype(bf16)                # (e, n*e)
    p["dec_ca_b"] = jnp.concatenate(
        [fold_b(l["c_bv"], l["c_bo"], l["c_wo"]) for l in dec])[None, :]                 # (1, n*e)

    p["dec_w1"] = jnp.stack([l["w1"] for l in dec]).astype(bf16)                         # (n,e,ffn)
    p["dec_b1"] = jnp.stack([l["b1"] for l in dec])                                      # (n,ffn)
    p["dec_w2"] = jnp.stack([l["w2"] for l in dec]).astype(bf16)                         # (n,ffn,e)
    p["dec_b2"] = jnp.stack([l["b2"] for l in dec])                                      # (n,e)
    p["dec_ln"] = jnp.stack(
        [jnp.stack([l["ln1_w"], l["ln1_b"], l["ln2_w"], l["ln2_b"], l["ln3_w"], l["ln3_b"]])
         for l in dec]
    ).reshape(len(dec) * 6, -1)                                                          # (6n,e)

    p["final_ln"] = jnp.stack(
        [raw["enc_norm_w"], raw["enc_norm_b"], raw["dec_norm_w"], raw["dec_norm_b"]])    # (4,e)
    p["w_fc"] = raw["w_fc"].T.astype(f32)                                                # (1,e)
    p["b_fc"] = raw["b_fc"][None, :].astype(f32)                                         # (1,1)
    return p


def reference_forward(x, raw):
    """Pure-JAX f32 reference on the UNFOLDED parameters (mirrors the PyTorch module at seq_len=1)."""
    def ln(h, w, b):
        mu = h.mean(-1, keepdims=True)
        xc = h - mu
        var = (xc * xc).mean(-1, keepdims=True)
        return xc / jnp.sqrt(var + EPS) * w + b

    emb = x @ raw["w_emb"] + raw["b_emb"]
    h = emb
    for l in raw["enc"]:
        sa = (h @ l["wv"] + l["bv"]) @ l["wo"] + l["bo"]
        h = ln(h + sa, l["ln1_w"], l["ln1_b"])
        ff = jax.nn.relu(h @ l["w1"] + l["b1"]) @ l["w2"] + l["b2"]
        h = ln(h + ff, l["ln2_w"], l["ln2_b"])
    mem = ln(h, raw["enc_norm_w"], raw["enc_norm_b"])

    t = emb
    for l in raw["dec"]:
        sa = (t @ l["s_wv"] + l["s_bv"]) @ l["s_wo"] + l["s_bo"]
        t = ln(t + sa, l["ln1_w"], l["ln1_b"])
        ca = (mem @ l["c_wv"] + l["c_bv"]) @ l["c_wo"] + l["c_bo"]
        t = ln(t + ca, l["ln2_w"], l["ln2_b"])
        ff = jax.nn.relu(t @ l["w1"] + l["b1"]) @ l["w2"] + l["b2"]
        t = ln(t + ff, l["ln3_w"], l["ln3_b"])
    t = ln(t, raw["dec_norm_w"], raw["dec_norm_b"])
    return t @ raw["w_fc"] + raw["b_fc"]


if __name__ == "__main__":
    # module constants: embed_size=64, num_heads=4 (irrelevant at seq_len=1),
    # num_encoder_layers=12, num_decoder_layers=6 (nn.Transformer default),
    # dim_feedforward=256, dropout=0.1 (eval mode -> identity).
    B, D_IN, EMBED, N_ENC, N_DEC, FFN = 16, 16, 64, 12, 6, 256

    key = jax.random.PRNGKey(0)
    pkey, xkey = jax.random.split(key)
    raw_params = init_raw_params(pkey, D_IN, EMBED, N_ENC, N_DEC, FFN)
    params = prepare_params(raw_params)
    x = jax.random.normal(xkey, (B, D_IN), dtype=jnp.float32)

    out = jax.block_until_ready(transformer_regression_forward(x, params))
    assert out.shape == (B, 1)

    ref = reference_forward(x, raw_params)
    # bf16 matmul weights/activations across 18 layers vs f32 reference: widened tolerance.
    assert jnp.allclose(out, ref, rtol=5e-2, atol=5e-2), float(jnp.max(jnp.abs(out - ref)))
    print("KERNEL_OK")
</pallas_src>

<mosaic_0001>
module attributes {stable_mosaic.version = 11 : i64} {
  func.func @transformer_kernel(%arg0: i32, %arg1: memref<16x16xf32, #tpu.memory_space<vmem>>, %arg2: memref<16x64xbf16, #tpu.memory_space<vmem>>, %arg3: memref<1x64xf32, #tpu.memory_space<vmem>>, %arg4: memref<12x64x64xbf16, #tpu.memory_space<vmem>>, %arg5: memref<12x64x256xbf16, #tpu.memory_space<vmem>>, %arg6: memref<12x256x64xbf16, #tpu.memory_space<vmem>>, %arg7: memref<12x64xf32, #tpu.memory_space<vmem>>, %arg8: memref<12x256xf32, #tpu.memory_space<vmem>>, %arg9: memref<12x64xf32, #tpu.memory_space<vmem>>, %arg10: memref<48x64xf32, #tpu.memory_space<vmem>>, %arg11: memref<6x64x64xbf16, #tpu.memory_space<any>>, %arg12: memref<64x384xbf16, #tpu.memory_space<any>>, %arg13: memref<6x64x256xbf16, #tpu.memory_space<any>>, %arg14: memref<6x256x64xbf16, #tpu.memory_space<any>>, %arg15: memref<6x64xf32, #tpu.memory_space<vmem>>, %arg16: memref<1x384xf32, #tpu.memory_space<vmem>>, %arg17: memref<6x256xf32, #tpu.memory_space<vmem>>, %arg18: memref<6x64xf32, #tpu.memory_space<vmem>>, %arg19: memref<36x64xf32, #tpu.memory_space<vmem>>, %arg20: memref<4x64xf32, #tpu.memory_space<vmem>>, %arg21: memref<1x64xf32, #tpu.memory_space<vmem>>, %arg22: memref<1x1xf32, #tpu.memory_space<vmem>>, %arg23: memref<16x1xf32, #tpu.memory_space<vmem>>, %arg24: memref<6x64x64xbf16, #tpu.memory_space<vmem>>, %arg25: memref<64x384xbf16, #tpu.memory_space<vmem>>, %arg26: memref<6x64x256xbf16, #tpu.memory_space<vmem>>, %arg27: memref<6x256x64xbf16, #tpu.memory_space<vmem>>, %arg28: memref<4x!tpu.dma_semaphore, #tpu.memory_space<semaphore_mem>>) attributes {dimension_semantics = [#tpu.dimension_semantics<parallel>], iteration_bounds = array<i64: 1>, scalar_prefetch = 0 : i64, scratch_operands = 5 : i64, tpu.core_type = #tpu.core_type<tc>, window_params = [{transform_indices = @transform_0, window_bounds = array<i64: 16, 16>}, {pipeline_mode = #tpu.pipeline_mode<synchronous>, transform_indices = @transform_1, window_bounds = array<i64: 16, 64>}, {pipeline_mode = #tpu.pipeline_mode<synchronous>, transform_indices = @transform_2, window_bounds = array<i64: 1, 64>}, {pipeline_mode = #tpu.pipeline_mode<synchronous>, transform_indices = @transform_3, window_bounds = array<i64: 12, 64, 64>}, {pipeline_mode = #tpu.pipeline_mode<synchronous>, transform_indices = @transform_4, window_bounds = array<i64: 12, 64, 256>}, {pipeline_mode = #tpu.pipeline_mode<synchronous>, transform_indices = @transform_5, window_bounds = array<i64: 12, 256, 64>}, {pipeline_mode = #tpu.pipeline_mode<synchronous>, transform_indices = @transform_6, window_bounds = array<i64: 12, 64>}, {pipeline_mode = #tpu.pipeline_mode<synchronous>, transform_indices = @transform_7, window_bounds = array<i64: 12, 256>}, {pipeline_mode = #tpu.pipeline_mode<synchronous>, transform_indices = @transform_8, window_bounds = array<i64: 12, 64>}, {pipeline_mode = #tpu.pipeline_mode<synchronous>, transform_indices = @transform_9, window_bounds = array<i64: 48, 64>}, {}, {}, {}, {}, {pipeline_mode = #tpu.pipeline_mode<synchronous>, transform_indices = @transform_14, window_bounds = array<i64: 6, 64>}, {pipeline_mode = #tpu.pipeline_mode<synchronous>, transform_indices = @transform_15, window_bounds = array<i64: 1, 384>}, {pipeline_mode = #tpu.pipeline_mode<synchronous>, transform_indices = @transform_16, window_bounds = array<i64: 6, 256>}, {pipeline_mode = #tpu.pipeline_mode<synchronous>, transform_indices = @transform_17, window_bounds = array<i64: 6, 64>}, {pipeline_mode = #tpu.pipeline_mode<synchronous>, transform_indices = @transform_18, window_bounds = array<i64: 36, 64>}, {pipeline_mode = #tpu.pipeline_mode<synchronous>, transform_indices = @transform_19, window_bounds = array<i64: 4, 64>}, {pipeline_mode = #tpu.pipeline_mode<synchronous>, transform_indices = @transform_20, window_bounds = array<i64: 1, 64>}, {pipeline_mode = #tpu.pipeline_mode<synchronous>, transform_indices = @transform_21, window_bounds = array<i64: 1, 1>}, {transform_indices = @transform_22, window_bounds = array<i64: 16, 1>}]} {
    %c0_i32 = arith.constant 0 : i32
    %0 = tpu.memref_slice %arg28[%c0_i32] : memref<4x!tpu.dma_semaphore, #tpu.memory_space<semaphore_mem>> -> memref<1x!tpu.dma_semaphore, #tpu.memory_space<semaphore_mem>>
    %1 = tpu.memref_squeeze %0 : memref<1x!tpu.dma_semaphore, #tpu.memory_space<semaphore_mem>> -> memref<!tpu.dma_semaphore, #tpu.memory_space<semaphore_mem>>
    tpu.enqueue_dma source(%arg11 : memref<6x64x64xbf16, #tpu.memory_space<any>>) target(%arg24 : memref<6x64x64xbf16, #tpu.memory_space<vmem>>) target_semaphore(%1 : memref<!tpu.dma_semaphore, #tpu.memory_space<semaphore_mem>>)
    %c1_i32 = arith.constant 1 : i32
    %2 = tpu.memref_slice %arg28[%c1_i32] : memref<4x!tpu.dma_semaphore, #tpu.memory_space<semaphore_mem>> -> memref<1x!tpu.dma_semaphore, #tpu.memory_space<semaphore_mem>>
    %3 = tpu.memref_squeeze %2 : memref<1x!tpu.dma_semaphore, #tpu.memory_space<semaphore_mem>> -> memref<!tpu.dma_semaphore, #tpu.memory_space<semaphore_mem>>
    tpu.enqueue_dma source(%arg12 : memref<64x384xbf16, #tpu.memory_space<any>>) target(%arg25 : memref<64x384xbf16, #tpu.memory_space<vmem>>) target_semaphore(%3 : memref<!tpu.dma_semaphore, #tpu.memory_space<semaphore_mem>>)
    %c2_i32 = arith.constant 2 : i32
    %4 = tpu.memref_slice %arg28[%c2_i32] : memref<4x!tpu.dma_semaphore, #tpu.memory_space<semaphore_mem>> -> memref<1x!tpu.dma_semaphore, #tpu.memory_space<semaphore_mem>>
    %5 = tpu.memref_squeeze %4 : memref<1x!tpu.dma_semaphore, #tpu.memory_space<semaphore_mem>> -> memref<!tpu.dma_semaphore, #tpu.memory_space<semaphore_mem>>
    tpu.enqueue_dma source(%arg13 : memref<6x64x256xbf16, #tpu.memory_space<any>>) target(%arg26 : memref<6x64x256xbf16, #tpu.memory_space<vmem>>) target_semaphore(%5 : memref<!tpu.dma_semaphore, #tpu.memory_space<semaphore_mem>>)
    %c3_i32 = arith.constant 3 : i32
    %6 = tpu.memref_slice %arg28[%c3_i32] : memref<4x!tpu.dma_semaphore, #tpu.memory_space<semaphore_mem>> -> memref<1x!tpu.dma_semaphore, #tpu.memory_space<semaphore_mem>>
    %7 = tpu.memref_squeeze %6 : memref<1x!tpu.dma_semaphore, #tpu.memory_space<semaphore_mem>> -> memref<!tpu.dma_semaphore, #tpu.memory_space<semaphore_mem>>
    tpu.enqueue_dma source(%arg14 : memref<6x256x64xbf16, #tpu.memory_space<any>>) target(%arg27 : memref<6x256x64xbf16, #tpu.memory_space<vmem>>) target_semaphore(%7 : memref<!tpu.dma_semaphore, #tpu.memory_space<semaphore_mem>>)
    %c0 = arith.constant 0 : index
    %c0_0 = arith.constant 0 : index
    %8 = vector.load %arg1[%c0, %c0_0] : memref<16x16xf32, #tpu.memory_space<vmem>>, vector<16x16xf32>
    %c0_1 = arith.constant 0 : index
    %c0_2 = arith.constant 0 : index
    %9 = vector.load %arg2[%c0_1, %c0_2] : memref<16x64xbf16, #tpu.memory_space<vmem>>, vector<16x64xbf16>
    %10 = arith.truncf %8 : vector<16x16xf32> to vector<16x16xbf16>
    %cst = arith.constant dense<0.000000e+00> : vector<16x64xf32>
    %11 = tpu.matmul %10, %9, %cst {dimension_numbers = #tpu.dot_dimension_numbers<[1], [0], [0], [1], [0, 0, 1, 1], [], []>} : vector<16x16xbf16>, vector<16x64xbf16>, vector<16x64xf32> -> vector<16x64xf32>
    %c0_3 = arith.constant 0 : index
    %c0_4 = arith.constant 0 : index
    %12 = vector.load %arg3[%c0_3, %c0_4] : memref<1x64xf32, #tpu.memory_space<vmem>>, vector<1x64xf32>
    %13 = vector.broadcast %12 : vector<1x64xf32> to vector<16x64xf32>
    %14 = arith.addf %11, %13 : vector<16x64xf32>
    %c0_5 = arith.constant 0 : index
    %c0_6 = arith.constant 0 : index
    %c0_7 = arith.constant 0 : index
    %15 = vector.load %arg4[%c0_5, %c0_6, %c0_7] : memref<12x64x64xbf16, #tpu.memory_space<vmem>>, vector<1x64x64xbf16>
    %16 = vector.shape_cast %15 : vector<1x64x64xbf16> to vector<64x64xbf16>
    %17 = arith.truncf %14 : vector<16x64xf32> to vector<16x64xbf16>
    %cst_8 = arith.constant dense<0.000000e+00> : vector<16x64xf32>
    %18 = tpu.matmul %17, %16, %cst_8 {dimension_numbers = #tpu.dot_dimension_numbers<[1], [0], [0], [1], [0, 0, 1, 1], [], []>} : vector<16x64xbf16>, vector<64x64xbf16>, vector<16x64xf32> -> vector<16x64xf32>
    %c0_9 = arith.constant 0 : index
    %c0_10 = arith.constant 0 : index
    %19 = vector.load %arg7[%c0_9, %c0_10] : memref<12x64xf32, #tpu.memory_space<vmem>>, vector<1x64xf32>
    %20 = vector.broadcast %19 : vector<1x64xf32> to vector<16x64xf32>
    %21 = arith.addf %18, %20 : vector<16x64xf32>
    %22 = arith.addf %14, %21 : vector<16x64xf32>
    %c0_11 = arith.constant 0 : index
    %c0_12 = arith.constant 0 : index
    %23 = vector.load %arg10[%c0_11, %c0_12] : memref<48x64xf32, #tpu.memory_space<vmem>>, vector<1x64xf32>
    %c1 = arith.constant 1 : index
    %c0_13 = arith.constant 0 : index
    %24 = vector.load %arg10[%c1, %c0_13] : memref<48x64xf32, #tpu.memory_space<vmem>>, vector<1x64xf32>
    %cst_14 = arith.constant dense<0.000000e+00> : vector<16xf32>
    %25 = vector.multi_reduction <add>, %22, %cst_14 [1] : vector<16x64xf32> to vector<16xf32>
    %26 = vector.shape_cast %25 : vector<16xf32> to vector<16x1xf32>
    %cst_15 = arith.constant 6.400000e+01 : f32
    %27 = vector.broadcast %cst_15 : f32 to vector<16x1xf32>
    %28 = arith.divf %26, %27 : vector<16x1xf32>
    %29 = arith.mulf %22, %22 : vector<16x64xf32>
    %cst_16 = arith.constant dense<0.000000e+00> : vector<16xf32>
    %30 = vector.multi_reduction <add>, %29, %cst_16 [1] : vector<16x64xf32> to vector<16xf32>
    %31 = vector.shape_cast %30 : vector<16xf32> to vector<16x1xf32>
    %cst_17 = arith.constant 6.400000e+01 : f32
    %32 = vector.broadcast %cst_17 : f32 to vector<16x1xf32>
    %33 = arith.divf %31, %32 : vector<16x1xf32>
    %34 = arith.mulf %28, %28 : vector<16x1xf32>
    %35 = arith.subf %33, %34 : vector<16x1xf32>
    %cst_18 = arith.constant 0.000000e+00 : f32
    %36 = vector.broadcast %cst_18 : f32 to vector<16x1xf32>
    %37 = arith.maximumf %35, %36 : vector<16x1xf32>
    %38 = vector.broadcast %28 : vector<16x1xf32> to vector<16x64xf32>
    %39 = arith.subf %22, %38 : vector<16x64xf32>
    %cst_19 = arith.constant 9.99999974E-6 : f32
    %40 = vector.broadcast %cst_19 : f32 to vector<16x1xf32>
    %41 = arith.addf %37, %40 : vector<16x1xf32>
    %42 = math.rsqrt %41 : vector<16x1xf32>
    %43 = vector.broadcast %42 : vector<16x1xf32> to vector<16x64xf32>
    %44 = arith.mulf %39, %43 : vector<16x64xf32>
    %45 = vector.broadcast %23 : vector<1x64xf32> to vector<16x64xf32>
    %46 = arith.mulf %44, %45 : vector<16x64xf32>
    %47 = vector.broadcast %24 : vector<1x64xf32> to vector<16x64xf32>
    %48 = arith.addf %46, %47 : vector<16x64xf32>
    %c0_20 = arith.constant 0 : index
    %c0_21 = arith.constant 0 : index
    %c0_22 = arith.constant 0 : index
    %49 = vector.load %arg5[%c0_20, %c0_21, %c0_22] : memref<12x64x256xbf16, #tpu.memory_space<vmem>>, vector<1x64x256xbf16>
    %50 = vector.shape_cast %49 : vector<1x64x256xbf16> to vector<64x256xbf16>
    %51 = arith.truncf %48 : vector<16x64xf32> to vector<16x64xbf16>
    %cst_23 = arith.constant dense<0.000000e+00> : vector<16x256xf32>
    %52 = tpu.matmul %51, %50, %cst_23 {dimension_numbers = #tpu.dot_dimension_numbers<[1], [0], [0], [1], [0, 0, 1, 1], [], []>} : vector<16x64xbf16>, vector<64x256xbf16>, vector<16x256xf32> -> vector<16x256xf32>
    %c0_24 = arith.constant 0 : index
    %c0_25 = arith.constant 0 : index
    %53 = vector.load %arg8[%c0_24, %c0_25] : memref<12x256xf32, #tpu.memory_space<vmem>>, vector<1x256xf32>
    %54 = vector.broadcast %53 : vector<1x256xf32> to vector<16x256xf32>
    %55 = arith.addf %52, %54 : vector<16x256xf32>
    %cst_26 = arith.constant 0.000000e+00 : f32
    %56 = vector.broadcast %cst_26 : f32 to vector<16x256xf32>
    %57 = arith.maximumf %55, %56 : vector<16x256xf32>
    %c0_27 = arith.constant 0 : index
    %c0_28 = arith.constant 0 : index
    %c0_29 = arith.constant 0 : index
    %58 = vector.load %arg6[%c0_27, %c0_28, %c0_29] : memref<12x256x64xbf16, #tpu.memory_space<vmem>>, vector<1x256x64xbf16>
    %59 = vector.shape_cast %58 : vector<1x256x64xbf16> to vector<256x64xbf16>
    %60 = arith.truncf %57 : vector<16x256xf32> to vector<16x256xbf16>
    %cst_30 = arith.constant dense<0.000000e+00> : vector<16x64xf32>
    %61 = tpu.matmul %60, %59, %cst_30 {dimension_numbers = #tpu.dot_dimension_numbers<[1], [0], [0], [1], [0, 0, 1, 1], [], []>} : vector<16x256xbf16>, vector<256x64xbf16>, vector<16x64xf32> -> vector<16x64xf32>
    %c0_31 = arith.constant 0 : index
    %c0_32 = arith.constant 0 : index
    %62 = vector.load %arg9[%c0_31, %c0_32] : memref<12x64xf32, #tpu.memory_space<vmem>>, vector<1x64xf32>
    %63 = vector.broadcast %62 : vector<1x64xf32> to vector<16x64xf32>
    %64 = arith.addf %61, %63 : vector<16x64xf32>
    %65 = arith.addf %48, %64 : vector<16x64xf32>
    %c2 = arith.constant 2 : index
    %c0_33 = arith.constant 0 : index
    %66 = vector.load %arg10[%c2, %c0_33] : memref<48x64xf32, #tpu.memory_space<vmem>>, vector<1x64xf32>
    %c3 = arith.constant 3 : index
    %c0_34 = arith.constant 0 : index
    %67 = vector.load %arg10[%c3, %c0_34] : memref<48x64xf32, #tpu.memory_space<vmem>>, vector<1x64xf32>
    %cst_35 = arith.constant dense<0.000000e+00> : vector<16xf32>
    %68 = vector.multi_reduction <add>, %65, %cst_35 [1] : vector<16x64xf32> to vector<16xf32>
    %69 = vector.shape_cast %68 : vector<16xf32> to vector<16x1xf32>
    %cst_36 = arith.constant 6.400000e+01 : f32
    %70 = vector.broadcast %cst_36 : f32 to vector<16x1xf32>
    %71 = arith.divf %69, %70 : vector<16x1xf32>
    %72 = arith.mulf %65, %65 : vector<16x64xf32>
    %cst_37 = arith.constant dense<0.000000e+00> : vector<16xf32>
    %73 = vector.multi_reduction <add>, %72, %cst_37 [1] : vector<16x64xf32> to vector<16xf32>
    %74 = vector.shape_cast %73 : vector<16xf32> to vector<16x1xf32>
    %cst_38 = arith.constant 6.400000e+01 : f32
    %75 = vector.broadcast %cst_38 : f32 to vector<16x1xf32>
    %76 = arith.divf %74, %75 : vector<16x1xf32>
    %77 = arith.mulf %71, %71 : vector<16x1xf32>
    %78 = arith.subf %76, %77 : vector<16x1xf32>
    %cst_39 = arith.constant 0.000000e+00 : f32
    %79 = vector.broadcast %cst_39 : f32 to vector<16x1xf32>
    %80 = arith.maximumf %78, %79 : vector<16x1xf32>
    %81 = vector.broadcast %71 : vector<16x1xf32> to vector<16x64xf32>
    %82 = arith.subf %65, %81 : vector<16x64xf32>
    %cst_40 = arith.constant 9.99999974E-6 : f32
    %83 = vector.broadcast %cst_40 : f32 to vector<16x1xf32>
    %84 = arith.addf %80, %83 : vector<16x1xf32>
    %85 = math.rsqrt %84 : vector<16x1xf32>
    %86 = vector.broadcast %85 : vector<16x1xf32> to vector<16x64xf32>
    %87 = arith.mulf %82, %86 : vector<16x64xf32>
    %88 = vector.broadcast %66 : vector<1x64xf32> to vector<16x64xf32>
    %89 = arith.mulf %87, %88 : vector<16x64xf32>
    %90 = vector.broadcast %67 : vector<1x64xf32> to vector<16x64xf32>
    %91 = arith.addf %89, %90 : vector<16x64xf32>
    %c1_41 = arith.constant 1 : index
    %c0_42 = arith.constant 0 : index
    %c0_43 = arith.constant 0 : index
    %92 = vector.load %arg4[%c1_41, %c0_42, %c0_43] : memref<12x64x64xbf16, #tpu.memory_space<vmem>>, vector<1x64x64xbf16>
    %93 = vector.shape_cast %92 : vector<1x64x64xbf16> to vector<64x64xbf16>
    %94 = arith.truncf %91 : vector<16x64xf32> to vector<16x64xbf16>
    %cst_44 = arith.constant dense<0.000000e+00> : vector<16x64xf32>
    %95 = tpu.matmul %94, %93, %cst_44 {dimension_numbers = #tpu.dot_dimension_numbers<[1], [0], [0], [1], [0, 0, 1, 1], [], []>} : vector<16x64xbf16>, vector<64x64xbf16>, vector<16x64xf32> -> vector<16x64xf32>
    %c1_45 = arith.constant 1 : index
    %c0_46 = arith.constant 0 : index
    %96 = vector.load %arg7[%c1_45, %c0_46] : memref<12x64xf32, #tpu.memory_space<vmem>>, vector<1x64xf32>
    %97 = vector.broadcast %96 : vector<1x64xf32> to vector<16x64xf32>
    %98 = arith.addf %95, %97 : vector<16x64xf32>
    %99 = arith.addf %91, %98 : vector<16x64xf32>
    %c4 = arith.constant 4 : index
    %c0_47 = arith.constant 0 : index
    %100 = vector.load %arg10[%c4, %c0_47] : memref<48x64xf32, #tpu.memory_space<vmem>>, vector<1x64xf32>
    %c5 = arith.constant 5 : index
    %c0_48 = arith.constant 0 : index
    %101 = vector.load %arg10[%c5, %c0_48] : memref<48x64xf32, #tpu.memory_space<vmem>>, vector<1x64xf32>
    %cst_49 = arith.constant dense<0.000000e+00> : vector<16xf32>
    %102 = vector.multi_reduction <add>, %99, %cst_49 [1] : vector<16x64xf32> to vector<16xf32>
    %103 = vector.shape_cast %102 : vector<16xf32> to vector<16x1xf32>
    %cst_50 = arith.constant 6.400000e+01 : f32
    %104 = vector.broadcast %cst_50 : f32 to vector<16x1xf32>
    %105 = arith.divf %103, %104 : vector<16x1xf32>
    %106 = arith.mulf %99, %99 : vector<16x64xf32>
    %cst_51 = arith.constant dense<0.000000e+00> : vector<16xf32>
    %107 = vector.multi_reduction <add>, %106, %cst_51 [1] : vector<16x64xf32> to vector<16xf32>
    %108 = vector.shape_cast %107 : vector<16xf32> to vector<16x1xf32>
    %cst_52 = arith.constant 6.400000e+01 : f32
    %109 = vector.broadcast %cst_52 : f32 to vector<16x1xf32>
    %110 = arith.divf %108, %109 : vector<16x1xf32>
    %111 = arith.mulf %105, %105 : vector<16x1xf32>
    %112 = arith.subf %110, %111 : vector<16x1xf32>
    %cst_53 = arith.constant 0.000000e+00 : f32
    %113 = vector.broadcast %cst_53 : f32 to vector<16x1xf32>
    %114 = arith.maximumf %112, %113 : vector<16x1xf32>
    %115 = vector.broadcast %105 : vector<16x1xf32> to vector<16x64xf32>
    %116 = arith.subf %99, %115 : vector<16x64xf32>
    %cst_54 = arith.constant 9.99999974E-6 : f32
    %117 = vector.broadcast %cst_54 : f32 to vector<16x1xf32>
    %118 = arith.addf %114, %117 : vector<16x1xf32>
    %119 = math.rsqrt %118 : vector<16x1xf32>
    %120 = vector.broadcast %119 : vector<16x1xf32> to vector<16x64xf32>
    %121 = arith.mulf %116, %120 : vector<16x64xf32>
    %122 = vector.broadcast %100 : vector<1x64xf32> to vector<16x64xf32>
    %123 = arith.mulf %121, %122 : vector<16x64xf32>
    %124 = vector.broadcast %101 : vector<1x64xf32> to vector<16x64xf32>
    %125 = arith.addf %123, %124 : vector<16x64xf32>
    %c1_55 = arith.constant 1 : index
    %c0_56 = arith.constant 0 : index
    %c0_57 = arith.constant 0 : index
    %126 = vector.load %arg5[%c1_55, %c0_56, %c0_57] : memref<12x64x256xbf16, #tpu.memory_space<vmem>>, vector<1x64x256xbf16>
    %127 = vector.shape_cast %126 : vector<1x64x256xbf16> to vector<64x256xbf16>
    %128 = arith.truncf %125 : vector<16x64xf32> to vector<16x64xbf16>
    %cst_58 = arith.constant dense<0.000000e+00> : vector<16x256xf32>
    %129 = tpu.matmul %128, %127, %cst_58 {dimension_numbers = #tpu.dot_dimension_numbers<[1], [0], [0], [1], [0, 0, 1, 1], [], []>} : vector<16x64xbf16>, vector<64x256xbf16>, vector<16x256xf32> -> vector<16x256xf32>
    %c1_59 = arith.constant 1 : index
    %c0_60 = arith.constant 0 : index
    %130 = vector.load %arg8[%c1_59, %c0_60] : memref<12x256xf32, #tpu.memory_space<vmem>>, vector<1x256xf32>
    %131 = vector.broadcast %130 : vector<1x256xf32> to vector<16x256xf32>
    %132 = arith.addf %129, %131 : vector<16x256xf32>
    %cst_61 = arith.constant 0.000000e+00 : f32
    %133 = vector.broadcast %cst_61 : f32 to vector<16x256xf32>
    %134 = arith.maximumf %132, %133 : vector<16x256xf32>
    %c1_62 = arith.constant 1 : index
    %c0_63 = arith.constant 0 : index
    %c0_64 = arith.constant 0 : index
    %135 = vector.load %arg6[%c1_62, %c0_63, %c0_64] : memref<12x256x64xbf16, #tpu.memory_space<vmem>>, vector<1x256x64xbf16>
    %136 = vector.shape_cast %135 : vector<1x256x64xbf16> to vector<256x64xbf16>
    %137 = arith.truncf %134 : vector<16x256xf32> to vector<16x256xbf16>
    %cst_65 = arith.constant dense<0.000000e+00> : vector<16x64xf32>
    %138 = tpu.matmul %137, %136, %cst_65 {dimension_numbers = #tpu.dot_dimension_numbers<[1], [0], [0], [1], [0, 0, 1, 1], [], []>} : vector<16x256xbf16>, vector<256x64xbf16>, vector<16x64xf32> -> vector<16x64xf32>
    %c1_66 = arith.constant 1 : index
    %c0_67 = arith.constant 0 : index
    %139 = vector.load %arg9[%c1_66, %c0_67] : memref<12x64xf32, #tpu.memory_space<vmem>>, vector<1x64xf32>
    %140 = vector.broadcast %139 : vector<1x64xf32> to vector<16x64xf32>
    %141 = arith.addf %138, %140 : vector<16x64xf32>
    %142 = arith.addf %125, %141 : vector<16x64xf32>
    %c6 = arith.constant 6 : index
    %c0_68 = arith.constant 0 : index
    %143 = vector.load %arg10[%c6, %c0_68] : memref<48x64xf32, #tpu.memory_space<vmem>>, vector<1x64xf32>
    %c7 = arith.constant 7 : index
    %c0_69 = arith.constant 0 : index
    %144 = vector.load %arg10[%c7, %c0_69] : memref<48x64xf32, #tpu.memory_space<vmem>>, vector<1x64xf32>
    %cst_70 = arith.constant dense<0.000000e+00> : vector<16xf32>
    %145 = vector.multi_reduction <add>, %142, %cst_70 [1] : vector<16x64xf32> to vector<16xf32>
    %146 = vector.shape_cast %145 : vector<16xf32> to vector<16x1xf32>
    %cst_71 = arith.constant 6.400000e+01 : f32
    %147 = vector.broadcast %cst_71 : f32 to vector<16x1xf32>
    %148 = arith.divf %146, %147 : vector<16x1xf32>
    %149 = arith.mulf %142, %142 : vector<16x64xf32>
    %cst_72 = arith.constant dense<0.000000e+00> : vector<16xf32>
    %150 = vector.multi_reduction <add>, %149, %cst_72 [1] : vector<16x64xf32> to vector<16xf32>
    %151 = vector.shape_cast %150 : vector<16xf32> to vector<16x1xf32>
    %cst_73 = arith.constant 6.400000e+01 : f32
    %152 = vector.broadcast %cst_73 : f32 to vector<16x1xf32>
    %153 = arith.divf %151, %152 : vector<16x1xf32>
    %154 = arith.mulf %148, %148 : vector<16x1xf32>
    %155 = arith.subf %153, %154 : vector<16x1xf32>
    %cst_74 = arith.constant 0.000000e+00 : f32
    %156 = vector.broadcast %cst_74 : f32 to vector<16x1xf32>
    %157 = arith.maximumf %155, %156 : vector<16x1xf32>
    %158 = vector.broadcast %148 : vector<16x1xf32> to vector<16x64xf32>
    %159 = arith.subf %142, %158 : vector<16x64xf32>
    %cst_75 = arith.constant 9.99999974E-6 : f32
    %160 = vector.broadcast %cst_75 : f32 to vector<16x1xf32>
    %161 = arith.addf %157, %160 : vector<16x1xf32>
    %162 = math.rsqrt %161 : vector<16x1xf32>
    %163 = vector.broadcast %162 : vector<16x1xf32> to vector<16x64xf32>
    %164 = arith.mulf %159, %163 : vector<16x64xf32>
    %165 = vector.broadcast %143 : vector<1x64xf32> to vector<16x64xf32>
    %166 = arith.mulf %164, %165 : vector<16x64xf32>
    %167 = vector.broadcast %144 : vector<1x64xf32> to vector<16x64xf32>
    %168 = arith.addf %166, %167 : vector<16x64xf32>
    %c2_76 = arith.constant 2 : index
    %c0_77 = arith.constant 0 : index
    %c0_78 = arith.constant 0 : index
    %169 = vector.load %arg4[%c2_76, %c0_77, %c0_78] : memref<12x64x64xbf16, #tpu.memory_space<vmem>>, vector<1x64x64xbf16>
    %170 = vector.shape_cast %169 : vector<1x64x64xbf16> to vector<64x64xbf16>
    %171 = arith.truncf %168 : vector<16x64xf32> to vector<16x64xbf16>
    %cst_79 = arith.constant dense<0.000000e+00> : vector<16x64xf32>
    %172 = tpu.matmul %171, %170, %cst_79 {dimension_numbers = #tpu.dot_dimension_numbers<[1], [0], [0], [1], [0, 0, 1, 1], [], []>} : vector<16x64xbf16>, vector<64x64xbf16>, vector<16x64xf32> -> vector<16x64xf32>
    %c2_80 = arith.constant 2 : index
    %c0_81 = arith.constant 0 : index
    %173 = vector.load %arg7[%c2_80, %c0_81] : memref<12x64xf32, #tpu.memory_space<vmem>>, vector<1x64xf32>
    %174 = vector.broadcast %173 : vector<1x64xf32> to vector<16x64xf32>
    %175 = arith.addf %172, %174 : vector<16x64xf32>
    %176 = arith.addf %168, %175 : vector<16x64xf32>
    %c8 = arith.constant 8 : index
    %c0_82 = arith.constant 0 : index
    %177 = vector.load %arg10[%c8, %c0_82] : memref<48x64xf32, #tpu.memory_space<vmem>>, vector<1x64xf32>
    %c9 = arith.constant 9 : index
    %c0_83 = arith.constant 0 : index
    %178 = vector.load %arg10[%c9, %c0_83] : memref<48x64xf32, #tpu.memory_space<vmem>>, vector<1x64xf32>
    %cst_84 = arith.constant dense<0.000000e+00> : vector<16xf32>
    %179 = vector.multi_reduction <add>, %176, %cst_84 [1] : vector<16x64xf32> to vector<16xf32>
    %180 = vector.shape_cast %179 : vector<16xf32> to vector<16x1xf32>
    %cst_85 = arith.constant 6.400000e+01 : f32
    %181 = vector.broadcast %cst_85 : f32 to vector<16x1xf32>
    %182 = arith.divf %180, %181 : vector<16x1xf32>
    %183 = arith.mulf %176, %176 : vector<16x64xf32>
    %cst_86 = arith.constant dense<0.000000e+00> : vector<16xf32>
    %184 = vector.multi_reduction <add>, %183, %cst_86 [1] : vector<16x64xf32> to vector<16xf32>
    %185 = vector.shape_cast %184 : vector<16xf32> to vector<16x1xf32>
    %cst_87 = arith.constant 6.400000e+01 : f32
    %186 = vector.broadcast %cst_87 : f32 to vector<16x1xf32>
    %187 = arith.divf %185, %186 : vector<16x1xf32>
    %188 = arith.mulf %182, %182 : vector<16x1xf32>
    %189 = arith.subf %187, %188 : vector<16x1xf32>
    %cst_88 = arith.constant 0.000000e+00 : f32
    %190 = vector.broadcast %cst_88 : f32 to vector<16x1xf32>
    %191 = arith.maximumf %189, %190 : vector<16x1xf32>
    %192 = vector.broadcast %182 : vector<16x1xf32> to vector<16x64xf32>
    %193 = arith.subf %176, %192 : vector<16x64xf32>
    %cst_89 = arith.constant 9.99999974E-6 : f32
    %194 = vector.broadcast %cst_89 : f32 to vector<16x1xf32>
    %195 = arith.addf %191, %194 : vector<16x1xf32>
    %196 = math.rsqrt %195 : vector<16x1xf32>
    %197 = vector.broadcast %196 : vector<16x1xf32> to vector<16x64xf32>
    %198 = arith.mulf %193, %197 : vector<16x64xf32>
    %199 = vector.broadcast %177 : vector<1x64xf32> to vector<16x64xf32>
    %200 = arith.mulf %198, %199 : vector<16x64xf32>
    %201 = vector.broadcast %178 : vector<1x64xf32> to vector<16x64xf32>
    %202 = arith.addf %200, %201 : vector<16x64xf32>
    %c2_90 = arith.constant 2 : index
    %c0_91 = arith.constant 0 : index
    %c0_92 = arith.constant 0 : index
    %203 = vector.load %arg5[%c2_90, %c0_91, %c0_92] : memref<12x64x256xbf16, #tpu.memory_space<vmem>>, vector<1x64x256xbf16>
    %204 = vector.shape_cast %203 : vector<1x64x256xbf16> to vector<64x256xbf16>
    %205 = arith.truncf %202 : vector<16x64xf32> to vector<16x64xbf16>
    %cst_93 = arith.constant dense<0.000000e+00> : vector<16x256xf32>
    %206 = tpu.matmul %205, %204, %cst_93 {dimension_numbers = #tpu.dot_dimension_numbers<[1], [0], [0], [1], [0, 0, 1, 1], [], []>} : vector<16x64xbf16>, vector<64x256xbf16>, vector<16x256xf32> -> vector<16x256xf32>
    %c2_94 = arith.constant 2 : index
    %c0_95 = arith.constant 0 : index
    %207 = vector.load %arg8[%c2_94, %c0_95] : memref<12x256xf32, #tpu.memory_space<vmem>>, vector<1x256xf32>
    %208 = vector.broadcast %207 : vector<1x256xf32> to vector<16x256xf32>
    %209 = arith.addf %206, %208 : vector<16x256xf32>
    %cst_96 = arith.constant 0.000000e+00 : f32
    %210 = vector.broadcast %cst_96 : f32 to vector<16x256xf32>
    %211 = arith.maximumf %209, %210 : vector<16x256xf32>
    %c2_97 = arith.constant 2 : index
    %c0_98 = arith.constant 0 : index
    %c0_99 = arith.constant 0 : index
    %212 = vector.load %arg6[%c2_97, %c0_98, %c0_99] : memref<12x256x64xbf16, #tpu.memory_space<vmem>>, vector<1x256x64xbf16>
    %213 = vector.shape_cast %212 : vector<1x256x64xbf16> to vector<256x64xbf16>
    %214 = arith.truncf %211 : vector<16x256xf32> to vector<16x256xbf16>
    %cst_100 = arith.constant dense<0.000000e+00> : vector<16x64xf32>
    %215 = tpu.matmul %214, %213, %cst_100 {dimension_numbers = #tpu.dot_dimension_numbers<[1], [0], [0], [1], [0, 0, 1, 1], [], []>} : vector<16x256xbf16>, vector<256x64xbf16>, vector<16x64xf32> -> vector<16x64xf32>
    %c2_101 = arith.constant 2 : index
    %c0_102 = arith.constant 0 : index
    %216 = vector.load %arg9[%c2_101, %c0_102] : memref<12x64xf32, #tpu.memory_space<vmem>>, vector<1x64xf32>
    %217 = vector.broadcast %216 : vector<1x64xf32> to vector<16x64xf32>
    %218 = arith.addf %215, %217 : vector<16x64xf32>
    %219 = arith.addf %202, %218 : vector<16x64xf32>
    %c10 = arith.constant 10 : index
    %c0_103 = arith.constant 0 : index
    %220 = vector.load %arg10[%c10, %c0_103] : memref<48x64xf32, #tpu.memory_space<vmem>>, vector<1x64xf32>
    %c11 = arith.constant 11 : index
    %c0_104 = arith.constant 0 : index
    %221 = vector.load %arg10[%c11, %c0_104] : memref<48x64xf32, #tpu.memory_space<vmem>>, vector<1x64xf32>
    %cst_105 = arith.constant dense<0.000000e+00> : vector<16xf32>
    %222 = vector.multi_reduction <add>, %219, %cst_105 [1] : vector<16x64xf32> to vector<16xf32>
    %223 = vector.shape_cast %222 : vector<16xf32> to vector<16x1xf32>
    %cst_106 = arith.constant 6.400000e+01 : f32
    %224 = vector.broadcast %cst_106 : f32 to vector<16x1xf32>
    %225 = arith.divf %223, %224 : vector<16x1xf32>
    %226 = arith.mulf %219, %219 : vector<16x64xf32>
    %cst_107 = arith.constant dense<0.000000e+00> : vector<16xf32>
    %227 = vector.multi_reduction <add>, %226, %cst_107 [1] : vector<16x64xf32> to vector<16xf32>
    %228 = vector.shape_cast %227 : vector<16xf32> to vector<16x1xf32>
    %cst_108 = arith.constant 6.400000e+01 : f32
    %229 = vector.broadcast %cst_108 : f32 to vector<16x1xf32>
    %230 = arith.divf %228, %229 : vector<16x1xf32>
    %231 = arith.mulf %225, %225 : vector<16x1xf32>
    %232 = arith.subf %230, %231 : vector<16x1xf32>
    %cst_109 = arith.constant 0.000000e+00 : f32
    %233 = vector.broadcast %cst_109 : f32 to vector<16x1xf32>
    %234 = arith.maximumf %232, %233 : vector<16x1xf32>
    %235 = vector.broadcast %225 : vector<16x1xf32> to vector<16x64xf32>
    %236 = arith.subf %219, %235 : vector<16x64xf32>
    %cst_110 = arith.constant 9.99999974E-6 : f32
    %237 = vector.broadcast %cst_110 : f32 to vector<16x1xf32>
    %238 = arith.addf %234, %237 : vector<16x1xf32>
    %239 = math.rsqrt %238 : vector<16x1xf32>
    %240 = vector.broadcast %239 : vector<16x1xf32> to vector<16x64xf32>
    %241 = arith.mulf %236, %240 : vector<16x64xf32>
    %242 = vector.broadcast %220 : vector<1x64xf32> to vector<16x64xf32>
    %243 = arith.mulf %241, %242 : vector<16x64xf32>
    %244 = vector.broadcast %221 : vector<1x64xf32> to vector<16x64xf32>
    %245 = arith.addf %243, %244 : vector<16x64xf32>
    %c3_111 = arith.constant 3 : index
    %c0_112 = arith.constant 0 : index
    %c0_113 = arith.constant 0 : index
    %246 = vector.load %arg4[%c3_111, %c0_112, %c0_113] : memref<12x64x64xbf16, #tpu.memory_space<vmem>>, vector<1x64x64xbf16>
    %247 = vector.shape_cast %246 : vector<1x64x64xbf16> to vector<64x64xbf16>
    %248 = arith.truncf %245 : vector<16x64xf32> to vector<16x64xbf16>
    %cst_114 = arith.constant dense<0.000000e+00> : vector<16x64xf32>
    %249 = tpu.matmul %248, %247, %cst_114 {dimension_numbers = #tpu.dot_dimension_numbers<[1], [0], [0], [1], [0, 0, 1, 1], [], []>} : vector<16x64xbf16>, vector<64x64xbf16>, vector<16x64xf32> -> vector<16x64xf32>
    %c3_115 = arith.constant 3 : index
    %c0_116 = arith.constant 0 : index
    %250 = vector.load %arg7[%c3_115, %c0_116] : memref<12x64xf32, #tpu.memory_space<vmem>>, vector<1x64xf32>
    %251 = vector.broadcast %250 : vector<1x64xf32> to vector<16x64xf32>
    %252 = arith.addf %249, %251 : vector<16x64xf32>
    %253 = arith.addf %245, %252 : vector<16x64xf32>
    %c12 = arith.constant 12 : index
    %c0_117 = arith.constant 0 : index
    %254 = vector.load %arg10[%c12, %c0_117] : memref<48x64xf32, #tpu.memory_space<vmem>>, vector<1x64xf32>
    %c13 = arith.constant 13 : index
    %c0_118 = arith.constant 0 : index
    %255 = vector.load %arg10[%c13, %c0_118] : memref<48x64xf32, #tpu.memory_space<vmem>>, vector<1x64xf32>
    %cst_119 = arith.constant dense<0.000000e+00> : vector<16xf32>
    %256 = vector.multi_reduction <add>, %253, %cst_119 [1] : vector<16x64xf32> to vector<16xf32>
    %257 = vector.shape_cast %256 : vector<16xf32> to vector<16x1xf32>
    %cst_120 = arith.constant 6.400000e+01 : f32
    %258 = vector.broadcast %cst_120 : f32 to vector<16x1xf32>
    %259 = arith.divf %257, %258 : vector<16x1xf32>
    %260 = arith.mulf %253, %253 : vector<16x64xf32>
    %cst_121 = arith.constant dense<0.000000e+00> : vector<16xf32>
    %261 = vector.multi_reduction <add>, %260, %cst_121 [1] : vector<16x64xf32> to vector<16xf32>
    %262 = vector.shape_cast %261 : vector<16xf32> to vector<16x1xf32>
    %cst_122 = arith.constant 6.400000e+01 : f32
    %263 = vector.broadcast %cst_122 : f32 to vector<16x1xf32>
    %264 = arith.divf %262, %263 : vector<16x1xf32>
    %265 = arith.mulf %259, %259 : vector<16x1xf32>
    %266 = arith.subf %264, %265 : vector<16x1xf32>
    %cst_123 = arith.constant 0.000000e+00 : f32
    %267 = vector.broadcast %cst_123 : f32 to vector<16x1xf32>
    %268 = arith.maximumf %266, %267 : vector<16x1xf32>
    %269 = vector.broadcast %259 : vector<16x1xf32> to vector<16x64xf32>
    %270 = arith.subf %253, %269 : vector<16x64xf32>
    %cst_124 = arith.constant 9.99999974E-6 : f32
    %271 = vector.broadcast %cst_124 : f32 to vector<16x1xf32>
    %272 = arith.addf %268, %271 : vector<16x1xf32>
    %273 = math.rsqrt %272 : vector<16x1xf32>
    %274 = vector.broadcast %273 : vector<16x1xf32> to vector<16x64xf32>
    %275 = arith.mulf %270, %274 : vector<16x64xf32>
    %276 = vector.broadcast %254 : vector<1x64xf32> to vector<16x64xf32>
    %277 = arith.mulf %275, %276 : vector<16x64xf32>
    %278 = vector.broadcast %255 : vector<1x64xf32> to vector<16x64xf32>
    %279 = arith.addf %277, %278 : vector<16x64xf32>
    %c3_125 = arith.constant 3 : index
    %c0_126 = arith.constant 0 : index
    %c0_127 = arith.constant 0 : index
    %280 = vector.load %arg5[%c3_125, %c0_126, %c0_127] : memref<12x64x256xbf16, #tpu.memory_space<vmem>>, vector<1x64x256xbf16>
    %281 = vector.shape_cast %280 : vector<1x64x256xbf16> to vector<64x256xbf16>
    %282 = arith.truncf %279 : vector<16x64xf32> to vector<16x64xbf16>
    %cst_128 = arith.constant dense<0.000000e+00> : vector<16x256xf32>
    %283 = tpu.matmul %282, %281, %cst_128 {dimension_numbers = #tpu.dot_dimension_numbers<[1], [0], [0], [1], [0, 0, 1, 1], [], []>} : vector<16x64xbf16>, vector<64x256xbf16>, vector<16x256xf32> -> vector<16x256xf32>
    %c3_129 = arith.constant 3 : index
    %c0_130 = arith.constant 0 : index
    %284 = vector.load %arg8[%c3_129, %c0_130] : memref<12x256xf32, #tpu.memory_space<vmem>>, vector<1x256xf32>
    %285 = vector.broadcast %284 : vector<1x256xf32> to vector<16x256xf32>
    %286 = arith.addf %283, %285 : vector<16x256xf32>
    %cst_131 = arith.constant 0.000000e+00 : f32
    %287 = vector.broadcast %cst_131 : f32 to vector<16x256xf32>
    %288 = arith.maximumf %286, %287 : vector<16x256xf32>
    %c3_132 = arith.constant 3 : index
    %c0_133 = arith.constant 0 : index
    %c0_134 = arith.constant 0 : index
    %289 = vector.load %arg6[%c3_132, %c0_133, %c0_134] : memref<12x256x64xbf16, #tpu.memory_space<vmem>>, vector<1x256x64xbf16>
    %290 = vector.shape_cast %289 : vector<1x256x64xbf16> to vector<256x64xbf16>
    %291 = arith.truncf %288 : vector<16x256xf32> to vector<16x256xbf16>
    %cst_135 = arith.constant dense<0.000000e+00> : vector<16x64xf32>
    %292 = tpu.matmul %291, %290, %cst_135 {dimension_numbers = #tpu.dot_dimension_numbers<[1], [0], [0], [1], [0, 0, 1, 1], [], []>} : vector<16x256xbf16>, vector<256x64xbf16>, vector<16x64xf32> -> vector<16x64xf32>
    %c3_136 = arith.constant 3 : index
    %c0_137 = arith.constant 0 : index
    %293 = vector.load %arg9[%c3_136, %c0_137] : memref<12x64xf32, #tpu.memory_space<vmem>>, vector<1x64xf32>
    %294 = vector.broadcast %293 : vector<1x64xf32> to vector<16x64xf32>
    %295 = arith.addf %292, %294 : vector<16x64xf32>
    %296 = arith.addf %279, %295 : vector<16x64xf32>
    %c14 = arith.constant 14 : index
    %c0_138 = arith.constant 0 : index
    %297 = vector.load %arg10[%c14, %c0_138] : memref<48x64xf32, #tpu.memory_space<vmem>>, vector<1x64xf32>
    %c15 = arith.constant 15 : index
    %c0_139 = arith.constant 0 : index
    %298 = vector.load %arg10[%c15, %c0_139] : memref<48x64xf32, #tpu.memory_space<vmem>>, vector<1x64xf32>
    %cst_140 = arith.constant dense<0.000000e+00> : vector<16xf32>
    %299 = vector.multi_reduction <add>, %296, %cst_140 [1] : vector<16x64xf32> to vector<16xf32>
    %300 = vector.shape_cast %299 : vector<16xf32> to vector<16x1xf32>
    %cst_141 = arith.constant 6.400000e+01 : f32
    %301 = vector.broadcast %cst_141 : f32 to vector<16x1xf32>
    %302 = arith.divf %300, %301 : vector<16x1xf32>
    %303 = arith.mulf %296, %296 : vector<16x64xf32>
    %cst_142 = arith.constant dense<0.000000e+00> : vector<16xf32>
    %304 = vector.multi_reduction <add>, %303, %cst_142 [1] : vector<16x64xf32> to vector<16xf32>
    %305 = vector.shape_cast %304 : vector<16xf32> to vector<16x1xf32>
    %cst_143 = arith.constant 6.400000e+01 : f32
    %306 = vector.broadcast %cst_143 : f32 to vector<16x1xf32>
    %307 = arith.divf %305, %306 : vector<16x1xf32>
    %308 = arith.mulf %302, %302 : vector<16x1xf32>
    %309 = arith.subf %307, %308 : vector<16x1xf32>
    %cst_144 = arith.constant 0.000000e+00 : f32
    %310 = vector.broadcast %cst_144 : f32 to vector<16x1xf32>
    %311 = arith.maximumf %309, %310 : vector<16x1xf32>
    %312 = vector.broadcast %302 : vector<16x1xf32> to vector<16x64xf32>
    %313 = arith.subf %296, %312 : vector<16x64xf32>
    %cst_145 = arith.constant 9.99999974E-6 : f32
    %314 = vector.broadcast %cst_145 : f32 to vector<16x1xf32>
    %315 = arith.addf %311, %314 : vector<16x1xf32>
    %316 = math.rsqrt %315 : vector<16x1xf32>
    %317 = vector.broadcast %316 : vector<16x1xf32> to vector<16x64xf32>
    %318 = arith.mulf %313, %317 : vector<16x64xf32>
    %319 = vector.broadcast %297 : vector<1x64xf32> to vector<16x64xf32>
    %320 = arith.mulf %318, %319 : vector<16x64xf32>
    %321 = vector.broadcast %298 : vector<1x64xf32> to vector<16x64xf32>
    %322 = arith.addf %320, %321 : vector<16x64xf32>
    %c4_146 = arith.constant 4 : index
    %c0_147 = arith.constant 0 : index
    %c0_148 = arith.constant 0 : index
    %323 = vector.load %arg4[%c4_146, %c0_147, %c0_148] : memref<12x64x64xbf16, #tpu.memory_space<vmem>>, vector<1x64x64xbf16>
    %324 = vector.shape_cast %323 : vector<1x64x64xbf16> to vector<64x64xbf16>
    %325 = arith.truncf %322 : vector<16x64xf32> to vector<16x64xbf16>
    %cst_149 = arith.constant dense<0.000000e+00> : vector<16x64xf32>
    %326 = tpu.matmul %325, %324, %cst_149 {dimension_numbers = #tpu.dot_dimension_numbers<[1], [0], [0], [1], [0, 0, 1, 1], [], []>} : vector<16x64xbf16>, vector<64x64xbf16>, vector<16x64xf32> -> vector<16x64xf32>
    %c4_150 = arith.constant 4 : index
    %c0_151 = arith.constant 0 : index
    %327 = vector.load %arg7[%c4_150, %c0_151] : memref<12x64xf32, #tpu.memory_space<vmem>>, vector<1x64xf32>
    %328 = vector.broadcast %327 : vector<1x64xf32> to vector<16x64xf32>
    %329 = arith.addf %326, %328 : vector<16x64xf32>
    %330 = arith.addf %322, %329 : vector<16x64xf32>
    %c16 = arith.constant 16 : index
    %c0_152 = arith.constant 0 : index
    %331 = vector.load %arg10[%c16, %c0_152] : memref<48x64xf32, #tpu.memory_space<vmem>>, vector<1x64xf32>
    %c17 = arith.constant 17 : index
    %c0_153 = arith.constant 0 : index
    %332 = vector.load %arg10[%c17, %c0_153] : memref<48x64xf32, #tpu.memory_space<vmem>>, vector<1x64xf32>
    %cst_154 = arith.constant dense<0.000000e+00> : vector<16xf32>
    %333 = vector.multi_reduction <add>, %330, %cst_154 [1] : vector<16x64xf32> to vector<16xf32>
    %334 = vector.shape_cast %333 : vector<16xf32> to vector<16x1xf32>
    %cst_155 = arith.constant 6.400000e+01 : f32
    %335 = vector.broadcast %cst_155 : f32 to vector<16x1xf32>
    %336 = arith.divf %334, %335 : vector<16x1xf32>
    %337 = arith.mulf %330, %330 : vector<16x64xf32>
    %cst_156 = arith.constant dense<0.000000e+00> : vector<16xf32>
    %338 = vector.multi_reduction <add>, %337, %cst_156 [1] : vector<16x64xf32> to vector<16xf32>
    %339 = vector.shape_cast %338 : vector<16xf32> to vector<16x1xf32>
    %cst_157 = arith.constant 6.400000e+01 : f32
    %340 = vector.broadcast %cst_157 : f32 to vector<16x1xf32>
    %341 = arith.divf %339, %340 : vector<16x1xf32>
    %342 = arith.mulf %336, %336 : vector<16x1xf32>
    %343 = arith.subf %341, %342 : vector<16x1xf32>
    %cst_158 = arith.constant 0.000000e+00 : f32
    %344 = vector.broadcast %cst_158 : f32 to vector<16x1xf32>
    %345 = arith.maximumf %343, %344 : vector<16x1xf32>
    %346 = vector.broadcast %336 : vector<16x1xf32> to vector<16x64xf32>
    %347 = arith.subf %330, %346 : vector<16x64xf32>
    %cst_159 = arith.constant 9.99999974E-6 : f32
    %348 = vector.broadcast %cst_159 : f32 to vector<16x1xf32>
    %349 = arith.addf %345, %348 : vector<16x1xf32>
    %350 = math.rsqrt %349 : vector<16x1xf32>
    %351 = vector.broadcast %350 : vector<16x1xf32> to vector<16x64xf32>
    %352 = arith.mulf %347, %351 : vector<16x64xf32>
    %353 = vector.broadcast %331 : vector<1x64xf32> to vector<16x64xf32>
    %354 = arith.mulf %352, %353 : vector<16x64xf32>
    %355 = vector.broadcast %332 : vector<1x64xf32> to vector<16x64xf32>
    %356 = arith.addf %354, %355 : vector<16x64xf32>
    %c4_160 = arith.constant 4 : index
    %c0_161 = arith.constant 0 : index
    %c0_162 = arith.constant 0 : index
    %357 = vector.load %arg5[%c4_160, %c0_161, %c0_162] : memref<12x64x256xbf16, #tpu.memory_space<vmem>>, vector<1x64x256xbf16>
    %358 = vector.shape_cast %357 : vector<1x64x256xbf16> to vector<64x256xbf16>
    %359 = arith.truncf %356 : vector<16x64xf32> to vector<16x64xbf16>
    %cst_163 = arith.constant dense<0.000000e+00> : vector<16x256xf32>
    %360 = tpu.matmul %359, %358, %cst_163 {dimension_numbers = #tpu.dot_dimension_numbers<[1], [0], [0], [1], [0, 0, 1, 1], [], []>} : vector<16x64xbf16>, vector<64x256xbf16>, vector<16x256xf32> -> vector<16x256xf32>
    %c4_164 = arith.constant 4 : index
    %c0_165 = arith.constant 0 : index
    %361 = vector.load %arg8[%c4_164, %c0_165] : memref<12x256xf32, #tpu.memory_space<vmem>>, vector<1x256xf32>
    %362 = vector.broadcast %361 : vector<1x256xf32> to vector<16x256xf32>
    %363 = arith.addf %360, %362 : vector<16x256xf32>
    %cst_166 = arith.constant 0.000000e+00 : f32
    %364 = vector.broadcast %cst_166 : f32 to vector<16x256xf32>
    %365 = arith.maximumf %363, %364 : vector<16x256xf32>
    %c4_167 = arith.constant 4 : index
    %c0_168 = arith.constant 0 : index
    %c0_169 = arith.constant 0 : index
    %366 = vector.load %arg6[%c4_167, %c0_168, %c0_169] : memref<12x256x64xbf16, #tpu.memory_space<vmem>>, vector<1x256x64xbf16>
    %367 = vector.shape_cast %366 : vector<1x256x64xbf16> to vector<256x64xbf16>
    %368 = arith.truncf %365 : vector<16x256xf32> to vector<16x256xbf16>
    %cst_170 = arith.constant dense<0.000000e+00> : vector<16x64xf32>
    %369 = tpu.matmul %368, %367, %cst_170 {dimension_numbers = #tpu.dot_dimension_numbers<[1], [0], [0], [1], [0, 0, 1, 1], [], []>} : vector<16x256xbf16>, vector<256x64xbf16>, vector<16x64xf32> -> vector<16x64xf32>
    %c4_171 = arith.constant 4 : index
    %c0_172 = arith.constant 0 : index
    %370 = vector.load %arg9[%c4_171, %c0_172] : memref<12x64xf32, #tpu.memory_space<vmem>>, vector<1x64xf32>
    %371 = vector.broadcast %370 : vector<1x64xf32> to vector<16x64xf32>
    %372 = arith.addf %369, %371 : vector<16x64xf32>
    %373 = arith.addf %356, %372 : vector<16x64xf32>
    %c18 = arith.constant 18 : index
    %c0_173 = arith.constant 0 : index
    %374 = vector.load %arg10[%c18, %c0_173] : memref<48x64xf32, #tpu.memory_space<vmem>>, vector<1x64xf32>
    %c19 = arith.constant 19 : index
    %c0_174 = arith.constant 0 : index
    %375 = vector.load %arg10[%c19, %c0_174] : memref<48x64xf32, #tpu.memory_space<vmem>>, vector<1x64xf32>
    %cst_175 = arith.constant dense<0.000000e+00> : vector<16xf32>
    %376 = vector.multi_reduction <add>, %373, %cst_175 [1] : vector<16x64xf32> to vector<16xf32>
    %377 = vector.shape_cast %376 : vector<16xf32> to vector<16x1xf32>
    %cst_176 = arith.constant 6.400000e+01 : f32
    %378 = vector.broadcast %cst_176 : f32 to vector<16x1xf32>
    %379 = arith.divf %377, %378 : vector<16x1xf32>
    %380 = arith.mulf %373, %373 : vector<16x64xf32>
    %cst_177 = arith.constant dense<0.000000e+00> : vector<16xf32>
    %381 = vector.multi_reduction <add>, %380, %cst_177 [1] : vector<16x64xf32> to vector<16xf32>
    %382 = vector.shape_cast %381 : vector<16xf32> to vector<16x1xf32>
    %cst_178 = arith.constant 6.400000e+01 : f32
    %383 = vector.broadcast %cst_178 : f32 to vector<16x1xf32>
    %384 = arith.divf %382, %383 : vector<16x1xf32>
    %385 = arith.mulf %379, %379 : vector<16x1xf32>
    %386 = arith.subf %384, %385 : vector<16x1xf32>
    %cst_179 = arith.constant 0.000000e+00 : f32
    %387 = vector.broadcast %cst_179 : f32 to vector<16x1xf32>
    %388 = arith.maximumf %386, %387 : vector<16x1xf32>
    %389 = vector.broadcast %379 : vector<16x1xf32> to vector<16x64xf32>
    %390 = arith.subf %373, %389 : vector<16x64xf32>
    %cst_180 = arith.constant 9.99999974E-6 : f32
    %391 = vector.broadcast %cst_180 : f32 to vector<16x1xf32>
    %392 = arith.addf %388, %391 : vector<16x1xf32>
    %393 = math.rsqrt %392 : vector<16x1xf32>
    %394 = vector.broadcast %393 : vector<16x1xf32> to vector<16x64xf32>
    %395 = arith.mulf %390, %394 : vector<16x64xf32>
    %396 = vector.broadcast %374 : vector<1x64xf32> to vector<16x64xf32>
    %397 = arith.mulf %395, %396 : vector<16x64xf32>
    %398 = vector.broadcast %375 : vector<1x64xf32> to vector<16x64xf32>
    %399 = arith.addf %397, %398 : vector<16x64xf32>
    %c5_181 = arith.constant 5 : index
    %c0_182 = arith.constant 0 : index
    %c0_183 = arith.constant 0 : index
    %400 = vector.load %arg4[%c5_181, %c0_182, %c0_183] : memref<12x64x64xbf16, #tpu.memory_space<vmem>>, vector<1x64x64xbf16>
    %401 = vector.shape_cast %400 : vector<1x64x64xbf16> to vector<64x64xbf16>
    %402 = arith.truncf %399 : vector<16x64xf32> to vector<16x64xbf16>
    %cst_184 = arith.constant dense<0.000000e+00> : vector<16x64xf32>
    %403 = tpu.matmul %402, %401, %cst_184 {dimension_numbers = #tpu.dot_dimension_numbers<[1], [0], [0], [1], [0, 0, 1, 1], [], []>} : vector<16x64xbf16>, vector<64x64xbf16>, vector<16x64xf32> -> vector<16x64xf32>
    %c5_185 = arith.constant 5 : index
    %c0_186 = arith.constant 0 : index
    %404 = vector.load %arg7[%c5_185, %c0_186] : memref<12x64xf32, #tpu.memory_space<vmem>>, vector<1x64xf32>
    %405 = vector.broadcast %404 : vector<1x64xf32> to vector<16x64xf32>
    %406 = arith.addf %403, %405 : vector<16x64xf32>
    %407 = arith.addf %399, %406 : vector<16x64xf32>
    %c20 = arith.constant 20 : index
    %c0_187 = arith.constant 0 : index
    %408 = vector.load %arg10[%c20, %c0_187] : memref<48x64xf32, #tpu.memory_space<vmem>>, vector<1x64xf32>
    %c21 = arith.constant 21 : index
    %c0_188 = arith.constant 0 : index
    %409 = vector.load %arg10[%c21, %c0_188] : memref<48x64xf32, #tpu.memory_space<vmem>>, vector<1x64xf32>
    %cst_189 = arith.constant dense<0.000000e+00> : vector<16xf32>
    %410 = vector.multi_reduction <add>, %407, %cst_189 [1] : vector<16x64xf32> to vector<16xf32>
    %411 = vector.shape_cast %410 : vector<16xf32> to vector<16x1xf32>
    %cst_190 = arith.constant 6.400000e+01 : f32
    %412 = vector.broadcast %cst_190 : f32 to vector<16x1xf32>
    %413 = arith.divf %411, %412 : vector<16x1xf32>
    %414 = arith.mulf %407, %407 : vector<16x64xf32>
    %cst_191 = arith.constant dense<0.000000e+00> : vector<16xf32>
    %415 = vector.multi_reduction <add>, %414, %cst_191 [1] : vector<16x64xf32> to vector<16xf32>
    %416 = vector.shape_cast %415 : vector<16xf32> to vector<16x1xf32>
    %cst_192 = arith.constant 6.400000e+01 : f32
    %417 = vector.broadcast %cst_192 : f32 to vector<16x1xf32>
    %418 = arith.divf %416, %417 : vector<16x1xf32>
    %419 = arith.mulf %413, %413 : vector<16x1xf32>
    %420 = arith.subf %418, %419 : vector<16x1xf32>
    %cst_193 = arith.constant 0.000000e+00 : f32
    %421 = vector.broadcast %cst_193 : f32 to vector<16x1xf32>
    %422 = arith.maximumf %420, %421 : vector<16x1xf32>
    %423 = vector.broadcast %413 : vector<16x1xf32> to vector<16x64xf32>
    %424 = arith.subf %407, %423 : vector<16x64xf32>
    %cst_194 = arith.constant 9.99999974E-6 : f32
    %425 = vector.broadcast %cst_194 : f32 to vector<16x1xf32>
    %426 = arith.addf %422, %425 : vector<16x1xf32>
    %427 = math.rsqrt %426 : vector<16x1xf32>
    %428 = vector.broadcast %427 : vector<16x1xf32> to vector<16x64xf32>
    %429 = arith.mulf %424, %428 : vector<16x64xf32>
    %430 = vector.broadcast %408 : vector<1x64xf32> to vector<16x64xf32>
    %431 = arith.mulf %429, %430 : vector<16x64xf32>
    %432 = vector.broadcast %409 : vector<1x64xf32> to vector<16x64xf32>
    %433 = arith.addf %431, %432 : vector<16x64xf32>
    %c5_195 = arith.constant 5 : index
    %c0_196 = arith.constant 0 : index
    %c0_197 = arith.constant 0 : index
    %434 = vector.load %arg5[%c5_195, %c0_196, %c0_197] : memref<12x64x256xbf16, #tpu.memory_space<vmem>>, vector<1x64x256xbf16>
    %435 = vector.shape_cast %434 : vector<1x64x256xbf16> to vector<64x256xbf16>
    %436 = arith.truncf %433 : vector<16x64xf32> to vector<16x64xbf16>
    %cst_198 = arith.constant dense<0.000000e+00> : vector<16x256xf32>
    %437 = tpu.matmul %436, %435, %cst_198 {dimension_numbers = #tpu.dot_dimension_numbers<[1], [0], [0], [1], [0, 0, 1, 1], [], []>} : vector<16x64xbf16>, vector<64x256xbf16>, vector<16x256xf32> -> vector<16x256xf32>
    %c5_199 = arith.constant 5 : index
    %c0_200 = arith.constant 0 : index
    %438 = vector.load %arg8[%c5_199, %c0_200] : memref<12x256xf32, #tpu.memory_space<vmem>>, vector<1x256xf32>
    %439 = vector.broadcast %438 : vector<1x256xf32> to vector<16x256xf32>
    %440 = arith.addf %437, %439 : vector<16x256xf32>
    %cst_201 = arith.constant 0.000000e+00 : f32
    %441 = vector.broadcast %cst_201 : f32 to vector<16x256xf32>
    %442 = arith.maximumf %440, %441 : vector<16x256xf32>
    %c5_202 = arith.constant 5 : index
    %c0_203 = arith.constant 0 : index
    %c0_204 = arith.constant 0 : index
    %443 = vector.load %arg6[%c5_202, %c0_203, %c0_204] : memref<12x256x64xbf16, #tpu.memory_space<vmem>>, vector<1x256x64xbf16>
    %444 = vector.shape_cast %443 : vector<1x256x64xbf16> to vector<256x64xbf16>
    %445 = arith.truncf %442 : vector<16x256xf32> to vector<16x256xbf16>
    %cst_205 = arith.constant dense<0.000000e+00> : vector<16x64xf32>
    %446 = tpu.matmul %445, %444, %cst_205 {dimension_numbers = #tpu.dot_dimension_numbers<[1], [0], [0], [1], [0, 0, 1, 1], [], []>} : vector<16x256xbf16>, vector<256x64xbf16>, vector<16x64xf32> -> vector<16x64xf32>
    %c5_206 = arith.constant 5 : index
    %c0_207 = arith.constant 0 : index
    %447 = vector.load %arg9[%c5_206, %c0_207] : memref<12x64xf32, #tpu.memory_space<vmem>>, vector<1x64xf32>
    %448 = vector.broadcast %447 : vector<1x64xf32> to vector<16x64xf32>
    %449 = arith.addf %446, %448 : vector<16x64xf32>
    %450 = arith.addf %433, %449 : vector<16x64xf32>
    %c22 = arith.constant 22 : index
    %c0_208 = arith.constant 0 : index
    %451 = vector.load %arg10[%c22, %c0_208] : memref<48x64xf32, #tpu.memory_space<vmem>>, vector<1x64xf32>
    %c23 = arith.constant 23 : index
    %c0_209 = arith.constant 0 : index
    %452 = vector.load %arg10[%c23, %c0_209] : memref<48x64xf32, #tpu.memory_space<vmem>>, vector<1x64xf32>
    %cst_210 = arith.constant dense<0.000000e+00> : vector<16xf32>
    %453 = vector.multi_reduction <add>, %450, %cst_210 [1] : vector<16x64xf32> to vector<16xf32>
    %454 = vector.shape_cast %453 : vector<16xf32> to vector<16x1xf32>
    %cst_211 = arith.constant 6.400000e+01 : f32
    %455 = vector.broadcast %cst_211 : f32 to vector<16x1xf32>
    %456 = arith.divf %454, %455 : vector<16x1xf32>
    %457 = arith.mulf %450, %450 : vector<16x64xf32>
    %cst_212 = arith.constant dense<0.000000e+00> : vector<16xf32>
    %458 = vector.multi_reduction <add>, %457, %cst_212 [1] : vector<16x64xf32> to vector<16xf32>
    %459 = vector.shape_cast %458 : vector<16xf32> to vector<16x1xf32>
    %cst_213 = arith.constant 6.400000e+01 : f32
    %460 = vector.broadcast %cst_213 : f32 to vector<16x1xf32>
    %461 = arith.divf %459, %460 : vector<16x1xf32>
    %462 = arith.mulf %456, %456 : vector<16x1xf32>
    %463 = arith.subf %461, %462 : vector<16x1xf32>
    %cst_214 = arith.constant 0.000000e+00 : f32
    %464 = vector.broadcast %cst_214 : f32 to vector<16x1xf32>
    %465 = arith.maximumf %463, %464 : vector<16x1xf32>
    %466 = vector.broadcast %456 : vector<16x1xf32> to vector<16x64xf32>
    %467 = arith.subf %450, %466 : vector<16x64xf32>
    %cst_215 = arith.constant 9.99999974E-6 : f32
    %468 = vector.broadcast %cst_215 : f32 to vector<16x1xf32>
    %469 = arith.addf %465, %468 : vector<16x1xf32>
    %470 = math.rsqrt %469 : vector<16x1xf32>
    %471 = vector.broadcast %470 : vector<16x1xf32> to vector<16x64xf32>
    %472 = arith.mulf %467, %471 : vector<16x64xf32>
    %473 = vector.broadcast %451 : vector<1x64xf32> to vector<16x64xf32>
    %474 = arith.mulf %472, %473 : vector<16x64xf32>
    %475 = vector.broadcast %452 : vector<1x64xf32> to vector<16x64xf32>
    %476 = arith.addf %474, %475 : vector<16x64xf32>
    %c6_216 = arith.constant 6 : index
    %c0_217 = arith.constant 0 : index
    %c0_218 = arith.constant 0 : index
    %477 = vector.load %arg4[%c6_216, %c0_217, %c0_218] : memref<12x64x64xbf16, #tpu.memory_space<vmem>>, vector<1x64x64xbf16>
    %478 = vector.shape_cast %477 : vector<1x64x64xbf16> to vector<64x64xbf16>
    %479 = arith.truncf %476 : vector<16x64xf32> to vector<16x64xbf16>
    %cst_219 = arith.constant dense<0.000000e+00> : vector<16x64xf32>
    %480 = tpu.matmul %479, %478, %cst_219 {dimension_numbers = #tpu.dot_dimension_numbers<[1], [0], [0], [1], [0, 0, 1, 1], [], []>} : vector<16x64xbf16>, vector<64x64xbf16>, vector<16x64xf32> -> vector<16x64xf32>
    %c6_220 = arith.constant 6 : index
    %c0_221 = arith.constant 0 : index
    %481 = vector.load %arg7[%c6_220, %c0_221] : memref<12x64xf32, #tpu.memory_space<vmem>>, vector<1x64xf32>
    %482 = vector.broadcast %481 : vector<1x64xf32> to vector<16x64xf32>
    %483 = arith.addf %480, %482 : vector<16x64xf32>
    %484 = arith.addf %476, %483 : vector<16x64xf32>
    %c24 = arith.constant 24 : index
    %c0_222 = arith.constant 0 : index
    %485 = vector.load %arg10[%c24, %c0_222] : memref<48x64xf32, #tpu.memory_space<vmem>>, vector<1x64xf32>
    %c25 = arith.constant 25 : index
    %c0_223 = arith.constant 0 : index
    %486 = vector.load %arg10[%c25, %c0_223] : memref<48x64xf32, #tpu.memory_space<vmem>>, vector<1x64xf32>
    %cst_224 = arith.constant dense<0.000000e+00> : vector<16xf32>
    %487 = vector.multi_reduction <add>, %484, %cst_224 [1] : vector<16x64xf32> to vector<16xf32>
    %488 = vector.shape_cast %487 : vector<16xf32> to vector<16x1xf32>
    %cst_225 = arith.constant 6.400000e+01 : f32
    %489 = vector.broadcast %cst_225 : f32 to vector<16x1xf32>
    %490 = arith.divf %488, %489 : vector<16x1xf32>
    %491 = arith.mulf %484, %484 : vector<16x64xf32>
    %cst_226 = arith.constant dense<0.000000e+00> : vector<16xf32>
    %492 = vector.multi_reduction <add>, %491, %cst_226 [1] : vector<16x64xf32> to vector<16xf32>
    %493 = vector.shape_cast %492 : vector<16xf32> to vector<16x1xf32>
    %cst_227 = arith.constant 6.400000e+01 : f32
    %494 = vector.broadcast %cst_227 : f32 to vector<16x1xf32>
    %495 = arith.divf %493, %494 : vector<16x1xf32>
    %496 = arith.mulf %490, %490 : vector<16x1xf32>
    %497 = arith.subf %495, %496 : vector<16x1xf32>
    %cst_228 = arith.constant 0.000000e+00 : f32
    %498 = vector.broadcast %cst_228 : f32 to vector<16x1xf32>
    %499 = arith.maximumf %497, %498 : vector<16x1xf32>
    %500 = vector.broadcast %490 : vector<16x1xf32> to vector<16x64xf32>
    %501 = arith.subf %484, %500 : vector<16x64xf32>
    %cst_229 = arith.constant 9.99999974E-6 : f32
    %502 = vector.broadcast %cst_229 : f32 to vector<16x1xf32>
    %503 = arith.addf %499, %502 : vector<16x1xf32>
    %504 = math.rsqrt %503 : vector<16x1xf32>
    %505 = vector.broadcast %504 : vector<16x1xf32> to vector<16x64xf32>
    %506 = arith.mulf %501, %505 : vector<16x64xf32>
    %507 = vector.broadcast %485 : vector<1x64xf32> to vector<16x64xf32>
    %508 = arith.mulf %506, %507 : vector<16x64xf32>
    %509 = vector.broadcast %486 : vector<1x64xf32> to vector<16x64xf32>
    %510 = arith.addf %508, %509 : vector<16x64xf32>
    %c6_230 = arith.constant 6 : index
    %c0_231 = arith.constant 0 : index
    %c0_232 = arith.constant 0 : index
    %511 = vector.load %arg5[%c6_230, %c0_231, %c0_232] : memref<12x64x256xbf16, #tpu.memory_space<vmem>>, vector<1x64x256xbf16>
    %512 = vector.shape_cast %511 : vector<1x64x256xbf16> to vector<64x256xbf16>
    %513 = arith.truncf %510 : vector<16x64xf32> to vector<16x64xbf16>
    %cst_233 = arith.constant dense<0.000000e+00> : vector<16x256xf32>
    %514 = tpu.matmul %513, %512, %cst_233 {dimension_numbers = #tpu.dot_dimension_numbers<[1], [0], [0], [1], [0, 0, 1, 1], [], []>} : vector<16x64xbf16>, vector<64x256xbf16>, vector<16x256xf32> -> vector<16x256xf32>
    %c6_234 = arith.constant 6 : index
    %c0_235 = arith.constant 0 : index
    %515 = vector.load %arg8[%c6_234, %c0_235] : memref<12x256xf32, #tpu.memory_space<vmem>>, vector<1x256xf32>
    %516 = vector.broadcast %515 : vector<1x256xf32> to vector<16x256xf32>
    %517 = arith.addf %514, %516 : vector<16x256xf32>
    %cst_236 = arith.constant 0.000000e+00 : f32
    %518 = vector.broadcast %cst_236 : f32 to vector<16x256xf32>
    %519 = arith.maximumf %517, %518 : vector<16x256xf32>
    %c6_237 = arith.constant 6 : index
    %c0_238 = arith.constant 0 : index
    %c0_239 = arith.constant 0 : index
    %520 = vector.load %arg6[%c6_237, %c0_238, %c0_239] : memref<12x256x64xbf16, #tpu.memory_space<vmem>>, vector<1x256x64xbf16>
    %521 = vector.shape_cast %520 : vector<1x256x64xbf16> to vector<256x64xbf16>
    %522 = arith.truncf %519 : vector<16x256xf32> to vector<16x256xbf16>
    %cst_240 = arith.constant dense<0.000000e+00> : vector<16x64xf32>
    %523 = tpu.matmul %522, %521, %cst_240 {dimension_numbers = #tpu.dot_dimension_numbers<[1], [0], [0], [1], [0, 0, 1, 1], [], []>} : vector<16x256xbf16>, vector<256x64xbf16>, vector<16x64xf32> -> vector<16x64xf32>
    %c6_241 = arith.constant 6 : index
    %c0_242 = arith.constant 0 : index
    %524 = vector.load %arg9[%c6_241, %c0_242] : memref<12x64xf32, #tpu.memory_space<vmem>>, vector<1x64xf32>
    %525 = vector.broadcast %524 : vector<1x64xf32> to vector<16x64xf32>
    %526 = arith.addf %523, %525 : vector<16x64xf32>
    %527 = arith.addf %510, %526 : vector<16x64xf32>
    %c26 = arith.constant 26 : index
    %c0_243 = arith.constant 0 : index
    %528 = vector.load %arg10[%c26, %c0_243] : memref<48x64xf32, #tpu.memory_space<vmem>>, vector<1x64xf32>
    %c27 = arith.constant 27 : index
    %c0_244 = arith.constant 0 : index
    %529 = vector.load %arg10[%c27, %c0_244] : memref<48x64xf32, #tpu.memory_space<vmem>>, vector<1x64xf32>
    %cst_245 = arith.constant dense<0.000000e+00> : vector<16xf32>
    %530 = vector.multi_reduction <add>, %527, %cst_245 [1] : vector<16x64xf32> to vector<16xf32>
    %531 = vector.shape_cast %530 : vector<16xf32> to vector<16x1xf32>
    %cst_246 = arith.constant 6.400000e+01 : f32
    %532 = vector.broadcast %cst_246 : f32 to vector<16x1xf32>
    %533 = arith.divf %531, %532 : vector<16x1xf32>
    %534 = arith.mulf %527, %527 : vector<16x64xf32>
    %cst_247 = arith.constant dense<0.000000e+00> : vector<16xf32>
    %535 = vector.multi_reduction <add>, %534, %cst_247 [1] : vector<16x64xf32> to vector<16xf32>
    %536 = vector.shape_cast %535 : vector<16xf32> to vector<16x1xf32>
    %cst_248 = arith.constant 6.400000e+01 : f32
    %537 = vector.broadcast %cst_248 : f32 to vector<16x1xf32>
    %538 = arith.divf %536, %537 : vector<16x1xf32>
    %539 = arith.mulf %533, %533 : vector<16x1xf32>
    %540 = arith.subf %538, %539 : vector<16x1xf32>
    %cst_249 = arith.constant 0.000000e+00 : f32
    %541 = vector.broadcast %cst_249 : f32 to vector<16x1xf32>
    %542 = arith.maximumf %540, %541 : vector<16x1xf32>
    %543 = vector.broadcast %533 : vector<16x1xf32> to vector<16x64xf32>
    %544 = arith.subf %527, %543 : vector<16x64xf32>
    %cst_250 = arith.constant 9.99999974E-6 : f32
    %545 = vector.broadcast %cst_250 : f32 to vector<16x1xf32>
    %546 = arith.addf %542, %545 : vector<16x1xf32>
    %547 = math.rsqrt %546 : vector<16x1xf32>
    %548 = vector.broadcast %547 : vector<16x1xf32> to vector<16x64xf32>
    %549 = arith.mulf %544, %548 : vector<16x64xf32>
    %550 = vector.broadcast %528 : vector<1x64xf32> to vector<16x64xf32>
    %551 = arith.mulf %549, %550 : vector<16x64xf32>
    %552 = vector.broadcast %529 : vector<1x64xf32> to vector<16x64xf32>
    %553 = arith.addf %551, %552 : vector<16x64xf32>
    %c7_251 = arith.constant 7 : index
    %c0_252 = arith.constant 0 : index
    %c0_253 = arith.constant 0 : index
    %554 = vector.load %arg4[%c7_251, %c0_252, %c0_253] : memref<12x64x64xbf16, #tpu.memory_space<vmem>>, vector<1x64x64xbf16>
    %555 = vector.shape_cast %554 : vector<1x64x64xbf16> to vector<64x64xbf16>
    %556 = arith.truncf %553 : vector<16x64xf32> to vector<16x64xbf16>
    %cst_254 = arith.constant dense<0.000000e+00> : vector<16x64xf32>
    %557 = tpu.matmul %556, %555, %cst_254 {dimension_numbers = #tpu.dot_dimension_numbers<[1], [0], [0], [1], [0, 0, 1, 1], [], []>} : vector<16x64xbf16>, vector<64x64xbf16>, vector<16x64xf32> -> vector<16x64xf32>
    %c7_255 = arith.constant 7 : index
    %c0_256 = arith.constant 0 : index
    %558 = vector.load %arg7[%c7_255, %c0_256] : memref<12x64xf32, #tpu.memory_space<vmem>>, vector<1x64xf32>
    %559 = vector.broadcast %558 : vector<1x64xf32> to vector<16x64xf32>
    %560 = arith.addf %557, %559 : vector<16x64xf32>
    %561 = arith.addf %553, %560 : vector<16x64xf32>
    %c28 = arith.constant 28 : index
    %c0_257 = arith.constant 0 : index
    %562 = vector.load %arg10[%c28, %c0_257] : memref<48x64xf32, #tpu.memory_space<vmem>>, vector<1x64xf32>
    %c29 = arith.constant 29 : index
    %c0_258 = arith.constant 0 : index
    %563 = vector.load %arg10[%c29, %c0_258] : memref<48x64xf32, #tpu.memory_space<vmem>>, vector<1x64xf32>
    %cst_259 = arith.constant dense<0.000000e+00> : vector<16xf32>
    %564 = vector.multi_reduction <add>, %561, %cst_259 [1] : vector<16x64xf32> to vector<16xf32>
    %565 = vector.shape_cast %564 : vector<16xf32> to vector<16x1xf32>
    %cst_260 = arith.constant 6.400000e+01 : f32
    %566 = vector.broadcast %cst_260 : f32 to vector<16x1xf32>
    %567 = arith.divf %565, %566 : vector<16x1xf32>
    %568 = arith.mulf %561, %561 : vector<16x64xf32>
    %cst_261 = arith.constant dense<0.000000e+00> : vector<16xf32>
    %569 = vector.multi_reduction <add>, %568, %cst_261 [1] : vector<16x64xf32> to vector<16xf32>
    %570 = vector.shape_cast %569 : vector<16xf32> to vector<16x1xf32>
    %cst_262 = arith.constant 6.400000e+01 : f32
    %571 = vector.broadcast %cst_262 : f32 to vector<16x1xf32>
    %572 = arith.divf %570, %571 : vector<16x1xf32>
    %573 = arith.mulf %567, %567 : vector<16x1xf32>
    %574 = arith.subf %572, %573 : vector<16x1xf32>
    %cst_263 = arith.constant 0.000000e+00 : f32
    %575 = vector.broadcast %cst_263 : f32 to vector<16x1xf32>
    %576 = arith.maximumf %574, %575 : vector<16x1xf32>
    %577 = vector.broadcast %567 : vector<16x1xf32> to vector<16x64xf32>
    %578 = arith.subf %561, %577 : vector<16x64xf32>
    %cst_264 = arith.constant 9.99999974E-6 : f32
    %579 = vector.broadcast %cst_264 : f32 to vector<16x1xf32>
    %580 = arith.addf %576, %579 : vector<16x1xf32>
    %581 = math.rsqrt %580 : vector<16x1xf32>
    %582 = vector.broadcast %581 : vector<16x1xf32> to vector<16x64xf32>
    %583 = arith.mulf %578, %582 : vector<16x64xf32>
    %584 = vector.broadcast %562 : vector<1x64xf32> to vector<16x64xf32>
    %585 = arith.mulf %583, %584 : vector<16x64xf32>
    %586 = vector.broadcast %563 : vector<1x64xf32> to vector<16x64xf32>
    %587 = arith.addf %585, %586 : vector<16x64xf32>
    %c7_265 = arith.constant 7 : index
    %c0_266 = arith.constant 0 : index
    %c0_267 = arith.constant 0 : index
    %588 = vector.load %arg5[%c7_265, %c0_266, %c0_267] : memref<12x64x256xbf16, #tpu.memory_space<vmem>>, vector<1x64x256xbf16>
    %589 = vector.shape_cast %588 : vector<1x64x256xbf16> to vector<64x256xbf16>
    %590 = arith.truncf %587 : vector<16x64xf32> to vector<16x64xbf16>
    %cst_268 = arith.constant dense<0.000000e+00> : vector<16x256xf32>
    %591 = tpu.matmul %590, %589, %cst_268 {dimension_numbers = #tpu.dot_dimension_numbers<[1], [0], [0], [1], [0, 0, 1, 1], [], []>} : vector<16x64xbf16>, vector<64x256xbf16>, vector<16x256xf32> -> vector<16x256xf32>
    %c7_269 = arith.constant 7 : index
    %c0_270 = arith.constant 0 : index
    %592 = vector.load %arg8[%c7_269, %c0_270] : memref<12x256xf32, #tpu.memory_space<vmem>>, vector<1x256xf32>
    %593 = vector.broadcast %592 : vector<1x256xf32> to vector<16x256xf32>
    %594 = arith.addf %591, %593 : vector<16x256xf32>
    %cst_271 = arith.constant 0.000000e+00 : f32
    %595 = vector.broadcast %cst_271 : f32 to vector<16x256xf32>
    %596 = arith.maximumf %594, %595 : vector<16x256xf32>
    %c7_272 = arith.constant 7 : index
    %c0_273 = arith.constant 0 : index
    %c0_274 = arith.constant 0 : index
    %597 = vector.load %arg6[%c7_272, %c0_273, %c0_274] : memref<12x256x64xbf16, #tpu.memory_space<vmem>>, vector<1x256x64xbf16>
    %598 = vector.shape_cast %597 : vector<1x256x64xbf16> to vector<256x64xbf16>
    %599 = arith.truncf %596 : vector<16x256xf32> to vector<16x256xbf16>
    %cst_275 = arith.constant dense<0.000000e+00> : vector<16x64xf32>
    %600 = tpu.matmul %599, %598, %cst_275 {dimension_numbers = #tpu.dot_dimension_numbers<[1], [0], [0], [1], [0, 0, 1, 1], [], []>} : vector<16x256xbf16>, vector<256x64xbf16>, vector<16x64xf32> -> vector<16x64xf32>
    %c7_276 = arith.constant 7 : index
    %c0_277 = arith.constant 0 : index
    %601 = vector.load %arg9[%c7_276, %c0_277] : memref<12x64xf32, #tpu.memory_space<vmem>>, vector<1x64xf32>
    %602 = vector.broadcast %601 : vector<1x64xf32> to vector<16x64xf32>
    %603 = arith.addf %600, %602 : vector<16x64xf32>
    %604 = arith.addf %587, %603 : vector<16x64xf32>
    %c30 = arith.constant 30 : index
    %c0_278 = arith.constant 0 : index
    %605 = vector.load %arg10[%c30, %c0_278] : memref<48x64xf32, #tpu.memory_space<vmem>>, vector<1x64xf32>
    %c31 = arith.constant 31 : index
    %c0_279 = arith.constant 0 : index
    %606 = vector.load %arg10[%c31, %c0_279] : memref<48x64xf32, #tpu.memory_space<vmem>>, vector<1x64xf32>
    %cst_280 = arith.constant dense<0.000000e+00> : vector<16xf32>
    %607 = vector.multi_reduction <add>, %604, %cst_280 [1] : vector<16x64xf32> to vector<16xf32>
    %608 = vector.shape_cast %607 : vector<16xf32> to vector<16x1xf32>
    %cst_281 = arith.constant 6.400000e+01 : f32
    %609 = vector.broadcast %cst_281 : f32 to vector<16x1xf32>
    %610 = arith.divf %608, %609 : vector<16x1xf32>
    %611 = arith.mulf %604, %604 : vector<16x64xf32>
    %cst_282 = arith.constant dense<0.000000e+00> : vector<16xf32>
    %612 = vector.multi_reduction <add>, %611, %cst_282 [1] : vector<16x64xf32> to vector<16xf32>
    %613 = vector.shape_cast %612 : vector<16xf32> to vector<16x1xf32>
    %cst_283 = arith.constant 6.400000e+01 : f32
    %614 = vector.broadcast %cst_283 : f32 to vector<16x1xf32>
    %615 = arith.divf %613, %614 : vector<16x1xf32>
    %616 = arith.mulf %610, %610 : vector<16x1xf32>
    %617 = arith.subf %615, %616 : vector<16x1xf32>
    %cst_284 = arith.constant 0.000000e+00 : f32
    %618 = vector.broadcast %cst_284 : f32 to vector<16x1xf32>
    %619 = arith.maximumf %617, %618 : vector<16x1xf32>
    %620 = vector.broadcast %610 : vector<16x1xf32> to vector<16x64xf32>
    %621 = arith.subf %604, %620 : vector<16x64xf32>
    %cst_285 = arith.constant 9.99999974E-6 : f32
    %622 = vector.broadcast %cst_285 : f32 to vector<16x1xf32>
    %623 = arith.addf %619, %622 : vector<16x1xf32>
    %624 = math.rsqrt %623 : vector<16x1xf32>
    %625 = vector.broadcast %624 : vector<16x1xf32> to vector<16x64xf32>
    %626 = arith.mulf %621, %625 : vector<16x64xf32>
    %627 = vector.broadcast %605 : vector<1x64xf32> to vector<16x64xf32>
    %628 = arith.mulf %626, %627 : vector<16x64xf32>
    %629 = vector.broadcast %606 : vector<1x64xf32> to vector<16x64xf32>
    %630 = arith.addf %628, %629 : vector<16x64xf32>
    %c8_286 = arith.constant 8 : index
    %c0_287 = arith.constant 0 : index
    %c0_288 = arith.constant 0 : index
    %631 = vector.load %arg4[%c8_286, %c0_287, %c0_288] : memref<12x64x64xbf16, #tpu.memory_space<vmem>>, vector<1x64x64xbf16>
    %632 = vector.shape_cast %631 : vector<1x64x64xbf16> to vector<64x64xbf16>
    %633 = arith.truncf %630 : vector<16x64xf32> to vector<16x64xbf16>
    %cst_289 = arith.constant dense<0.000000e+00> : vector<16x64xf32>
    %634 = tpu.matmul %633, %632, %cst_289 {dimension_numbers = #tpu.dot_dimension_numbers<[1], [0], [0], [1], [0, 0, 1, 1], [], []>} : vector<16x64xbf16>, vector<64x64xbf16>, vector<16x64xf32> -> vector<16x64xf32>
    %c8_290 = arith.constant 8 : index
    %c0_291 = arith.constant 0 : index
    %635 = vector.load %arg7[%c8_290, %c0_291] : memref<12x64xf32, #tpu.memory_space<vmem>>, vector<1x64xf32>
    %636 = vector.broadcast %635 : vector<1x64xf32> to vector<16x64xf32>
    %637 = arith.addf %634, %636 : vector<16x64xf32>
    %638 = arith.addf %630, %637 : vector<16x64xf32>
    %c32 = arith.constant 32 : index
    %c0_292 = arith.constant 0 : index
    %639 = vector.load %arg10[%c32, %c0_292] : memref<48x64xf32, #tpu.memory_space<vmem>>, vector<1x64xf32>
    %c33 = arith.constant 33 : index
    %c0_293 = arith.constant 0 : index
    %640 = vector.load %arg10[%c33, %c0_293] : memref<48x64xf32, #tpu.memory_space<vmem>>, vector<1x64xf32>
    %cst_294 = arith.constant dense<0.000000e+00> : vector<16xf32>
    %641 = vector.multi_reduction <add>, %638, %cst_294 [1] : vector<16x64xf32> to vector<16xf32>
    %642 = vector.shape_cast %641 : vector<16xf32> to vector<16x1xf32>
    %cst_295 = arith.constant 6.400000e+01 : f32
    %643 = vector.broadcast %cst_295 : f32 to vector<16x1xf32>
    %644 = arith.divf %642, %643 : vector<16x1xf32>
    %645 = arith.mulf %638, %638 : vector<16x64xf32>
    %cst_296 = arith.constant dense<0.000000e+00> : vector<16xf32>
    %646 = vector.multi_reduction <add>, %645, %cst_296 [1] : vector<16x64xf32> to vector<16xf32>
    %647 = vector.shape_cast %646 : vector<16xf32> to vector<16x1xf32>
    %cst_297 = arith.constant 6.400000e+01 : f32
    %648 = vector.broadcast %cst_297 : f32 to vector<16x1xf32>
    %649 = arith.divf %647, %648 : vector<16x1xf32>
    %650 = arith.mulf %644, %644 : vector<16x1xf32>
    %651 = arith.subf %649, %650 : vector<16x1xf32>
    %cst_298 = arith.constant 0.000000e+00 : f32
    %652 = vector.broadcast %cst_298 : f32 to vector<16x1xf32>
    %653 = arith.maximumf %651, %652 : vector<16x1xf32>
    %654 = vector.broadcast %644 : vector<16x1xf32> to vector<16x64xf32>
    %655 = arith.subf %638, %654 : vector<16x64xf32>
    %cst_299 = arith.constant 9.99999974E-6 : f32
    %656 = vector.broadcast %cst_299 : f32 to vector<16x1xf32>
    %657 = arith.addf %653, %656 : vector<16x1xf32>
    %658 = math.rsqrt %657 : vector<16x1xf32>
    %659 = vector.broadcast %658 : vector<16x1xf32> to vector<16x64xf32>
    %660 = arith.mulf %655, %659 : vector<16x64xf32>
    %661 = vector.broadcast %639 : vector<1x64xf32> to vector<16x64xf32>
    %662 = arith.mulf %660, %661 : vector<16x64xf32>
    %663 = vector.broadcast %640 : vector<1x64xf32> to vector<16x64xf32>
    %664 = arith.addf %662, %663 : vector<16x64xf32>
    %c8_300 = arith.constant 8 : index
    %c0_301 = arith.constant 0 : index
    %c0_302 = arith.constant 0 : index
    %665 = vector.load %arg5[%c8_300, %c0_301, %c0_302] : memref<12x64x256xbf16, #tpu.memory_space<vmem>>, vector<1x64x256xbf16>
    %666 = vector.shape_cast %665 : vector<1x64x256xbf16> to vector<64x256xbf16>
    %667 = arith.truncf %664 : vector<16x64xf32> to vector<16x64xbf16>
    %cst_303 = arith.constant dense<0.000000e+00> : vector<16x256xf32>
    %668 = tpu.matmul %667, %666, %cst_303 {dimension_numbers = #tpu.dot_dimension_numbers<[1], [0], [0], [1], [0, 0, 1, 1], [], []>} : vector<16x64xbf16>, vector<64x256xbf16>, vector<16x256xf32> -> vector<16x256xf32>
    %c8_304 = arith.constant 8 : index
    %c0_305 = arith.constant 0 : index
    %669 = vector.load %arg8[%c8_304, %c0_305] : memref<12x256xf32, #tpu.memory_space<vmem>>, vector<1x256xf32>
    %670 = vector.broadcast %669 : vector<1x256xf32> to vector<16x256xf32>
    %671 = arith.addf %668, %670 : vector<16x256xf32>
    %cst_306 = arith.constant 0.000000e+00 : f32
    %672 = vector.broadcast %cst_306 : f32 to vector<16x256xf32>
    %673 = arith.maximumf %671, %672 : vector<16x256xf32>
    %c8_307 = arith.constant 8 : index
    %c0_308 = arith.constant 0 : index
    %c0_309 = arith.constant 0 : index
    %674 = vector.load %arg6[%c8_307, %c0_308, %c0_309] : memref<12x256x64xbf16, #tpu.memory_space<vmem>>, vector<1x256x64xbf16>
    %675 = vector.shape_cast %674 : vector<1x256x64xbf16> to vector<256x64xbf16>
    %676 = arith.truncf %673 : vector<16x256xf32> to vector<16x256xbf16>
    %cst_310 = arith.constant dense<0.000000e+00> : vector<16x64xf32>
    %677 = tpu.matmul %676, %675, %cst_310 {dimension_numbers = #tpu.dot_dimension_numbers<[1], [0], [0], [1], [0, 0, 1, 1], [], []>} : vector<16x256xbf16>, vector<256x64xbf16>, vector<16x64xf32> -> vector<16x64xf32>
    %c8_311 = arith.constant 8 : index
    %c0_312 = arith.constant 0 : index
    %678 = vector.load %arg9[%c8_311, %c0_312] : memref<12x64xf32, #tpu.memory_space<vmem>>, vector<1x64xf32>
    %679 = vector.broadcast %678 : vector<1x64xf32> to vector<16x64xf32>
    %680 = arith.addf %677, %679 : vector<16x64xf32>
    %681 = arith.addf %664, %680 : vector<16x64xf32>
    %c34 = arith.constant 34 : index
    %c0_313 = arith.constant 0 : index
    %682 = vector.load %arg10[%c34, %c0_313] : memref<48x64xf32, #tpu.memory_space<vmem>>, vector<1x64xf32>
    %c35 = arith.constant 35 : index
    %c0_314 = arith.constant 0 : index
    %683 = vector.load %arg10[%c35, %c0_314] : memref<48x64xf32, #tpu.memory_space<vmem>>, vector<1x64xf32>
    %cst_315 = arith.constant dense<0.000000e+00> : vector<16xf32>
    %684 = vector.multi_reduction <add>, %681, %cst_315 [1] : vector<16x64xf32> to vector<16xf32>
    %685 = vector.shape_cast %684 : vector<16xf32> to vector<16x1xf32>
    %cst_316 = arith.constant 6.400000e+01 : f32
    %686 = vector.broadcast %cst_316 : f32 to vector<16x1xf32>
    %687 = arith.divf %685, %686 : vector<16x1xf32>
    %688 = arith.mulf %681, %681 : vector<16x64xf32>
    %cst_317 = arith.constant dense<0.000000e+00> : vector<16xf32>
    %689 = vector.multi_reduction <add>, %688, %cst_317 [1] : vector<16x64xf32> to vector<16xf32>
    %690 = vector.shape_cast %689 : vector<16xf32> to vector<16x1xf32>
    %cst_318 = arith.constant 6.400000e+01 : f32
    %691 = vector.broadcast %cst_318 : f32 to vector<16x1xf32>
    %692 = arith.divf %690, %691 : vector<16x1xf32>
    %693 = arith.mulf %687, %687 : vector<16x1xf32>
    %694 = arith.subf %692, %693 : vector<16x1xf32>
    %cst_319 = arith.constant 0.000000e+00 : f32
    %695 = vector.broadcast %cst_319 : f32 to vector<16x1xf32>
    %696 = arith.maximumf %694, %695 : vector<16x1xf32>
    %697 = vector.broadcast %687 : vector<16x1xf32> to vector<16x64xf32>
    %698 = arith.subf %681, %697 : vector<16x64xf32>
    %cst_320 = arith.constant 9.99999974E-6 : f32
    %699 = vector.broadcast %cst_320 : f32 to vector<16x1xf32>
    %700 = arith.addf %696, %699 : vector<16x1xf32>
    %701 = math.rsqrt %700 : vector<16x1xf32>
    %702 = vector.broadcast %701 : vector<16x1xf32> to vector<16x64xf32>
    %703 = arith.mulf %698, %702 : vector<16x64xf32>
    %704 = vector.broadcast %682 : vector<1x64xf32> to vector<16x64xf32>
    %705 = arith.mulf %703, %704 : vector<16x64xf32>
    %706 = vector.broadcast %683 : vector<1x64xf32> to vector<16x64xf32>
    %707 = arith.addf %705, %706 : vector<16x64xf32>
    %c9_321 = arith.constant 9 : index
    %c0_322 = arith.constant 0 : index
    %c0_323 = arith.constant 0 : index
    %708 = vector.load %arg4[%c9_321, %c0_322, %c0_323] : memref<12x64x64xbf16, #tpu.memory_space<vmem>>, vector<1x64x64xbf16>
    %709 = vector.shape_cast %708 : vector<1x64x64xbf16> to vector<64x64xbf16>
    %710 = arith.truncf %707 : vector<16x64xf32> to vector<16x64xbf16>
    %cst_324 = arith.constant dense<0.000000e+00> : vector<16x64xf32>
    %711 = tpu.matmul %710, %709, %cst_324 {dimension_numbers = #tpu.dot_dimension_numbers<[1], [0], [0], [1], [0, 0, 1, 1], [], []>} : vector<16x64xbf16>, vector<64x64xbf16>, vector<16x64xf32> -> vector<16x64xf32>
    %c9_325 = arith.constant 9 : index
    %c0_326 = arith.constant 0 : index
    %712 = vector.load %arg7[%c9_325, %c0_326] : memref<12x64xf32, #tpu.memory_space<vmem>>, vector<1x64xf32>
    %713 = vector.broadcast %712 : vector<1x64xf32> to vector<16x64xf32>
    %714 = arith.addf %711, %713 : vector<16x64xf32>
    %715 = arith.addf %707, %714 : vector<16x64xf32>
    %c36 = arith.constant 36 : index
    %c0_327 = arith.constant 0 : index
    %716 = vector.load %arg10[%c36, %c0_327] : memref<48x64xf32, #tpu.memory_space<vmem>>, vector<1x64xf32>
    %c37 = arith.constant 37 : index
    %c0_328 = arith.constant 0 : index
    %717 = vector.load %arg10[%c37, %c0_328] : memref<48x64xf32, #tpu.memory_space<vmem>>, vector<1x64xf32>
    %cst_329 = arith.constant dense<0.000000e+00> : vector<16xf32>
    %718 = vector.multi_reduction <add>, %715, %cst_329 [1] : vector<16x64xf32> to vector<16xf32>
    %719 = vector.shape_cast %718 : vector<16xf32> to vector<16x1xf32>
    %cst_330 = arith.constant 6.400000e+01 : f32
    %720 = vector.broadcast %cst_330 : f32 to vector<16x1xf32>
    %721 = arith.divf %719, %720 : vector<16x1xf32>
    %722 = arith.mulf %715, %715 : vector<16x64xf32>
    %cst_331 = arith.constant dense<0.000000e+00> : vector<16xf32>
    %723 = vector.multi_reduction <add>, %722, %cst_331 [1] : vector<16x64xf32> to vector<16xf32>
    %724 = vector.shape_cast %723 : vector<16xf32> to vector<16x1xf32>
    %cst_332 = arith.constant 6.400000e+01 : f32
    %725 = vector.broadcast %cst_332 : f32 to vector<16x1xf32>
    %726 = arith.divf %724, %725 : vector<16x1xf32>
    %727 = arith.mulf %721, %721 : vector<16x1xf32>
    %728 = arith.subf %726, %727 : vector<16x1xf32>
    %cst_333 = arith.constant 0.000000e+00 : f32
    %729 = vector.broadcast %cst_333 : f32 to vector<16x1xf32>
    %730 = arith.maximumf %728, %729 : vector<16x1xf32>
    %731 = vector.broadcast %721 : vector<16x1xf32> to vector<16x64xf32>
    %732 = arith.subf %715, %731 : vector<16x64xf32>
    %cst_334 = arith.constant 9.99999974E-6 : f32
    %733 = vector.broadcast %cst_334 : f32 to vector<16x1xf32>
    %734 = arith.addf %730, %733 : vector<16x1xf32>
    %735 = math.rsqrt %734 : vector<16x1xf32>
    %736 = vector.broadcast %735 : vector<16x1xf32> to vector<16x64xf32>
    %737 = arith.mulf %732, %736 : vector<16x64xf32>
    %738 = vector.broadcast %716 : vector<1x64xf32> to vector<16x64xf32>
    %739 = arith.mulf %737, %738 : vector<16x64xf32>
    %740 = vector.broadcast %717 : vector<1x64xf32> to vector<16x64xf32>
    %741 = arith.addf %739, %740 : vector<16x64xf32>
    %c9_335 = arith.constant 9 : index
    %c0_336 = arith.constant 0 : index
    %c0_337 = arith.constant 0 : index
    %742 = vector.load %arg5[%c9_335, %c0_336, %c0_337] : memref<12x64x256xbf16, #tpu.memory_space<vmem>>, vector<1x64x256xbf16>
    %743 = vector.shape_cast %742 : vector<1x64x256xbf16> to vector<64x256xbf16>
    %744 = arith.truncf %741 : vector<16x64xf32> to vector<16x64xbf16>
    %cst_338 = arith.constant dense<0.000000e+00> : vector<16x256xf32>
    %745 = tpu.matmul %744, %743, %cst_338 {dimension_numbers = #tpu.dot_dimension_numbers<[1], [0], [0], [1], [0, 0, 1, 1], [], []>} : vector<16x64xbf16>, vector<64x256xbf16>, vector<16x256xf32> -> vector<16x256xf32>
    %c9_339 = arith.constant 9 : index
    %c0_340 = arith.constant 0 : index
    %746 = vector.load %arg8[%c9_339, %c0_340] : memref<12x256xf32, #tpu.memory_space<vmem>>, vector<1x256xf32>
    %747 = vector.broadcast %746 : vector<1x256xf32> to vector<16x256xf32>
    %748 = arith.addf %745, %747 : vector<16x256xf32>
    %cst_341 = arith.constant 0.000000e+00 : f32
    %749 = vector.broadcast %cst_341 : f32 to vector<16x256xf32>
    %750 = arith.maximumf %748, %749 : vector<16x256xf32>
    %c9_342 = arith.constant 9 : index
    %c0_343 = arith.constant 0 : index
    %c0_344 = arith.constant 0 : index
    %751 = vector.load %arg6[%c9_342, %c0_343, %c0_344] : memref<12x256x64xbf16, #tpu.memory_space<vmem>>, vector<1x256x64xbf16>
    %752 = vector.shape_cast %751 : vector<1x256x64xbf16> to vector<256x64xbf16>
    %753 = arith.truncf %750 : vector<16x256xf32> to vector<16x256xbf16>
    %cst_345 = arith.constant dense<0.000000e+00> : vector<16x64xf32>
    %754 = tpu.matmul %753, %752, %cst_345 {dimension_numbers = #tpu.dot_dimension_numbers<[1], [0], [0], [1], [0, 0, 1, 1], [], []>} : vector<16x256xbf16>, vector<256x64xbf16>, vector<16x64xf32> -> vector<16x64xf32>
    %c9_346 = arith.constant 9 : index
    %c0_347 = arith.constant 0 : index
    %755 = vector.load %arg9[%c9_346, %c0_347] : memref<12x64xf32, #tpu.memory_space<vmem>>, vector<1x64xf32>
    %756 = vector.broadcast %755 : vector<1x64xf32> to vector<16x64xf32>
    %757 = arith.addf %754, %756 : vector<16x64xf32>
    %758 = arith.addf %741, %757 : vector<16x64xf32>
    %c38 = arith.constant 38 : index
    %c0_348 = arith.constant 0 : index
    %759 = vector.load %arg10[%c38, %c0_348] : memref<48x64xf32, #tpu.memory_space<vmem>>, vector<1x64xf32>
    %c39 = arith.constant 39 : index
    %c0_349 = arith.constant 0 : index
    %760 = vector.load %arg10[%c39, %c0_349] : memref<48x64xf32, #tpu.memory_space<vmem>>, vector<1x64xf32>
    %cst_350 = arith.constant dense<0.000000e+00> : vector<16xf32>
    %761 = vector.multi_reduction <add>, %758, %cst_350 [1] : vector<16x64xf32> to vector<16xf32>
    %762 = vector.shape_cast %761 : vector<16xf32> to vector<16x1xf32>
    %cst_351 = arith.constant 6.400000e+01 : f32
    %763 = vector.broadcast %cst_351 : f32 to vector<16x1xf32>
    %764 = arith.divf %762, %763 : vector<16x1xf32>
    %765 = arith.mulf %758, %758 : vector<16x64xf32>
    %cst_352 = arith.constant dense<0.000000e+00> : vector<16xf32>
    %766 = vector.multi_reduction <add>, %765, %cst_352 [1] : vector<16x64xf32> to vector<16xf32>
    %767 = vector.shape_cast %766 : vector<16xf32> to vector<16x1xf32>
    %cst_353 = arith.constant 6.400000e+01 : f32
    %768 = vector.broadcast %cst_353 : f32 to vector<16x1xf32>
    %769 = arith.divf %767, %768 : vector<16x1xf32>
    %770 = arith.mulf %764, %764 : vector<16x1xf32>
    %771 = arith.subf %769, %770 : vector<16x1xf32>
    %cst_354 = arith.constant 0.000000e+00 : f32
    %772 = vector.broadcast %cst_354 : f32 to vector<16x1xf32>
    %773 = arith.maximumf %771, %772 : vector<16x1xf32>
    %774 = vector.broadcast %764 : vector<16x1xf32> to vector<16x64xf32>
    %775 = arith.subf %758, %774 : vector<16x64xf32>
    %cst_355 = arith.constant 9.99999974E-6 : f32
    %776 = vector.broadcast %cst_355 : f32 to vector<16x1xf32>
    %777 = arith.addf %773, %776 : vector<16x1xf32>
    %778 = math.rsqrt %777 : vector<16x1xf32>
    %779 = vector.broadcast %778 : vector<16x1xf32> to vector<16x64xf32>
    %780 = arith.mulf %775, %779 : vector<16x64xf32>
    %781 = vector.broadcast %759 : vector<1x64xf32> to vector<16x64xf32>
    %782 = arith.mulf %780, %781 : vector<16x64xf32>
    %783 = vector.broadcast %760 : vector<1x64xf32> to vector<16x64xf32>
    %784 = arith.addf %782, %783 : vector<16x64xf32>
    %c10_356 = arith.constant 10 : index
    %c0_357 = arith.constant 0 : index
    %c0_358 = arith.constant 0 : index
    %785 = vector.load %arg4[%c10_356, %c0_357, %c0_358] : memref<12x64x64xbf16, #tpu.memory_space<vmem>>, vector<1x64x64xbf16>
    %786 = vector.shape_cast %785 : vector<1x64x64xbf16> to vector<64x64xbf16>
    %787 = arith.truncf %784 : vector<16x64xf32> to vector<16x64xbf16>
    %cst_359 = arith.constant dense<0.000000e+00> : vector<16x64xf32>
    %788 = tpu.matmul %787, %786, %cst_359 {dimension_numbers = #tpu.dot_dimension_numbers<[1], [0], [0], [1], [0, 0, 1, 1], [], []>} : vector<16x64xbf16>, vector<64x64xbf16>, vector<16x64xf32> -> vector<16x64xf32>
    %c10_360 = arith.constant 10 : index
    %c0_361 = arith.constant 0 : index
    %789 = vector.load %arg7[%c10_360, %c0_361] : memref<12x64xf32, #tpu.memory_space<vmem>>, vector<1x64xf32>
    %790 = vector.broadcast %789 : vector<1x64xf32> to vector<16x64xf32>
    %791 = arith.addf %788, %790 : vector<16x64xf32>
    %792 = arith.addf %784, %791 : vector<16x64xf32>
    %c40 = arith.constant 40 : index
    %c0_362 = arith.constant 0 : index
    %793 = vector.load %arg10[%c40, %c0_362] : memref<48x64xf32, #tpu.memory_space<vmem>>, vector<1x64xf32>
    %c41 = arith.constant 41 : index
    %c0_363 = arith.constant 0 : index
    %794 = vector.load %arg10[%c41, %c0_363] : memref<48x64xf32, #tpu.memory_space<vmem>>, vector<1x64xf32>
    %cst_364 = arith.constant dense<0.000000e+00> : vector<16xf32>
    %795 = vector.multi_reduction <add>, %792, %cst_364 [1] : vector<16x64xf32> to vector<16xf32>
    %796 = vector.shape_cast %795 : vector<16xf32> to vector<16x1xf32>
    %cst_365 = arith.constant 6.400000e+01 : f32
    %797 = vector.broadcast %cst_365 : f32 to vector<16x1xf32>
    %798 = arith.divf %796, %797 : vector<16x1xf32>
    %799 = arith.mulf %792, %792 : vector<16x64xf32>
    %cst_366 = arith.constant dense<0.000000e+00> : vector<16xf32>
    %800 = vector.multi_reduction <add>, %799, %cst_366 [1] : vector<16x64xf32> to vector<16xf32>
    %801 = vector.shape_cast %800 : vector<16xf32> to vector<16x1xf32>
    %cst_367 = arith.constant 6.400000e+01 : f32
    %802 = vector.broadcast %cst_367 : f32 to vector<16x1xf32>
    %803 = arith.divf %801, %802 : vector<16x1xf32>
    %804 = arith.mulf %798, %798 : vector<16x1xf32>
    %805 = arith.subf %803, %804 : vector<16x1xf32>
    %cst_368 = arith.constant 0.000000e+00 : f32
    %806 = vector.broadcast %cst_368 : f32 to vector<16x1xf32>
    %807 = arith.maximumf %805, %806 : vector<16x1xf32>
    %808 = vector.broadcast %798 : vector<16x1xf32> to vector<16x64xf32>
    %809 = arith.subf %792, %808 : vector<16x64xf32>
    %cst_369 = arith.constant 9.99999974E-6 : f32
    %810 = vector.broadcast %cst_369 : f32 to vector<16x1xf32>
    %811 = arith.addf %807, %810 : vector<16x1xf32>
    %812 = math.rsqrt %811 : vector<16x1xf32>
    %813 = vector.broadcast %812 : vector<16x1xf32> to vector<16x64xf32>
    %814 = arith.mulf %809, %813 : vector<16x64xf32>
    %815 = vector.broadcast %793 : vector<1x64xf32> to vector<16x64xf32>
    %816 = arith.mulf %814, %815 : vector<16x64xf32>
    %817 = vector.broadcast %794 : vector<1x64xf32> to vector<16x64xf32>
    %818 = arith.addf %816, %817 : vector<16x64xf32>
    %c10_370 = arith.constant 10 : index
    %c0_371 = arith.constant 0 : index
    %c0_372 = arith.constant 0 : index
    %819 = vector.load %arg5[%c10_370, %c0_371, %c0_372] : memref<12x64x256xbf16, #tpu.memory_space<vmem>>, vector<1x64x256xbf16>
    %820 = vector.shape_cast %819 : vector<1x64x256xbf16> to vector<64x256xbf16>
    %821 = arith.truncf %818 : vector<16x64xf32> to vector<16x64xbf16>
    %cst_373 = arith.constant dense<0.000000e+00> : vector<16x256xf32>
    %822 = tpu.matmul %821, %820, %cst_373 {dimension_numbers = #tpu.dot_dimension_numbers<[1], [0], [0], [1], [0, 0, 1, 1], [], []>} : vector<16x64xbf16>, vector<64x256xbf16>, vector<16x256xf32> -> vector<16x256xf32>
    %c10_374 = arith.constant 10 : index
    %c0_375 = arith.constant 0 : index
    %823 = vector.load %arg8[%c10_374, %c0_375] : memref<12x256xf32, #tpu.memory_space<vmem>>, vector<1x256xf32>
    %824 = vector.broadcast %823 : vector<1x256xf32> to vector<16x256xf32>
    %825 = arith.addf %822, %824 : vector<16x256xf32>
    %cst_376 = arith.constant 0.000000e+00 : f32
    %826 = vector.broadcast %cst_376 : f32 to vector<16x256xf32>
    %827 = arith.maximumf %825, %826 : vector<16x256xf32>
    %c10_377 = arith.constant 10 : index
    %c0_378 = arith.constant 0 : index
    %c0_379 = arith.constant 0 : index
    %828 = vector.load %arg6[%c10_377, %c0_378, %c0_379] : memref<12x256x64xbf16, #tpu.memory_space<vmem>>, vector<1x256x64xbf16>
    %829 = vector.shape_cast %828 : vector<1x256x64xbf16> to vector<256x64xbf16>
    %830 = arith.truncf %827 : vector<16x256xf32> to vector<16x256xbf16>
    %cst_380 = arith.constant dense<0.000000e+00> : vector<16x64xf32>
    %831 = tpu.matmul %830, %829, %cst_380 {dimension_numbers = #tpu.dot_dimension_numbers<[1], [0], [0], [1], [0, 0, 1, 1], [], []>} : vector<16x256xbf16>, vector<256x64xbf16>, vector<16x64xf32> -> vector<16x64xf32>
    %c10_381 = arith.constant 10 : index
    %c0_382 = arith.constant 0 : index
    %832 = vector.load %arg9[%c10_381, %c0_382] : memref<12x64xf32, #tpu.memory_space<vmem>>, vector<1x64xf32>
    %833 = vector.broadcast %832 : vector<1x64xf32> to vector<16x64xf32>
    %834 = arith.addf %831, %833 : vector<16x64xf32>
    %835 = arith.addf %818, %834 : vector<16x64xf32>
    %c42 = arith.constant 42 : index
    %c0_383 = arith.constant 0 : index
    %836 = vector.load %arg10[%c42, %c0_383] : memref<48x64xf32, #tpu.memory_space<vmem>>, vector<1x64xf32>
    %c43 = arith.constant 43 : index
    %c0_384 = arith.constant 0 : index
    %837 = vector.load %arg10[%c43, %c0_384] : memref<48x64xf32, #tpu.memory_space<vmem>>, vector<1x64xf32>
    %cst_385 = arith.constant dense<0.000000e+00> : vector<16xf32>
    %838 = vector.multi_reduction <add>, %835, %cst_385 [1] : vector<16x64xf32> to vector<16xf32>
    %839 = vector.shape_cast %838 : vector<16xf32> to vector<16x1xf32>
    %cst_386 = arith.constant 6.400000e+01 : f32
    %840 = vector.broadcast %cst_386 : f32 to vector<16x1xf32>
    %841 = arith.divf %839, %840 : vector<16x1xf32>
    %842 = arith.mulf %835, %835 : vector<16x64xf32>
    %cst_387 = arith.constant dense<0.000000e+00> : vector<16xf32>
    %843 = vector.multi_reduction <add>, %842, %cst_387 [1] : vector<16x64xf32> to vector<16xf32>
    %844 = vector.shape_cast %843 : vector<16xf32> to vector<16x1xf32>
    %cst_388 = arith.constant 6.400000e+01 : f32
    %845 = vector.broadcast %cst_388 : f32 to vector<16x1xf32>
    %846 = arith.divf %844, %845 : vector<16x1xf32>
    %847 = arith.mulf %841, %841 : vector<16x1xf32>
    %848 = arith.subf %846, %847 : vector<16x1xf32>
    %cst_389 = arith.constant 0.000000e+00 : f32
    %849 = vector.broadcast %cst_389 : f32 to vector<16x1xf32>
    %850 = arith.maximumf %848, %849 : vector<16x1xf32>
    %851 = vector.broadcast %841 : vector<16x1xf32> to vector<16x64xf32>
    %852 = arith.subf %835, %851 : vector<16x64xf32>
    %cst_390 = arith.constant 9.99999974E-6 : f32
    %853 = vector.broadcast %cst_390 : f32 to vector<16x1xf32>
    %854 = arith.addf %850, %853 : vector<16x1xf32>
    %855 = math.rsqrt %854 : vector<16x1xf32>
    %856 = vector.broadcast %855 : vector<16x1xf32> to vector<16x64xf32>
    %857 = arith.mulf %852, %856 : vector<16x64xf32>
    %858 = vector.broadcast %836 : vector<1x64xf32> to vector<16x64xf32>
    %859 = arith.mulf %857, %858 : vector<16x64xf32>
    %860 = vector.broadcast %837 : vector<1x64xf32> to vector<16x64xf32>
    %861 = arith.addf %859, %860 : vector<16x64xf32>
    %c11_391 = arith.constant 11 : index
    %c0_392 = arith.constant 0 : index
    %c0_393 = arith.constant 0 : index
    %862 = vector.load %arg4[%c11_391, %c0_392, %c0_393] : memref<12x64x64xbf16, #tpu.memory_space<vmem>>, vector<1x64x64xbf16>
    %863 = vector.shape_cast %862 : vector<1x64x64xbf16> to vector<64x64xbf16>
    %864 = arith.truncf %861 : vector<16x64xf32> to vector<16x64xbf16>
    %cst_394 = arith.constant dense<0.000000e+00> : vector<16x64xf32>
    %865 = tpu.matmul %864, %863, %cst_394 {dimension_numbers = #tpu.dot_dimension_numbers<[1], [0], [0], [1], [0, 0, 1, 1], [], []>} : vector<16x64xbf16>, vector<64x64xbf16>, vector<16x64xf32> -> vector<16x64xf32>
    %c11_395 = arith.constant 11 : index
    %c0_396 = arith.constant 0 : index
    %866 = vector.load %arg7[%c11_395, %c0_396] : memref<12x64xf32, #tpu.memory_space<vmem>>, vector<1x64xf32>
    %867 = vector.broadcast %866 : vector<1x64xf32> to vector<16x64xf32>
    %868 = arith.addf %865, %867 : vector<16x64xf32>
    %869 = arith.addf %861, %868 : vector<16x64xf32>
    %c44 = arith.constant 44 : index
    %c0_397 = arith.constant 0 : index
    %870 = vector.load %arg10[%c44, %c0_397] : memref<48x64xf32, #tpu.memory_space<vmem>>, vector<1x64xf32>
    %c45 = arith.constant 45 : index
    %c0_398 = arith.constant 0 : index
    %871 = vector.load %arg10[%c45, %c0_398] : memref<48x64xf32, #tpu.memory_space<vmem>>, vector<1x64xf32>
    %cst_399 = arith.constant dense<0.000000e+00> : vector<16xf32>
    %872 = vector.multi_reduction <add>, %869, %cst_399 [1] : vector<16x64xf32> to vector<16xf32>
    %873 = vector.shape_cast %872 : vector<16xf32> to vector<16x1xf32>
    %cst_400 = arith.constant 6.400000e+01 : f32
    %874 = vector.broadcast %cst_400 : f32 to vector<16x1xf32>
    %875 = arith.divf %873, %874 : vector<16x1xf32>
    %876 = arith.mulf %869, %869 : vector<16x64xf32>
    %cst_401 = arith.constant dense<0.000000e+00> : vector<16xf32>
    %877 = vector.multi_reduction <add>, %876, %cst_401 [1] : vector<16x64xf32> to vector<16xf32>
    %878 = vector.shape_cast %877 : vector<16xf32> to vector<16x1xf32>
    %cst_402 = arith.constant 6.400000e+01 : f32
    %879 = vector.broadcast %cst_402 : f32 to vector<16x1xf32>
    %880 = arith.divf %878, %879 : vector<16x1xf32>
    %881 = arith.mulf %875, %875 : vector<16x1xf32>
    %882 = arith.subf %880, %881 : vector<16x1xf32>
    %cst_403 = arith.constant 0.000000e+00 : f32
    %883 = vector.broadcast %cst_403 : f32 to vector<16x1xf32>
    %884 = arith.maximumf %882, %883 : vector<16x1xf32>
    %885 = vector.broadcast %875 : vector<16x1xf32> to vector<16x64xf32>
    %886 = arith.subf %869, %885 : vector<16x64xf32>
    %cst_404 = arith.constant 9.99999974E-6 : f32
    %887 = vector.broadcast %cst_404 : f32 to vector<16x1xf32>
    %888 = arith.addf %884, %887 : vector<16x1xf32>
    %889 = math.rsqrt %888 : vector<16x1xf32>
    %890 = vector.broadcast %889 : vector<16x1xf32> to vector<16x64xf32>
    %891 = arith.mulf %886, %890 : vector<16x64xf32>
    %892 = vector.broadcast %870 : vector<1x64xf32> to vector<16x64xf32>
    %893 = arith.mulf %891, %892 : vector<16x64xf32>
    %894 = vector.broadcast %871 : vector<1x64xf32> to vector<16x64xf32>
    %895 = arith.addf %893, %894 : vector<16x64xf32>
    %c11_405 = arith.constant 11 : index
    %c0_406 = arith.constant 0 : index
    %c0_407 = arith.constant 0 : index
    %896 = vector.load %arg5[%c11_405, %c0_406, %c0_407] : memref<12x64x256xbf16, #tpu.memory_space<vmem>>, vector<1x64x256xbf16>
    %897 = vector.shape_cast %896 : vector<1x64x256xbf16> to vector<64x256xbf16>
    %898 = arith.truncf %895 : vector<16x64xf32> to vector<16x64xbf16>
    %cst_408 = arith.constant dense<0.000000e+00> : vector<16x256xf32>
    %899 = tpu.matmul %898, %897, %cst_408 {dimension_numbers = #tpu.dot_dimension_numbers<[1], [0], [0], [1], [0, 0, 1, 1], [], []>} : vector<16x64xbf16>, vector<64x256xbf16>, vector<16x256xf32> -> vector<16x256xf32>
    %c11_409 = arith.constant 11 : index
    %c0_410 = arith.constant 0 : index
    %900 = vector.load %arg8[%c11_409, %c0_410] : memref<12x256xf32, #tpu.memory_space<vmem>>, vector<1x256xf32>
    %901 = vector.broadcast %900 : vector<1x256xf32> to vector<16x256xf32>
    %902 = arith.addf %899, %901 : vector<16x256xf32>
    %cst_411 = arith.constant 0.000000e+00 : f32
    %903 = vector.broadcast %cst_411 : f32 to vector<16x256xf32>
    %904 = arith.maximumf %902, %903 : vector<16x256xf32>
    %c11_412 = arith.constant 11 : index
    %c0_413 = arith.constant 0 : index
    %c0_414 = arith.constant 0 : index
    %905 = vector.load %arg6[%c11_412, %c0_413, %c0_414] : memref<12x256x64xbf16, #tpu.memory_space<vmem>>, vector<1x256x64xbf16>
    %906 = vector.shape_cast %905 : vector<1x256x64xbf16> to vector<256x64xbf16>
    %907 = arith.truncf %904 : vector<16x256xf32> to vector<16x256xbf16>
    %cst_415 = arith.constant dense<0.000000e+00> : vector<16x64xf32>
    %908 = tpu.matmul %907, %906, %cst_415 {dimension_numbers = #tpu.dot_dimension_numbers<[1], [0], [0], [1], [0, 0, 1, 1], [], []>} : vector<16x256xbf16>, vector<256x64xbf16>, vector<16x64xf32> -> vector<16x64xf32>
    %c11_416 = arith.constant 11 : index
    %c0_417 = arith.constant 0 : index
    %909 = vector.load %arg9[%c11_416, %c0_417] : memref<12x64xf32, #tpu.memory_space<vmem>>, vector<1x64xf32>
    %910 = vector.broadcast %909 : vector<1x64xf32> to vector<16x64xf32>
    %911 = arith.addf %908, %910 : vector<16x64xf32>
    %912 = arith.addf %895, %911 : vector<16x64xf32>
    %c46 = arith.constant 46 : index
    %c0_418 = arith.constant 0 : index
    %913 = vector.load %arg10[%c46, %c0_418] : memref<48x64xf32, #tpu.memory_space<vmem>>, vector<1x64xf32>
    %c47 = arith.constant 47 : index
    %c0_419 = arith.constant 0 : index
    %914 = vector.load %arg10[%c47, %c0_419] : memref<48x64xf32, #tpu.memory_space<vmem>>, vector<1x64xf32>
    %cst_420 = arith.constant dense<0.000000e+00> : vector<16xf32>
    %915 = vector.multi_reduction <add>, %912, %cst_420 [1] : vector<16x64xf32> to vector<16xf32>
    %916 = vector.shape_cast %915 : vector<16xf32> to vector<16x1xf32>
    %cst_421 = arith.constant 6.400000e+01 : f32
    %917 = vector.broadcast %cst_421 : f32 to vector<16x1xf32>
    %918 = arith.divf %916, %917 : vector<16x1xf32>
    %919 = arith.mulf %912, %912 : vector<16x64xf32>
    %cst_422 = arith.constant dense<0.000000e+00> : vector<16xf32>
    %920 = vector.multi_reduction <add>, %919, %cst_422 [1] : vector<16x64xf32> to vector<16xf32>
    %921 = vector.shape_cast %920 : vector<16xf32> to vector<16x1xf32>
    %cst_423 = arith.constant 6.400000e+01 : f32
    %922 = vector.broadcast %cst_423 : f32 to vector<16x1xf32>
    %923 = arith.divf %921, %922 : vector<16x1xf32>
    %924 = arith.mulf %918, %918 : vector<16x1xf32>
    %925 = arith.subf %923, %924 : vector<16x1xf32>
    %cst_424 = arith.constant 0.000000e+00 : f32
    %926 = vector.broadcast %cst_424 : f32 to vector<16x1xf32>
    %927 = arith.maximumf %925, %926 : vector<16x1xf32>
    %928 = vector.broadcast %918 : vector<16x1xf32> to vector<16x64xf32>
    %929 = arith.subf %912, %928 : vector<16x64xf32>
    %cst_425 = arith.constant 9.99999974E-6 : f32
    %930 = vector.broadcast %cst_425 : f32 to vector<16x1xf32>
    %931 = arith.addf %927, %930 : vector<16x1xf32>
    %932 = math.rsqrt %931 : vector<16x1xf32>
    %933 = vector.broadcast %932 : vector<16x1xf32> to vector<16x64xf32>
    %934 = arith.mulf %929, %933 : vector<16x64xf32>
    %935 = vector.broadcast %913 : vector<1x64xf32> to vector<16x64xf32>
    %936 = arith.mulf %934, %935 : vector<16x64xf32>
    %937 = vector.broadcast %914 : vector<1x64xf32> to vector<16x64xf32>
    %938 = arith.addf %936, %937 : vector<16x64xf32>
    %c0_426 = arith.constant 0 : index
    %c0_427 = arith.constant 0 : index
    %939 = vector.load %arg20[%c0_426, %c0_427] : memref<4x64xf32, #tpu.memory_space<vmem>>, vector<1x64xf32>
    %c1_428 = arith.constant 1 : index
    %c0_429 = arith.constant 0 : index
    %940 = vector.load %arg20[%c1_428, %c0_429] : memref<4x64xf32, #tpu.memory_space<vmem>>, vector<1x64xf32>
    %cst_430 = arith.constant dense<0.000000e+00> : vector<16xf32>
    %941 = vector.multi_reduction <add>, %938, %cst_430 [1] : vector<16x64xf32> to vector<16xf32>
    %942 = vector.shape_cast %941 : vector<16xf32> to vector<16x1xf32>
    %cst_431 = arith.constant 6.400000e+01 : f32
    %943 = vector.broadcast %cst_431 : f32 to vector<16x1xf32>
    %944 = arith.divf %942, %943 : vector<16x1xf32>
    %945 = arith.mulf %938, %938 : vector<16x64xf32>
    %cst_432 = arith.constant dense<0.000000e+00> : vector<16xf32>
    %946 = vector.multi_reduction <add>, %945, %cst_432 [1] : vector<16x64xf32> to vector<16xf32>
    %947 = vector.shape_cast %946 : vector<16xf32> to vector<16x1xf32>
    %cst_433 = arith.constant 6.400000e+01 : f32
    %948 = vector.broadcast %cst_433 : f32 to vector<16x1xf32>
    %949 = arith.divf %947, %948 : vector<16x1xf32>
    %950 = arith.mulf %944, %944 : vector<16x1xf32>
    %951 = arith.subf %949, %950 : vector<16x1xf32>
    %cst_434 = arith.constant 0.000000e+00 : f32
    %952 = vector.broadcast %cst_434 : f32 to vector<16x1xf32>
    %953 = arith.maximumf %951, %952 : vector<16x1xf32>
    %954 = vector.broadcast %944 : vector<16x1xf32> to vector<16x64xf32>
    %955 = arith.subf %938, %954 : vector<16x64xf32>
    %cst_435 = arith.constant 9.99999974E-6 : f32
    %956 = vector.broadcast %cst_435 : f32 to vector<16x1xf32>
    %957 = arith.addf %953, %956 : vector<16x1xf32>
    %958 = math.rsqrt %957 : vector<16x1xf32>
    %959 = vector.broadcast %958 : vector<16x1xf32> to vector<16x64xf32>
    %960 = arith.mulf %955, %959 : vector<16x64xf32>
    %961 = vector.broadcast %939 : vector<1x64xf32> to vector<16x64xf32>
    %962 = arith.mulf %960, %961 : vector<16x64xf32>
    %963 = vector.broadcast %940 : vector<1x64xf32> to vector<16x64xf32>
    %964 = arith.addf %962, %963 : vector<16x64xf32>
    %c0_i32_436 = arith.constant 0 : i32
    %965 = tpu.memref_slice %arg28[%c0_i32_436] : memref<4x!tpu.dma_semaphore, #tpu.memory_space<semaphore_mem>> -> memref<1x!tpu.dma_semaphore, #tpu.memory_space<semaphore_mem>>
    %966 = tpu.memref_squeeze %965 : memref<1x!tpu.dma_semaphore, #tpu.memory_space<semaphore_mem>> -> memref<!tpu.dma_semaphore, #tpu.memory_space<semaphore_mem>>
    tpu.wait_dma2 semaphore(%966 : memref<!tpu.dma_semaphore, #tpu.memory_space<semaphore_mem>>) src(%arg11 : memref<6x64x64xbf16, #tpu.memory_space<any>>) dst(%arg24 : memref<6x64x64xbf16, #tpu.memory_space<vmem>>)
    %c1_i32_437 = arith.constant 1 : i32
    %967 = tpu.memref_slice %arg28[%c1_i32_437] : memref<4x!tpu.dma_semaphore, #tpu.memory_space<semaphore_mem>> -> memref<1x!tpu.dma_semaphore, #tpu.memory_space<semaphore_mem>>
    %968 = tpu.memref_squeeze %967 : memref<1x!tpu.dma_semaphore, #tpu.memory_space<semaphore_mem>> -> memref<!tpu.dma_semaphore, #tpu.memory_space<semaphore_mem>>
    tpu.wait_dma2 semaphore(%968 : memref<!tpu.dma_semaphore, #tpu.memory_space<semaphore_mem>>) src(%arg12 : memref<64x384xbf16, #tpu.memory_space<any>>) dst(%arg25 : memref<64x384xbf16, #tpu.memory_space<vmem>>)
    %c2_i32_438 = arith.constant 2 : i32
    %969 = tpu.memref_slice %arg28[%c2_i32_438] : memref<4x!tpu.dma_semaphore, #tpu.memory_space<semaphore_mem>> -> memref<1x!tpu.dma_semaphore, #tpu.memory_space<semaphore_mem>>
    %970 = tpu.memref_squeeze %969 : memref<1x!tpu.dma_semaphore, #tpu.memory_space<semaphore_mem>> -> memref<!tpu.dma_semaphore, #tpu.memory_space<semaphore_mem>>
    tpu.wait_dma2 semaphore(%970 : memref<!tpu.dma_semaphore, #tpu.memory_space<semaphore_mem>>) src(%arg13 : memref<6x64x256xbf16, #tpu.memory_space<any>>) dst(%arg26 : memref<6x64x256xbf16, #tpu.memory_space<vmem>>)
    %c3_i32_439 = arith.constant 3 : i32
    %971 = tpu.memref_slice %arg28[%c3_i32_439] : memref<4x!tpu.dma_semaphore, #tpu.memory_space<semaphore_mem>> -> memref<1x!tpu.dma_semaphore, #tpu.memory_space<semaphore_mem>>
    %972 = tpu.memref_squeeze %971 : memref<1x!tpu.dma_semaphore, #tpu.memory_space<semaphore_mem>> -> memref<!tpu.dma_semaphore, #tpu.memory_space<semaphore_mem>>
    tpu.wait_dma2 semaphore(%972 : memref<!tpu.dma_semaphore, #tpu.memory_space<semaphore_mem>>) src(%arg14 : memref<6x256x64xbf16, #tpu.memory_space<any>>) dst(%arg27 : memref<6x256x64xbf16, #tpu.memory_space<vmem>>)
    %973 = arith.truncf %964 : vector<16x64xf32> to vector<16x64xbf16>
    %c0_440 = arith.constant 0 : index
    %c0_441 = arith.constant 0 : index
    %974 = vector.load %arg25[%c0_440, %c0_441] : memref<64x384xbf16, #tpu.memory_space<vmem>>, vector<64x384xbf16>
    %cst_442 = arith.constant dense<0.000000e+00> : vector<16x384xf32>
    %975 = tpu.matmul %973, %974, %cst_442 {dimension_numbers = #tpu.dot_dimension_numbers<[1], [0], [0], [1], [0, 0, 1, 1], [], []>} : vector<16x64xbf16>, vector<64x384xbf16>, vector<16x384xf32> -> vector<16x384xf32>
    %c0_443 = arith.constant 0 : index
    %c0_444 = arith.constant 0 : index
    %976 = vector.load %arg16[%c0_443, %c0_444] : memref<1x384xf32, #tpu.memory_space<vmem>>, vector<1x384xf32>
    %977 = vector.broadcast %976 : vector<1x384xf32> to vector<16x384xf32>
    %978 = arith.addf %975, %977 : vector<16x384xf32>
    %c0_445 = arith.constant 0 : index
    %c0_446 = arith.constant 0 : index
    %c0_447 = arith.constant 0 : index
    %979 = vector.load %arg24[%c0_445, %c0_446, %c0_447] : memref<6x64x64xbf16, #tpu.memory_space<vmem>>, vector<1x64x64xbf16>
    %980 = vector.shape_cast %979 : vector<1x64x64xbf16> to vector<64x64xbf16>
    %981 = arith.truncf %14 : vector<16x64xf32> to vector<16x64xbf16>
    %cst_448 = arith.constant dense<0.000000e+00> : vector<16x64xf32>
    %982 = tpu.matmul %981, %980, %cst_448 {dimension_numbers = #tpu.dot_dimension_numbers<[1], [0], [0], [1], [0, 0, 1, 1], [], []>} : vector<16x64xbf16>, vector<64x64xbf16>, vector<16x64xf32> -> vector<16x64xf32>
    %c0_449 = arith.constant 0 : index
    %c0_450 = arith.constant 0 : index
    %983 = vector.load %arg15[%c0_449, %c0_450] : memref<6x64xf32, #tpu.memory_space<vmem>>, vector<1x64xf32>
    %984 = vector.broadcast %983 : vector<1x64xf32> to vector<16x64xf32>
    %985 = arith.addf %982, %984 : vector<16x64xf32>
    %986 = arith.addf %14, %985 : vector<16x64xf32>
    %c0_451 = arith.constant 0 : index
    %c0_452 = arith.constant 0 : index
    %987 = vector.load %arg19[%c0_451, %c0_452] : memref<36x64xf32, #tpu.memory_space<vmem>>, vector<1x64xf32>
    %c1_453 = arith.constant 1 : index
    %c0_454 = arith.constant 0 : index
    %988 = vector.load %arg19[%c1_453, %c0_454] : memref<36x64xf32, #tpu.memory_space<vmem>>, vector<1x64xf32>
    %cst_455 = arith.constant dense<0.000000e+00> : vector<16xf32>
    %989 = vector.multi_reduction <add>, %986, %cst_455 [1] : vector<16x64xf32> to vector<16xf32>
    %990 = vector.shape_cast %989 : vector<16xf32> to vector<16x1xf32>
    %cst_456 = arith.constant 6.400000e+01 : f32
    %991 = vector.broadcast %cst_456 : f32 to vector<16x1xf32>
    %992 = arith.divf %990, %991 : vector<16x1xf32>
    %993 = arith.mulf %986, %986 : vector<16x64xf32>
    %cst_457 = arith.constant dense<0.000000e+00> : vector<16xf32>
    %994 = vector.multi_reduction <add>, %993, %cst_457 [1] : vector<16x64xf32> to vector<16xf32>
    %995 = vector.shape_cast %994 : vector<16xf32> to vector<16x1xf32>
    %cst_458 = arith.constant 6.400000e+01 : f32
    %996 = vector.broadcast %cst_458 : f32 to vector<16x1xf32>
    %997 = arith.divf %995, %996 : vector<16x1xf32>
    %998 = arith.mulf %992, %992 : vector<16x1xf32>
    %999 = arith.subf %997, %998 : vector<16x1xf32>
    %cst_459 = arith.constant 0.000000e+00 : f32
    %1000 = vector.broadcast %cst_459 : f32 to vector<16x1xf32>
    %1001 = arith.maximumf %999, %1000 : vector<16x1xf32>
    %1002 = vector.broadcast %992 : vector<16x1xf32> to vector<16x64xf32>
    %1003 = arith.subf %986, %1002 : vector<16x64xf32>
    %cst_460 = arith.constant 9.99999974E-6 : f32
    %1004 = vector.broadcast %cst_460 : f32 to vector<16x1xf32>
    %1005 = arith.addf %1001, %1004 : vector<16x1xf32>
    %1006 = math.rsqrt %1005 : vector<16x1xf32>
    %1007 = vector.broadcast %1006 : vector<16x1xf32> to vector<16x64xf32>
    %1008 = arith.mulf %1003, %1007 : vector<16x64xf32>
    %1009 = vector.broadcast %987 : vector<1x64xf32> to vector<16x64xf32>
    %1010 = arith.mulf %1008, %1009 : vector<16x64xf32>
    %1011 = vector.broadcast %988 : vector<1x64xf32> to vector<16x64xf32>
    %1012 = arith.addf %1010, %1011 : vector<16x64xf32>
    %1013 = vector.extract_strided_slice %978 {offsets = [0, 0], sizes = [16, 64], strides = [1, 1]} : vector<16x384xf32> to vector<16x64xf32>
    %1014 = arith.addf %1012, %1013 : vector<16x64xf32>
    %c2_461 = arith.constant 2 : index
    %c0_462 = arith.constant 0 : index
    %1015 = vector.load %arg19[%c2_461, %c0_462] : memref<36x64xf32, #tpu.memory_space<vmem>>, vector<1x64xf32>
    %c3_463 = arith.constant 3 : index
    %c0_464 = arith.constant 0 : index
    %1016 = vector.load %arg19[%c3_463, %c0_464] : memref<36x64xf32, #tpu.memory_space<vmem>>, vector<1x64xf32>
    %cst_465 = arith.constant dense<0.000000e+00> : vector<16xf32>
    %1017 = vector.multi_reduction <add>, %1014, %cst_465 [1] : vector<16x64xf32> to vector<16xf32>
    %1018 = vector.shape_cast %1017 : vector<16xf32> to vector<16x1xf32>
    %cst_466 = arith.constant 6.400000e+01 : f32
    %1019 = vector.broadcast %cst_466 : f32 to vector<16x1xf32>
    %1020 = arith.divf %1018, %1019 : vector<16x1xf32>
    %1021 = arith.mulf %1014, %1014 : vector<16x64xf32>
    %cst_467 = arith.constant dense<0.000000e+00> : vector<16xf32>
    %1022 = vector.multi_reduction <add>, %1021, %cst_467 [1] : vector<16x64xf32> to vector<16xf32>
    %1023 = vector.shape_cast %1022 : vector<16xf32> to vector<16x1xf32>
    %cst_468 = arith.constant 6.400000e+01 : f32
    %1024 = vector.broadcast %cst_468 : f32 to vector<16x1xf32>
    %1025 = arith.divf %1023, %1024 : vector<16x1xf32>
    %1026 = arith.mulf %1020, %1020 : vector<16x1xf32>
    %1027 = arith.subf %1025, %1026 : vector<16x1xf32>
    %cst_469 = arith.constant 0.000000e+00 : f32
    %1028 = vector.broadcast %cst_469 : f32 to vector<16x1xf32>
    %1029 = arith.maximumf %1027, %1028 : vector<16x1xf32>
    %1030 = vector.broadcast %1020 : vector<16x1xf32> to vector<16x64xf32>
    %1031 = arith.subf %1014, %1030 : vector<16x64xf32>
    %cst_470 = arith.constant 9.99999974E-6 : f32
    %1032 = vector.broadcast %cst_470 : f32 to vector<16x1xf32>
    %1033 = arith.addf %1029, %1032 : vector<16x1xf32>
    %1034 = math.rsqrt %1033 : vector<16x1xf32>
    %1035 = vector.broadcast %1034 : vector<16x1xf32> to vector<16x64xf32>
    %1036 = arith.mulf %1031, %1035 : vector<16x64xf32>
    %1037 = vector.broadcast %1015 : vector<1x64xf32> to vector<16x64xf32>
    %1038 = arith.mulf %1036, %1037 : vector<16x64xf32>
    %1039 = vector.broadcast %1016 : vector<1x64xf32> to vector<16x64xf32>
    %1040 = arith.addf %1038, %1039 : vector<16x64xf32>
    %c0_471 = arith.constant 0 : index
    %c0_472 = arith.constant 0 : index
    %c0_473 = arith.constant 0 : index
    %1041 = vector.load %arg26[%c0_471, %c0_472, %c0_473] : memref<6x64x256xbf16, #tpu.memory_space<vmem>>, vector<1x64x256xbf16>
    %1042 = vector.shape_cast %1041 : vector<1x64x256xbf16> to vector<64x256xbf16>
    %1043 = arith.truncf %1040 : vector<16x64xf32> to vector<16x64xbf16>
    %cst_474 = arith.constant dense<0.000000e+00> : vector<16x256xf32>
    %1044 = tpu.matmul %1043, %1042, %cst_474 {dimension_numbers = #tpu.dot_dimension_numbers<[1], [0], [0], [1], [0, 0, 1, 1], [], []>} : vector<16x64xbf16>, vector<64x256xbf16>, vector<16x256xf32> -> vector<16x256xf32>
    %c0_475 = arith.constant 0 : index
    %c0_476 = arith.constant 0 : index
    %1045 = vector.load %arg17[%c0_475, %c0_476] : memref<6x256xf32, #tpu.memory_space<vmem>>, vector<1x256xf32>
    %1046 = vector.broadcast %1045 : vector<1x256xf32> to vector<16x256xf32>
    %1047 = arith.addf %1044, %1046 : vector<16x256xf32>
    %cst_477 = arith.constant 0.000000e+00 : f32
    %1048 = vector.broadcast %cst_477 : f32 to vector<16x256xf32>
    %1049 = arith.maximumf %1047, %1048 : vector<16x256xf32>
    %c0_478 = arith.constant 0 : index
    %c0_479 = arith.constant 0 : index
    %c0_480 = arith.constant 0 : index
    %1050 = vector.load %arg27[%c0_478, %c0_479, %c0_480] : memref<6x256x64xbf16, #tpu.memory_space<vmem>>, vector<1x256x64xbf16>
    %1051 = vector.shape_cast %1050 : vector<1x256x64xbf16> to vector<256x64xbf16>
    %1052 = arith.truncf %1049 : vector<16x256xf32> to vector<16x256xbf16>
    %cst_481 = arith.constant dense<0.000000e+00> : vector<16x64xf32>
    %1053 = tpu.matmul %1052, %1051, %cst_481 {dimension_numbers = #tpu.dot_dimension_numbers<[1], [0], [0], [1], [0, 0, 1, 1], [], []>} : vector<16x256xbf16>, vector<256x64xbf16>, vector<16x64xf32> -> vector<16x64xf32>
    %c0_482 = arith.constant 0 : index
    %c0_483 = arith.constant 0 : index
    %1054 = vector.load %arg18[%c0_482, %c0_483] : memref<6x64xf32, #tpu.memory_space<vmem>>, vector<1x64xf32>
    %1055 = vector.broadcast %1054 : vector<1x64xf32> to vector<16x64xf32>
    %1056 = arith.addf %1053, %1055 : vector<16x64xf32>
    %1057 = arith.addf %1040, %1056 : vector<16x64xf32>
    %c4_484 = arith.constant 4 : index
    %c0_485 = arith.constant 0 : index
    %1058 = vector.load %arg19[%c4_484, %c0_485] : memref<36x64xf32, #tpu.memory_space<vmem>>, vector<1x64xf32>
    %c5_486 = arith.constant 5 : index
    %c0_487 = arith.constant 0 : index
    %1059 = vector.load %arg19[%c5_486, %c0_487] : memref<36x64xf32, #tpu.memory_space<vmem>>, vector<1x64xf32>
    %cst_488 = arith.constant dense<0.000000e+00> : vector<16xf32>
    %1060 = vector.multi_reduction <add>, %1057, %cst_488 [1] : vector<16x64xf32> to vector<16xf32>
    %1061 = vector.shape_cast %1060 : vector<16xf32> to vector<16x1xf32>
    %cst_489 = arith.constant 6.400000e+01 : f32
    %1062 = vector.broadcast %cst_489 : f32 to vector<16x1xf32>
    %1063 = arith.divf %1061, %1062 : vector<16x1xf32>
    %1064 = arith.mulf %1057, %1057 : vector<16x64xf32>
    %cst_490 = arith.constant dense<0.000000e+00> : vector<16xf32>
    %1065 = vector.multi_reduction <add>, %1064, %cst_490 [1] : vector<16x64xf32> to vector<16xf32>
    %1066 = vector.shape_cast %1065 : vector<16xf32> to vector<16x1xf32>
    %cst_491 = arith.constant 6.400000e+01 : f32
    %1067 = vector.broadcast %cst_491 : f32 to vector<16x1xf32>
    %1068 = arith.divf %1066, %1067 : vector<16x1xf32>
    %1069 = arith.mulf %1063, %1063 : vector<16x1xf32>
    %1070 = arith.subf %1068, %1069 : vector<16x1xf32>
    %cst_492 = arith.constant 0.000000e+00 : f32
    %1071 = vector.broadcast %cst_492 : f32 to vector<16x1xf32>
    %1072 = arith.maximumf %1070, %1071 : vector<16x1xf32>
    %1073 = vector.broadcast %1063 : vector<16x1xf32> to vector<16x64xf32>
    %1074 = arith.subf %1057, %1073 : vector<16x64xf32>
    %cst_493 = arith.constant 9.99999974E-6 : f32
    %1075 = vector.broadcast %cst_493 : f32 to vector<16x1xf32>
    %1076 = arith.addf %1072, %1075 : vector<16x1xf32>
    %1077 = math.rsqrt %1076 : vector<16x1xf32>
    %1078 = vector.broadcast %1077 : vector<16x1xf32> to vector<16x64xf32>
    %1079 = arith.mulf %1074, %1078 : vector<16x64xf32>
    %1080 = vector.broadcast %1058 : vector<1x64xf32> to vector<16x64xf32>
    %1081 = arith.mulf %1079, %1080 : vector<16x64xf32>
    %1082 = vector.broadcast %1059 : vector<1x64xf32> to vector<16x64xf32>
    %1083 = arith.addf %1081, %1082 : vector<16x64xf32>
    %c1_494 = arith.constant 1 : index
    %c0_495 = arith.constant 0 : index
    %c0_496 = arith.constant 0 : index
    %1084 = vector.load %arg24[%c1_494, %c0_495, %c0_496] : memref<6x64x64xbf16, #tpu.memory_space<vmem>>, vector<1x64x64xbf16>
    %1085 = vector.shape_cast %1084 : vector<1x64x64xbf16> to vector<64x64xbf16>
    %1086 = arith.truncf %1083 : vector<16x64xf32> to vector<16x64xbf16>
    %cst_497 = arith.constant dense<0.000000e+00> : vector<16x64xf32>
    %1087 = tpu.matmul %1086, %1085, %cst_497 {dimension_numbers = #tpu.dot_dimension_numbers<[1], [0], [0], [1], [0, 0, 1, 1], [], []>} : vector<16x64xbf16>, vector<64x64xbf16>, vector<16x64xf32> -> vector<16x64xf32>
    %c1_498 = arith.constant 1 : index
    %c0_499 = arith.constant 0 : index
    %1088 = vector.load %arg15[%c1_498, %c0_499] : memref<6x64xf32, #tpu.memory_space<vmem>>, vector<1x64xf32>
    %1089 = vector.broadcast %1088 : vector<1x64xf32> to vector<16x64xf32>
    %1090 = arith.addf %1087, %1089 : vector<16x64xf32>
    %1091 = arith.addf %1083, %1090 : vector<16x64xf32>
    %c6_500 = arith.constant 6 : index
    %c0_501 = arith.constant 0 : index
    %1092 = vector.load %arg19[%c6_500, %c0_501] : memref<36x64xf32, #tpu.memory_space<vmem>>, vector<1x64xf32>
    %c7_502 = arith.constant 7 : index
    %c0_503 = arith.constant 0 : index
    %1093 = vector.load %arg19[%c7_502, %c0_503] : memref<36x64xf32, #tpu.memory_space<vmem>>, vector<1x64xf32>
    %cst_504 = arith.constant dense<0.000000e+00> : vector<16xf32>
    %1094 = vector.multi_reduction <add>, %1091, %cst_504 [1] : vector<16x64xf32> to vector<16xf32>
    %1095 = vector.shape_cast %1094 : vector<16xf32> to vector<16x1xf32>
    %cst_505 = arith.constant 6.400000e+01 : f32
    %1096 = vector.broadcast %cst_505 : f32 to vector<16x1xf32>
    %1097 = arith.divf %1095, %1096 : vector<16x1xf32>
    %1098 = arith.mulf %1091, %1091 : vector<16x64xf32>
    %cst_506 = arith.constant dense<0.000000e+00> : vector<16xf32>
    %1099 = vector.multi_reduction <add>, %1098, %cst_506 [1] : vector<16x64xf32> to vector<16xf32>
    %1100 = vector.shape_cast %1099 : vector<16xf32> to vector<16x1xf32>
    %cst_507 = arith.constant 6.400000e+01 : f32
    %1101 = vector.broadcast %cst_507 : f32 to vector<16x1xf32>
    %1102 = arith.divf %1100, %1101 : vector<16x1xf32>
    %1103 = arith.mulf %1097, %1097 : vector<16x1xf32>
    %1104 = arith.subf %1102, %1103 : vector<16x1xf32>
    %cst_508 = arith.constant 0.000000e+00 : f32
    %1105 = vector.broadcast %cst_508 : f32 to vector<16x1xf32>
    %1106 = arith.maximumf %1104, %1105 : vector<16x1xf32>
    %1107 = vector.broadcast %1097 : vector<16x1xf32> to vector<16x64xf32>
    %1108 = arith.subf %1091, %1107 : vector<16x64xf32>
    %cst_509 = arith.constant 9.99999974E-6 : f32
    %1109 = vector.broadcast %cst_509 : f32 to vector<16x1xf32>
    %1110 = arith.addf %1106, %1109 : vector<16x1xf32>
    %1111 = math.rsqrt %1110 : vector<16x1xf32>
    %1112 = vector.broadcast %1111 : vector<16x1xf32> to vector<16x64xf32>
    %1113 = arith.mulf %1108, %1112 : vector<16x64xf32>
    %1114 = vector.broadcast %1092 : vector<1x64xf32> to vector<16x64xf32>
    %1115 = arith.mulf %1113, %1114 : vector<16x64xf32>
    %1116 = vector.broadcast %1093 : vector<1x64xf32> to vector<16x64xf32>
    %1117 = arith.addf %1115, %1116 : vector<16x64xf32>
    %1118 = vector.extract_strided_slice %978 {offsets = [0, 64], sizes = [16, 64], strides = [1, 1]} : vector<16x384xf32> to vector<16x64xf32>
    %1119 = arith.addf %1117, %1118 : vector<16x64xf32>
    %c8_510 = arith.constant 8 : index
    %c0_511 = arith.constant 0 : index
    %1120 = vector.load %arg19[%c8_510, %c0_511] : memref<36x64xf32, #tpu.memory_space<vmem>>, vector<1x64xf32>
    %c9_512 = arith.constant 9 : index
    %c0_513 = arith.constant 0 : index
    %1121 = vector.load %arg19[%c9_512, %c0_513] : memref<36x64xf32, #tpu.memory_space<vmem>>, vector<1x64xf32>
    %cst_514 = arith.constant dense<0.000000e+00> : vector<16xf32>
    %1122 = vector.multi_reduction <add>, %1119, %cst_514 [1] : vector<16x64xf32> to vector<16xf32>
    %1123 = vector.shape_cast %1122 : vector<16xf32> to vector<16x1xf32>
    %cst_515 = arith.constant 6.400000e+01 : f32
    %1124 = vector.broadcast %cst_515 : f32 to vector<16x1xf32>
    %1125 = arith.divf %1123, %1124 : vector<16x1xf32>
    %1126 = arith.mulf %1119, %1119 : vector<16x64xf32>
    %cst_516 = arith.constant dense<0.000000e+00> : vector<16xf32>
    %1127 = vector.multi_reduction <add>, %1126, %cst_516 [1] : vector<16x64xf32> to vector<16xf32>
    %1128 = vector.shape_cast %1127 : vector<16xf32> to vector<16x1xf32>
    %cst_517 = arith.constant 6.400000e+01 : f32
    %1129 = vector.broadcast %cst_517 : f32 to vector<16x1xf32>
    %1130 = arith.divf %1128, %1129 : vector<16x1xf32>
    %1131 = arith.mulf %1125, %1125 : vector<16x1xf32>
    %1132 = arith.subf %1130, %1131 : vector<16x1xf32>
    %cst_518 = arith.constant 0.000000e+00 : f32
    %1133 = vector.broadcast %cst_518 : f32 to vector<16x1xf32>
    %1134 = arith.maximumf %1132, %1133 : vector<16x1xf32>
    %1135 = vector.broadcast %1125 : vector<16x1xf32> to vector<16x64xf32>
    %1136 = arith.subf %1119, %1135 : vector<16x64xf32>
    %cst_519 = arith.constant 9.99999974E-6 : f32
    %1137 = vector.broadcast %cst_519 : f32 to vector<16x1xf32>
    %1138 = arith.addf %1134, %1137 : vector<16x1xf32>
    %1139 = math.rsqrt %1138 : vector<16x1xf32>
    %1140 = vector.broadcast %1139 : vector<16x1xf32> to vector<16x64xf32>
    %1141 = arith.mulf %1136, %1140 : vector<16x64xf32>
    %1142 = vector.broadcast %1120 : vector<1x64xf32> to vector<16x64xf32>
    %1143 = arith.mulf %1141, %1142 : vector<16x64xf32>
    %1144 = vector.broadcast %1121 : vector<1x64xf32> to vector<16x64xf32>
    %1145 = arith.addf %1143, %1144 : vector<16x64xf32>
    %c1_520 = arith.constant 1 : index
    %c0_521 = arith.constant 0 : index
    %c0_522 = arith.constant 0 : index
    %1146 = vector.load %arg26[%c1_520, %c0_521, %c0_522] : memref<6x64x256xbf16, #tpu.memory_space<vmem>>, vector<1x64x256xbf16>
    %1147 = vector.shape_cast %1146 : vector<1x64x256xbf16> to vector<64x256xbf16>
    %1148 = arith.truncf %1145 : vector<16x64xf32> to vector<16x64xbf16>
    %cst_523 = arith.constant dense<0.000000e+00> : vector<16x256xf32>
    %1149 = tpu.matmul %1148, %1147, %cst_523 {dimension_numbers = #tpu.dot_dimension_numbers<[1], [0], [0], [1], [0, 0, 1, 1], [], []>} : vector<16x64xbf16>, vector<64x256xbf16>, vector<16x256xf32> -> vector<16x256xf32>
    %c1_524 = arith.constant 1 : index
    %c0_525 = arith.constant 0 : index
    %1150 = vector.load %arg17[%c1_524, %c0_525] : memref<6x256xf32, #tpu.memory_space<vmem>>, vector<1x256xf32>
    %1151 = vector.broadcast %1150 : vector<1x256xf32> to vector<16x256xf32>
    %1152 = arith.addf %1149, %1151 : vector<16x256xf32>
    %cst_526 = arith.constant 0.000000e+00 : f32
    %1153 = vector.broadcast %cst_526 : f32 to vector<16x256xf32>
    %1154 = arith.maximumf %1152, %1153 : vector<16x256xf32>
    %c1_527 = arith.constant 1 : index
    %c0_528 = arith.constant 0 : index
    %c0_529 = arith.constant 0 : index
    %1155 = vector.load %arg27[%c1_527, %c0_528, %c0_529] : memref<6x256x64xbf16, #tpu.memory_space<vmem>>, vector<1x256x64xbf16>
    %1156 = vector.shape_cast %1155 : vector<1x256x64xbf16> to vector<256x64xbf16>
    %1157 = arith.truncf %1154 : vector<16x256xf32> to vector<16x256xbf16>
    %cst_530 = arith.constant dense<0.000000e+00> : vector<16x64xf32>
    %1158 = tpu.matmul %1157, %1156, %cst_530 {dimension_numbers = #tpu.dot_dimension_numbers<[1], [0], [0], [1], [0, 0, 1, 1], [], []>} : vector<16x256xbf16>, vector<256x64xbf16>, vector<16x64xf32> -> vector<16x64xf32>
    %c1_531 = arith.constant 1 : index
    %c0_532 = arith.constant 0 : index
    %1159 = vector.load %arg18[%c1_531, %c0_532] : memref<6x64xf32, #tpu.memory_space<vmem>>, vector<1x64xf32>
    %1160 = vector.broadcast %1159 : vector<1x64xf32> to vector<16x64xf32>
    %1161 = arith.addf %1158, %1160 : vector<16x64xf32>
    %1162 = arith.addf %1145, %1161 : vector<16x64xf32>
    %c10_533 = arith.constant 10 : index
    %c0_534 = arith.constant 0 : index
    %1163 = vector.load %arg19[%c10_533, %c0_534] : memref<36x64xf32, #tpu.memory_space<vmem>>, vector<1x64xf32>
    %c11_535 = arith.constant 11 : index
    %c0_536 = arith.constant 0 : index
    %1164 = vector.load %arg19[%c11_535, %c0_536] : memref<36x64xf32, #tpu.memory_space<vmem>>, vector<1x64xf32>
    %cst_537 = arith.constant dense<0.000000e+00> : vector<16xf32>
    %1165 = vector.multi_reduction <add>, %1162, %cst_537 [1] : vector<16x64xf32> to vector<16xf32>
    %1166 = vector.shape_cast %1165 : vector<16xf32> to vector<16x1xf32>
    %cst_538 = arith.constant 6.400000e+01 : f32
    %1167 = vector.broadcast %cst_538 : f32 to vector<16x1xf32>
    %1168 = arith.divf %1166, %1167 : vector<16x1xf32>
    %1169 = arith.mulf %1162, %1162 : vector<16x64xf32>
    %cst_539 = arith.constant dense<0.000000e+00> : vector<16xf32>
    %1170 = vector.multi_reduction <add>, %1169, %cst_539 [1] : vector<16x64xf32> to vector<16xf32>
    %1171 = vector.shape_cast %1170 : vector<16xf32> to vector<16x1xf32>
    %cst_540 = arith.constant 6.400000e+01 : f32
    %1172 = vector.broadcast %cst_540 : f32 to vector<16x1xf32>
    %1173 = arith.divf %1171, %1172 : vector<16x1xf32>
    %1174 = arith.mulf %1168, %1168 : vector<16x1xf32>
    %1175 = arith.subf %1173, %1174 : vector<16x1xf32>
    %cst_541 = arith.constant 0.000000e+00 : f32
    %1176 = vector.broadcast %cst_541 : f32 to vector<16x1xf32>
    %1177 = arith.maximumf %1175, %1176 : vector<16x1xf32>
    %1178 = vector.broadcast %1168 : vector<16x1xf32> to vector<16x64xf32>
    %1179 = arith.subf %1162, %1178 : vector<16x64xf32>
    %cst_542 = arith.constant 9.99999974E-6 : f32
    %1180 = vector.broadcast %cst_542 : f32 to vector<16x1xf32>
    %1181 = arith.addf %1177, %1180 : vector<16x1xf32>
    %1182 = math.rsqrt %1181 : vector<16x1xf32>
    %1183 = vector.broadcast %1182 : vector<16x1xf32> to vector<16x64xf32>
    %1184 = arith.mulf %1179, %1183 : vector<16x64xf32>
    %1185 = vector.broadcast %1163 : vector<1x64xf32> to vector<16x64xf32>
    %1186 = arith.mulf %1184, %1185 : vector<16x64xf32>
    %1187 = vector.broadcast %1164 : vector<1x64xf32> to vector<16x64xf32>
    %1188 = arith.addf %1186, %1187 : vector<16x64xf32>
    %c2_543 = arith.constant 2 : index
    %c0_544 = arith.constant 0 : index
    %c0_545 = arith.constant 0 : index
    %1189 = vector.load %arg24[%c2_543, %c0_544, %c0_545] : memref<6x64x64xbf16, #tpu.memory_space<vmem>>, vector<1x64x64xbf16>
    %1190 = vector.shape_cast %1189 : vector<1x64x64xbf16> to vector<64x64xbf16>
    %1191 = arith.truncf %1188 : vector<16x64xf32> to vector<16x64xbf16>
    %cst_546 = arith.constant dense<0.000000e+00> : vector<16x64xf32>
    %1192 = tpu.matmul %1191, %1190, %cst_546 {dimension_numbers = #tpu.dot_dimension_numbers<[1], [0], [0], [1], [0, 0, 1, 1], [], []>} : vector<16x64xbf16>, vector<64x64xbf16>, vector<16x64xf32> -> vector<16x64xf32>
    %c2_547 = arith.constant 2 : index
    %c0_548 = arith.constant 0 : index
    %1193 = vector.load %arg15[%c2_547, %c0_548] : memref<6x64xf32, #tpu.memory_space<vmem>>, vector<1x64xf32>
    %1194 = vector.broadcast %1193 : vector<1x64xf32> to vector<16x64xf32>
    %1195 = arith.addf %1192, %1194 : vector<16x64xf32>
    %1196 = arith.addf %1188, %1195 : vector<16x64xf32>
    %c12_549 = arith.constant 12 : index
    %c0_550 = arith.constant 0 : index
    %1197 = vector.load %arg19[%c12_549, %c0_550] : memref<36x64xf32, #tpu.memory_space<vmem>>, vector<1x64xf32>
    %c13_551 = arith.constant 13 : index
    %c0_552 = arith.constant 0 : index
    %1198 = vector.load %arg19[%c13_551, %c0_552] : memref<36x64xf32, #tpu.memory_space<vmem>>, vector<1x64xf32>
    %cst_553 = arith.constant dense<0.000000e+00> : vector<16xf32>
    %1199 = vector.multi_reduction <add>, %1196, %cst_553 [1] : vector<16x64xf32> to vector<16xf32>
    %1200 = vector.shape_cast %1199 : vector<16xf32> to vector<16x1xf32>
    %cst_554 = arith.constant 6.400000e+01 : f32
    %1201 = vector.broadcast %cst_554 : f32 to vector<16x1xf32>
    %1202 = arith.divf %1200, %1201 : vector<16x1xf32>
    %1203 = arith.mulf %1196, %1196 : vector<16x64xf32>
    %cst_555 = arith.constant dense<0.000000e+00> : vector<16xf32>
    %1204 = vector.multi_reduction <add>, %1203, %cst_555 [1] : vector<16x64xf32> to vector<16xf32>
    %1205 = vector.shape_cast %1204 : vector<16xf32> to vector<16x1xf32>
    %cst_556 = arith.constant 6.400000e+01 : f32
    %1206 = vector.broadcast %cst_556 : f32 to vector<16x1xf32>
    %1207 = arith.divf %1205, %1206 : vector<16x1xf32>
    %1208 = arith.mulf %1202, %1202 : vector<16x1xf32>
    %1209 = arith.subf %1207, %1208 : vector<16x1xf32>
    %cst_557 = arith.constant 0.000000e+00 : f32
    %1210 = vector.broadcast %cst_557 : f32 to vector<16x1xf32>
    %1211 = arith.maximumf %1209, %1210 : vector<16x1xf32>
    %1212 = vector.broadcast %1202 : vector<16x1xf32> to vector<16x64xf32>
    %1213 = arith.subf %1196, %1212 : vector<16x64xf32>
    %cst_558 = arith.constant 9.99999974E-6 : f32
    %1214 = vector.broadcast %cst_558 : f32 to vector<16x1xf32>
    %1215 = arith.addf %1211, %1214 : vector<16x1xf32>
    %1216 = math.rsqrt %1215 : vector<16x1xf32>
    %1217 = vector.broadcast %1216 : vector<16x1xf32> to vector<16x64xf32>
    %1218 = arith.mulf %1213, %1217 : vector<16x64xf32>
    %1219 = vector.broadcast %1197 : vector<1x64xf32> to vector<16x64xf32>
    %1220 = arith.mulf %1218, %1219 : vector<16x64xf32>
    %1221 = vector.broadcast %1198 : vector<1x64xf32> to vector<16x64xf32>
    %1222 = arith.addf %1220, %1221 : vector<16x64xf32>
    %1223 = vector.extract_strided_slice %978 {offsets = [0, 128], sizes = [16, 64], strides = [1, 1]} : vector<16x384xf32> to vector<16x64xf32>
    %1224 = arith.addf %1222, %1223 : vector<16x64xf32>
    %c14_559 = arith.constant 14 : index
    %c0_560 = arith.constant 0 : index
    %1225 = vector.load %arg19[%c14_559, %c0_560] : memref<36x64xf32, #tpu.memory_space<vmem>>, vector<1x64xf32>
    %c15_561 = arith.constant 15 : index
    %c0_562 = arith.constant 0 : index
    %1226 = vector.load %arg19[%c15_561, %c0_562] : memref<36x64xf32, #tpu.memory_space<vmem>>, vector<1x64xf32>
    %cst_563 = arith.constant dense<0.000000e+00> : vector<16xf32>
    %1227 = vector.multi_reduction <add>, %1224, %cst_563 [1] : vector<16x64xf32> to vector<16xf32>
    %1228 = vector.shape_cast %1227 : vector<16xf32> to vector<16x1xf32>
    %cst_564 = arith.constant 6.400000e+01 : f32
    %1229 = vector.broadcast %cst_564 : f32 to vector<16x1xf32>
    %1230 = arith.divf %1228, %1229 : vector<16x1xf32>
    %1231 = arith.mulf %1224, %1224 : vector<16x64xf32>
    %cst_565 = arith.constant dense<0.000000e+00> : vector<16xf32>
    %1232 = vector.multi_reduction <add>, %1231, %cst_565 [1] : vector<16x64xf32> to vector<16xf32>
    %1233 = vector.shape_cast %1232 : vector<16xf32> to vector<16x1xf32>
    %cst_566 = arith.constant 6.400000e+01 : f32
    %1234 = vector.broadcast %cst_566 : f32 to vector<16x1xf32>
    %1235 = arith.divf %1233, %1234 : vector<16x1xf32>
    %1236 = arith.mulf %1230, %1230 : vector<16x1xf32>
    %1237 = arith.subf %1235, %1236 : vector<16x1xf32>
    %cst_567 = arith.constant 0.000000e+00 : f32
    %1238 = vector.broadcast %cst_567 : f32 to vector<16x1xf32>
    %1239 = arith.maximumf %1237, %1238 : vector<16x1xf32>
    %1240 = vector.broadcast %1230 : vector<16x1xf32> to vector<16x64xf32>
    %1241 = arith.subf %1224, %1240 : vector<16x64xf32>
    %cst_568 = arith.constant 9.99999974E-6 : f32
    %1242 = vector.broadcast %cst_568 : f32 to vector<16x1xf32>
    %1243 = arith.addf %1239, %1242 : vector<16x1xf32>
    %1244 = math.rsqrt %1243 : vector<16x1xf32>
    %1245 = vector.broadcast %1244 : vector<16x1xf32> to vector<16x64xf32>
    %1246 = arith.mulf %1241, %1245 : vector<16x64xf32>
    %1247 = vector.broadcast %1225 : vector<1x64xf32> to vector<16x64xf32>
    %1248 = arith.mulf %1246, %1247 : vector<16x64xf32>
    %1249 = vector.broadcast %1226 : vector<1x64xf32> to vector<16x64xf32>
    %1250 = arith.addf %1248, %1249 : vector<16x64xf32>
    %c2_569 = arith.constant 2 : index
    %c0_570 = arith.constant 0 : index
    %c0_571 = arith.constant 0 : index
    %1251 = vector.load %arg26[%c2_569, %c0_570, %c0_571] : memref<6x64x256xbf16, #tpu.memory_space<vmem>>, vector<1x64x256xbf16>
    %1252 = vector.shape_cast %1251 : vector<1x64x256xbf16> to vector<64x256xbf16>
    %1253 = arith.truncf %1250 : vector<16x64xf32> to vector<16x64xbf16>
    %cst_572 = arith.constant dense<0.000000e+00> : vector<16x256xf32>
    %1254 = tpu.matmul %1253, %1252, %cst_572 {dimension_numbers = #tpu.dot_dimension_numbers<[1], [0], [0], [1], [0, 0, 1, 1], [], []>} : vector<16x64xbf16>, vector<64x256xbf16>, vector<16x256xf32> -> vector<16x256xf32>
    %c2_573 = arith.constant 2 : index
    %c0_574 = arith.constant 0 : index
    %1255 = vector.load %arg17[%c2_573, %c0_574] : memref<6x256xf32, #tpu.memory_space<vmem>>, vector<1x256xf32>
    %1256 = vector.broadcast %1255 : vector<1x256xf32> to vector<16x256xf32>
    %1257 = arith.addf %1254, %1256 : vector<16x256xf32>
    %cst_575 = arith.constant 0.000000e+00 : f32
    %1258 = vector.broadcast %cst_575 : f32 to vector<16x256xf32>
    %1259 = arith.maximumf %1257, %1258 : vector<16x256xf32>
    %c2_576 = arith.constant 2 : index
    %c0_577 = arith.constant 0 : index
    %c0_578 = arith.constant 0 : index
    %1260 = vector.load %arg27[%c2_576, %c0_577, %c0_578] : memref<6x256x64xbf16, #tpu.memory_space<vmem>>, vector<1x256x64xbf16>
    %1261 = vector.shape_cast %1260 : vector<1x256x64xbf16> to vector<256x64xbf16>
    %1262 = arith.truncf %1259 : vector<16x256xf32> to vector<16x256xbf16>
    %cst_579 = arith.constant dense<0.000000e+00> : vector<16x64xf32>
    %1263 = tpu.matmul %1262, %1261, %cst_579 {dimension_numbers = #tpu.dot_dimension_numbers<[1], [0], [0], [1], [0, 0, 1, 1], [], []>} : vector<16x256xbf16>, vector<256x64xbf16>, vector<16x64xf32> -> vector<16x64xf32>
    %c2_580 = arith.constant 2 : index
    %c0_581 = arith.constant 0 : index
    %1264 = vector.load %arg18[%c2_580, %c0_581] : memref<6x64xf32, #tpu.memory_space<vmem>>, vector<1x64xf32>
    %1265 = vector.broadcast %1264 : vector<1x64xf32> to vector<16x64xf32>
    %1266 = arith.addf %1263, %1265 : vector<16x64xf32>
    %1267 = arith.addf %1250, %1266 : vector<16x64xf32>
    %c16_582 = arith.constant 16 : index
    %c0_583 = arith.constant 0 : index
    %1268 = vector.load %arg19[%c16_582, %c0_583] : memref<36x64xf32, #tpu.memory_space<vmem>>, vector<1x64xf32>
    %c17_584 = arith.constant 17 : index
    %c0_585 = arith.constant 0 : index
    %1269 = vector.load %arg19[%c17_584, %c0_585] : memref<36x64xf32, #tpu.memory_space<vmem>>, vector<1x64xf32>
    %cst_586 = arith.constant dense<0.000000e+00> : vector<16xf32>
    %1270 = vector.multi_reduction <add>, %1267, %cst_586 [1] : vector<16x64xf32> to vector<16xf32>
    %1271 = vector.shape_cast %1270 : vector<16xf32> to vector<16x1xf32>
    %cst_587 = arith.constant 6.400000e+01 : f32
    %1272 = vector.broadcast %cst_587 : f32 to vector<16x1xf32>
    %1273 = arith.divf %1271, %1272 : vector<16x1xf32>
    %1274 = arith.mulf %1267, %1267 : vector<16x64xf32>
    %cst_588 = arith.constant dense<0.000000e+00> : vector<16xf32>
    %1275 = vector.multi_reduction <add>, %1274, %cst_588 [1] : vector<16x64xf32> to vector<16xf32>
    %1276 = vector.shape_cast %1275 : vector<16xf32> to vector<16x1xf32>
    %cst_589 = arith.constant 6.400000e+01 : f32
    %1277 = vector.broadcast %cst_589 : f32 to vector<16x1xf32>
    %1278 = arith.divf %1276, %1277 : vector<16x1xf32>
    %1279 = arith.mulf %1273, %1273 : vector<16x1xf32>
    %1280 = arith.subf %1278, %1279 : vector<16x1xf32>
    %cst_590 = arith.constant 0.000000e+00 : f32
    %1281 = vector.broadcast %cst_590 : f32 to vector<16x1xf32>
    %1282 = arith.maximumf %1280, %1281 : vector<16x1xf32>
    %1283 = vector.broadcast %1273 : vector<16x1xf32> to vector<16x64xf32>
    %1284 = arith.subf %1267, %1283 : vector<16x64xf32>
    %cst_591 = arith.constant 9.99999974E-6 : f32
    %1285 = vector.broadcast %cst_591 : f32 to vector<16x1xf32>
    %1286 = arith.addf %1282, %1285 : vector<16x1xf32>
    %1287 = math.rsqrt %1286 : vector<16x1xf32>
    %1288 = vector.broadcast %1287 : vector<16x1xf32> to vector<16x64xf32>
    %1289 = arith.mulf %1284, %1288 : vector<16x64xf32>
    %1290 = vector.broadcast %1268 : vector<1x64xf32> to vector<16x64xf32>
    %1291 = arith.mulf %1289, %1290 : vector<16x64xf32>
    %1292 = vector.broadcast %1269 : vector<1x64xf32> to vector<16x64xf32>
    %1293 = arith.addf %1291, %1292 : vector<16x64xf32>
    %c3_592 = arith.constant 3 : index
    %c0_593 = arith.constant 0 : index
    %c0_594 = arith.constant 0 : index
    %1294 = vector.load %arg24[%c3_592, %c0_593, %c0_594] : memref<6x64x64xbf16, #tpu.memory_space<vmem>>, vector<1x64x64xbf16>
    %1295 = vector.shape_cast %1294 : vector<1x64x64xbf16> to vector<64x64xbf16>
    %1296 = arith.truncf %1293 : vector<16x64xf32> to vector<16x64xbf16>
    %cst_595 = arith.constant dense<0.000000e+00> : vector<16x64xf32>
    %1297 = tpu.matmul %1296, %1295, %cst_595 {dimension_numbers = #tpu.dot_dimension_numbers<[1], [0], [0], [1], [0, 0, 1, 1], [], []>} : vector<16x64xbf16>, vector<64x64xbf16>, vector<16x64xf32> -> vector<16x64xf32>
    %c3_596 = arith.constant 3 : index
    %c0_597 = arith.constant 0 : index
    %1298 = vector.load %arg15[%c3_596, %c0_597] : memref<6x64xf32, #tpu.memory_space<vmem>>, vector<1x64xf32>
    %1299 = vector.broadcast %1298 : vector<1x64xf32> to vector<16x64xf32>
    %1300 = arith.addf %1297, %1299 : vector<16x64xf32>
    %1301 = arith.addf %1293, %1300 : vector<16x64xf32>
    %c18_598 = arith.constant 18 : index
    %c0_599 = arith.constant 0 : index
    %1302 = vector.load %arg19[%c18_598, %c0_599] : memref<36x64xf32, #tpu.memory_space<vmem>>, vector<1x64xf32>
    %c19_600 = arith.constant 19 : index
    %c0_601 = arith.constant 0 : index
    %1303 = vector.load %arg19[%c19_600, %c0_601] : memref<36x64xf32, #tpu.memory_space<vmem>>, vector<1x64xf32>
    %cst_602 = arith.constant dense<0.000000e+00> : vector<16xf32>
    %1304 = vector.multi_reduction <add>, %1301, %cst_602 [1] : vector<16x64xf32> to vector<16xf32>
    %1305 = vector.shape_cast %1304 : vector<16xf32> to vector<16x1xf32>
    %cst_603 = arith.constant 6.400000e+01 : f32
    %1306 = vector.broadcast %cst_603 : f32 to vector<16x1xf32>
    %1307 = arith.divf %1305, %1306 : vector<16x1xf32>
    %1308 = arith.mulf %1301, %1301 : vector<16x64xf32>
    %cst_604 = arith.constant dense<0.000000e+00> : vector<16xf32>
    %1309 = vector.multi_reduction <add>, %1308, %cst_604 [1] : vector<16x64xf32> to vector<16xf32>
    %1310 = vector.shape_cast %1309 : vector<16xf32> to vector<16x1xf32>
    %cst_605 = arith.constant 6.400000e+01 : f32
    %1311 = vector.broadcast %cst_605 : f32 to vector<16x1xf32>
    %1312 = arith.divf %1310, %1311 : vector<16x1xf32>
    %1313 = arith.mulf %1307, %1307 : vector<16x1xf32>
    %1314 = arith.subf %1312, %1313 : vector<16x1xf32>
    %cst_606 = arith.constant 0.000000e+00 : f32
    %1315 = vector.broadcast %cst_606 : f32 to vector<16x1xf32>
    %1316 = arith.maximumf %1314, %1315 : vector<16x1xf32>
    %1317 = vector.broadcast %1307 : vector<16x1xf32> to vector<16x64xf32>
    %1318 = arith.subf %1301, %1317 : vector<16x64xf32>
    %cst_607 = arith.constant 9.99999974E-6 : f32
    %1319 = vector.broadcast %cst_607 : f32 to vector<16x1xf32>
    %1320 = arith.addf %1316, %1319 : vector<16x1xf32>
    %1321 = math.rsqrt %1320 : vector<16x1xf32>
    %1322 = vector.broadcast %1321 : vector<16x1xf32> to vector<16x64xf32>
    %1323 = arith.mulf %1318, %1322 : vector<16x64xf32>
    %1324 = vector.broadcast %1302 : vector<1x64xf32> to vector<16x64xf32>
    %1325 = arith.mulf %1323, %1324 : vector<16x64xf32>
    %1326 = vector.broadcast %1303 : vector<1x64xf32> to vector<16x64xf32>
    %1327 = arith.addf %1325, %1326 : vector<16x64xf32>
    %1328 = vector.extract_strided_slice %978 {offsets = [0, 192], sizes = [16, 64], strides = [1, 1]} : vector<16x384xf32> to vector<16x64xf32>
    %1329 = arith.addf %1327, %1328 : vector<16x64xf32>
    %c20_608 = arith.constant 20 : index
    %c0_609 = arith.constant 0 : index
    %1330 = vector.load %arg19[%c20_608, %c0_609] : memref<36x64xf32, #tpu.memory_space<vmem>>, vector<1x64xf32>
    %c21_610 = arith.constant 21 : index
    %c0_611 = arith.constant 0 : index
    %1331 = vector.load %arg19[%c21_610, %c0_611] : memref<36x64xf32, #tpu.memory_space<vmem>>, vector<1x64xf32>
    %cst_612 = arith.constant dense<0.000000e+00> : vector<16xf32>
    %1332 = vector.multi_reduction <add>, %1329, %cst_612 [1] : vector<16x64xf32> to vector<16xf32>
    %1333 = vector.shape_cast %1332 : vector<16xf32> to vector<16x1xf32>
    %cst_613 = arith.constant 6.400000e+01 : f32
    %1334 = vector.broadcast %cst_613 : f32 to vector<16x1xf32>
    %1335 = arith.divf %1333, %1334 : vector<16x1xf32>
    %1336 = arith.mulf %1329, %1329 : vector<16x64xf32>
    %cst_614 = arith.constant dense<0.000000e+00> : vector<16xf32>
    %1337 = vector.multi_reduction <add>, %1336, %cst_614 [1] : vector<16x64xf32> to vector<16xf32>
    %1338 = vector.shape_cast %1337 : vector<16xf32> to vector<16x1xf32>
    %cst_615 = arith.constant 6.400000e+01 : f32
    %1339 = vector.broadcast %cst_615 : f32 to vector<16x1xf32>
    %1340 = arith.divf %1338, %1339 : vector<16x1xf32>
    %1341 = arith.mulf %1335, %1335 : vector<16x1xf32>
    %1342 = arith.subf %1340, %1341 : vector<16x1xf32>
    %cst_616 = arith.constant 0.000000e+00 : f32
    %1343 = vector.broadcast %cst_616 : f32 to vector<16x1xf32>
    %1344 = arith.maximumf %1342, %1343 : vector<16x1xf32>
    %1345 = vector.broadcast %1335 : vector<16x1xf32> to vector<16x64xf32>
    %1346 = arith.subf %1329, %1345 : vector<16x64xf32>
    %cst_617 = arith.constant 9.99999974E-6 : f32
    %1347 = vector.broadcast %cst_617 : f32 to vector<16x1xf32>
    %1348 = arith.addf %1344, %1347 : vector<16x1xf32>
    %1349 = math.rsqrt %1348 : vector<16x1xf32>
    %1350 = vector.broadcast %1349 : vector<16x1xf32> to vector<16x64xf32>
    %1351 = arith.mulf %1346, %1350 : vector<16x64xf32>
    %1352 = vector.broadcast %1330 : vector<1x64xf32> to vector<16x64xf32>
    %1353 = arith.mulf %1351, %1352 : vector<16x64xf32>
    %1354 = vector.broadcast %1331 : vector<1x64xf32> to vector<16x64xf32>
    %1355 = arith.addf %1353, %1354 : vector<16x64xf32>
    %c3_618 = arith.constant 3 : index
    %c0_619 = arith.constant 0 : index
    %c0_620 = arith.constant 0 : index
    %1356 = vector.load %arg26[%c3_618, %c0_619, %c0_620] : memref<6x64x256xbf16, #tpu.memory_space<vmem>>, vector<1x64x256xbf16>
    %1357 = vector.shape_cast %1356 : vector<1x64x256xbf16> to vector<64x256xbf16>
    %1358 = arith.truncf %1355 : vector<16x64xf32> to vector<16x64xbf16>
    %cst_621 = arith.constant dense<0.000000e+00> : vector<16x256xf32>
    %1359 = tpu.matmul %1358, %1357, %cst_621 {dimension_numbers = #tpu.dot_dimension_numbers<[1], [0], [0], [1], [0, 0, 1, 1], [], []>} : vector<16x64xbf16>, vector<64x256xbf16>, vector<16x256xf32> -> vector<16x256xf32>
    %c3_622 = arith.constant 3 : index
    %c0_623 = arith.constant 0 : index
    %1360 = vector.load %arg17[%c3_622, %c0_623] : memref<6x256xf32, #tpu.memory_space<vmem>>, vector<1x256xf32>
    %1361 = vector.broadcast %1360 : vector<1x256xf32> to vector<16x256xf32>
    %1362 = arith.addf %1359, %1361 : vector<16x256xf32>
    %cst_624 = arith.constant 0.000000e+00 : f32
    %1363 = vector.broadcast %cst_624 : f32 to vector<16x256xf32>
    %1364 = arith.maximumf %1362, %1363 : vector<16x256xf32>
    %c3_625 = arith.constant 3 : index
    %c0_626 = arith.constant 0 : index
    %c0_627 = arith.constant 0 : index
    %1365 = vector.load %arg27[%c3_625, %c0_626, %c0_627] : memref<6x256x64xbf16, #tpu.memory_space<vmem>>, vector<1x256x64xbf16>
    %1366 = vector.shape_cast %1365 : vector<1x256x64xbf16> to vector<256x64xbf16>
    %1367 = arith.truncf %1364 : vector<16x256xf32> to vector<16x256xbf16>
    %cst_628 = arith.constant dense<0.000000e+00> : vector<16x64xf32>
    %1368 = tpu.matmul %1367, %1366, %cst_628 {dimension_numbers = #tpu.dot_dimension_numbers<[1], [0], [0], [1], [0, 0, 1, 1], [], []>} : vector<16x256xbf16>, vector<256x64xbf16>, vector<16x64xf32> -> vector<16x64xf32>
    %c3_629 = arith.constant 3 : index
    %c0_630 = arith.constant 0 : index
    %1369 = vector.load %arg18[%c3_629, %c0_630] : memref<6x64xf32, #tpu.memory_space<vmem>>, vector<1x64xf32>
    %1370 = vector.broadcast %1369 : vector<1x64xf32> to vector<16x64xf32>
    %1371 = arith.addf %1368, %1370 : vector<16x64xf32>
    %1372 = arith.addf %1355, %1371 : vector<16x64xf32>
    %c22_631 = arith.constant 22 : index
    %c0_632 = arith.constant 0 : index
    %1373 = vector.load %arg19[%c22_631, %c0_632] : memref<36x64xf32, #tpu.memory_space<vmem>>, vector<1x64xf32>
    %c23_633 = arith.constant 23 : index
    %c0_634 = arith.constant 0 : index
    %1374 = vector.load %arg19[%c23_633, %c0_634] : memref<36x64xf32, #tpu.memory_space<vmem>>, vector<1x64xf32>
    %cst_635 = arith.constant dense<0.000000e+00> : vector<16xf32>
    %1375 = vector.multi_reduction <add>, %1372, %cst_635 [1] : vector<16x64xf32> to vector<16xf32>
    %1376 = vector.shape_cast %1375 : vector<16xf32> to vector<16x1xf32>
    %cst_636 = arith.constant 6.400000e+01 : f32
    %1377 = vector.broadcast %cst_636 : f32 to vector<16x1xf32>
    %1378 = arith.divf %1376, %1377 : vector<16x1xf32>
    %1379 = arith.mulf %1372, %1372 : vector<16x64xf32>
    %cst_637 = arith.constant dense<0.000000e+00> : vector<16xf32>
    %1380 = vector.multi_reduction <add>, %1379, %cst_637 [1] : vector<16x64xf32> to vector<16xf32>
    %1381 = vector.shape_cast %1380 : vector<16xf32> to vector<16x1xf32>
    %cst_638 = arith.constant 6.400000e+01 : f32
    %1382 = vector.broadcast %cst_638 : f32 to vector<16x1xf32>
    %1383 = arith.divf %1381, %1382 : vector<16x1xf32>
    %1384 = arith.mulf %1378, %1378 : vector<16x1xf32>
    %1385 = arith.subf %1383, %1384 : vector<16x1xf32>
    %cst_639 = arith.constant 0.000000e+00 : f32
    %1386 = vector.broadcast %cst_639 : f32 to vector<16x1xf32>
    %1387 = arith.maximumf %1385, %1386 : vector<16x1xf32>
    %1388 = vector.broadcast %1378 : vector<16x1xf32> to vector<16x64xf32>
    %1389 = arith.subf %1372, %1388 : vector<16x64xf32>
    %cst_640 = arith.constant 9.99999974E-6 : f32
    %1390 = vector.broadcast %cst_640 : f32 to vector<16x1xf32>
    %1391 = arith.addf %1387, %1390 : vector<16x1xf32>
    %1392 = math.rsqrt %1391 : vector<16x1xf32>
    %1393 = vector.broadcast %1392 : vector<16x1xf32> to vector<16x64xf32>
    %1394 = arith.mulf %1389, %1393 : vector<16x64xf32>
    %1395 = vector.broadcast %1373 : vector<1x64xf32> to vector<16x64xf32>
    %1396 = arith.mulf %1394, %1395 : vector<16x64xf32>
    %1397 = vector.broadcast %1374 : vector<1x64xf32> to vector<16x64xf32>
    %1398 = arith.addf %1396, %1397 : vector<16x64xf32>
    %c4_641 = arith.constant 4 : index
    %c0_642 = arith.constant 0 : index
    %c0_643 = arith.constant 0 : index
    %1399 = vector.load %arg24[%c4_641, %c0_642, %c0_643] : memref<6x64x64xbf16, #tpu.memory_space<vmem>>, vector<1x64x64xbf16>
    %1400 = vector.shape_cast %1399 : vector<1x64x64xbf16> to vector<64x64xbf16>
    %1401 = arith.truncf %1398 : vector<16x64xf32> to vector<16x64xbf16>
    %cst_644 = arith.constant dense<0.000000e+00> : vector<16x64xf32>
    %1402 = tpu.matmul %1401, %1400, %cst_644 {dimension_numbers = #tpu.dot_dimension_numbers<[1], [0], [0], [1], [0, 0, 1, 1], [], []>} : vector<16x64xbf16>, vector<64x64xbf16>, vector<16x64xf32> -> vector<16x64xf32>
    %c4_645 = arith.constant 4 : index
    %c0_646 = arith.constant 0 : index
    %1403 = vector.load %arg15[%c4_645, %c0_646] : memref<6x64xf32, #tpu.memory_space<vmem>>, vector<1x64xf32>
    %1404 = vector.broadcast %1403 : vector<1x64xf32> to vector<16x64xf32>
    %1405 = arith.addf %1402, %1404 : vector<16x64xf32>
    %1406 = arith.addf %1398, %1405 : vector<16x64xf32>
    %c24_647 = arith.constant 24 : index
    %c0_648 = arith.constant 0 : index
    %1407 = vector.load %arg19[%c24_647, %c0_648] : memref<36x64xf32, #tpu.memory_space<vmem>>, vector<1x64xf32>
    %c25_649 = arith.constant 25 : index
    %c0_650 = arith.constant 0 : index
    %1408 = vector.load %arg19[%c25_649, %c0_650] : memref<36x64xf32, #tpu.memory_space<vmem>>, vector<1x64xf32>
    %cst_651 = arith.constant dense<0.000000e+00> : vector<16xf32>
    %1409 = vector.multi_reduction <add>, %1406, %cst_651 [1] : vector<16x64xf32> to vector<16xf32>
    %1410 = vector.shape_cast %1409 : vector<16xf32> to vector<16x1xf32>
    %cst_652 = arith.constant 6.400000e+01 : f32
    %1411 = vector.broadcast %cst_652 : f32 to vector<16x1xf32>
    %1412 = arith.divf %1410, %1411 : vector<16x1xf32>
    %1413 = arith.mulf %1406, %1406 : vector<16x64xf32>
    %cst_653 = arith.constant dense<0.000000e+00> : vector<16xf32>
    %1414 = vector.multi_reduction <add>, %1413, %cst_653 [1] : vector<16x64xf32> to vector<16xf32>
    %1415 = vector.shape_cast %1414 : vector<16xf32> to vector<16x1xf32>
    %cst_654 = arith.constant 6.400000e+01 : f32
    %1416 = vector.broadcast %cst_654 : f32 to vector<16x1xf32>
    %1417 = arith.divf %1415, %1416 : vector<16x1xf32>
    %1418 = arith.mulf %1412, %1412 : vector<16x1xf32>
    %1419 = arith.subf %1417, %1418 : vector<16x1xf32>
    %cst_655 = arith.constant 0.000000e+00 : f32
    %1420 = vector.broadcast %cst_655 : f32 to vector<16x1xf32>
    %1421 = arith.maximumf %1419, %1420 : vector<16x1xf32>
    %1422 = vector.broadcast %1412 : vector<16x1xf32> to vector<16x64xf32>
    %1423 = arith.subf %1406, %1422 : vector<16x64xf32>
    %cst_656 = arith.constant 9.99999974E-6 : f32
    %1424 = vector.broadcast %cst_656 : f32 to vector<16x1xf32>
    %1425 = arith.addf %1421, %1424 : vector<16x1xf32>
    %1426 = math.rsqrt %1425 : vector<16x1xf32>
    %1427 = vector.broadcast %1426 : vector<16x1xf32> to vector<16x64xf32>
    %1428 = arith.mulf %1423, %1427 : vector<16x64xf32>
    %1429 = vector.broadcast %1407 : vector<1x64xf32> to vector<16x64xf32>
    %1430 = arith.mulf %1428, %1429 : vector<16x64xf32>
    %1431 = vector.broadcast %1408 : vector<1x64xf32> to vector<16x64xf32>
    %1432 = arith.addf %1430, %1431 : vector<16x64xf32>
    %1433 = vector.extract_strided_slice %978 {offsets = [0, 256], sizes = [16, 64], strides = [1, 1]} : vector<16x384xf32> to vector<16x64xf32>
    %1434 = arith.addf %1432, %1433 : vector<16x64xf32>
    %c26_657 = arith.constant 26 : index
    %c0_658 = arith.constant 0 : index
    %1435 = vector.load %arg19[%c26_657, %c0_658] : memref<36x64xf32, #tpu.memory_space<vmem>>, vector<1x64xf32>
    %c27_659 = arith.constant 27 : index
    %c0_660 = arith.constant 0 : index
    %1436 = vector.load %arg19[%c27_659, %c0_660] : memref<36x64xf32, #tpu.memory_space<vmem>>, vector<1x64xf32>
    %cst_661 = arith.constant dense<0.000000e+00> : vector<16xf32>
    %1437 = vector.multi_reduction <add>, %1434, %cst_661 [1] : vector<16x64xf32> to vector<16xf32>
    %1438 = vector.shape_cast %1437 : vector<16xf32> to vector<16x1xf32>
    %cst_662 = arith.constant 6.400000e+01 : f32
    %1439 = vector.broadcast %cst_662 : f32 to vector<16x1xf32>
    %1440 = arith.divf %1438, %1439 : vector<16x1xf32>
    %1441 = arith.mulf %1434, %1434 : vector<16x64xf32>
    %cst_663 = arith.constant dense<0.000000e+00> : vector<16xf32>
    %1442 = vector.multi_reduction <add>, %1441, %cst_663 [1] : vector<16x64xf32> to vector<16xf32>
    %1443 = vector.shape_cast %1442 : vector<16xf32> to vector<16x1xf32>
    %cst_664 = arith.constant 6.400000e+01 : f32
    %1444 = vector.broadcast %cst_664 : f32 to vector<16x1xf32>
    %1445 = arith.divf %1443, %1444 : vector<16x1xf32>
    %1446 = arith.mulf %1440, %1440 : vector<16x1xf32>
    %1447 = arith.subf %1445, %1446 : vector<16x1xf32>
    %cst_665 = arith.constant 0.000000e+00 : f32
    %1448 = vector.broadcast %cst_665 : f32 to vector<16x1xf32>
    %1449 = arith.maximumf %1447, %1448 : vector<16x1xf32>
    %1450 = vector.broadcast %1440 : vector<16x1xf32> to vector<16x64xf32>
    %1451 = arith.subf %1434, %1450 : vector<16x64xf32>
    %cst_666 = arith.constant 9.99999974E-6 : f32
    %1452 = vector.broadcast %cst_666 : f32 to vector<16x1xf32>
    %1453 = arith.addf %1449, %1452 : vector<16x1xf32>
    %1454 = math.rsqrt %1453 : vector<16x1xf32>
    %1455 = vector.broadcast %1454 : vector<16x1xf32> to vector<16x64xf32>
    %1456 = arith.mulf %1451, %1455 : vector<16x64xf32>
    %1457 = vector.broadcast %1435 : vector<1x64xf32> to vector<16x64xf32>
    %1458 = arith.mulf %1456, %1457 : vector<16x64xf32>
    %1459 = vector.broadcast %1436 : vector<1x64xf32> to vector<16x64xf32>
    %1460 = arith.addf %1458, %1459 : vector<16x64xf32>
    %c4_667 = arith.constant 4 : index
    %c0_668 = arith.constant 0 : index
    %c0_669 = arith.constant 0 : index
    %1461 = vector.load %arg26[%c4_667, %c0_668, %c0_669] : memref<6x64x256xbf16, #tpu.memory_space<vmem>>, vector<1x64x256xbf16>
    %1462 = vector.shape_cast %1461 : vector<1x64x256xbf16> to vector<64x256xbf16>
    %1463 = arith.truncf %1460 : vector<16x64xf32> to vector<16x64xbf16>
    %cst_670 = arith.constant dense<0.000000e+00> : vector<16x256xf32>
    %1464 = tpu.matmul %1463, %1462, %cst_670 {dimension_numbers = #tpu.dot_dimension_numbers<[1], [0], [0], [1], [0, 0, 1, 1], [], []>} : vector<16x64xbf16>, vector<64x256xbf16>, vector<16x256xf32> -> vector<16x256xf32>
    %c4_671 = arith.constant 4 : index
    %c0_672 = arith.constant 0 : index
    %1465 = vector.load %arg17[%c4_671, %c0_672] : memref<6x256xf32, #tpu.memory_space<vmem>>, vector<1x256xf32>
    %1466 = vector.broadcast %1465 : vector<1x256xf32> to vector<16x256xf32>
    %1467 = arith.addf %1464, %1466 : vector<16x256xf32>
    %cst_673 = arith.constant 0.000000e+00 : f32
    %1468 = vector.broadcast %cst_673 : f32 to vector<16x256xf32>
    %1469 = arith.maximumf %1467, %1468 : vector<16x256xf32>
    %c4_674 = arith.constant 4 : index
    %c0_675 = arith.constant 0 : index
    %c0_676 = arith.constant 0 : index
    %1470 = vector.load %arg27[%c4_674, %c0_675, %c0_676] : memref<6x256x64xbf16, #tpu.memory_space<vmem>>, vector<1x256x64xbf16>
    %1471 = vector.shape_cast %1470 : vector<1x256x64xbf16> to vector<256x64xbf16>
    %1472 = arith.truncf %1469 : vector<16x256xf32> to vector<16x256xbf16>
    %cst_677 = arith.constant dense<0.000000e+00> : vector<16x64xf32>
    %1473 = tpu.matmul %1472, %1471, %cst_677 {dimension_numbers = #tpu.dot_dimension_numbers<[1], [0], [0], [1], [0, 0, 1, 1], [], []>} : vector<16x256xbf16>, vector<256x64xbf16>, vector<16x64xf32> -> vector<16x64xf32>
    %c4_678 = arith.constant 4 : index
    %c0_679 = arith.constant 0 : index
    %1474 = vector.load %arg18[%c4_678, %c0_679] : memref<6x64xf32, #tpu.memory_space<vmem>>, vector<1x64xf32>
    %1475 = vector.broadcast %1474 : vector<1x64xf32> to vector<16x64xf32>
    %1476 = arith.addf %1473, %1475 : vector<16x64xf32>
    %1477 = arith.addf %1460, %1476 : vector<16x64xf32>
    %c28_680 = arith.constant 28 : index
    %c0_681 = arith.constant 0 : index
    %1478 = vector.load %arg19[%c28_680, %c0_681] : memref<36x64xf32, #tpu.memory_space<vmem>>, vector<1x64xf32>
    %c29_682 = arith.constant 29 : index
    %c0_683 = arith.constant 0 : index
    %1479 = vector.load %arg19[%c29_682, %c0_683] : memref<36x64xf32, #tpu.memory_space<vmem>>, vector<1x64xf32>
    %cst_684 = arith.constant dense<0.000000e+00> : vector<16xf32>
    %1480 = vector.multi_reduction <add>, %1477, %cst_684 [1] : vector<16x64xf32> to vector<16xf32>
    %1481 = vector.shape_cast %1480 : vector<16xf32> to vector<16x1xf32>
    %cst_685 = arith.constant 6.400000e+01 : f32
    %1482 = vector.broadcast %cst_685 : f32 to vector<16x1xf32>
    %1483 = arith.divf %1481, %1482 : vector<16x1xf32>
    %1484 = arith.mulf %1477, %1477 : vector<16x64xf32>
    %cst_686 = arith.constant dense<0.000000e+00> : vector<16xf32>
    %1485 = vector.multi_reduction <add>, %1484, %cst_686 [1] : vector<16x64xf32> to vector<16xf32>
    %1486 = vector.shape_cast %1485 : vector<16xf32> to vector<16x1xf32>
    %cst_687 = arith.constant 6.400000e+01 : f32
    %1487 = vector.broadcast %cst_687 : f32 to vector<16x1xf32>
    %1488 = arith.divf %1486, %1487 : vector<16x1xf32>
    %1489 = arith.mulf %1483, %1483 : vector<16x1xf32>
    %1490 = arith.subf %1488, %1489 : vector<16x1xf32>
    %cst_688 = arith.constant 0.000000e+00 : f32
    %1491 = vector.broadcast %cst_688 : f32 to vector<16x1xf32>
    %1492 = arith.maximumf %1490, %1491 : vector<16x1xf32>
    %1493 = vector.broadcast %1483 : vector<16x1xf32> to vector<16x64xf32>
    %1494 = arith.subf %1477, %1493 : vector<16x64xf32>
    %cst_689 = arith.constant 9.99999974E-6 : f32
    %1495 = vector.broadcast %cst_689 : f32 to vector<16x1xf32>
    %1496 = arith.addf %1492, %1495 : vector<16x1xf32>
    %1497 = math.rsqrt %1496 : vector<16x1xf32>
    %1498 = vector.broadcast %1497 : vector<16x1xf32> to vector<16x64xf32>
    %1499 = arith.mulf %1494, %1498 : vector<16x64xf32>
    %1500 = vector.broadcast %1478 : vector<1x64xf32> to vector<16x64xf32>
    %1501 = arith.mulf %1499, %1500 : vector<16x64xf32>
    %1502 = vector.broadcast %1479 : vector<1x64xf32> to vector<16x64xf32>
    %1503 = arith.addf %1501, %1502 : vector<16x64xf32>
    %c5_690 = arith.constant 5 : index
    %c0_691 = arith.constant 0 : index
    %c0_692 = arith.constant 0 : index
    %1504 = vector.load %arg24[%c5_690, %c0_691, %c0_692] : memref<6x64x64xbf16, #tpu.memory_space<vmem>>, vector<1x64x64xbf16>
    %1505 = vector.shape_cast %1504 : vector<1x64x64xbf16> to vector<64x64xbf16>
    %1506 = arith.truncf %1503 : vector<16x64xf32> to vector<16x64xbf16>
    %cst_693 = arith.constant dense<0.000000e+00> : vector<16x64xf32>
    %1507 = tpu.matmul %1506, %1505, %cst_693 {dimension_numbers = #tpu.dot_dimension_numbers<[1], [0], [0], [1], [0, 0, 1, 1], [], []>} : vector<16x64xbf16>, vector<64x64xbf16>, vector<16x64xf32> -> vector<16x64xf32>
    %c5_694 = arith.constant 5 : index
    %c0_695 = arith.constant 0 : index
    %1508 = vector.load %arg15[%c5_694, %c0_695] : memref<6x64xf32, #tpu.memory_space<vmem>>, vector<1x64xf32>
    %1509 = vector.broadcast %1508 : vector<1x64xf32> to vector<16x64xf32>
    %1510 = arith.addf %1507, %1509 : vector<16x64xf32>
    %1511 = arith.addf %1503, %1510 : vector<16x64xf32>
    %c30_696 = arith.constant 30 : index
    %c0_697 = arith.constant 0 : index
    %1512 = vector.load %arg19[%c30_696, %c0_697] : memref<36x64xf32, #tpu.memory_space<vmem>>, vector<1x64xf32>
    %c31_698 = arith.constant 31 : index
    %c0_699 = arith.constant 0 : index
    %1513 = vector.load %arg19[%c31_698, %c0_699] : memref<36x64xf32, #tpu.memory_space<vmem>>, vector<1x64xf32>
    %cst_700 = arith.constant dense<0.000000e+00> : vector<16xf32>
    %1514 = vector.multi_reduction <add>, %1511, %cst_700 [1] : vector<16x64xf32> to vector<16xf32>
    %1515 = vector.shape_cast %1514 : vector<16xf32> to vector<16x1xf32>
    %cst_701 = arith.constant 6.400000e+01 : f32
    %1516 = vector.broadcast %cst_701 : f32 to vector<16x1xf32>
    %1517 = arith.divf %1515, %1516 : vector<16x1xf32>
    %1518 = arith.mulf %1511, %1511 : vector<16x64xf32>
    %cst_702 = arith.constant dense<0.000000e+00> : vector<16xf32>
    %1519 = vector.multi_reduction <add>, %1518, %cst_702 [1] : vector<16x64xf32> to vector<16xf32>
    %1520 = vector.shape_cast %1519 : vector<16xf32> to vector<16x1xf32>
    %cst_703 = arith.constant 6.400000e+01 : f32
    %1521 = vector.broadcast %cst_703 : f32 to vector<16x1xf32>
    %1522 = arith.divf %1520, %1521 : vector<16x1xf32>
    %1523 = arith.mulf %1517, %1517 : vector<16x1xf32>
    %1524 = arith.subf %1522, %1523 : vector<16x1xf32>
    %cst_704 = arith.constant 0.000000e+00 : f32
    %1525 = vector.broadcast %cst_704 : f32 to vector<16x1xf32>
    %1526 = arith.maximumf %1524, %1525 : vector<16x1xf32>
    %1527 = vector.broadcast %1517 : vector<16x1xf32> to vector<16x64xf32>
    %1528 = arith.subf %1511, %1527 : vector<16x64xf32>
    %cst_705 = arith.constant 9.99999974E-6 : f32
    %1529 = vector.broadcast %cst_705 : f32 to vector<16x1xf32>
    %1530 = arith.addf %1526, %1529 : vector<16x1xf32>
    %1531 = math.rsqrt %1530 : vector<16x1xf32>
    %1532 = vector.broadcast %1531 : vector<16x1xf32> to vector<16x64xf32>
    %1533 = arith.mulf %1528, %1532 : vector<16x64xf32>
    %1534 = vector.broadcast %1512 : vector<1x64xf32> to vector<16x64xf32>
    %1535 = arith.mulf %1533, %1534 : vector<16x64xf32>
    %1536 = vector.broadcast %1513 : vector<1x64xf32> to vector<16x64xf32>
    %1537 = arith.addf %1535, %1536 : vector<16x64xf32>
    %1538 = vector.extract_strided_slice %978 {offsets = [0, 320], sizes = [16, 64], strides = [1, 1]} : vector<16x384xf32> to vector<16x64xf32>
    %1539 = arith.addf %1537, %1538 : vector<16x64xf32>
    %c32_706 = arith.constant 32 : index
    %c0_707 = arith.constant 0 : index
    %1540 = vector.load %arg19[%c32_706, %c0_707] : memref<36x64xf32, #tpu.memory_space<vmem>>, vector<1x64xf32>
    %c33_708 = arith.constant 33 : index
    %c0_709 = arith.constant 0 : index
    %1541 = vector.load %arg19[%c33_708, %c0_709] : memref<36x64xf32, #tpu.memory_space<vmem>>, vector<1x64xf32>
    %cst_710 = arith.constant dense<0.000000e+00> : vector<16xf32>
    %1542 = vector.multi_reduction <add>, %1539, %cst_710 [1] : vector<16x64xf32> to vector<16xf32>
    %1543 = vector.shape_cast %1542 : vector<16xf32> to vector<16x1xf32>
    %cst_711 = arith.constant 6.400000e+01 : f32
    %1544 = vector.broadcast %cst_711 : f32 to vector<16x1xf32>
    %1545 = arith.divf %1543, %1544 : vector<16x1xf32>
    %1546 = arith.mulf %1539, %1539 : vector<16x64xf32>
    %cst_712 = arith.constant dense<0.000000e+00> : vector<16xf32>
    %1547 = vector.multi_reduction <add>, %1546, %cst_712 [1] : vector<16x64xf32> to vector<16xf32>
    %1548 = vector.shape_cast %1547 : vector<16xf32> to vector<16x1xf32>
    %cst_713 = arith.constant 6.400000e+01 : f32
    %1549 = vector.broadcast %cst_713 : f32 to vector<16x1xf32>
    %1550 = arith.divf %1548, %1549 : vector<16x1xf32>
    %1551 = arith.mulf %1545, %1545 : vector<16x1xf32>
    %1552 = arith.subf %1550, %1551 : vector<16x1xf32>
    %cst_714 = arith.constant 0.000000e+00 : f32
    %1553 = vector.broadcast %cst_714 : f32 to vector<16x1xf32>
    %1554 = arith.maximumf %1552, %1553 : vector<16x1xf32>
    %1555 = vector.broadcast %1545 : vector<16x1xf32> to vector<16x64xf32>
    %1556 = arith.subf %1539, %1555 : vector<16x64xf32>
    %cst_715 = arith.constant 9.99999974E-6 : f32
    %1557 = vector.broadcast %cst_715 : f32 to vector<16x1xf32>
    %1558 = arith.addf %1554, %1557 : vector<16x1xf32>
    %1559 = math.rsqrt %1558 : vector<16x1xf32>
    %1560 = vector.broadcast %1559 : vector<16x1xf32> to vector<16x64xf32>
    %1561 = arith.mulf %1556, %1560 : vector<16x64xf32>
    %1562 = vector.broadcast %1540 : vector<1x64xf32> to vector<16x64xf32>
    %1563 = arith.mulf %1561, %1562 : vector<16x64xf32>
    %1564 = vector.broadcast %1541 : vector<1x64xf32> to vector<16x64xf32>
    %1565 = arith.addf %1563, %1564 : vector<16x64xf32>
    %c5_716 = arith.constant 5 : index
    %c0_717 = arith.constant 0 : index
    %c0_718 = arith.constant 0 : index
    %1566 = vector.load %arg26[%c5_716, %c0_717, %c0_718] : memref<6x64x256xbf16, #tpu.memory_space<vmem>>, vector<1x64x256xbf16>
    %1567 = vector.shape_cast %1566 : vector<1x64x256xbf16> to vector<64x256xbf16>
    %1568 = arith.truncf %1565 : vector<16x64xf32> to vector<16x64xbf16>
    %cst_719 = arith.constant dense<0.000000e+00> : vector<16x256xf32>
    %1569 = tpu.matmul %1568, %1567, %cst_719 {dimension_numbers = #tpu.dot_dimension_numbers<[1], [0], [0], [1], [0, 0, 1, 1], [], []>} : vector<16x64xbf16>, vector<64x256xbf16>, vector<16x256xf32> -> vector<16x256xf32>
    %c5_720 = arith.constant 5 : index
    %c0_721 = arith.constant 0 : index
    %1570 = vector.load %arg17[%c5_720, %c0_721] : memref<6x256xf32, #tpu.memory_space<vmem>>, vector<1x256xf32>
    %1571 = vector.broadcast %1570 : vector<1x256xf32> to vector<16x256xf32>
    %1572 = arith.addf %1569, %1571 : vector<16x256xf32>
    %cst_722 = arith.constant 0.000000e+00 : f32
    %1573 = vector.broadcast %cst_722 : f32 to vector<16x256xf32>
    %1574 = arith.maximumf %1572, %1573 : vector<16x256xf32>
    %c5_723 = arith.constant 5 : index
    %c0_724 = arith.constant 0 : index
    %c0_725 = arith.constant 0 : index
    %1575 = vector.load %arg27[%c5_723, %c0_724, %c0_725] : memref<6x256x64xbf16, #tpu.memory_space<vmem>>, vector<1x256x64xbf16>
    %1576 = vector.shape_cast %1575 : vector<1x256x64xbf16> to vector<256x64xbf16>
    %1577 = arith.truncf %1574 : vector<16x256xf32> to vector<16x256xbf16>
    %cst_726 = arith.constant dense<0.000000e+00> : vector<16x64xf32>
    %1578 = tpu.matmul %1577, %1576, %cst_726 {dimension_numbers = #tpu.dot_dimension_numbers<[1], [0], [0], [1], [0, 0, 1, 1], [], []>} : vector<16x256xbf16>, vector<256x64xbf16>, vector<16x64xf32> -> vector<16x64xf32>
    %c5_727 = arith.constant 5 : index
    %c0_728 = arith.constant 0 : index
    %1579 = vector.load %arg18[%c5_727, %c0_728] : memref<6x64xf32, #tpu.memory_space<vmem>>, vector<1x64xf32>
    %1580 = vector.broadcast %1579 : vector<1x64xf32> to vector<16x64xf32>
    %1581 = arith.addf %1578, %1580 : vector<16x64xf32>
    %1582 = arith.addf %1565, %1581 : vector<16x64xf32>
    %c34_729 = arith.constant 34 : index
    %c0_730 = arith.constant 0 : index
    %1583 = vector.load %arg19[%c34_729, %c0_730] : memref<36x64xf32, #tpu.memory_space<vmem>>, vector<1x64xf32>
    %c35_731 = arith.constant 35 : index
    %c0_732 = arith.constant 0 : index
    %1584 = vector.load %arg19[%c35_731, %c0_732] : memref<36x64xf32, #tpu.memory_space<vmem>>, vector<1x64xf32>
    %cst_733 = arith.constant dense<0.000000e+00> : vector<16xf32>
    %1585 = vector.multi_reduction <add>, %1582, %cst_733 [1] : vector<16x64xf32> to vector<16xf32>
    %1586 = vector.shape_cast %1585 : vector<16xf32> to vector<16x1xf32>
    %cst_734 = arith.constant 6.400000e+01 : f32
    %1587 = vector.broadcast %cst_734 : f32 to vector<16x1xf32>
    %1588 = arith.divf %1586, %1587 : vector<16x1xf32>
    %1589 = arith.mulf %1582, %1582 : vector<16x64xf32>
    %cst_735 = arith.constant dense<0.000000e+00> : vector<16xf32>
    %1590 = vector.multi_reduction <add>, %1589, %cst_735 [1] : vector<16x64xf32> to vector<16xf32>
    %1591 = vector.shape_cast %1590 : vector<16xf32> to vector<16x1xf32>
    %cst_736 = arith.constant 6.400000e+01 : f32
    %1592 = vector.broadcast %cst_736 : f32 to vector<16x1xf32>
    %1593 = arith.divf %1591, %1592 : vector<16x1xf32>
    %1594 = arith.mulf %1588, %1588 : vector<16x1xf32>
    %1595 = arith.subf %1593, %1594 : vector<16x1xf32>
    %cst_737 = arith.constant 0.000000e+00 : f32
    %1596 = vector.broadcast %cst_737 : f32 to vector<16x1xf32>
    %1597 = arith.maximumf %1595, %1596 : vector<16x1xf32>
    %1598 = vector.broadcast %1588 : vector<16x1xf32> to vector<16x64xf32>
    %1599 = arith.subf %1582, %1598 : vector<16x64xf32>
    %cst_738 = arith.constant 9.99999974E-6 : f32
    %1600 = vector.broadcast %cst_738 : f32 to vector<16x1xf32>
    %1601 = arith.addf %1597, %1600 : vector<16x1xf32>
    %1602 = math.rsqrt %1601 : vector<16x1xf32>
    %1603 = vector.broadcast %1602 : vector<16x1xf32> to vector<16x64xf32>
    %1604 = arith.mulf %1599, %1603 : vector<16x64xf32>
    %1605 = vector.broadcast %1583 : vector<1x64xf32> to vector<16x64xf32>
    %1606 = arith.mulf %1604, %1605 : vector<16x64xf32>
    %1607 = vector.broadcast %1584 : vector<1x64xf32> to vector<16x64xf32>
    %1608 = arith.addf %1606, %1607 : vector<16x64xf32>
    %c2_739 = arith.constant 2 : index
    %c0_740 = arith.constant 0 : index
    %1609 = vector.load %arg20[%c2_739, %c0_740] : memref<4x64xf32, #tpu.memory_space<vmem>>, vector<1x64xf32>
    %c3_741 = arith.constant 3 : index
    %c0_742 = arith.constant 0 : index
    %1610 = vector.load %arg20[%c3_741, %c0_742] : memref<4x64xf32, #tpu.memory_space<vmem>>, vector<1x64xf32>
    %cst_743 = arith.constant dense<0.000000e+00> : vector<16xf32>
    %1611 = vector.multi_reduction <add>, %1608, %cst_743 [1] : vector<16x64xf32> to vector<16xf32>
    %1612 = vector.shape_cast %1611 : vector<16xf32> to vector<16x1xf32>
    %cst_744 = arith.constant 6.400000e+01 : f32
    %1613 = vector.broadcast %cst_744 : f32 to vector<16x1xf32>
    %1614 = arith.divf %1612, %1613 : vector<16x1xf32>
    %1615 = arith.mulf %1608, %1608 : vector<16x64xf32>
    %cst_745 = arith.constant dense<0.000000e+00> : vector<16xf32>
    %1616 = vector.multi_reduction <add>, %1615, %cst_745 [1] : vector<16x64xf32> to vector<16xf32>
    %1617 = vector.shape_cast %1616 : vector<16xf32> to vector<16x1xf32>
    %cst_746 = arith.constant 6.400000e+01 : f32
    %1618 = vector.broadcast %cst_746 : f32 to vector<16x1xf32>
    %1619 = arith.divf %1617, %1618 : vector<16x1xf32>
    %1620 = arith.mulf %1614, %1614 : vector<16x1xf32>
    %1621 = arith.subf %1619, %1620 : vector<16x1xf32>
    %cst_747 = arith.constant 0.000000e+00 : f32
    %1622 = vector.broadcast %cst_747 : f32 to vector<16x1xf32>
    %1623 = arith.maximumf %1621, %1622 : vector<16x1xf32>
    %1624 = vector.broadcast %1614 : vector<16x1xf32> to vector<16x64xf32>
    %1625 = arith.subf %1608, %1624 : vector<16x64xf32>
    %cst_748 = arith.constant 9.99999974E-6 : f32
    %1626 = vector.broadcast %cst_748 : f32 to vector<16x1xf32>
    %1627 = arith.addf %1623, %1626 : vector<16x1xf32>
    %1628 = math.rsqrt %1627 : vector<16x1xf32>
    %1629 = vector.broadcast %1628 : vector<16x1xf32> to vector<16x64xf32>
    %1630 = arith.mulf %1625, %1629 : vector<16x64xf32>
    %1631 = vector.broadcast %1609 : vector<1x64xf32> to vector<16x64xf32>
    %1632 = arith.mulf %1630, %1631 : vector<16x64xf32>
    %1633 = vector.broadcast %1610 : vector<1x64xf32> to vector<16x64xf32>
    %1634 = arith.addf %1632, %1633 : vector<16x64xf32>
    %c0_749 = arith.constant 0 : index
    %c0_750 = arith.constant 0 : index
    %1635 = vector.load %arg21[%c0_749, %c0_750] : memref<1x64xf32, #tpu.memory_space<vmem>>, vector<1x64xf32>
    %1636 = vector.broadcast %1635 : vector<1x64xf32> to vector<16x64xf32>
    %1637 = arith.mulf %1634, %1636 : vector<16x64xf32>
    %cst_751 = arith.constant dense<0.000000e+00> : vector<16xf32>
    %1638 = vector.multi_reduction <add>, %1637, %cst_751 [1] : vector<16x64xf32> to vector<16xf32>
    %1639 = vector.shape_cast %1638 : vector<16xf32> to vector<16x1xf32>
    %c0_752 = arith.constant 0 : index
    %c0_753 = arith.constant 0 : index
    %1640 = vector.load %arg22[%c0_752, %c0_753] : memref<1x1xf32, #tpu.memory_space<vmem>>, vector<1x1xf32>
    %1641 = vector.broadcast %1640 : vector<1x1xf32> to vector<16x1xf32>
    %1642 = arith.addf %1639, %1641 : vector<16x1xf32>
    %c0_754 = arith.constant 0 : index
    %c0_755 = arith.constant 0 : index
    %1643 = vector.load %arg23[%c0_754, %c0_755] : memref<16x1xf32, #tpu.memory_space<vmem>>, vector<16x1xf32>
    tpu.vector_store %arg23[%c0_754, %c0_755], %1642 {strides = array<i32>} : memref<16x1xf32, #tpu.memory_space<vmem>>, vector<16x1xf32>,
    return
  }
  func.func @transform_0(%arg0: i32) -> (i32, i32) {
    %c0_i32 = arith.constant 0 : i32
    %c0_i32_0 = arith.constant 0 : i32
    return %arg0, %c0_i32 : i32, i32
  }
  func.func @transform_1(%arg0: i32) -> (i32, i32) {
    %c0_i32 = arith.constant 0 : i32
    %c0_i32_0 = arith.constant 0 : i32
    %c0_i32_1 = arith.constant 0 : i32
    return %c0_i32, %c0_i32_0 : i32, i32
  }
  func.func @transform_2(%arg0: i32) -> (i32, i32) {
    %c0_i32 = arith.constant 0 : i32
    %c0_i32_0 = arith.constant 0 : i32
    %c0_i32_1 = arith.constant 0 : i32
    return %c0_i32, %c0_i32_0 : i32, i32
  }
  func.func @transform_3(%arg0: i32) -> (i32, i32, i32) {
    %c0_i32 = arith.constant 0 : i32
    %c0_i32_0 = arith.constant 0 : i32
    %c0_i32_1 = arith.constant 0 : i32
    %c0_i32_2 = arith.constant 0 : i32
    return %c0_i32, %c0_i32_0, %c0_i32_1 : i32, i32, i32
  }
  func.func @transform_4(%arg0: i32) -> (i32, i32, i32) {
    %c0_i32 = arith.constant 0 : i32
    %c0_i32_0 = arith.constant 0 : i32
    %c0_i32_1 = arith.constant 0 : i32
    %c0_i32_2 = arith.constant 0 : i32
    return %c0_i32, %c0_i32_0, %c0_i32_1 : i32, i32, i32
  }
  func.func @transform_5(%arg0: i32) -> (i32, i32, i32) {
    %c0_i32 = arith.constant 0 : i32
    %c0_i32_0 = arith.constant 0 : i32
    %c0_i32_1 = arith.constant 0 : i32
    %c0_i32_2 = arith.constant 0 : i32
    return %c0_i32, %c0_i32_0, %c0_i32_1 : i32, i32, i32
  }
  func.func @transform_6(%arg0: i32) -> (i32, i32) {
    %c0_i32 = arith.constant 0 : i32
    %c0_i32_0 = arith.constant 0 : i32
    %c0_i32_1 = arith.constant 0 : i32
    return %c0_i32, %c0_i32_0 : i32, i32
  }
  func.func @transform_7(%arg0: i32) -> (i32, i32) {
    %c0_i32 = arith.constant 0 : i32
    %c0_i32_0 = arith.constant 0 : i32
    %c0_i32_1 = arith.constant 0 : i32
    return %c0_i32, %c0_i32_0 : i32, i32
  }
  func.func @transform_8(%arg0: i32) -> (i32, i32) {
    %c0_i32 = arith.constant 0 : i32
    %c0_i32_0 = arith.constant 0 : i32
    %c0_i32_1 = arith.constant 0 : i32
    return %c0_i32, %c0_i32_0 : i32, i32
  }
  func.func @transform_9(%arg0: i32) -> (i32, i32) {
    %c0_i32 = arith.constant 0 : i32
    %c0_i32_0 = arith.constant 0 : i32
    %c0_i32_1 = arith.constant 0 : i32
    return %c0_i32, %c0_i32_0 : i32, i32
  }
  func.func @transform_14(%arg0: i32) -> (i32, i32) {
    %c0_i32 = arith.constant 0 : i32
    %c0_i32_0 = arith.constant 0 : i32
    %c0_i32_1 = arith.constant 0 : i32
    return %c0_i32, %c0_i32_0 : i32, i32
  }
  func.func @transform_15(%arg0: i32) -> (i32, i32) {
    %c0_i32 = arith.constant 0 : i32
    %c0_i32_0 = arith.constant 0 : i32
    %c0_i32_1 = arith.constant 0 : i32
    return %c0_i32, %c0_i32_0 : i32, i32
  }
  func.func @transform_16(%arg0: i32) -> (i32, i32) {
    %c0_i32 = arith.constant 0 : i32
    %c0_i32_0 = arith.constant 0 : i32
    %c0_i32_1 = arith.constant 0 : i32
    return %c0_i32, %c0_i32_0 : i32, i32
  }
  func.func @transform_17(%arg0: i32) -> (i32, i32) {
    %c0_i32 = arith.constant 0 : i32
    %c0_i32_0 = arith.constant 0 : i32
    %c0_i32_1 = arith.constant 0 : i32
    return %c0_i32, %c0_i32_0 : i32, i32
  }
  func.func @transform_18(%arg0: i32) -> (i32, i32) {
    %c0_i32 = arith.constant 0 : i32
    %c0_i32_0 = arith.constant 0 : i32
    %c0_i32_1 = arith.constant 0 : i32
    return %c0_i32, %c0_i32_0 : i32, i32
  }
  func.func @transform_19(%arg0: i32) -> (i32, i32) {
    %c0_i32 = arith.constant 0 : i32
    %c0_i32_0 = arith.constant 0 : i32
    %c0_i32_1 = arith.constant 0 : i32
    return %c0_i32, %c0_i32_0 : i32, i32
  }
  func.func @transform_20(%arg0: i32) -> (i32, i32) {
    %c0_i32 = arith.constant 0 : i32
    %c0_i32_0 = arith.constant 0 : i32
    %c0_i32_1 = arith.constant 0 : i32
    return %c0_i32, %c0_i32_0 : i32, i32
  }
  func.func @transform_21(%arg0: i32) -> (i32, i32) {
    %c0_i32 = arith.constant 0 : i32
    %c0_i32_0 = arith.constant 0 : i32
    %c0_i32_1 = arith.constant 0 : i32
    return %c0_i32, %c0_i32_0 : i32, i32
  }
  func.func @transform_22(%arg0: i32) -> (i32, i32) {
    %c0_i32 = arith.constant 0 : i32
    %c0_i32_0 = arith.constant 0 : i32
    return %arg0, %c0_i32 : i32, i32
  }
}

</mosaic_0001>

<bundles_post_ra>
// kernel: tpu_custom_call.1
= control target key start
LH: loop header
LB: loop body
LE: loop exit
PB: predicated region body
PF: predicated region fallthrough
CT: control target
= control target key end

     0   :  { %s15445_s0 = inlined_call_operand.vmem [shape: f32[16,16], index: 0, kind: input, shape index: {}]   ;;  %s15446_s1 = inlined_call_operand.vmem [shape: bf16[16,64], index: 1, kind: input, shape index: {}]   ;;  %s15447_s2 = inlined_call_operand.vmem [shape: f32[1,64], index: 2, kind: input, shape index: {}]   ;;  %s15448_s3 = inlined_call_operand.vmem [shape: bf16[12,64,64], index: 3, kind: input, shape index: {}]   ;;  %s15449_s4 = inlined_call_operand.vmem [shape: bf16[12,64,256], index: 4, kind: input, shape index: {}]   ;;  %s15450_s5 = inlined_call_operand.vmem [shape: bf16[12,256,64], index: 5, kind: input, shape index: {}]   ;;  %s15451_s6 = inlined_call_operand.vmem [shape: f32[12,64], index: 6, kind: input, shape index: {}]   ;;  %s15452_s7 = inlined_call_operand.vmem [shape: f32[12,256], index: 7, kind: input, shape index: {}]   ;;  %s15453_s8 = inlined_call_operand.vmem [shape: f32[12,64], index: 8, kind: input, shape index: {}]   ;;  %s15454_s9 = inlined_call_operand.vmem [shape: f32[48,64], index: 9, kind: input, shape index: {}]   ;;  %s15455_s11 = inlined_call_operand.vmem [shape: bf16[64,384], index: 11, kind: input, shape index: {}]   ;;  %s15456_s12 = inlined_call_operand.vmem [shape: bf16[6,64,256], index: 12, kind: input, shape index: {}]   ;;  %s15457_s13 = inlined_call_operand.vmem [shape: bf16[6,256,64], index: 13, kind: input, shape index: {}]   ;;  %s15458_s14 = inlined_call_operand.vmem [shape: f32[6,64], index: 14, kind: input, shape index: {}]   ;;  %s15459_s15 = inlined_call_operand.vmem [shape: f32[1,384], index: 15, kind: input, shape index: {}]   ;;  %s15460_s16 = inlined_call_operand.vmem [shape: f32[6,256], index: 16, kind: input, shape index: {}]   ;;  %s15461_s17 = inlined_call_operand.vmem [shape: f32[6,64], index: 17, kind: input, shape index: {}]   ;;  %s15462_s18 = inlined_call_operand.vmem [shape: f32[36,64], index: 18, kind: input, shape index: {}]   ;;  %s15463_s19 = inlined_call_operand.vmem [shape: f32[4,64], index: 19, kind: input, shape index: {}]   ;;  %s15464_s20 = inlined_call_operand.vmem [shape: f32[1,64], index: 20, kind: input, shape index: {}]   ;;  %s15465_s21 = inlined_call_operand.<no memory space> [shape: f32[1,1], index: 21, kind: input, shape index: {}]   ;;  %s15466_s22 = inlined_call_operand.vmem [shape: f32[16,1], index: 22, kind: output, shape index: {}]   ;;  %s15467_s10 = inlined_call_operand.vmem [shape: bf16[6,64,64], index: 10, kind: input, shape index: {}]  }
   0x1   :  { %15491 = sst [smem:[#allocation30_spill]] %s15445_s0  ;;  %v27_v0 = vstv %s15465_s21  ;;  %v99_v1 = vld [vmem:[%s15467_s10] sm:$0xff]  ;;  %v101_v2 = vld [vmem:[%s15467_s10 + $0x8] sm:$0xff]  ;;  %v103_v3 = vld [vmem:[%s15467_s10 + $0x10] sm:$0xff] }
   0x2   :  { %15492 = sst [smem:[#allocation31_spill]] %s15446_s1  ;;  %28 = vst [vmem:[#allocation7] sm:$0x1] %v27_v0  ;;  %100 = vst [vmem:[#allocation2] sm:$0xff] %v99_v1  ;;  %v105_v4 = vld [vmem:[%s15467_s10 + $0x18] sm:$0xff]  ;;  %v107_v5 = vld [vmem:[%s15467_s10 + $0x20] sm:$0xff] }
   0x3   :  { %15493 = sst [smem:[#allocation32_spill]] %s15447_s2  ;;  %102 = vst [vmem:[#allocation2 + $0x8] sm:$0xff] %v101_v2  ;;  %104 = vst [vmem:[#allocation2 + $0x10] sm:$0xff] %v103_v3  ;;  %v109_v6 = vld [vmem:[%s15467_s10 + $0x28] sm:$0xff]  ;;  %v111_v7 = vld [vmem:[%s15467_s10 + $0x30] sm:$0xff] }
   0x4   :  { %15494 = sst [smem:[#allocation33_spill]] %s15448_s3  ;;  %106 = vst [vmem:[#allocation2 + $0x18] sm:$0xff] %v105_v4  ;;  %108 = vst [vmem:[#allocation2 + $0x20] sm:$0xff] %v107_v5  ;;  %v113_v8 = vld [vmem:[%s15467_s10 + $0x38] sm:$0xff]  ;;  %v115_v9 = vld [vmem:[%s15467_s10 + $0x40] sm:$0xff] }
   0x5   :  { %15495 = sst [smem:[#allocation34_spill]] %s15449_s4  ;;  %110 = vst [vmem:[#allocation2 + $0x28] sm:$0xff] %v109_v6  ;;  %112 = vst [vmem:[#allocation2 + $0x30] sm:$0xff] %v111_v7  ;;  %v117_v10 = vld [vmem:[%s15467_s10 + $0x48] sm:$0xff]  ;;  %v119_v11 = vld [vmem:[%s15467_s10 + $0x50] sm:$0xff] }
   0x6   :  { %15496 = sst [smem:[#allocation35_spill]] %s15450_s5  ;;  %114 = vst [vmem:[#allocation2 + $0x38] sm:$0xff] %v113_v8  ;;  %116 = vst [vmem:[#allocation2 + $0x40] sm:$0xff] %v115_v9  ;;  %v121_v12 = vld [vmem:[%s15467_s10 + $0x58] sm:$0xff]  ;;  %v123_v13 = vld [vmem:[%s15467_s10 + $0x60] sm:$0xff] }
   0x7   :  { %15497 = sst [smem:[#allocation36_spill]] %s15451_s6  ;;  %118 = vst [vmem:[#allocation2 + $0x48] sm:$0xff] %v117_v10  ;;  %120 = vst [vmem:[#allocation2 + $0x50] sm:$0xff] %v119_v11  ;;  %v125_v14 = vld [vmem:[%s15467_s10 + $0x68] sm:$0xff]  ;;  %v127_v15 = vld [vmem:[%s15467_s10 + $0x70] sm:$0xff] }
   0x8   :  { %122 = vst [vmem:[#allocation2 + $0x58] sm:$0xff] %v121_v12  ;;  %124 = vst [vmem:[#allocation2 + $0x60] sm:$0xff] %v123_v13  ;;  %v129_v16 = vld [vmem:[%s15467_s10 + $0x78] sm:$0xff]  ;;  %v131_v17 = vld [vmem:[%s15467_s10 + $0x80] sm:$0xff] }
   0x9   :  { %126 = vst [vmem:[#allocation2 + $0x68] sm:$0xff] %v125_v14  ;;  %128 = vst [vmem:[#allocation2 + $0x70] sm:$0xff] %v127_v15  ;;  %v133_v18 = vld [vmem:[%s15467_s10 + $0x88] sm:$0xff]  ;;  %v135_v19 = vld [vmem:[%s15467_s10 + $0x90] sm:$0xff] }
   0xa   :  { %130 = vst [vmem:[#allocation2 + $0x78] sm:$0xff] %v129_v16  ;;  %132 = vst [vmem:[#allocation2 + $0x80] sm:$0xff] %v131_v17  ;;  %v137_v20 = vld [vmem:[%s15467_s10 + $0x98] sm:$0xff]  ;;  %v139_v21 = vld [vmem:[%s15467_s10 + $0xa0] sm:$0xff] }
   0xb   :  { %134 = vst [vmem:[#allocation2 + $0x88] sm:$0xff] %v133_v18  ;;  %136 = vst [vmem:[#allocation2 + $0x90] sm:$0xff] %v135_v19  ;;  %v141_v22 = vld [vmem:[%s15467_s10 + $0xa8] sm:$0xff]  ;;  %v143_v23 = vld [vmem:[%s15467_s10 + $0xb0] sm:$0xff] }
   0xc   :  { %138 = vst [vmem:[#allocation2 + $0x98] sm:$0xff] %v137_v20  ;;  %140 = vst [vmem:[#allocation2 + $0xa0] sm:$0xff] %v139_v21  ;;  %v145_v24 = vld [vmem:[%s15467_s10 + $0xb8] sm:$0xff] }
   0xd   :  { %142 = vst [vmem:[#allocation2 + $0xa8] sm:$0xff] %v141_v22  ;;  %144 = vst [vmem:[#allocation2 + $0xb0] sm:$0xff] %v143_v23 }
   0xe   :  { %146 = vst [vmem:[#allocation2 + $0xb8] sm:$0xff] %v145_v24 }
   0xf   :  { %154 = vsyncadd [#allocation6], 3072  ;;  %v189_v25 = vld [vmem:[%s15455_s11] sm:$0xff]  ;;  %v191_v26 = vld [vmem:[%s15455_s11 + $0x8] sm:$0xff] }
  0x10   :  { %190 = vst [vmem:[#allocation3] sm:$0xff] %v189_v25  ;;  %192 = vst [vmem:[#allocation3 + $0x8] sm:$0xff] %v191_v26  ;;  %v193_v27 = vld [vmem:[%s15455_s11 + $0x10] sm:$0xff]  ;;  %v195_v28 = vld [vmem:[%s15455_s11 + $0x18] sm:$0xff] }
  0x11   :  { %v197_v29 = vld [vmem:[%s15455_s11 + $0x20] sm:$0xff]  ;;  %194 = vst [vmem:[#allocation3 + $0x10] sm:$0xff] %v193_v27  ;;  %196 = vst [vmem:[#allocation3 + $0x18] sm:$0xff] %v195_v28  ;;  %v199_v30 = vld [vmem:[%s15455_s11 + $0x28] sm:$0xff] }
  0x12   :  { %198 = vst [vmem:[#allocation3 + $0x20] sm:$0xff] %v197_v29  ;;  %v201_v31 = vld [vmem:[%s15455_s11 + $0x30] sm:$0xff]  ;;  %v203_v32 = vld [vmem:[%s15455_s11 + $0x38] sm:$0xff]  ;;  %200 = vst [vmem:[#allocation3 + $0x28] sm:$0xff] %v199_v30 }
  0x13   :  { %202 = vst [vmem:[#allocation3 + $0x30] sm:$0xff] %v201_v31  ;;  %204 = vst [vmem:[#allocation3 + $0x38] sm:$0xff] %v203_v32  ;;  %v205_v33 = vld [vmem:[%s15455_s11 + $0x40] sm:$0xff]  ;;  %v207_v34 = vld [vmem:[%s15455_s11 + $0x48] sm:$0xff] }
  0x14   :  { %v209_v35 = vld [vmem:[%s15455_s11 + $0x50] sm:$0xff]  ;;  %206 = vst [vmem:[#allocation3 + $0x40] sm:$0xff] %v205_v33  ;;  %208 = vst [vmem:[#allocation3 + $0x48] sm:$0xff] %v207_v34  ;;  %v211_v36 = vld [vmem:[%s15455_s11 + $0x58] sm:$0xff] }
  0x15   :  { %210 = vst [vmem:[#allocation3 + $0x50] sm:$0xff] %v209_v35  ;;  %212 = vst [vmem:[#allocation3 + $0x58] sm:$0xff] %v211_v36 }
  0x16   :  { %220 = vsyncadd [#allocation6 + $0x1], 1536  ;;  %v12684_v37 = vld [vmem:[%s15456_s12] sm:$0xff]  ;;  %v12689_v38 = vld [vmem:[%s15456_s12 + $0x8] sm:$0xff] }
  0x17   :  { %v12694_v39 = vld [vmem:[%s15456_s12 + $0x10] sm:$0xff]  ;;  %v12699_v40 = vld [vmem:[%s15456_s12 + $0x18] sm:$0xff]  ;;  %v12704_v41 = vld [vmem:[%s15456_s12 + $0x20] sm:$0xff] }
  0x18   :  { %v12709_v42 = vld [vmem:[%s15456_s12 + $0x28] sm:$0xff]  ;;  %v12714_v43 = vld [vmem:[%s15456_s12 + $0x30] sm:$0xff]  ;;  %v12719_v44 = vld [vmem:[%s15456_s12 + $0x38] sm:$0xff] }
  0x19   :  { %v12724_v45 = vld [vmem:[%s15456_s12 + $0x40] sm:$0xff]  ;;  %v12729_v46 = vld [vmem:[%s15456_s12 + $0x48] sm:$0xff]  ;;  %v12734_v47 = vld [vmem:[%s15456_s12 + $0x50] sm:$0xff] }
  0x1a   :  { %v12739_v48 = vld [vmem:[%s15456_s12 + $0x58] sm:$0xff]  ;;  %v12744_v49 = vld [vmem:[%s15456_s12 + $0x60] sm:$0xff]  ;;  %v12749_v50 = vld [vmem:[%s15456_s12 + $0x68] sm:$0xff] }
  0x1b   :  { %v12754_v51 = vld [vmem:[%s15456_s12 + $0x70] sm:$0xff]  ;;  %v12759_v52 = vld [vmem:[%s15456_s12 + $0x78] sm:$0xff]  ;;  %v12764_v53 = vld [vmem:[%s15456_s12 + $0x80] sm:$0xff] }
  0x1c   :  { %v12769_v54 = vld [vmem:[%s15456_s12 + $0x88] sm:$0xff]  ;;  %v12774_v55 = vld [vmem:[%s15456_s12 + $0x90] sm:$0xff]  ;;  %v12779_v56 = vld [vmem:[%s15456_s12 + $0x98] sm:$0xff] }
  0x1d   :  { %v12784_v57 = vld [vmem:[%s15456_s12 + $0xa0] sm:$0xff]  ;;  %v12789_v58 = vld [vmem:[%s15456_s12 + $0xa8] sm:$0xff]  ;;  %v12794_v59 = vld [vmem:[%s15456_s12 + $0xb0] sm:$0xff] }
  0x1e   :  { %v12799_v60 = vld [vmem:[%s15456_s12 + $0xb8] sm:$0xff]  ;;  %v12804_v61 = vld [vmem:[%s15456_s12 + $0xc0] sm:$0xff]  ;;  %v12809_v62 = vld [vmem:[%s15456_s12 + $0xc8] sm:$0xff] }
  0x1f   :  { %v12814_v63 = vld [vmem:[%s15456_s12 + $0xd0] sm:$0xff]  ;;  %v12819_v0 = vld [vmem:[%s15456_s12 + $0xd8] sm:$0xff]  ;;  %v12824_v1 = vld [vmem:[%s15456_s12 + $0xe0] sm:$0xff] }
  0x20   :  { %v12829_v2 = vld [vmem:[%s15456_s12 + $0xe8] sm:$0xff]  ;;  %v12834_v3 = vld [vmem:[%s15456_s12 + $0xf0] sm:$0xff]  ;;  %v12839_v4 = vld [vmem:[%s15456_s12 + $0xf8] sm:$0xff] }
  0x21   :  { %v12844_v5 = vld [vmem:[%s15456_s12 + $0x100] sm:$0xff]  ;;  %v12849_v6 = vld [vmem:[%s15456_s12 + $0x108] sm:$0xff]  ;;  %v12854_v7 = vld [vmem:[%s15456_s12 + $0x110] sm:$0xff] }
  0x22   :  { %15498 = vst [vmem:[#allocation16_spill] sm:$0xff] %v12844_v5  ;;  %15499 = vst [vmem:[#allocation17_spill] sm:$0xff] %v12849_v6  ;;  %v12859_v8 = vld [vmem:[%s15456_s12 + $0x118] sm:$0xff]  ;;  %v12864_v9 = vld [vmem:[%s15456_s12 + $0x120] sm:$0xff] }
  0x23   :  { %15500 = vst [vmem:[#allocation18_spill] sm:$0xff] %v12854_v7  ;;  %15501 = vst [vmem:[#allocation19_spill] sm:$0xff] %v12859_v8  ;;  %v12869_v10 = vld [vmem:[%s15456_s12 + $0x128] sm:$0xff]  ;;  %v12874_v11 = vld [vmem:[%s15456_s12 + $0x130] sm:$0xff] }
  0x24   :  { %15502 = vst [vmem:[#allocation20_spill] sm:$0xff] %v12864_v9  ;;  %15503 = vst [vmem:[#allocation21_spill] sm:$0xff] %v12869_v10  ;;  %v12879_v12 = vld [vmem:[%s15456_s12 + $0x138] sm:$0xff]  ;;  %v12884_v13 = vld [vmem:[%s15456_s12 + $0x140] sm:$0xff] }
  0x25   :  { %15504 = vst [vmem:[#allocation22_spill] sm:$0xff] %v12884_v13  ;;  %v12889_v14 = vld [vmem:[%s15456_s12 + $0x148] sm:$0xff]  ;;  %v12894_v15 = vld [vmem:[%s15456_s12 + $0x150] sm:$0xff]  ;;  %v12899_v16 = vld [vmem:[%s15456_s12 + $0x158] sm:$0xff] }
  0x26   :  { %15505 = vst [vmem:[#allocation23_spill] sm:$0xff] %v12889_v14  ;;  %15506 = vst [vmem:[#allocation24_spill] sm:$0xff] %v12894_v15  ;;  %v12904_v17 = vld [vmem:[%s15456_s12 + $0x160] sm:$0xff]  ;;  %v12909_v18 = vld [vmem:[%s15456_s12 + $0x168] sm:$0xff] }
  0x27   :  { %15507 = vst [vmem:[#allocation25_spill] sm:$0xff] %v12899_v16  ;;  %15508 = vst [vmem:[#allocation26_spill] sm:$0xff] %v12904_v17  ;;  %v12914_v19 = vld [vmem:[%s15456_s12 + $0x170] sm:$0xff]  ;;  %v12919_v20 = vld [vmem:[%s15456_s12 + $0x178] sm:$0xff] }
  0x28   :  { %15509 = vst [vmem:[#allocation27_spill] sm:$0xff] %v12909_v18  ;;  %15510 = vst [vmem:[#allocation28_spill] sm:$0xff] %v12914_v19 }
  0x29   :  { %15511 = vst [vmem:[#allocation29_spill] sm:$0xff] %v12919_v20 }
  0x2a   :  { %358 = vsyncadd [#allocation6 + $0x2], 6144  ;;  %v393_v21 = vld [vmem:[%s15457_s13] sm:$0xff]  ;;  %v395_v22 = vld [vmem:[%s15457_s13 + $0x8] sm:$0xff] }
  0x2b   :  { %394 = vst [vmem:[#allocation5] sm:$0xff] %v393_v21  ;;  %396 = vst [vmem:[#allocation5 + $0x8] sm:$0xff] %v395_v22  ;;  %v397_v23 = vld [vmem:[%s15457_s13 + $0x10] sm:$0xff]  ;;  %v399_v24 = vld [vmem:[%s15457_s13 + $0x18] sm:$0xff] }
  0x2c   :  { %v401_v25 = vld [vmem:[%s15457_s13 + $0x20] sm:$0xff]  ;;  %398 = vst [vmem:[#allocation5 + $0x10] sm:$0xff] %v397_v23  ;;  %400 = vst [vmem:[#allocation5 + $0x18] sm:$0xff] %v399_v24  ;;  %v403_v26 = vld [vmem:[%s15457_s13 + $0x28] sm:$0xff] }
  0x2d   :  { %402 = vst [vmem:[#allocation5 + $0x20] sm:$0xff] %v401_v25  ;;  %v405_v27 = vld [vmem:[%s15457_s13 + $0x30] sm:$0xff]  ;;  %v407_v28 = vld [vmem:[%s15457_s13 + $0x38] sm:$0xff]  ;;  %404 = vst [vmem:[#allocation5 + $0x28] sm:$0xff] %v403_v26 }
  0x2e   :  { %406 = vst [vmem:[#allocation5 + $0x30] sm:$0xff] %v405_v27  ;;  %408 = vst [vmem:[#allocation5 + $0x38] sm:$0xff] %v407_v28  ;;  %v409_v29 = vld [vmem:[%s15457_s13 + $0x40] sm:$0xff]  ;;  %v411_v30 = vld [vmem:[%s15457_s13 + $0x48] sm:$0xff] }
  0x2f   :  { %v413_v31 = vld [vmem:[%s15457_s13 + $0x50] sm:$0xff]  ;;  %410 = vst [vmem:[#allocation5 + $0x40] sm:$0xff] %v409_v29  ;;  %412 = vst [vmem:[#allocation5 + $0x48] sm:$0xff] %v411_v30  ;;  %v415_v32 = vld [vmem:[%s15457_s13 + $0x58] sm:$0xff] }
  0x30   :  { %414 = vst [vmem:[#allocation5 + $0x50] sm:$0xff] %v413_v31  ;;  %v417_v33 = vld [vmem:[%s15457_s13 + $0x60] sm:$0xff]  ;;  %v419_v34 = vld [vmem:[%s15457_s13 + $0x68] sm:$0xff]  ;;  %416 = vst [vmem:[#allocation5 + $0x58] sm:$0xff] %v415_v32 }
  0x31   :  { %418 = vst [vmem:[#allocation5 + $0x60] sm:$0xff] %v417_v33  ;;  %420 = vst [vmem:[#allocation5 + $0x68] sm:$0xff] %v419_v34  ;;  %v421_v35 = vld [vmem:[%s15457_s13 + $0x70] sm:$0xff]  ;;  %v423_v36 = vld [vmem:[%s15457_s13 + $0x78] sm:$0xff] }
  0x32   :  { %v425_v21 = vld [vmem:[%s15457_s13 + $0x80] sm:$0xff]  ;;  %422 = vst [vmem:[#allocation5 + $0x70] sm:$0xff] %v421_v35  ;;  %424 = vst [vmem:[#allocation5 + $0x78] sm:$0xff] %v423_v36  ;;  %v427_v22 = vld [vmem:[%s15457_s13 + $0x88] sm:$0xff] }
  0x33   :  { %426 = vst [vmem:[#allocation5 + $0x80] sm:$0xff] %v425_v21  ;;  %v429_v23 = vld [vmem:[%s15457_s13 + $0x90] sm:$0xff]  ;;  %v431_v24 = vld [vmem:[%s15457_s13 + $0x98] sm:$0xff]  ;;  %428 = vst [vmem:[#allocation5 + $0x88] sm:$0xff] %v427_v22 }
  0x34   :  { %430 = vst [vmem:[#allocation5 + $0x90] sm:$0xff] %v429_v23  ;;  %432 = vst [vmem:[#allocation5 + $0x98] sm:$0xff] %v431_v24  ;;  %v433_v25 = vld [vmem:[%s15457_s13 + $0xa0] sm:$0xff]  ;;  %v435_v26 = vld [vmem:[%s15457_s13 + $0xa8] sm:$0xff] }
  0x35   :  { %v437_v27 = vld [vmem:[%s15457_s13 + $0xb0] sm:$0xff]  ;;  %434 = vst [vmem:[#allocation5 + $0xa0] sm:$0xff] %v433_v25  ;;  %436 = vst [vmem:[#allocation5 + $0xa8] sm:$0xff] %v435_v26  ;;  %v439_v28 = vld [vmem:[%s15457_s13 + $0xb8] sm:$0xff] }
  0x36   :  { %438 = vst [vmem:[#allocation5 + $0xb0] sm:$0xff] %v437_v27  ;;  %v441_v29 = vld [vmem:[%s15457_s13 + $0xc0] sm:$0xff]  ;;  %v443_v30 = vld [vmem:[%s15457_s13 + $0xc8] sm:$0xff]  ;;  %440 = vst [vmem:[#allocation5 + $0xb8] sm:$0xff] %v439_v28 }
  0x37   :  { %442 = vst [vmem:[#allocation5 + $0xc0] sm:$0xff] %v441_v29  ;;  %444 = vst [vmem:[#allocation5 + $0xc8] sm:$0xff] %v443_v30  ;;  %v445_v31 = vld [vmem:[%s15457_s13 + $0xd0] sm:$0xff]  ;;  %v447_v32 = vld [vmem:[%s15457_s13 + $0xd8] sm:$0xff] }
  0x38   :  { %v449_v33 = vld [vmem:[%s15457_s13 + $0xe0] sm:$0xff]  ;;  %446 = vst [vmem:[#allocation5 + $0xd0] sm:$0xff] %v445_v31  ;;  %448 = vst [vmem:[#allocation5 + $0xd8] sm:$0xff] %v447_v32  ;;  %v451_v34 = vld [vmem:[%s15457_s13 + $0xe8] sm:$0xff] }
  0x39   :  { %450 = vst [vmem:[#allocation5 + $0xe0] sm:$0xff] %v449_v33  ;;  %v453_v35 = vld [vmem:[%s15457_s13 + $0xf0] sm:$0xff]  ;;  %v455_v36 = vld [vmem:[%s15457_s13 + $0xf8] sm:$0xff]  ;;  %452 = vst [vmem:[#allocation5 + $0xe8] sm:$0xff] %v451_v34 }
  0x3a   :  { %454 = vst [vmem:[#allocation5 + $0xf0] sm:$0xff] %v453_v35  ;;  %456 = vst [vmem:[#allocation5 + $0xf8] sm:$0xff] %v455_v36  ;;  %v457_v21 = vld [vmem:[%s15457_s13 + $0x100] sm:$0xff]  ;;  %v459_v22 = vld [vmem:[%s15457_s13 + $0x108] sm:$0xff] }
  0x3b   :  { %v461_v23 = vld [vmem:[%s15457_s13 + $0x110] sm:$0xff]  ;;  %458 = vst [vmem:[#allocation5 + $0x100] sm:$0xff] %v457_v21  ;;  %460 = vst [vmem:[#allocation5 + $0x108] sm:$0xff] %v459_v22  ;;  %v463_v24 = vld [vmem:[%s15457_s13 + $0x118] sm:$0xff] }
  0x3c   :  { %462 = vst [vmem:[#allocation5 + $0x110] sm:$0xff] %v461_v23  ;;  %v465_v25 = vld [vmem:[%s15457_s13 + $0x120] sm:$0xff]  ;;  %v467_v26 = vld [vmem:[%s15457_s13 + $0x128] sm:$0xff]  ;;  %464 = vst [vmem:[#allocation5 + $0x118] sm:$0xff] %v463_v24 }
  0x3d   :  { %466 = vst [vmem:[#allocation5 + $0x120] sm:$0xff] %v465_v25  ;;  %468 = vst [vmem:[#allocation5 + $0x128] sm:$0xff] %v467_v26  ;;  %v469_v27 = vld [vmem:[%s15457_s13 + $0x130] sm:$0xff]  ;;  %v471_v28 = vld [vmem:[%s15457_s13 + $0x138] sm:$0xff] }
  0x3e   :  { %v473_v29 = vld [vmem:[%s15457_s13 + $0x140] sm:$0xff]  ;;  %470 = vst [vmem:[#allocation5 + $0x130] sm:$0xff] %v469_v27  ;;  %472 = vst [vmem:[#allocation5 + $0x138] sm:$0xff] %v471_v28  ;;  %v475_v30 = vld [vmem:[%s15457_s13 + $0x148] sm:$0xff] }
  0x3f   :  { %474 = vst [vmem:[#allocation5 + $0x140] sm:$0xff] %v473_v29  ;;  %v477_v31 = vld [vmem:[%s15457_s13 + $0x150] sm:$0xff]  ;;  %v479_v32 = vld [vmem:[%s15457_s13 + $0x158] sm:$0xff]  ;;  %476 = vst [vmem:[#allocation5 + $0x148] sm:$0xff] %v475_v30 }
  0x40   :  { %478 = vst [vmem:[#allocation5 + $0x150] sm:$0xff] %v477_v31  ;;  %480 = vst [vmem:[#allocation5 + $0x158] sm:$0xff] %v479_v32  ;;  %v481_v33 = vld [vmem:[%s15457_s13 + $0x160] sm:$0xff]  ;;  %v483_v34 = vld [vmem:[%s15457_s13 + $0x168] sm:$0xff] }
  0x41   :  { %v485_v35 = vld [vmem:[%s15457_s13 + $0x170] sm:$0xff]  ;;  %482 = vst [vmem:[#allocation5 + $0x160] sm:$0xff] %v481_v33  ;;  %484 = vst [vmem:[#allocation5 + $0x168] sm:$0xff] %v483_v34  ;;  %v487_v36 = vld [vmem:[%s15457_s13 + $0x178] sm:$0xff] }
  0x42   :  { %486 = vst [vmem:[#allocation5 + $0x170] sm:$0xff] %v485_v35  ;;  %v489_v21 = vld [vmem:[%s15457_s13 + $0x180] sm:$0xff]  ;;  %v491_v22 = vld [vmem:[%s15457_s13 + $0x188] sm:$0xff]  ;;  %488 = vst [vmem:[#allocation5 + $0x178] sm:$0xff] %v487_v36 }
  0x43   :  { %490 = vst [vmem:[#allocation5 + $0x180] sm:$0xff] %v489_v21  ;;  %492 = vst [vmem:[#allocation5 + $0x188] sm:$0xff] %v491_v22  ;;  %v493_v23 = vld [vmem:[%s15457_s13 + $0x190] sm:$0xff]  ;;  %v495_v24 = vld [vmem:[%s15457_s13 + $0x198] sm:$0xff] }
  0x44   :  { %v497_v25 = vld [vmem:[%s15457_s13 + $0x1a0] sm:$0xff]  ;;  %494 = vst [vmem:[#allocation5 + $0x190] sm:$0xff] %v493_v23  ;;  %496 = vst [vmem:[#allocation5 + $0x198] sm:$0xff] %v495_v24  ;;  %v499_v26 = vld [vmem:[%s15457_s13 + $0x1a8] sm:$0xff] }
  0x45   :  { %498 = vst [vmem:[#allocation5 + $0x1a0] sm:$0xff] %v497_v25  ;;  %v501_v27 = vld [vmem:[%s15457_s13 + $0x1b0] sm:$0xff]  ;;  %v503_v28 = vld [vmem:[%s15457_s13 + $0x1b8] sm:$0xff]  ;;  %500 = vst [vmem:[#allocation5 + $0x1a8] sm:$0xff] %v499_v26 }
  0x46   :  { %502 = vst [vmem:[#allocation5 + $0x1b0] sm:$0xff] %v501_v27  ;;  %504 = vst [vmem:[#allocation5 + $0x1b8] sm:$0xff] %v503_v28  ;;  %v505_v29 = vld [vmem:[%s15457_s13 + $0x1c0] sm:$0xff]  ;;  %v507_v30 = vld [vmem:[%s15457_s13 + $0x1c8] sm:$0xff] }
  0x47   :  { %v509_v31 = vld [vmem:[%s15457_s13 + $0x1d0] sm:$0xff]  ;;  %506 = vst [vmem:[#allocation5 + $0x1c0] sm:$0xff] %v505_v29  ;;  %508 = vst [vmem:[#allocation5 + $0x1c8] sm:$0xff] %v507_v30  ;;  %v511_v32 = vld [vmem:[%s15457_s13 + $0x1d8] sm:$0xff] }
  0x48   :  { %510 = vst [vmem:[#allocation5 + $0x1d0] sm:$0xff] %v509_v31  ;;  %v513_v33 = vld [vmem:[%s15457_s13 + $0x1e0] sm:$0xff]  ;;  %v515_v34 = vld [vmem:[%s15457_s13 + $0x1e8] sm:$0xff]  ;;  %512 = vst [vmem:[#allocation5 + $0x1d8] sm:$0xff] %v511_v32 }
  0x49   :  { %514 = vst [vmem:[#allocation5 + $0x1e0] sm:$0xff] %v513_v33  ;;  %516 = vst [vmem:[#allocation5 + $0x1e8] sm:$0xff] %v515_v34  ;;  %v517_v35 = vld [vmem:[%s15457_s13 + $0x1f0] sm:$0xff]  ;;  %v519_v36 = vld [vmem:[%s15457_s13 + $0x1f8] sm:$0xff] }
  0x4a   :  { %v521_v21 = vld [vmem:[%s15457_s13 + $0x200] sm:$0xff]  ;;  %518 = vst [vmem:[#allocation5 + $0x1f0] sm:$0xff] %v517_v35  ;;  %520 = vst [vmem:[#allocation5 + $0x1f8] sm:$0xff] %v519_v36  ;;  %v523_v22 = vld [vmem:[%s15457_s13 + $0x208] sm:$0xff] }
  0x4b   :  { %522 = vst [vmem:[#allocation5 + $0x200] sm:$0xff] %v521_v21  ;;  %v525_v23 = vld [vmem:[%s15457_s13 + $0x210] sm:$0xff]  ;;  %v527_v24 = vld [vmem:[%s15457_s13 + $0x218] sm:$0xff]  ;;  %524 = vst [vmem:[#allocation5 + $0x208] sm:$0xff] %v523_v22 }
  0x4c   :  { %526 = vst [vmem:[#allocation5 + $0x210] sm:$0xff] %v525_v23  ;;  %528 = vst [vmem:[#allocation5 + $0x218] sm:$0xff] %v527_v24  ;;  %v529_v25 = vld [vmem:[%s15457_s13 + $0x220] sm:$0xff]  ;;  %v531_v26 = vld [vmem:[%s15457_s13 + $0x228] sm:$0xff] }
  0x4d   :  { %v533_v27 = vld [vmem:[%s15457_s13 + $0x230] sm:$0xff]  ;;  %530 = vst [vmem:[#allocation5 + $0x220] sm:$0xff] %v529_v25  ;;  %532 = vst [vmem:[#allocation5 + $0x228] sm:$0xff] %v531_v26  ;;  %v535_v28 = vld [vmem:[%s15457_s13 + $0x238] sm:$0xff] }
  0x4e   :  { %534 = vst [vmem:[#allocation5 + $0x230] sm:$0xff] %v533_v27  ;;  %v537_v29 = vld [vmem:[%s15457_s13 + $0x240] sm:$0xff]  ;;  %v539_v30 = vld [vmem:[%s15457_s13 + $0x248] sm:$0xff]  ;;  %536 = vst [vmem:[#allocation5 + $0x238] sm:$0xff] %v535_v28 }
  0x4f   :  { %538 = vst [vmem:[#allocation5 + $0x240] sm:$0xff] %v537_v29  ;;  %540 = vst [vmem:[#allocation5 + $0x248] sm:$0xff] %v539_v30  ;;  %v541_v31 = vld [vmem:[%s15457_s13 + $0x250] sm:$0xff]  ;;  %v543_v32 = vld [vmem:[%s15457_s13 + $0x258] sm:$0xff] }
  0x50   :  { %v545_v33 = vld [vmem:[%s15457_s13 + $0x260] sm:$0xff]  ;;  %542 = vst [vmem:[#allocation5 + $0x250] sm:$0xff] %v541_v31  ;;  %544 = vst [vmem:[#allocation5 + $0x258] sm:$0xff] %v543_v32  ;;  %v547_v34 = vld [vmem:[%s15457_s13 + $0x268] sm:$0xff] }
  0x51   :  { %546 = vst [vmem:[#allocation5 + $0x260] sm:$0xff] %v545_v33  ;;  %v549_v35 = vld [vmem:[%s15457_s13 + $0x270] sm:$0xff]  ;;  %v551_v36 = vld [vmem:[%s15457_s13 + $0x278] sm:$0xff]  ;;  %548 = vst [vmem:[#allocation5 + $0x268] sm:$0xff] %v547_v34 }
  0x52   :  { %550 = vst [vmem:[#allocation5 + $0x270] sm:$0xff] %v549_v35  ;;  %552 = vst [vmem:[#allocation5 + $0x278] sm:$0xff] %v551_v36  ;;  %v553_v21 = vld [vmem:[%s15457_s13 + $0x280] sm:$0xff]  ;;  %v555_v22 = vld [vmem:[%s15457_s13 + $0x288] sm:$0xff] }
  0x53   :  { %v557_v23 = vld [vmem:[%s15457_s13 + $0x290] sm:$0xff]  ;;  %554 = vst [vmem:[#allocation5 + $0x280] sm:$0xff] %v553_v21  ;;  %556 = vst [vmem:[#allocation5 + $0x288] sm:$0xff] %v555_v22  ;;  %v559_v24 = vld [vmem:[%s15457_s13 + $0x298] sm:$0xff] }
  0x54   :  { %558 = vst [vmem:[#allocation5 + $0x290] sm:$0xff] %v557_v23  ;;  %v561_v25 = vld [vmem:[%s15457_s13 + $0x2a0] sm:$0xff]  ;;  %v563_v26 = vld [vmem:[%s15457_s13 + $0x2a8] sm:$0xff]  ;;  %560 = vst [vmem:[#allocation5 + $0x298] sm:$0xff] %v559_v24 }
  0x55   :  { %562 = vst [vmem:[#allocation5 + $0x2a0] sm:$0xff] %v561_v25  ;;  %564 = vst [vmem:[#allocation5 + $0x2a8] sm:$0xff] %v563_v26  ;;  %v565_v27 = vld [vmem:[%s15457_s13 + $0x2b0] sm:$0xff]  ;;  %v567_v28 = vld [vmem:[%s15457_s13 + $0x2b8] sm:$0xff] }
  0x56   :  { %v569_v29 = vld [vmem:[%s15457_s13 + $0x2c0] sm:$0xff]  ;;  %566 = vst [vmem:[#allocation5 + $0x2b0] sm:$0xff] %v565_v27  ;;  %568 = vst [vmem:[#allocation5 + $0x2b8] sm:$0xff] %v567_v28  ;;  %v571_v30 = vld [vmem:[%s15457_s13 + $0x2c8] sm:$0xff] }
  0x57   :  { %570 = vst [vmem:[#allocation5 + $0x2c0] sm:$0xff] %v569_v29  ;;  %v573_v31 = vld [vmem:[%s15457_s13 + $0x2d0] sm:$0xff]  ;;  %v575_v32 = vld [vmem:[%s15457_s13 + $0x2d8] sm:$0xff]  ;;  %572 = vst [vmem:[#allocation5 + $0x2c8] sm:$0xff] %v571_v30 }
  0x58   :  { %574 = vst [vmem:[#allocation5 + $0x2d0] sm:$0xff] %v573_v31  ;;  %576 = vst [vmem:[#allocation5 + $0x2d8] sm:$0xff] %v575_v32  ;;  %v577_v33 = vld [vmem:[%s15457_s13 + $0x2e0] sm:$0xff]  ;;  %v579_v34 = vld [vmem:[%s15457_s13 + $0x2e8] sm:$0xff] }
  0x59   :  { %v581_v35 = vld [vmem:[%s15457_s13 + $0x2f0] sm:$0xff]  ;;  %578 = vst [vmem:[#allocation5 + $0x2e0] sm:$0xff] %v577_v33  ;;  %580 = vst [vmem:[#allocation5 + $0x2e8] sm:$0xff] %v579_v34  ;;  %v583_v36 = vld [vmem:[%s15457_s13 + $0x2f8] sm:$0xff] }
  0x5a   :  { %582 = vst [vmem:[#allocation5 + $0x2f0] sm:$0xff] %v581_v35  ;;  %584 = vst [vmem:[#allocation5 + $0x2f8] sm:$0xff] %v583_v36 }
  0x5b   :  { %592 = vsyncadd [#allocation6 + $0x3], 12288  ;;  %s15512_s28 = sld [smem:[#allocation31_spill]]  ;;  %v15475_v22 = vmov 0.0   ;;  %vm12452_vm0 = vmmov 0   ;;  %vm611_vm1 = vcmask 130048  }
  0x5c   :  { %11507 = vmatprep.subr.bf16.mxu0 %v15475_v22  ;;  %s15513_s4 = sld [smem:[#allocation30_spill]]  ;;  %11509 = vmatprep.mubr.msk.bf16.mxu0 %vm12452_vm0, %v15475_v22  ;;  %vm694_vm2 = vcmask 523264  }
  0x5d   :  { %s15514_s1 = sld [smem:[#allocation33_spill]] }
  0x5e   :  { %s15515_s27 = sld [smem:[#allocation32_spill]] }
  0x5f   :  { %s15518_s30 = sld [smem:[#allocation35_spill]] }
  0x61   :  { %v11745_v21 = vld [vmem:[%s15512_s28] sm:$0xff]   ;;  %s15516_s28 = sld [smem:[#allocation36_spill]] }
  0x62   :  { %v593_v23 = vld [vmem:[%s15513_s4] sm:$0xff]  ;;  %v594_v24 = vld [vmem:[%s15513_s4 + $0x8] sm:$0xff]  ;;  %11508 = vmatpush3.bf16.msra.mxu0 %v11745_v21  ;;  %s15517_s4 = sld [smem:[#allocation34_spill]] }
  0x63   :  { %v597_v25 = vpack.c.bf16 %v594_v24, %v593_v23  ;;  %v11746_v26 = vld [vmem:[%s15514_s1 + $0x18] sm:$0xff]   ;;  %11513 = vmatprep.subr.bf16.mxu0 %v15475_v22  ;;  %v11747_v27 = vld [vmem:[%s15514_s1 + $0x10] sm:$0xff]   ;;  %v11748_v28 = vld [vmem:[%s15514_s1 + $0x8] sm:$0xff]  }
  0x64   :  { %v11749_v29 = vld [vmem:[%s15514_s1] sm:$0xff]  }
  0x65   :  { %11510 = vmatmul.mubr.msk.bf16.vlgmr.msra.gmra.mxu0 %vm611_vm1, %v597_v25  ;;  %v9783_v31 = vld [vmem:[%s15515_s27] ss:$0 sm:$0xff] }
  0x66   :  { %11514 = vmatpush3.bf16.msra.mxu0 %v11746_v26  ;;  %11521 = vmatprep.mubr.msk.bf16.mxu0 %vm12452_vm0, %v15475_v22 }
  0x67   :  { %11515 = vmatprep.subr.bf16.mxu0 %v15475_v22  ;;  %v9786_v23 = vld [vmem:[%s15516_s28] ss:$0 sm:$0xff] }
  0x6a   :  { %11516 = vmatpush3.bf16.msra.mxu0 %v11747_v27 }
  0x6b   :  { %11517 = vmatprep.subr.bf16.mxu0 %v15475_v22 }
  0x6e   :  { %11518 = vmatpush3.bf16.msra.mxu0 %v11748_v28 }
  0x6f   :  { %11519 = vmatprep.subr.bf16.mxu0 %v15475_v22 }
  0x72   :  { %11520 = vmatpush3.bf16.msra.mxu0 %v11749_v29 }
 0x125   :  { %v649_v30 = vpop.f32.mrf.mxu0 }
 0x126   :  { %v13242_v34 = vadd.f32 %v9783_v31, %v649_v30 }
 0x127   :  { %v11511_v32 = vpop.f32.mrf.mxu0 }
 0x129   :  { %v652_v33 = vpop.f32.mrf.mxu0 }
 0x12a   :  { %v13244_v35 = vadd.f32 %v9783_v31, %v652_v33 }
 0x12b   :  { %v11512_v36 = vpop.f32.mrf.mxu0 }
 0x12c   :  { %v13248_v21 = vpack.c.bf16 %v13244_v35, %v13242_v34 }
 0x12e   :  { %11522 = vmatmul.mubr.msk.bf16.vlgmr.msra.gmra.mxu0 %vm694_vm2, %v13248_v21 }
 0x1ee   :  { %v732_v24 = vpop.f32.mrf.mxu0 }
 0x1ef   :  { %v733_v25 = vadd.f32 %v9786_v23, %v732_v24 }
 0x1f0   :  { %v11523_v26 = vpop.f32.mrf.mxu0 }
 0x1f1   :  { %v13256_v27 = vadd.f32 %v733_v25, %v13242_v34  ;;  %v11750_v26 = vld [vmem:[%s15517_s4 + $0x30] ss:$8 sps:$4 sm:$0xff]  }
 0x1f2   :  { %v735_v28 = vpop.f32.mrf.mxu0 }
 0x1f3   :  { %v736_v29 = vadd.f32 %v9786_v23, %v735_v28  ;;  %v743_v30 = vsel %vm694_vm2, %v13256_v27, 0.0  ;;  %v752_v31 = vmul.f32 %v13256_v27, %v13256_v27  ;;  %v11752_v28 = vld [vmem:[%s15517_s4 + $0x34] ss:$8 sps:$4 sm:$0xff]  }
 0x1f4   :  { %744 = vadd.xlane.f32.xlu0 %v743_v30  ;;  %v11524_v32 = vpop.f32.mrf.mxu0  ;;  %860 = vmatprep.subr.bf16.mxu0 %v11752_v28  ;;  %v11753_v30 = vld [vmem:[%s15517_s4 + $0x20] ss:$8 sps:$4 sm:$0xff]   ;;  %v11764_v28 = vld [vmem:[%s15518_s30 + $0x70] sm:$0xff]  }
 0x1f5   :  { %v13263_v33 = vadd.f32 %v736_v29, %v13244_v35  ;;  %v754_v36 = vsel %vm694_vm2, %v752_v31, 0.0  ;;  %v11755_v29 = vld [vmem:[%s15517_s4 + $0x24] ss:$8 sps:$4 sm:$0xff]   ;;  %861 = vmatpush1.bf16.msra.mxu0 %v11750_v26  ;;  %v15473_v31 = vmov 0   ;;  %v11758_v32 = vld [vmem:[%s15517_s4 + $0x14] ss:$8 sps:$4 sm:$0xff]  }
 0x1f6   :  { %755 = vadd.xlane.f32.xlu1 %v754_v36  ;;  %884 = vmatprep.mubr.bf16.mxu0 %v15473_v31  ;;  %v11756_v36 = vld [vmem:[%s15517_s4 + $0x10] ss:$8 sps:$4 sm:$0xff]  }
 0x1f7   :  { %v746_v24 = vsel %vm694_vm2, %v13263_v33, 0.0  ;;  %v753_v23 = vmul.f32 %v13263_v33, %v13263_v33  ;;  %862 = vmatprep.subr.bf16.mxu0 %v11755_v29  ;;  %v11763_v26 = vld [vmem:[%s15518_s30 + $0x38] sm:$0xff]   ;;  %v11765_v29 = vld [vmem:[%s15518_s30 + $0x30] sm:$0xff]  }
 0x1f8   :  { %747 = vadd.xlane.f32.xlu0 %v746_v24  ;;  %v11761_v24 = vld [vmem:[%s15517_s4 + $0x4] ss:$8 sps:$4 sm:$0xff]  }
 0x1f9   :  { %v757_v25 = vsel %vm694_vm2, %v753_v23, 0.0  ;;  %863 = vmatpush1.bf16.msra.mxu0 %v11753_v30  ;;  %v11759_v23 = vld [vmem:[%s15517_s4] ss:$8 sps:$4 sm:$0xff]  }
 0x1fa   :  { %758 = vadd.xlane.f32.xlu1 %v757_v25  ;;  %864 = vmatprep.subr.bf16.mxu0 %v11758_v32  ;;  %v11762_v25 = vld [vmem:[%s15518_s30 + $0x78] sm:$0xff]   ;;  %v11766_v30 = vld [vmem:[%s15518_s30 + $0x68] sm:$0xff]  }
 0x1fb   :  { %11021 = vmatprep.subr.bf16.mxu1 %v11762_v25  ;;  %v11767_v32 = vld [vmem:[%s15518_s30 + $0x28] sm:$0xff]   ;;  %v11771_v25 = vld [vmem:[%s15518_s30 + $0x18] sm:$0xff]  }
 0x1fc   :  { %11022 = vmatpush3.bf16.msra.mxu1 %v11763_v26 }
 0x1fd   :  { %865 = vmatpush1.bf16.msra.mxu0 %v11756_v36  ;;  %11023 = vmatprep.subr.bf16.mxu1 %v11764_v28  ;;  %v11768_v36 = vld [vmem:[%s15518_s30 + $0x60] sm:$0xff]  }
 0x1fe   :  { %866 = vmatprep.subr.bf16.mxu0 %v11761_v24  ;;  %v11769_v24 = vld [vmem:[%s15518_s30 + $0x20] sm:$0xff]  }
 0x200   :  { %11024 = vmatpush3.bf16.msra.mxu1 %v11765_v29 }
 0x201   :  { %867 = vmatpush1.bf16.msra.mxu0 %v11759_v23  ;;  %11025 = vmatprep.subr.bf16.mxu1 %v11766_v30  ;;  %v11770_v23 = vld [vmem:[%s15518_s30 + $0x58] sm:$0xff]  }
 0x202   :  { %11525 = vmatprep.subr.bf16.mxu0 %v15475_v22 }
 0x204   :  { %11026 = vmatpush3.bf16.msra.mxu1 %v11767_v32 }
 0x205   :  { %11027 = vmatprep.subr.bf16.mxu1 %v11768_v36 }
 0x208   :  { %11028 = vmatpush3.bf16.msra.mxu1 %v11769_v24 }
 0x209   :  { %11029 = vmatprep.subr.bf16.mxu1 %v11770_v23 }
 0x20c   :  { %11030 = vmatpush3.bf16.msra.mxu1 %v11771_v25 }
 0x27d   :  { %v745_v26 = vpop.xlane.xlu0 %744 }
 0x27e   :  { %v750_v28 = vmul.f32 0.015625, %v745_v26 }
 0x27f   :  { %v756_v29 = vpop.xlane.xlu1 %755 }
 0x280   :  { %v762_v30 = vmul.f32 %v750_v28, %v750_v28  ;;  %v760_v32 = vmul.f32 0.015625, %v756_v29  ;;  %v768_v23 = vsub.f32 %v13256_v27, %v750_v28  ;;  %v9792_v29 = vld [vmem:[%s15454_s9] ss:$0 sm:$0xff]  ;;  %v11773_v27 = vld [vmem:[%s15518_s30 + $0x10] sm:$0xff]   ;;  %v11775_v28 = vld [vmem:[%s15518_s30 + $0x8] sm:$0xff]  }
 0x281   :  { %v748_v31 = vpop.xlane.xlu0 %747 }
 0x282   :  { %v764_v22 = vsub.f32 %v760_v32, %v762_v30  ;;  %v751_v13 = vmul.f32 0.015625, %v748_v31 }
 0x283   :  { %v759_v36 = vpop.xlane.xlu1 %758 }
 0x284   :  { %v766_v14 = vmax.f32 %v764_v22, 0.0  ;;  %v763_v15 = vmul.f32 %v751_v13, %v751_v13  ;;  %v761_v16 = vmul.f32 0.015625, %v759_v36  ;;  %v769_v31 = vsub.f32 %v13263_v33, %v751_v13  ;;  %v11772_v13 = vld [vmem:[%s15518_s30 + $0x50] sm:$0xff]   ;;  %v11774_v33 = vld [vmem:[%s15518_s30 + $0x48] sm:$0xff]   ;;  %v11776_v36 = vld [vmem:[%s15518_s30 + $0x40] sm:$0xff]  }
 0x285   :  { %11031 = vmatprep.subr.bf16.mxu1 %v11772_v13 }
 0x286   :  { %v770_v17 = vadd.f32 1e-05, %v766_v14  ;;  %v765_v24 = vsub.f32 %v761_v16, %v763_v15  ;;  %v9793_v14 = vld [vmem:[%s15454_s9 + $0x1] ss:$0 sm:$0xff]  ;;  %11032 = vmatpush3.bf16.msra.mxu1 %v11773_v27 }
 0x287   :  { %11033 = vmatprep.subr.bf16.mxu1 %v11774_v33 }
 0x288   :  { %12130 = vrsqrt.f32 %v770_v17  ;;  %v767_v18 = vmax.f32 %v765_v24, 0.0  ;;  %v11777_v24 = vld [vmem:[%s15518_s30] sm:$0xff]  }
 0x28a   :  { %v771_v19 = vadd.f32 1e-05, %v767_v18  ;;  %11034 = vmatpush3.bf16.msra.mxu1 %v11775_v28 }
 0x28b   :  { %11035 = vmatprep.subr.bf16.mxu1 %v11776_v36 }
 0x28c   :  { %12132 = vrsqrt.f32 %v771_v19  ;;  %v15519_v19 = vmov 0.0  }
 0x28e   :  { %11036 = vmatpush3.bf16.msra.mxu1 %v11777_v24 }
 0x295   :  { %v12131_v25 = vpop.eup %12130 }
 0x296   :  { %v774_v26 = vmul.f32 %v12131_v25, %v768_v23  ;;  %v799_v23 = vlaneseq }
 0x298   :  { %v780_v32 = vmul.f32 %v9792_v29, %v774_v26  ;;  %v13356_v25 = vshrl.u32 %v799_v23, 7 }
 0x299   :  { %v12133_v30 = vpop.eup %12132 }
 0x29a   :  { %v775_v22 = vmul.f32 %v12133_v30, %v769_v31  ;;  %v786_v16 = vadd.f32 %v9793_v14, %v780_v32  ;;  %v13359_v26 = vsub.s32 1, %v13356_v25  ;;  %v797_v31 = vld [vmem:[%s15452_s7] ss:$8 sm:$0x3] }
 0x29c   :  { %v781_v15 = vmul.f32 %v9792_v29, %v775_v22  ;;  %v13362_v29 = vsub.s32 0, %v13356_v25  ;;  %v806_v22 = vrot.slane %v797_v31, %v13359_v26 }
 0x29e   :  { %v787_v17 = vadd.f32 %v9793_v14, %v781_v15  ;;  %v802_v32 = vrot.slane %v797_v31, %v13362_v29  ;;  %v9803_v31 = vld [vmem:[%s15453_s8] ss:$0 sm:$0xff] }
 0x2a0   :  { %v796_v18 = vpack.c.bf16 %v787_v17, %v786_v16 }
 0x2a2   :  { %9802 = vmatmul.mubr.msk.bf16.vlgmr.msra.gmra.mxu0 %vm694_vm2, %v796_v18 }
 0x2a3   :  { %11533 = vmatprep.mubr.msk.bf16.mxu0 %vm12452_vm0, %v15519_v19 }
 0x362   :  { %v886_v30 = vpop.f32.mrf.mxu0 }
 0x363   :  { %v887_v27 = vadd.f32 %v886_v30, %v802_v32 }
 0x364   :  { %v888_v14 = vpop.f32.mrf.mxu0 }
 0x365   :  { %v889_v18 = vadd.f32 %v888_v14, %v806_v22  ;;  %v895_v20 = vmax.f32 %v887_v27, 0.0 }
 0x366   :  { %v890_v15 = vpop.f32.mrf.mxu0 }
 0x367   :  { %v891_v13 = vadd.f32 %v890_v15, %v802_v32  ;;  %v896_v24 = vmax.f32 %v889_v18, 0.0 }
 0x368   :  { %v892_v33 = vpop.f32.mrf.mxu0 }
 0x369   :  { %v893_v28 = vadd.f32 %v892_v33, %v806_v22  ;;  %v897_v36 = vmax.f32 %v891_v13, 0.0 }
 0x36b   :  { %v898_v23 = vmax.f32 %v893_v28, 0.0  ;;  %v931_v6 = vpack.c.bf16 %v897_v36, %v895_v20 }
 0x36d   :  { %v932_v5 = vpack.c.bf16 %v898_v23, %v896_v24 }
 0x36f   :  { %1066 = vmatprep.mubr.bf16.mxu1 %v932_v5 }
 0x370   :  { %1067 = vmatmul.mubr.bf16.vlgmr.msra.gmra.mxu1 %v931_v6 }
 0x430   :  { %v11037_v7 = vpop.f32.mrf.mxu1 }
 0x432   :  { %v11038_v8 = vpop.f32.mrf.mxu1 }
 0x433   :  { %v11039_v9 = vadd.f32 %v11038_v8, %v11037_v7  ;;  %v11778_v8 = vld [vmem:[%s15514_s1 + $0x38] sm:$0xff]  }
 0x434   :  { %v11040_v14 = vpop.f32.mrf.mxu1  ;;  %11526 = vmatpush3.bf16.msra.mxu0 %v11778_v8 }
 0x435   :  { %v1069_v15 = vadd.f32 %v11039_v9, %v9803_v31  ;;  %v11779_v9 = vld [vmem:[%s15514_s1 + $0x30] sm:$0xff]   ;;  %11527 = vmatprep.subr.bf16.mxu0 %v15519_v19 }
 0x436   :  { %v11041_v30 = vpop.f32.mrf.mxu1 }
 0x437   :  { %v1075_v32 = vadd.f32 %v1069_v15, %v786_v16  ;;  %v11042_v22 = vadd.f32 %v11041_v30, %v11040_v14  ;;  %v11780_v16 = vld [vmem:[%s15514_s1 + $0x28] sm:$0xff]  }
 0x438   :  { %11528 = vmatpush3.bf16.msra.mxu0 %v11779_v9 }
 0x439   :  { %v1072_v13 = vadd.f32 %v11042_v22, %v9803_v31  ;;  %v1079_v18 = vsel %vm694_vm2, %v1075_v32, 0.0  ;;  %v1087_v27 = vmul.f32 %v1075_v32, %v1075_v32  ;;  %11529 = vmatprep.subr.bf16.mxu0 %v15519_v19 }
 0x43a   :  { %1080 = vadd.xlane.f32.xlu0 %v1079_v18 }
 0x43b   :  { %v1076_v20 = vadd.f32 %v1072_v13, %v787_v17  ;;  %v1089_v6 = vsel %vm694_vm2, %v1087_v27, 0.0  ;;  %v11781_v17 = vld [vmem:[%s15514_s1 + $0x20] sm:$0xff]  }
 0x43c   :  { %11530 = vmatpush3.bf16.msra.mxu0 %v11780_v16 }
 0x43d   :  { %v1082_v5 = vsel %vm694_vm2, %v1076_v20, 0.0  ;;  %v1088_v33 = vmul.f32 %v1076_v20, %v1076_v20  ;;  %11531 = vmatprep.subr.bf16.mxu0 %v15519_v19 }
 0x43e   :  { %1083 = vadd.xlane.f32.xlu1 %v1082_v5  ;;  %1090 = vadd.xlane.f32.xlu0 %v1089_v6 }
 0x43f   :  { %v1092_v7 = vsel %vm694_vm2, %v1088_v33, 0.0 }
 0x440   :  { %11532 = vmatpush3.bf16.msra.mxu0 %v11781_v17  ;;  %v9820_v17 = vld [vmem:[%s15454_s9 + $0x2] ss:$0 sm:$0xff] }
 0x442   :  { %1093 = vadd.xlane.f32.xlu1 %v1092_v7 }
 0x4c3   :  { %v1081_v28 = vpop.xlane.xlu0 %1080 }
 0x4c4   :  { %v1085_v36 = vmul.f32 0.015625, %v1081_v28 }
 0x4c6   :  { %v1097_v31 = vmul.f32 %v1085_v36, %v1085_v36  ;;  %v1103_v8 = vsub.f32 %v1075_v32, %v1085_v36  ;;  %v15520_v32 = vmov 0   ;;  %v9830_v36 = vld [vmem:[%s15516_s28 + $0x1] ss:$0 sm:$0xff] }
 0x4c7   :  { %v1084_v24 = vpop.xlane.xlu1 %1083  ;;  %v1091_v23 = vpop.xlane.xlu0 %1090 }
 0x4c8   :  { %v1086_v14 = vmul.f32 0.015625, %v1084_v24  ;;  %v1095_v15 = vmul.f32 0.015625, %v1091_v23 }
 0x4ca   :  { %v1099_v30 = vsub.f32 %v1095_v15, %v1097_v31  ;;  %v1098_v13 = vmul.f32 %v1086_v14, %v1086_v14  ;;  %v1104_v28 = vsub.f32 %v1076_v20, %v1086_v14  ;;  %v9821_v15 = vld [vmem:[%s15454_s9 + $0x3] ss:$0 sm:$0xff] }
 0x4cb   :  { %v1094_v22 = vpop.xlane.xlu1 %1093 }
 0x4cc   :  { %v1101_v18 = vmax.f32 %v1099_v30, 0.0  ;;  %v1096_v27 = vmul.f32 0.015625, %v1094_v22 }
 0x4ce   :  { %v1105_v5 = vadd.f32 1e-05, %v1101_v18  ;;  %v1100_v6 = vsub.f32 %v1096_v27, %v1098_v13 }
 0x4d0   :  { %12134 = vrsqrt.f32 %v1105_v5  ;;  %v1102_v33 = vmax.f32 %v1100_v6, 0.0 }
 0x4d2   :  { %v1106_v7 = vadd.f32 1e-05, %v1102_v33 }
 0x4d4   :  { %12136 = vrsqrt.f32 %v1106_v7 }
 0x4dd   :  { %v12135_v9 = vpop.eup %12134 }
 0x4de   :  { %v1109_v16 = vmul.f32 %v12135_v9, %v1103_v8 }
 0x4e0   :  { %v1115_v31 = vmul.f32 %v9820_v17, %v1109_v16 }
 0x4e1   :  { %v12137_v24 = vpop.eup %12136 }
 0x4e2   :  { %v1110_v23 = vmul.f32 %v12137_v24, %v1104_v28  ;;  %v1121_v22 = vadd.f32 %v9821_v15, %v1115_v31  ;;  %v11782_v31 = vld [vmem:[%s15517_s4 + $0x70] ss:$8 sps:$4 sm:$0xff]  }
 0x4e4   :  { %v1116_v30 = vmul.f32 %v9820_v17, %v1110_v23 }
 0x4e6   :  { %v1122_v13 = vadd.f32 %v9821_v15, %v1116_v30  ;;  %v11784_v15 = vld [vmem:[%s15517_s4 + $0x74] ss:$8 sps:$4 sm:$0xff]   ;;  %v11787_v30 = vld [vmem:[%s15517_s4 + $0x64] ss:$8 sps:$4 sm:$0xff]  }
 0x4e7   :  { %1328 = vmatprep.subr.bf16.mxu0 %v11784_v15 }
 0x4e8   :  { %v1132_v18 = vpack.c.bf16 %v1122_v13, %v1121_v22 }
 0x4ea   :  { %11534 = vmatmul.mubr.msk.bf16.vlgmr.msra.gmra.mxu0 %vm694_vm2, %v1132_v18  ;;  %v11788_v18 = vld [vmem:[%s15517_s4 + $0x50] ss:$8 sps:$4 sm:$0xff]  }
 0x4eb   :  { %1352 = vmatprep.mubr.bf16.mxu0 %v15520_v32  ;;  %1329 = vmatpush1.bf16.msra.mxu0 %v11782_v31 }
 0x4ec   :  { %1330 = vmatprep.subr.bf16.mxu0 %v11787_v30 }
 0x5aa   :  { %v1199_v20 = vpop.f32.mrf.mxu0 }
 0x5ab   :  { %v1200_v14 = vadd.f32 %v9830_v36, %v1199_v20  ;;  %v11791_v20 = vld [vmem:[%s15517_s4 + $0x40] ss:$8 sps:$4 sm:$0xff]  }
 0x5ac   :  { %v11535_v27 = vpop.f32.mrf.mxu0 }
 0x5ad   :  { %v13402_v5 = vadd.f32 %v1200_v14, %v1121_v22  ;;  %v11785_v22 = vld [vmem:[%s15517_s4 + $0x60] ss:$8 sps:$4 sm:$0xff]   ;;  %v11794_v14 = vld [vmem:[%s15518_s30 + $0xf8] sm:$0xff]  }
 0x5ae   :  { %v1202_v6 = vpop.f32.mrf.mxu0  ;;  %1331 = vmatpush1.bf16.msra.mxu0 %v11785_v22  ;;  %v11795_v27 = vld [vmem:[%s15518_s30 + $0xb8] sm:$0xff]   ;;  %11048 = vmatprep.subr.bf16.mxu1 %v11794_v14 }
 0x5af   :  { %v1203_v33 = vadd.f32 %v9830_v36, %v1202_v6  ;;  %v1210_v7 = vsel %vm694_vm2, %v13402_v5, 0.0  ;;  %v1218_v8 = vmul.f32 %v13402_v5, %v13402_v5  ;;  %v11793_v36 = vld [vmem:[%s15517_s4 + $0x44] ss:$8 sps:$4 sm:$0xff]   ;;  %v11796_v6 = vld [vmem:[%s15518_s30 + $0xf0] sm:$0xff]   ;;  %11049 = vmatpush3.bf16.msra.mxu1 %v11795_v27 }
 0x5b0   :  { %1211 = vadd.xlane.f32.xlu0 %v1210_v7  ;;  %v11536_v9 = vpop.f32.mrf.mxu0  ;;  %11050 = vmatprep.subr.bf16.mxu1 %v11796_v6  ;;  %v11798_v7 = vld [vmem:[%s15518_s30 + $0xe8] sm:$0xff]  }
 0x5b1   :  { %v13408_v16 = vadd.f32 %v1203_v33, %v1122_v13  ;;  %v1220_v17 = vsel %vm694_vm2, %v1218_v8, 0.0  ;;  %v11790_v13 = vld [vmem:[%s15517_s4 + $0x54] ss:$8 sps:$4 sm:$0xff]   ;;  %v11799_v8 = vld [vmem:[%s15518_s30 + $0xa8] sm:$0xff]   ;;  %v11800_v9 = vld [vmem:[%s15518_s30 + $0xe0] sm:$0xff]  }
 0x5b2   :  { %1332 = vmatprep.subr.bf16.mxu0 %v11790_v13  ;;  %v11797_v33 = vld [vmem:[%s15518_s30 + $0xb0] sm:$0xff]  }
 0x5b3   :  { %v1213_v28 = vsel %vm694_vm2, %v13408_v16, 0.0  ;;  %v1219_v24 = vmul.f32 %v13408_v16, %v13408_v16  ;;  %1333 = vmatpush1.bf16.msra.mxu0 %v11788_v18  ;;  %11051 = vmatpush3.bf16.msra.mxu1 %v11797_v33 }
 0x5b4   :  { %1221 = vadd.xlane.f32.xlu0 %v1220_v17  ;;  %1214 = vadd.xlane.f32.xlu1 %v1213_v28  ;;  %v11801_v17 = vld [vmem:[%s15518_s30 + $0xa0] sm:$0xff]   ;;  %v11802_v28 = vld [vmem:[%s15518_s30 + $0xd8] sm:$0xff]  }
 0x5b5   :  { %v1223_v23 = vsel %vm694_vm2, %v1219_v24, 0.0  ;;  %1334 = vmatprep.subr.bf16.mxu0 %v11793_v36  ;;  %11052 = vmatprep.subr.bf16.mxu1 %v11798_v7  ;;  %v11803_v24 = vld [vmem:[%s15518_s30 + $0x98] sm:$0xff]  }
 0x5b7   :  { %1335 = vmatpush1.bf16.msra.mxu0 %v11791_v20  ;;  %11053 = vmatpush3.bf16.msra.mxu1 %v11799_v8 }
 0x5b8   :  { %1224 = vadd.xlane.f32.xlu1 %v1223_v23  ;;  %11537 = vmatprep.subr.bf16.mxu0 %v15519_v19 }
 0x5b9   :  { %11054 = vmatprep.subr.bf16.mxu1 %v11800_v9 }
 0x5bb   :  { %11055 = vmatpush3.bf16.msra.mxu1 %v11801_v17 }
 0x5bc   :  { %11056 = vmatprep.subr.bf16.mxu1 %v11802_v28 }
 0x5bf   :  { %11057 = vmatpush3.bf16.msra.mxu1 %v11803_v24 }
 0x639   :  { %v1212_v23 = vpop.xlane.xlu0 %1211 }
 0x63a   :  { %v1216_v31 = vmul.f32 0.015625, %v1212_v23  ;;  %v9836_v23 = vld [vmem:[%s15454_s9 + $0x4] ss:$0 sm:$0xff] }
 0x63c   :  { %v1228_v22 = vmul.f32 %v1216_v31, %v1216_v31  ;;  %v1234_v17 = vsub.f32 %v13402_v5, %v1216_v31  ;;  %v11804_v5 = vld [vmem:[%s15518_s30 + $0xd0] sm:$0xff]   ;;  %v11806_v31 = vld [vmem:[%s15518_s30 + $0xc8] sm:$0xff]  }
 0x63d   :  { %v1222_v15 = vpop.xlane.xlu0 %1221  ;;  %v1215_v30 = vpop.xlane.xlu1 %1214  ;;  %11058 = vmatprep.subr.bf16.mxu1 %v11804_v5 }
 0x63e   :  { %v1226_v13 = vmul.f32 0.015625, %v1222_v15  ;;  %v1217_v18 = vmul.f32 0.015625, %v1215_v30 }
 0x640   :  { %v1230_v36 = vsub.f32 %v1226_v13, %v1228_v22  ;;  %v1229_v27 = vmul.f32 %v1217_v18, %v1217_v18  ;;  %v1235_v15 = vsub.f32 %v13408_v16, %v1217_v18  ;;  %v11805_v16 = vld [vmem:[%s15518_s30 + $0x90] sm:$0xff]   ;;  %v11807_v18 = vld [vmem:[%s15518_s30 + $0x88] sm:$0xff]  }
 0x641   :  { %v1225_v20 = vpop.xlane.xlu1 %1224  ;;  %11059 = vmatpush3.bf16.msra.mxu1 %v11805_v16 }
 0x642   :  { %v1232_v14 = vmax.f32 %v1230_v36, 0.0  ;;  %v1227_v6 = vmul.f32 0.015625, %v1225_v20  ;;  %v9837_v36 = vld [vmem:[%s15454_s9 + $0x5] ss:$0 sm:$0xff]  ;;  %11060 = vmatprep.subr.bf16.mxu1 %v11806_v31 }
 0x644   :  { %v1236_v33 = vadd.f32 1e-05, %v1232_v14  ;;  %v1231_v7 = vsub.f32 %v1227_v6, %v1229_v27 }
 0x645   :  { %11061 = vmatpush3.bf16.msra.mxu1 %v11807_v18 }
 0x646   :  { %12138 = vrsqrt.f32 %v1236_v33  ;;  %v1233_v8 = vmax.f32 %v1231_v7, 0.0  ;;  %v11808_v33 = vld [vmem:[%s15518_s30 + $0xc0] sm:$0xff]  }
 0x647   :  { %v11809_v7 = vld [vmem:[%s15518_s30 + $0x80] sm:$0xff]   ;;  %11062 = vmatprep.subr.bf16.mxu1 %v11808_v33 }
 0x648   :  { %v1237_v9 = vadd.f32 1e-05, %v1233_v8  ;;  %v9846_v8 = vld [vmem:[%s15452_s7 + $0x1] ss:$8 sm:$0x3] }
 0x649   :  { %11063 = vmatpush3.bf16.msra.mxu1 %v11809_v7  ;;  %v9888_v7 = vld [vmem:[%s15453_s8 + $0x1] ss:$0 sm:$0xff] }
 0x64a   :  { %12140 = vrsqrt.f32 %v1237_v9 }
 0x653   :  { %v12139_v28 = vpop.eup %12138 }
 0x654   :  { %v1240_v24 = vmul.f32 %v12139_v28, %v1234_v17  ;;  %v1274_v17 = vrot.slane %v9846_v8, %v13359_v26  ;;  %v1270_v28 = vrot.slane %v9846_v8, %v13362_v29 }
 0x656   :  { %v1246_v13 = vmul.f32 %v9836_v23, %v1240_v24 }
 0x657   :  { %v12141_v30 = vpop.eup %12140 }
 0x658   :  { %v1241_v22 = vmul.f32 %v12141_v30, %v1235_v15  ;;  %v1252_v14 = vadd.f32 %v9837_v36, %v1246_v13 }
 0x65a   :  { %v1247_v20 = vmul.f32 %v9836_v23, %v1241_v22 }
 0x65c   :  { %v1253_v27 = vadd.f32 %v9837_v36, %v1247_v20 }
 0x65e   :  { %v1263_v6 = vpack.c.bf16 %v1253_v27, %v1252_v14 }
 0x660   :  { %9855 = vmatmul.mubr.msk.bf16.vlgmr.msra.gmra.mxu0 %vm694_vm2, %v1263_v6 }
 0x661   :  { %11545 = vmatprep.mubr.msk.bf16.mxu0 %vm12452_vm0, %v15519_v19 }
 0x720   :  { %v1354_v9 = vpop.f32.mrf.mxu0 }
 0x721   :  { %v1355_v22 = vadd.f32 %v1354_v9, %v1270_v28 }
 0x722   :  { %v1356_v24 = vpop.f32.mrf.mxu0 }
 0x723   :  { %v1357_v15 = vadd.f32 %v1356_v24, %v1274_v17  ;;  %v1363_v16 = vmax.f32 %v1355_v22, 0.0 }
 0x724   :  { %v1358_v23 = vpop.f32.mrf.mxu0 }
 0x725   :  { %v1359_v30 = vadd.f32 %v1358_v23, %v1270_v28  ;;  %v1364_v6 = vmax.f32 %v1357_v15, 0.0 }
 0x726   :  { %v1360_v13 = vpop.f32.mrf.mxu0 }
 0x727   :  { %v1361_v36 = vadd.f32 %v1360_v13, %v1274_v17  ;;  %v1365_v20 = vmax.f32 %v1359_v30, 0.0 }
 0x729   :  { %v1366_v5 = vmax.f32 %v1361_v36, 0.0  ;;  %v1400_v18 = vpack.c.bf16 %v1365_v20, %v1363_v16  ;;  %v11813_v16 = vld [vmem:[%s15514_s1 + $0x40] sm:$0xff]  }
 0x72b   :  { %v1401_v31 = vpack.c.bf16 %v1366_v5, %v1364_v6 }
 0x72d   :  { %1535 = vmatprep.mubr.bf16.mxu1 %v1401_v31 }
 0x72e   :  { %1536 = vmatmul.mubr.bf16.vlgmr.msra.gmra.mxu1 %v1400_v18 }
 0x7ee   :  { %v11064_v33 = vpop.f32.mrf.mxu1 }
 0x7f0   :  { %v11065_v8 = vpop.f32.mrf.mxu1 }
 0x7f1   :  { %v11066_v10 = vadd.f32 %v11065_v8, %v11064_v33 }
 0x7f2   :  { %v11067_v24 = vpop.f32.mrf.mxu1 }
 0x7f3   :  { %v1538_v23 = vadd.f32 %v11066_v10, %v9888_v7  ;;  %v11810_v10 = vld [vmem:[%s15514_s1 + $0x58] sm:$0xff]  }
 0x7f4   :  { %v11068_v9 = vpop.f32.mrf.mxu1  ;;  %11538 = vmatpush3.bf16.msra.mxu0 %v11810_v10 }
 0x7f5   :  { %v1544_v28 = vadd.f32 %v1538_v23, %v1252_v14  ;;  %v11069_v17 = vadd.f32 %v11068_v9, %v11067_v24  ;;  %v11811_v14 = vld [vmem:[%s15514_s1 + $0x50] sm:$0xff]   ;;  %11539 = vmatprep.subr.bf16.mxu0 %v15519_v19 }
 0x7f7   :  { %v1541_v30 = vadd.f32 %v11069_v17, %v9888_v7  ;;  %v1548_v15 = vsel %vm694_vm2, %v1544_v28, 0.0  ;;  %v1556_v22 = vmul.f32 %v1544_v28, %v1544_v28 }
 0x7f8   :  { %1549 = vadd.xlane.f32.xlu0 %v1548_v15  ;;  %11540 = vmatpush3.bf16.msra.mxu0 %v11811_v14 }
 0x7f9   :  { %v1545_v13 = vadd.f32 %v1541_v30, %v1253_v27  ;;  %v1558_v20 = vsel %vm694_vm2, %v1556_v22, 0.0  ;;  %v11812_v27 = vld [vmem:[%s15514_s1 + $0x48] sm:$0xff]   ;;  %11541 = vmatprep.subr.bf16.mxu0 %v15519_v19 }
 0x7fb   :  { %v1551_v36 = vsel %vm694_vm2, %v1545_v13, 0.0  ;;  %v1557_v6 = vmul.f32 %v1545_v13, %v1545_v13 }
 0x7fc   :  { %1552 = vadd.xlane.f32.xlu1 %v1551_v36  ;;  %1559 = vadd.xlane.f32.xlu0 %v1558_v20 }
 0x7fd   :  { %v1561_v5 = vsel %vm694_vm2, %v1557_v6, 0.0  ;;  %11542 = vmatpush3.bf16.msra.mxu0 %v11812_v27 }
 0x7fe   :  { %11543 = vmatprep.subr.bf16.mxu0 %v15519_v19 }
 0x800   :  { %1562 = vadd.xlane.f32.xlu1 %v1561_v5 }
 0x801   :  { %11544 = vmatpush3.bf16.msra.mxu0 %v11813_v16  ;;  %v9905_v16 = vld [vmem:[%s15454_s9 + $0x6] ss:$0 sm:$0xff] }
 0x881   :  { %v1550_v31 = vpop.xlane.xlu0 %1549 }
 0x882   :  { %v1554_v18 = vmul.f32 0.015625, %v1550_v31 }
 0x884   :  { %v1566_v8 = vmul.f32 %v1554_v18, %v1554_v18  ;;  %v1572_v10 = vsub.f32 %v1544_v28, %v1554_v18  ;;  %v9915_v28 = vld [vmem:[%s15516_s28 + $0x2] ss:$0 sm:$0xff] }
 0x885   :  { %v1553_v33 = vpop.xlane.xlu1 %1552  ;;  %v1560_v7 = vpop.xlane.xlu0 %1559 }
 0x886   :  { %v1555_v24 = vmul.f32 0.015625, %v1553_v33  ;;  %v1564_v23 = vmul.f32 0.015625, %v1560_v7 }
 0x888   :  { %v1568_v9 = vsub.f32 %v1564_v23, %v1566_v8  ;;  %v1567_v30 = vmul.f32 %v1555_v24, %v1555_v24  ;;  %v1573_v31 = vsub.f32 %v1545_v13, %v1555_v24  ;;  %v9906_v23 = vld [vmem:[%s15454_s9 + $0x7] ss:$0 sm:$0xff] }
 0x889   :  { %v1563_v17 = vpop.xlane.xlu1 %1562 }
 0x88a   :  { %v1570_v15 = vmax.f32 %v1568_v9, 0.0  ;;  %v1565_v22 = vmul.f32 0.015625, %v1563_v17 }
 0x88c   :  { %v1574_v36 = vadd.f32 1e-05, %v1570_v15  ;;  %v1569_v20 = vsub.f32 %v1565_v22, %v1567_v30 }
 0x88e   :  { %12142 = vrsqrt.f32 %v1574_v36  ;;  %v1571_v6 = vmax.f32 %v1569_v20, 0.0 }
 0x890   :  { %v1575_v5 = vadd.f32 1e-05, %v1571_v6 }
 0x892   :  { %12144 = vrsqrt.f32 %v1575_v5 }
 0x89b   :  { %v12143_v14 = vpop.eup %12142 }
 0x89c   :  { %v1578_v27 = vmul.f32 %v12143_v14, %v1572_v10 }
 0x89e   :  { %v1584_v8 = vmul.f32 %v9905_v16, %v1578_v27 }
 0x89f   :  { %v12145_v33 = vpop.eup %12144 }
 0x8a0   :  { %v1579_v7 = vmul.f32 %v12145_v33, %v1573_v31  ;;  %v1590_v17 = vadd.f32 %v9906_v23, %v1584_v8  ;;  %v11816_v8 = vld [vmem:[%s15517_s4 + $0xb4] ss:$8 sps:$4 sm:$0xff]  }
 0x8a1   :  { %1797 = vmatprep.subr.bf16.mxu0 %v11816_v8 }
 0x8a2   :  { %v1585_v9 = vmul.f32 %v9905_v16, %v1579_v7  ;;  %v11814_v7 = vld [vmem:[%s15517_s4 + $0xb0] ss:$8 sps:$4 sm:$0xff]  }
 0x8a4   :  { %v1591_v30 = vadd.f32 %v9906_v23, %v1585_v9  ;;  %v11819_v23 = vld [vmem:[%s15517_s4 + $0xa4] ss:$8 sps:$4 sm:$0xff]   ;;  %v11817_v9 = vld [vmem:[%s15517_s4 + $0xa0] ss:$8 sps:$4 sm:$0xff]  }
 0x8a6   :  { %v1601_v15 = vpack.c.bf16 %v1591_v30, %v1590_v17 }
 0x8a8   :  { %11546 = vmatmul.mubr.msk.bf16.vlgmr.msra.gmra.mxu0 %vm694_vm2, %v1601_v15  ;;  %v11825_v15 = vld [vmem:[%s15517_s4 + $0x84] ss:$8 sps:$4 sm:$0xff]  }
 0x8a9   :  { %1821 = vmatprep.mubr.bf16.mxu0 %v15520_v32  ;;  %1798 = vmatpush1.bf16.msra.mxu0 %v11814_v7 }
 0x8aa   :  { %1799 = vmatprep.subr.bf16.mxu0 %v11819_v23 }
 0x8ad   :  { %1800 = vmatpush1.bf16.msra.mxu0 %v11817_v9 }
 0x968   :  { %v1668_v13 = vpop.f32.mrf.mxu0 }
 0x969   :  { %v1669_v18 = vadd.f32 %v9915_v28, %v1668_v13  ;;  %v11826_v13 = vld [vmem:[%s15518_s30 + $0x178] sm:$0xff]  }
 0x96a   :  { %v11547_v24 = vpop.f32.mrf.mxu0  ;;  %11075 = vmatprep.subr.bf16.mxu1 %v11826_v13 }
 0x96b   :  { %v13538_v22 = vadd.f32 %v1669_v18, %v1590_v17  ;;  %v11822_v17 = vld [vmem:[%s15517_s4 + $0x94] ss:$8 sps:$4 sm:$0xff]  }
 0x96c   :  { %v1671_v36 = vpop.f32.mrf.mxu0  ;;  %1801 = vmatprep.subr.bf16.mxu0 %v11822_v17  ;;  %v11827_v18 = vld [vmem:[%s15518_s30 + $0x138] sm:$0xff]   ;;  %v11828_v24 = vld [vmem:[%s15518_s30 + $0x170] sm:$0xff]  }
 0x96d   :  { %v1672_v20 = vadd.f32 %v9915_v28, %v1671_v36  ;;  %v1679_v6 = vsel %vm694_vm2, %v13538_v22, 0.0  ;;  %v1687_v5 = vmul.f32 %v13538_v22, %v13538_v22  ;;  %v11823_v28 = vld [vmem:[%s15517_s4 + $0x80] ss:$8 sps:$4 sm:$0xff]   ;;  %11076 = vmatpush3.bf16.msra.mxu1 %v11827_v18  ;;  %v11829_v36 = vld [vmem:[%s15518_s30 + $0x130] sm:$0xff]  }
 0x96e   :  { %1680 = vadd.xlane.f32.xlu0 %v1679_v6  ;;  %v11548_v10 = vpop.f32.mrf.mxu0  ;;  %11077 = vmatprep.subr.bf16.mxu1 %v11828_v24  ;;  %v11831_v6 = vld [vmem:[%s15518_s30 + $0x128] sm:$0xff]  }
 0x96f   :  { %v13544_v14 = vadd.f32 %v1672_v20, %v1591_v30  ;;  %v1689_v27 = vsel %vm694_vm2, %v1687_v5, 0.0  ;;  %v11820_v30 = vld [vmem:[%s15517_s4 + $0x90] ss:$8 sps:$4 sm:$0xff]   ;;  %v11830_v20 = vld [vmem:[%s15518_s30 + $0x168] sm:$0xff]   ;;  %v11832_v5 = vld [vmem:[%s15518_s30 + $0x160] sm:$0xff]  }
 0x970   :  { %1802 = vmatpush1.bf16.msra.mxu0 %v11820_v30  ;;  %v11833_v10 = vld [vmem:[%s15518_s30 + $0x120] sm:$0xff]  }
 0x971   :  { %v1682_v16 = vsel %vm694_vm2, %v13544_v14, 0.0  ;;  %v1688_v31 = vmul.f32 %v13544_v14, %v13544_v14  ;;  %1803 = vmatprep.subr.bf16.mxu0 %v11825_v15  ;;  %11078 = vmatpush3.bf16.msra.mxu1 %v11829_v36 }
 0x972   :  { %1690 = vadd.xlane.f32.xlu0 %v1689_v27  ;;  %1683 = vadd.xlane.f32.xlu1 %v1682_v16  ;;  %v11834_v27 = vld [vmem:[%s15518_s30 + $0x158] sm:$0xff]  }
 0x973   :  { %v1692_v33 = vsel %vm694_vm2, %v1688_v31, 0.0  ;;  %11079 = vmatprep.subr.bf16.mxu1 %v11830_v20  ;;  %v11835_v16 = vld [vmem:[%s15518_s30 + $0x118] sm:$0xff]  }
 0x974   :  { %1804 = vmatpush1.bf16.msra.mxu0 %v11823_v28 }
 0x975   :  { %11549 = vmatprep.subr.bf16.mxu0 %v15519_v19  ;;  %11080 = vmatpush3.bf16.msra.mxu1 %v11831_v6 }
 0x976   :  { %1693 = vadd.xlane.f32.xlu1 %v1692_v33  ;;  %11081 = vmatprep.subr.bf16.mxu1 %v11832_v5 }
 0x979   :  { %11082 = vmatpush3.bf16.msra.mxu1 %v11833_v10 }
 0x97a   :  { %11083 = vmatprep.subr.bf16.mxu1 %v11834_v27 }
 0x97d   :  { %11084 = vmatpush3.bf16.msra.mxu1 %v11835_v16  ;;  %v9921_v16 = vld [vmem:[%s15454_s9 + $0x8] ss:$0 sm:$0xff] }
 0x9f7   :  { %v1681_v31 = vpop.xlane.xlu0 %1680 }
 0x9f8   :  { %v1685_v33 = vmul.f32 0.015625, %v1681_v31 }
 0x9fa   :  { %v1697_v23 = vmul.f32 %v1685_v33, %v1685_v33  ;;  %v1703_v5 = vsub.f32 %v13538_v22, %v1685_v33  ;;  %v11836_v22 = vld [vmem:[%s15518_s30 + $0x150] sm:$0xff]   ;;  %v11838_v33 = vld [vmem:[%s15518_s30 + $0x148] sm:$0xff]  }
 0x9fb   :  { %v1691_v7 = vpop.xlane.xlu0 %1690  ;;  %v1684_v8 = vpop.xlane.xlu1 %1683  ;;  %11085 = vmatprep.subr.bf16.mxu1 %v11836_v22 }
 0x9fc   :  { %v1695_v9 = vmul.f32 0.015625, %v1691_v7  ;;  %v1686_v17 = vmul.f32 0.015625, %v1684_v8 }
 0x9fe   :  { %v1699_v30 = vsub.f32 %v1695_v9, %v1697_v23  ;;  %v1698_v13 = vmul.f32 %v1686_v17, %v1686_v17  ;;  %v1704_v31 = vsub.f32 %v13544_v14, %v1686_v17  ;;  %v9922_v9 = vld [vmem:[%s15454_s9 + $0x9] ss:$0 sm:$0xff]  ;;  %v11837_v14 = vld [vmem:[%s15518_s30 + $0x110] sm:$0xff]  }
 0x9ff   :  { %v1694_v15 = vpop.xlane.xlu1 %1693  ;;  %11086 = vmatpush3.bf16.msra.mxu1 %v11837_v14  ;;  %v11839_v17 = vld [vmem:[%s15518_s30 + $0x108] sm:$0xff]  }
 0xa00   :  { %v1701_v28 = vmax.f32 %v1699_v30, 0.0  ;;  %v1696_v18 = vmul.f32 0.015625, %v1694_v15  ;;  %11087 = vmatprep.subr.bf16.mxu1 %v11838_v33 }
 0xa02   :  { %v1705_v24 = vadd.f32 1e-05, %v1701_v28  ;;  %v1700_v36 = vsub.f32 %v1696_v18, %v1698_v13  ;;  %v11840_v18 = vld [vmem:[%s15518_s30 + $0x140] sm:$0xff]  }
 0xa03   :  { %11088 = vmatpush3.bf16.msra.mxu1 %v11839_v17 }
 0xa04   :  { %12146 = vrsqrt.f32 %v1705_v24  ;;  %v1702_v20 = vmax.f32 %v1700_v36, 0.0  ;;  %v11841_v24 = vld [vmem:[%s15518_s30 + $0x100] sm:$0xff]   ;;  %11089 = vmatprep.subr.bf16.mxu1 %v11840_v18 }
 0xa05   :  { %v9931_v36 = vld [vmem:[%s15452_s7 + $0x2] ss:$8 sm:$0x3] }
 0xa06   :  { %v1706_v6 = vadd.f32 1e-05, %v1702_v20  ;;  %v9973_v18 = vld [vmem:[%s15453_s8 + $0x2] ss:$0 sm:$0xff] }
 0xa07   :  { %11090 = vmatpush3.bf16.msra.mxu1 %v11841_v24 }
 0xa08   :  { %12148 = vrsqrt.f32 %v1706_v6  ;;  %v1743_v6 = vrot.slane %v9931_v36, %v13359_v26 }
 0xa11   :  { %v12147_v10 = vpop.eup %12146 }
 0xa12   :  { %v1709_v27 = vmul.f32 %v12147_v10, %v1703_v5  ;;  %v1739_v5 = vrot.slane %v9931_v36, %v13362_v29 }
 0xa14   :  { %v1715_v23 = vmul.f32 %v9921_v16, %v1709_v27 }
 0xa15   :  { %v12149_v7 = vpop.eup %12148 }
 0xa16   :  { %v1710_v8 = vmul.f32 %v12149_v7, %v1704_v31  ;;  %v1721_v15 = vadd.f32 %v9922_v9, %v1715_v23 }
 0xa18   :  { %v1716_v30 = vmul.f32 %v9921_v16, %v1710_v8 }
 0xa1a   :  { %v1722_v28 = vadd.f32 %v9922_v9, %v1716_v30 }
 0xa1c   :  { %v1732_v13 = vpack.c.bf16 %v1722_v28, %v1721_v15 }
 0xa1e   :  { %9940 = vmatmul.mubr.msk.bf16.vlgmr.msra.gmra.mxu0 %vm694_vm2, %v1732_v13 }
 0xa1f   :  { %11557 = vmatprep.mubr.msk.bf16.mxu0 %vm12452_vm0, %v15519_v19 }
 0xade   :  { %v1823_v20 = vpop.f32.mrf.mxu0 }
 0xadf   :  { %v1824_v7 = vadd.f32 %v1823_v20, %v1739_v5 }
 0xae0   :  { %v1825_v10 = vpop.f32.mrf.mxu0 }
 0xae1   :  { %v1826_v16 = vadd.f32 %v1825_v10, %v1743_v6  ;;  %v1832_v22 = vmax.f32 %v1824_v7, 0.0 }
 0xae2   :  { %v1827_v27 = vpop.f32.mrf.mxu0 }
 0xae3   :  { %v1828_v31 = vadd.f32 %v1827_v27, %v1739_v5  ;;  %v1833_v30 = vmax.f32 %v1826_v16, 0.0 }
 0xae4   :  { %v1829_v8 = vpop.f32.mrf.mxu0 }
 0xae5   :  { %v1830_v23 = vadd.f32 %v1829_v8, %v1743_v6  ;;  %v1834_v9 = vmax.f32 %v1828_v31, 0.0 }
 0xae7   :  { %v1835_v13 = vmax.f32 %v1830_v23, 0.0  ;;  %v1869_v33 = vpack.c.bf16 %v1834_v9, %v1832_v22  ;;  %v11843_v22 = vld [vmem:[%s15514_s1 + $0x70] sm:$0xff]  }
 0xae9   :  { %v1870_v14 = vpack.c.bf16 %v1835_v13, %v1833_v30 }
 0xaeb   :  { %2004 = vmatprep.mubr.bf16.mxu1 %v1870_v14  ;;  %v11845_v14 = vld [vmem:[%s15514_s1 + $0x60] sm:$0xff]  }
 0xaec   :  { %2005 = vmatmul.mubr.bf16.vlgmr.msra.gmra.mxu1 %v1869_v33 }
 0xbac   :  { %v11091_v17 = vpop.f32.mrf.mxu1 }
 0xbae   :  { %v11092_v24 = vpop.f32.mrf.mxu1 }
 0xbaf   :  { %v11093_v36 = vadd.f32 %v11092_v24, %v11091_v17 }
 0xbb0   :  { %v11094_v10 = vpop.f32.mrf.mxu1 }
 0xbb1   :  { %v2007_v27 = vadd.f32 %v11093_v36, %v9973_v18 }
 0xbb2   :  { %v11095_v20 = vpop.f32.mrf.mxu1 }
 0xbb3   :  { %v2013_v5 = vadd.f32 %v2007_v27, %v1721_v15  ;;  %v11096_v6 = vadd.f32 %v11095_v20, %v11094_v10  ;;  %v11842_v15 = vld [vmem:[%s15514_s1 + $0x78] sm:$0xff]  }
 0xbb4   :  { %11550 = vmatpush3.bf16.msra.mxu0 %v11842_v15 }
 0xbb5   :  { %v2010_v31 = vadd.f32 %v11096_v6, %v9973_v18  ;;  %v2017_v16 = vsel %vm694_vm2, %v2013_v5, 0.0  ;;  %v2025_v7 = vmul.f32 %v2013_v5, %v2013_v5  ;;  %11551 = vmatprep.subr.bf16.mxu0 %v15519_v19 }
 0xbb6   :  { %2018 = vadd.xlane.f32.xlu0 %v2017_v16 }
 0xbb7   :  { %v2014_v8 = vadd.f32 %v2010_v31, %v1722_v28  ;;  %v2027_v9 = vsel %vm694_vm2, %v2025_v7, 0.0  ;;  %v11844_v28 = vld [vmem:[%s15514_s1 + $0x68] sm:$0xff]  }
 0xbb8   :  { %11552 = vmatpush3.bf16.msra.mxu0 %v11843_v22 }
 0xbb9   :  { %v2020_v23 = vsel %vm694_vm2, %v2014_v8, 0.0  ;;  %v2026_v30 = vmul.f32 %v2014_v8, %v2014_v8  ;;  %11553 = vmatprep.subr.bf16.mxu0 %v15519_v19 }
 0xbba   :  { %2021 = vadd.xlane.f32.xlu1 %v2020_v23  ;;  %2028 = vadd.xlane.f32.xlu0 %v2027_v9 }
 0xbbb   :  { %v2030_v13 = vsel %vm694_vm2, %v2026_v30, 0.0 }
 0xbbc   :  { %11554 = vmatpush3.bf16.msra.mxu0 %v11844_v28 }
 0xbbd   :  { %11555 = vmatprep.subr.bf16.mxu0 %v15519_v19 }
 0xbbe   :  { %2031 = vadd.xlane.f32.xlu1 %v2030_v13 }
 0xbc0   :  { %11556 = vmatpush3.bf16.msra.mxu0 %v11845_v14  ;;  %v9990_v14 = vld [vmem:[%s15454_s9 + $0xa] ss:$0 sm:$0xff] }
 0xc3f   :  { %v2019_v33 = vpop.xlane.xlu0 %2018 }
 0xc40   :  { %v2023_v17 = vmul.f32 0.015625, %v2019_v33 }
 0xc42   :  { %v2035_v36 = vmul.f32 %v2023_v17, %v2023_v17  ;;  %v2041_v15 = vsub.f32 %v2013_v5, %v2023_v17  ;;  %v10000_v5 = vld [vmem:[%s15516_s28 + $0x3] ss:$0 sm:$0xff] }
 0xc43   :  { %v2022_v18 = vpop.xlane.xlu1 %2021  ;;  %v2029_v24 = vpop.xlane.xlu0 %2028 }
 0xc44   :  { %v2024_v10 = vmul.f32 0.015625, %v2022_v18  ;;  %v2033_v27 = vmul.f32 0.015625, %v2029_v24 }
 0xc46   :  { %v2037_v20 = vsub.f32 %v2033_v27, %v2035_v36  ;;  %v2036_v31 = vmul.f32 %v2024_v10, %v2024_v10  ;;  %v2042_v33 = vsub.f32 %v2014_v8, %v2024_v10  ;;  %v9991_v27 = vld [vmem:[%s15454_s9 + $0xb] ss:$0 sm:$0xff] }
 0xc47   :  { %v2032_v6 = vpop.xlane.xlu1 %2031 }
 0xc48   :  { %v2039_v16 = vmax.f32 %v2037_v20, 0.0  ;;  %v2034_v7 = vmul.f32 0.015625, %v2032_v6 }
 0xc4a   :  { %v2043_v23 = vadd.f32 1e-05, %v2039_v16  ;;  %v2038_v9 = vsub.f32 %v2034_v7, %v2036_v31 }
 0xc4c   :  { %12150 = vrsqrt.f32 %v2043_v23  ;;  %v2040_v30 = vmax.f32 %v2038_v9, 0.0 }
 0xc4e   :  { %v2044_v13 = vadd.f32 1e-05, %v2040_v30 }
 0xc50   :  { %12152 = vrsqrt.f32 %v2044_v13 }
 0xc59   :  { %v12151_v22 = vpop.eup %12150 }
 0xc5a   :  { %v2047_v28 = vmul.f32 %v12151_v22, %v2041_v15 }
 0xc5c   :  { %v2053_v36 = vmul.f32 %v9990_v14, %v2047_v28 }
 0xc5d   :  { %v12153_v18 = vpop.eup %12152 }
 0xc5e   :  { %v2048_v24 = vmul.f32 %v12153_v18, %v2042_v33  ;;  %v2059_v6 = vadd.f32 %v9991_v27, %v2053_v36  ;;  %v11848_v36 = vld [vmem:[%s15517_s4 + $0xf4] ss:$8 sps:$4 sm:$0xff]  }
 0xc5f   :  { %2266 = vmatprep.subr.bf16.mxu0 %v11848_v36 }
 0xc60   :  { %v2054_v20 = vmul.f32 %v9990_v14, %v2048_v24  ;;  %v11846_v24 = vld [vmem:[%s15517_s4 + $0xf0] ss:$8 sps:$4 sm:$0xff]  }
 0xc62   :  { %v2060_v31 = vadd.f32 %v9991_v27, %v2054_v20  ;;  %v11851_v27 = vld [vmem:[%s15517_s4 + $0xe4] ss:$8 sps:$4 sm:$0xff]   ;;  %v11849_v20 = vld [vmem:[%s15517_s4 + $0xe0] ss:$8 sps:$4 sm:$0xff]  }
 0xc64   :  { %v2070_v16 = vpack.c.bf16 %v2060_v31, %v2059_v6 }
 0xc66   :  { %11558 = vmatmul.mubr.msk.bf16.vlgmr.msra.gmra.mxu0 %vm694_vm2, %v2070_v16  ;;  %v11857_v16 = vld [vmem:[%s15517_s4 + $0xc4] ss:$8 sps:$4 sm:$0xff]  }
 0xc67   :  { %2290 = vmatprep.mubr.bf16.mxu0 %v15520_v32  ;;  %2267 = vmatpush1.bf16.msra.mxu0 %v11846_v24 }
 0xc68   :  { %2268 = vmatprep.subr.bf16.mxu0 %v11851_v27 }
 0xc6b   :  { %2269 = vmatpush1.bf16.msra.mxu0 %v11849_v20 }
 0xd26   :  { %v2137_v8 = vpop.f32.mrf.mxu0 }
 0xd27   :  { %v2138_v17 = vadd.f32 %v10000_v5, %v2137_v8  ;;  %v11858_v8 = vld [vmem:[%s15518_s30 + $0x1f8] sm:$0xff]  }
 0xd28   :  { %v11559_v10 = vpop.f32.mrf.mxu0  ;;  %11102 = vmatprep.subr.bf16.mxu1 %v11858_v8 }
 0xd29   :  { %v13674_v7 = vadd.f32 %v2138_v17, %v2059_v6  ;;  %v11854_v6 = vld [vmem:[%s15517_s4 + $0xd4] ss:$8 sps:$4 sm:$0xff]  }
 0xd2a   :  { %v2140_v23 = vpop.f32.mrf.mxu0  ;;  %2270 = vmatprep.subr.bf16.mxu0 %v11854_v6  ;;  %v11859_v17 = vld [vmem:[%s15518_s30 + $0x1b8] sm:$0xff]   ;;  %v11860_v10 = vld [vmem:[%s15518_s30 + $0x1f0] sm:$0xff]  }
 0xd2b   :  { %v2141_v9 = vadd.f32 %v10000_v5, %v2140_v23  ;;  %v2148_v30 = vsel %vm694_vm2, %v13674_v7, 0.0  ;;  %v2156_v13 = vmul.f32 %v13674_v7, %v13674_v7  ;;  %v11855_v5 = vld [vmem:[%s15517_s4 + $0xc0] ss:$8 sps:$4 sm:$0xff]   ;;  %11103 = vmatpush3.bf16.msra.mxu1 %v11859_v17  ;;  %v11861_v23 = vld [vmem:[%s15518_s30 + $0x1b0] sm:$0xff]  }
 0xd2c   :  { %2149 = vadd.xlane.f32.xlu0 %v2148_v30  ;;  %v11560_v15 = vpop.f32.mrf.mxu0  ;;  %11104 = vmatprep.subr.bf16.mxu1 %v11860_v10  ;;  %v11863_v30 = vld [vmem:[%s15518_s30 + $0x1a8] sm:$0xff]  }
 0xd2d   :  { %v13680_v22 = vadd.f32 %v2141_v9, %v2060_v31  ;;  %v2158_v28 = vsel %vm694_vm2, %v2156_v13, 0.0  ;;  %v11852_v31 = vld [vmem:[%s15517_s4 + $0xd0] ss:$8 sps:$4 sm:$0xff]   ;;  %v11862_v9 = vld [vmem:[%s15518_s30 + $0x1e8] sm:$0xff]   ;;  %v11864_v13 = vld [vmem:[%s15518_s30 + $0x1e0] sm:$0xff]  }
 0xd2e   :  { %2271 = vmatpush1.bf16.msra.mxu0 %v11852_v31  ;;  %v11865_v15 = vld [vmem:[%s15518_s30 + $0x1a0] sm:$0xff]  }
 0xd2f   :  { %v2151_v14 = vsel %vm694_vm2, %v13680_v22, 0.0  ;;  %v2157_v33 = vmul.f32 %v13680_v22, %v13680_v22  ;;  %2272 = vmatprep.subr.bf16.mxu0 %v11857_v16  ;;  %11105 = vmatpush3.bf16.msra.mxu1 %v11861_v23 }
 0xd30   :  { %2159 = vadd.xlane.f32.xlu0 %v2158_v28  ;;  %2152 = vadd.xlane.f32.xlu1 %v2151_v14  ;;  %v11866_v28 = vld [vmem:[%s15518_s30 + $0x1d8] sm:$0xff]  }
 0xd31   :  { %v2161_v18 = vsel %vm694_vm2, %v2157_v33, 0.0  ;;  %11106 = vmatprep.subr.bf16.mxu1 %v11862_v9  ;;  %v11867_v14 = vld [vmem:[%s15518_s30 + $0x198] sm:$0xff]  }
 0xd32   :  { %2273 = vmatpush1.bf16.msra.mxu0 %v11855_v5 }
 0xd33   :  { %11561 = vmatprep.subr.bf16.mxu0 %v15519_v19  ;;  %11107 = vmatpush3.bf16.msra.mxu1 %v11863_v30 }
 0xd34   :  { %2162 = vadd.xlane.f32.xlu1 %v2161_v18  ;;  %11108 = vmatprep.subr.bf16.mxu1 %v11864_v13 }
 0xd37   :  { %11109 = vmatpush3.bf16.msra.mxu1 %v11865_v15 }
 0xd38   :  { %11110 = vmatprep.subr.bf16.mxu1 %v11866_v28 }
 0xd3b   :  { %11111 = vmatpush3.bf16.msra.mxu1 %v11867_v14  ;;  %v10006_v14 = vld [vmem:[%s15454_s9 + $0xc] ss:$0 sm:$0xff] }
 0xdb5   :  { %v2150_v33 = vpop.xlane.xlu0 %2149 }
 0xdb6   :  { %v2154_v18 = vmul.f32 0.015625, %v2150_v33 }
 0xdb8   :  { %v2166_v27 = vmul.f32 %v2154_v18, %v2154_v18  ;;  %v2172_v13 = vsub.f32 %v13674_v7, %v2154_v18  ;;  %v11868_v7 = vld [vmem:[%s15518_s30 + $0x1d0] sm:$0xff]   ;;  %v11870_v18 = vld [vmem:[%s15518_s30 + $0x1c8] sm:$0xff]  }
 0xdb9   :  { %v2160_v24 = vpop.xlane.xlu0 %2159  ;;  %v2153_v36 = vpop.xlane.xlu1 %2152  ;;  %11112 = vmatprep.subr.bf16.mxu1 %v11868_v7 }
 0xdba   :  { %v2164_v20 = vmul.f32 0.015625, %v2160_v24  ;;  %v2155_v6 = vmul.f32 0.015625, %v2153_v36 }
 0xdbc   :  { %v2168_v31 = vsub.f32 %v2164_v20, %v2166_v27  ;;  %v2167_v8 = vmul.f32 %v2155_v6, %v2155_v6  ;;  %v2173_v33 = vsub.f32 %v13680_v22, %v2155_v6  ;;  %v10007_v20 = vld [vmem:[%s15454_s9 + $0xd] ss:$0 sm:$0xff]  ;;  %v11869_v22 = vld [vmem:[%s15518_s30 + $0x190] sm:$0xff]  }
 0xdbd   :  { %v2163_v16 = vpop.xlane.xlu1 %2162  ;;  %11113 = vmatpush3.bf16.msra.mxu1 %v11869_v22  ;;  %v11871_v6 = vld [vmem:[%s15518_s30 + $0x188] sm:$0xff]  }
 0xdbe   :  { %v2170_v5 = vmax.f32 %v2168_v31, 0.0  ;;  %v2165_v17 = vmul.f32 0.015625, %v2163_v16  ;;  %11114 = vmatprep.subr.bf16.mxu1 %v11870_v18 }
 0xdc0   :  { %v2174_v10 = vadd.f32 1e-05, %v2170_v5  ;;  %v2169_v23 = vsub.f32 %v2165_v17, %v2167_v8  ;;  %v11872_v17 = vld [vmem:[%s15518_s30 + $0x1c0] sm:$0xff]  }
 0xdc1   :  { %11115 = vmatpush3.bf16.msra.mxu1 %v11871_v6 }
 0xdc2   :  { %12154 = vrsqrt.f32 %v2174_v10  ;;  %v2171_v9 = vmax.f32 %v2169_v23, 0.0  ;;  %v11873_v10 = vld [vmem:[%s15518_s30 + $0x180] sm:$0xff]   ;;  %11116 = vmatprep.subr.bf16.mxu1 %v11872_v17 }
 0xdc3   :  { %v10016_v23 = vld [vmem:[%s15452_s7 + $0x3] ss:$8 sm:$0x3] }
 0xdc4   :  { %v2175_v30 = vadd.f32 1e-05, %v2171_v9  ;;  %v10058_v17 = vld [vmem:[%s15453_s8 + $0x3] ss:$0 sm:$0xff] }
 0xdc5   :  { %11117 = vmatpush3.bf16.msra.mxu1 %v11873_v10 }
 0xdc6   :  { %12156 = vrsqrt.f32 %v2175_v30  ;;  %v2212_v30 = vrot.slane %v10016_v23, %v13359_v26 }
 0xdcf   :  { %v12155_v15 = vpop.eup %12154 }
 0xdd0   :  { %v2178_v28 = vmul.f32 %v12155_v15, %v2172_v13  ;;  %v2208_v13 = vrot.slane %v10016_v23, %v13362_v29 }
 0xdd2   :  { %v2184_v27 = vmul.f32 %v10006_v14, %v2178_v28 }
 0xdd3   :  { %v12157_v24 = vpop.eup %12156 }
 0xdd4   :  { %v2179_v36 = vmul.f32 %v12157_v24, %v2173_v33  ;;  %v2190_v16 = vadd.f32 %v10007_v20, %v2184_v27 }
 0xdd6   :  { %v2185_v31 = vmul.f32 %v10006_v14, %v2179_v36 }
 0xdd8   :  { %v2191_v5 = vadd.f32 %v10007_v20, %v2185_v31 }
 0xdda   :  { %v2201_v8 = vpack.c.bf16 %v2191_v5, %v2190_v16 }
 0xddc   :  { %10025 = vmatmul.mubr.msk.bf16.vlgmr.msra.gmra.mxu0 %vm694_vm2, %v2201_v8 }
 0xddd   :  { %11569 = vmatprep.mubr.msk.bf16.mxu0 %vm12452_vm0, %v15519_v19 }
 0xe9c   :  { %v2292_v9 = vpop.f32.mrf.mxu0 }
 0xe9d   :  { %v2293_v24 = vadd.f32 %v2292_v9, %v2208_v13 }
 0xe9e   :  { %v2294_v15 = vpop.f32.mrf.mxu0 }
 0xe9f   :  { %v2295_v14 = vadd.f32 %v2294_v15, %v2212_v30  ;;  %v2301_v7 = vmax.f32 %v2293_v24, 0.0 }
 0xea0   :  { %v2296_v28 = vpop.f32.mrf.mxu0 }
 0xea1   :  { %v2297_v33 = vadd.f32 %v2296_v28, %v2208_v13  ;;  %v2302_v31 = vmax.f32 %v2295_v14, 0.0 }
 0xea2   :  { %v2298_v36 = vpop.f32.mrf.mxu0 }
 0xea3   :  { %v2299_v27 = vadd.f32 %v2298_v36, %v2212_v30  ;;  %v2303_v20 = vmax.f32 %v2297_v33, 0.0 }
 0xea5   :  { %v2304_v8 = vmax.f32 %v2299_v27, 0.0  ;;  %v2338_v18 = vpack.c.bf16 %v2303_v20, %v2301_v7  ;;  %v11875_v7 = vld [vmem:[%s15514_s1 + $0x90] sm:$0xff]  }
 0xea7   :  { %v2339_v22 = vpack.c.bf16 %v2304_v8, %v2302_v31 }
 0xea9   :  { %2473 = vmatprep.mubr.bf16.mxu1 %v2339_v22  ;;  %v11877_v22 = vld [vmem:[%s15514_s1 + $0x80] sm:$0xff]  }
 0xeaa   :  { %2474 = vmatmul.mubr.bf16.vlgmr.msra.gmra.mxu1 %v2338_v18 }
 0xf6a   :  { %v11118_v6 = vpop.f32.mrf.mxu1 }
 0xf6c   :  { %v11119_v10 = vpop.f32.mrf.mxu1 }
 0xf6d   :  { %v11120_v23 = vadd.f32 %v11119_v10, %v11118_v6 }
 0xf6e   :  { %v11121_v15 = vpop.f32.mrf.mxu1 }
 0xf6f   :  { %v2476_v28 = vadd.f32 %v11120_v23, %v10058_v17 }
 0xf70   :  { %v11122_v9 = vpop.f32.mrf.mxu1 }
 0xf71   :  { %v2482_v13 = vadd.f32 %v2476_v28, %v2190_v16  ;;  %v11123_v30 = vadd.f32 %v11122_v9, %v11121_v15  ;;  %v11874_v16 = vld [vmem:[%s15514_s1 + $0x98] sm:$0xff]  }
 0xf72   :  { %11562 = vmatpush3.bf16.msra.mxu0 %v11874_v16 }
 0xf73   :  { %v2479_v33 = vadd.f32 %v11123_v30, %v10058_v17  ;;  %v2486_v14 = vsel %vm694_vm2, %v2482_v13, 0.0  ;;  %v2494_v24 = vmul.f32 %v2482_v13, %v2482_v13  ;;  %11563 = vmatprep.subr.bf16.mxu0 %v15519_v19 }
 0xf74   :  { %2487 = vadd.xlane.f32.xlu0 %v2486_v14 }
 0xf75   :  { %v2483_v36 = vadd.f32 %v2479_v33, %v2191_v5  ;;  %v2496_v20 = vsel %vm694_vm2, %v2494_v24, 0.0  ;;  %v11876_v5 = vld [vmem:[%s15514_s1 + $0x88] sm:$0xff]  }
 0xf76   :  { %11564 = vmatpush3.bf16.msra.mxu0 %v11875_v7 }
 0xf77   :  { %v2489_v27 = vsel %vm694_vm2, %v2483_v36, 0.0  ;;  %v2495_v31 = vmul.f32 %v2483_v36, %v2483_v36  ;;  %11565 = vmatprep.subr.bf16.mxu0 %v15519_v19 }
 0xf78   :  { %2490 = vadd.xlane.f32.xlu1 %v2489_v27  ;;  %2497 = vadd.xlane.f32.xlu0 %v2496_v20 }
 0xf79   :  { %v2499_v8 = vsel %vm694_vm2, %v2495_v31, 0.0 }
 0xf7a   :  { %11566 = vmatpush3.bf16.msra.mxu0 %v11876_v5 }
 0xf7b   :  { %11567 = vmatprep.subr.bf16.mxu0 %v15519_v19 }
 0xf7c   :  { %2500 = vadd.xlane.f32.xlu1 %v2499_v8 }
 0xf7e   :  { %11568 = vmatpush3.bf16.msra.mxu0 %v11877_v22  ;;  %v10075_v22 = vld [vmem:[%s15454_s9 + $0xe] ss:$0 sm:$0xff] }
 0xffd   :  { %v2488_v18 = vpop.xlane.xlu0 %2487 }
 0xffe   :  { %v2492_v6 = vmul.f32 0.015625, %v2488_v18 }
0x1000   :  { %v2504_v23 = vmul.f32 %v2492_v6, %v2492_v6  ;;  %v2510_v16 = vsub.f32 %v2482_v13, %v2492_v6  ;;  %v10085_v13 = vld [vmem:[%s15516_s28 + $0x4] ss:$0 sm:$0xff] }
0x1001   :  { %v2491_v17 = vpop.xlane.xlu1 %2490  ;;  %v2498_v10 = vpop.xlane.xlu0 %2497 }
0x1002   :  { %v2493_v15 = vmul.f32 0.015625, %v2491_v17  ;;  %v2502_v28 = vmul.f32 0.015625, %v2498_v10 }
0x1004   :  { %v2506_v9 = vsub.f32 %v2502_v28, %v2504_v23  ;;  %v2505_v33 = vmul.f32 %v2493_v15, %v2493_v15  ;;  %v2511_v18 = vsub.f32 %v2483_v36, %v2493_v15  ;;  %v10076_v28 = vld [vmem:[%s15454_s9 + $0xf] ss:$0 sm:$0xff] }
0x1005   :  { %v2501_v30 = vpop.xlane.xlu1 %2500 }
0x1006   :  { %v2508_v14 = vmax.f32 %v2506_v9, 0.0  ;;  %v2503_v24 = vmul.f32 0.015625, %v2501_v30 }
0x1008   :  { %v2512_v27 = vadd.f32 1e-05, %v2508_v14  ;;  %v2507_v20 = vsub.f32 %v2503_v24, %v2505_v33 }
0x100a   :  { %12158 = vrsqrt.f32 %v2512_v27  ;;  %v2509_v31 = vmax.f32 %v2507_v20, 0.0 }
0x100c   :  { %v2513_v8 = vadd.f32 1e-05, %v2509_v31 }
0x100e   :  { %12160 = vrsqrt.f32 %v2513_v8 }
0x1017   :  { %v12159_v7 = vpop.eup %12158 }
0x1018   :  { %v2516_v5 = vmul.f32 %v12159_v7, %v2510_v16 }
0x101a   :  { %v2522_v23 = vmul.f32 %v10075_v22, %v2516_v5 }
0x101b   :  { %v12161_v17 = vpop.eup %12160 }
0x101c   :  { %v2517_v10 = vmul.f32 %v12161_v17, %v2511_v18  ;;  %v2528_v30 = vadd.f32 %v10076_v28, %v2522_v23  ;;  %v11880_v23 = vld [vmem:[%s15517_s4 + $0x134] ss:$8 sps:$4 sm:$0xff]  }
0x101d   :  { %2735 = vmatprep.subr.bf16.mxu0 %v11880_v23 }
0x101e   :  { %v2523_v9 = vmul.f32 %v10075_v22, %v2517_v10  ;;  %v11878_v10 = vld [vmem:[%s15517_s4 + $0x130] ss:$8 sps:$4 sm:$0xff]  }
0x1020   :  { %v2529_v33 = vadd.f32 %v10076_v28, %v2523_v9  ;;  %v11883_v28 = vld [vmem:[%s15517_s4 + $0x124] ss:$8 sps:$4 sm:$0xff]   ;;  %v11881_v9 = vld [vmem:[%s15517_s4 + $0x120] ss:$8 sps:$4 sm:$0xff]  }
0x1022   :  { %v2539_v14 = vpack.c.bf16 %v2529_v33, %v2528_v30 }
0x1024   :  { %11570 = vmatmul.mubr.msk.bf16.vlgmr.msra.gmra.mxu0 %vm694_vm2, %v2539_v14  ;;  %v11889_v14 = vld [vmem:[%s15517_s4 + $0x104] ss:$8 sps:$4 sm:$0xff]  }
0x1025   :  { %2759 = vmatprep.mubr.bf16.mxu0 %v15520_v32  ;;  %2736 = vmatpush1.bf16.msra.mxu0 %v11878_v10 }
0x1026   :  { %2737 = vmatprep.subr.bf16.mxu0 %v11883_v28 }
0x1029   :  { %2738 = vmatpush1.bf16.msra.mxu0 %v11881_v9 }
0x10e4   :  { %v2606_v36 = vpop.f32.mrf.mxu0 }
0x10e5   :  { %v2607_v6 = vadd.f32 %v10085_v13, %v2606_v36  ;;  %v11890_v36 = vld [vmem:[%s15518_s30 + $0x278] sm:$0xff]  }
0x10e6   :  { %v11571_v15 = vpop.f32.mrf.mxu0  ;;  %11129 = vmatprep.subr.bf16.mxu1 %v11890_v36 }
0x10e7   :  { %v13810_v24 = vadd.f32 %v2607_v6, %v2528_v30  ;;  %v11886_v30 = vld [vmem:[%s15517_s4 + $0x114] ss:$8 sps:$4 sm:$0xff]  }
0x10e8   :  { %v2609_v27 = vpop.f32.mrf.mxu0  ;;  %2739 = vmatprep.subr.bf16.mxu0 %v11886_v30  ;;  %v11891_v6 = vld [vmem:[%s15518_s30 + $0x238] sm:$0xff]   ;;  %v11892_v15 = vld [vmem:[%s15518_s30 + $0x270] sm:$0xff]  }
0x10e9   :  { %v2610_v20 = vadd.f32 %v10085_v13, %v2609_v27  ;;  %v2617_v31 = vsel %vm694_vm2, %v13810_v24, 0.0  ;;  %v2625_v8 = vmul.f32 %v13810_v24, %v13810_v24  ;;  %v11887_v13 = vld [vmem:[%s15517_s4 + $0x100] ss:$8 sps:$4 sm:$0xff]   ;;  %11130 = vmatpush3.bf16.msra.mxu1 %v11891_v6  ;;  %v11893_v27 = vld [vmem:[%s15518_s30 + $0x230] sm:$0xff]  }
0x10ea   :  { %2618 = vadd.xlane.f32.xlu0 %v2617_v31  ;;  %v11572_v16 = vpop.f32.mrf.mxu0  ;;  %11131 = vmatprep.subr.bf16.mxu1 %v11892_v15  ;;  %v11895_v31 = vld [vmem:[%s15518_s30 + $0x228] sm:$0xff]  }
0x10eb   :  { %v13816_v7 = vadd.f32 %v2610_v20, %v2529_v33  ;;  %v2627_v5 = vsel %vm694_vm2, %v2625_v8, 0.0  ;;  %v11884_v33 = vld [vmem:[%s15517_s4 + $0x110] ss:$8 sps:$4 sm:$0xff]   ;;  %v11894_v20 = vld [vmem:[%s15518_s30 + $0x268] sm:$0xff]   ;;  %v11896_v8 = vld [vmem:[%s15518_s30 + $0x260] sm:$0xff]  }
0x10ec   :  { %2740 = vmatpush1.bf16.msra.mxu0 %v11884_v33  ;;  %v11897_v16 = vld [vmem:[%s15518_s30 + $0x220] sm:$0xff]  }
0x10ed   :  { %v2620_v22 = vsel %vm694_vm2, %v13816_v7, 0.0  ;;  %v2626_v18 = vmul.f32 %v13816_v7, %v13816_v7  ;;  %2741 = vmatprep.subr.bf16.mxu0 %v11889_v14  ;;  %11132 = vmatpush3.bf16.msra.mxu1 %v11893_v27 }
0x10ee   :  { %2628 = vadd.xlane.f32.xlu0 %v2627_v5  ;;  %2621 = vadd.xlane.f32.xlu1 %v2620_v22  ;;  %v11898_v5 = vld [vmem:[%s15518_s30 + $0x258] sm:$0xff]  }
0x10ef   :  { %v2630_v17 = vsel %vm694_vm2, %v2626_v18, 0.0  ;;  %11133 = vmatprep.subr.bf16.mxu1 %v11894_v20  ;;  %v11899_v22 = vld [vmem:[%s15518_s30 + $0x218] sm:$0xff]  }
0x10f0   :  { %2742 = vmatpush1.bf16.msra.mxu0 %v11887_v13 }
0x10f1   :  { %11573 = vmatprep.subr.bf16.mxu0 %v15519_v19  ;;  %11134 = vmatpush3.bf16.msra.mxu1 %v11895_v31 }
0x10f2   :  { %2631 = vadd.xlane.f32.xlu1 %v2630_v17  ;;  %11135 = vmatprep.subr.bf16.mxu1 %v11896_v8 }
0x10f5   :  { %11136 = vmatpush3.bf16.msra.mxu1 %v11897_v16 }
0x10f6   :  { %11137 = vmatprep.subr.bf16.mxu1 %v11898_v5 }
0x10f9   :  { %11138 = vmatpush3.bf16.msra.mxu1 %v11899_v22  ;;  %v10091_v22 = vld [vmem:[%s15454_s9 + $0x10] ss:$0 sm:$0xff] }
0x1173   :  { %v2619_v18 = vpop.xlane.xlu0 %2618 }
0x1174   :  { %v2623_v17 = vmul.f32 0.015625, %v2619_v18 }
0x1176   :  { %v2635_v28 = vmul.f32 %v2623_v17, %v2623_v17  ;;  %v2641_v8 = vsub.f32 %v13810_v24, %v2623_v17  ;;  %v11900_v24 = vld [vmem:[%s15518_s30 + $0x250] sm:$0xff]   ;;  %v11902_v17 = vld [vmem:[%s15518_s30 + $0x248] sm:$0xff]  }
0x1177   :  { %v2629_v10 = vpop.xlane.xlu0 %2628  ;;  %v2622_v23 = vpop.xlane.xlu1 %2621  ;;  %11139 = vmatprep.subr.bf16.mxu1 %v11900_v24 }
0x1178   :  { %v2633_v9 = vmul.f32 0.015625, %v2629_v10  ;;  %v2624_v30 = vmul.f32 0.015625, %v2622_v23 }
0x117a   :  { %v2637_v33 = vsub.f32 %v2633_v9, %v2635_v28  ;;  %v2636_v36 = vmul.f32 %v2624_v30, %v2624_v30  ;;  %v2642_v18 = vsub.f32 %v13816_v7, %v2624_v30  ;;  %v10092_v9 = vld [vmem:[%s15454_s9 + $0x11] ss:$0 sm:$0xff]  ;;  %v11903_v30 = vld [vmem:[%s15518_s30 + $0x208] sm:$0xff]  }
0x117b   :  { %v2632_v14 = vpop.xlane.xlu1 %2631  ;;  %v11901_v7 = vld [vmem:[%s15518_s30 + $0x210] sm:$0xff]  }
0x117c   :  { %v2639_v13 = vmax.f32 %v2637_v33, 0.0  ;;  %v2634_v6 = vmul.f32 0.015625, %v2632_v14  ;;  %11140 = vmatpush3.bf16.msra.mxu1 %v11901_v7 }
0x117d   :  { %11141 = vmatprep.subr.bf16.mxu1 %v11902_v17 }
0x117e   :  { %v2643_v15 = vadd.f32 1e-05, %v2639_v13  ;;  %v2638_v27 = vsub.f32 %v2634_v6, %v2636_v36  ;;  %v11904_v6 = vld [vmem:[%s15518_s30 + $0x240] sm:$0xff]  }
0x1180   :  { %12162 = vrsqrt.f32 %v2643_v15  ;;  %v2640_v20 = vmax.f32 %v2638_v27, 0.0  ;;  %11142 = vmatpush3.bf16.msra.mxu1 %v11903_v30  ;;  %v11905_v15 = vld [vmem:[%s15518_s30 + $0x200] sm:$0xff]  }
0x1181   :  { %11143 = vmatprep.subr.bf16.mxu1 %v11904_v6  ;;  %v10101_v27 = vld [vmem:[%s15452_s7 + $0x4] ss:$8 sm:$0x3] }
0x1182   :  { %v2644_v31 = vadd.f32 1e-05, %v2640_v20  ;;  %v10143_v6 = vld [vmem:[%s15453_s8 + $0x4] ss:$0 sm:$0xff] }
0x1184   :  { %12164 = vrsqrt.f32 %v2644_v31  ;;  %11144 = vmatpush3.bf16.msra.mxu1 %v11905_v15  ;;  %v2681_v31 = vrot.slane %v10101_v27, %v13359_v26 }
0x118d   :  { %v12163_v16 = vpop.eup %12162 }
0x118e   :  { %v2647_v5 = vmul.f32 %v12163_v16, %v2641_v8  ;;  %v2677_v8 = vrot.slane %v10101_v27, %v13362_v29 }
0x1190   :  { %v2653_v28 = vmul.f32 %v10091_v22, %v2647_v5 }
0x1191   :  { %v12165_v10 = vpop.eup %12164 }
0x1192   :  { %v2648_v23 = vmul.f32 %v12165_v10, %v2642_v18  ;;  %v2659_v14 = vadd.f32 %v10092_v9, %v2653_v28 }
0x1194   :  { %v2654_v33 = vmul.f32 %v10091_v22, %v2648_v23 }
0x1196   :  { %v2660_v13 = vadd.f32 %v10092_v9, %v2654_v33 }
0x1198   :  { %v2670_v36 = vpack.c.bf16 %v2660_v13, %v2659_v14 }
0x119a   :  { %10110 = vmatmul.mubr.msk.bf16.vlgmr.msra.gmra.mxu0 %vm694_vm2, %v2670_v36 }
0x119b   :  { %11581 = vmatprep.mubr.msk.bf16.mxu0 %vm12452_vm0, %v15519_v19 }
0x125a   :  { %v2761_v20 = vpop.f32.mrf.mxu0 }
0x125b   :  { %v2762_v10 = vadd.f32 %v2761_v20, %v2677_v8 }
0x125c   :  { %v2763_v16 = vpop.f32.mrf.mxu0 }
0x125d   :  { %v2764_v22 = vadd.f32 %v2763_v16, %v2681_v31  ;;  %v2770_v24 = vmax.f32 %v2762_v10, 0.0 }
0x125e   :  { %v2765_v5 = vpop.f32.mrf.mxu0 }
0x125f   :  { %v2766_v18 = vadd.f32 %v2765_v5, %v2677_v8  ;;  %v2771_v33 = vmax.f32 %v2764_v22, 0.0 }
0x1260   :  { %v2767_v23 = vpop.f32.mrf.mxu0 }
0x1261   :  { %v2768_v28 = vadd.f32 %v2767_v23, %v2681_v31  ;;  %v2772_v9 = vmax.f32 %v2766_v18, 0.0 }
0x1263   :  { %v2773_v36 = vmax.f32 %v2768_v28, 0.0  ;;  %v2807_v17 = vpack.c.bf16 %v2772_v9, %v2770_v24  ;;  %v11907_v24 = vld [vmem:[%s15514_s1 + $0xb0] sm:$0xff]  }
0x1265   :  { %v2808_v7 = vpack.c.bf16 %v2773_v36, %v2771_v33 }
0x1267   :  { %2942 = vmatprep.mubr.bf16.mxu1 %v2808_v7  ;;  %v11909_v7 = vld [vmem:[%s15514_s1 + $0xa0] sm:$0xff]  }
0x1268   :  { %2943 = vmatmul.mubr.bf16.vlgmr.msra.gmra.mxu1 %v2807_v17 }
0x1328   :  { %v11145_v30 = vpop.f32.mrf.mxu1 }
0x132a   :  { %v11146_v15 = vpop.f32.mrf.mxu1 }
0x132b   :  { %v11147_v27 = vadd.f32 %v11146_v15, %v11145_v30 }
0x132c   :  { %v11148_v16 = vpop.f32.mrf.mxu1 }
0x132d   :  { %v2945_v5 = vadd.f32 %v11147_v27, %v10143_v6 }
0x132e   :  { %v11149_v20 = vpop.f32.mrf.mxu1 }
0x132f   :  { %v2951_v8 = vadd.f32 %v2945_v5, %v2659_v14  ;;  %v11150_v31 = vadd.f32 %v11149_v20, %v11148_v16  ;;  %v11906_v14 = vld [vmem:[%s15514_s1 + $0xb8] sm:$0xff]  }
0x1330   :  { %11574 = vmatpush3.bf16.msra.mxu0 %v11906_v14 }
0x1331   :  { %v2948_v18 = vadd.f32 %v11150_v31, %v10143_v6  ;;  %v2955_v22 = vsel %vm694_vm2, %v2951_v8, 0.0  ;;  %v2963_v10 = vmul.f32 %v2951_v8, %v2951_v8  ;;  %11575 = vmatprep.subr.bf16.mxu0 %v15519_v19 }
0x1332   :  { %2956 = vadd.xlane.f32.xlu0 %v2955_v22 }
0x1333   :  { %v2952_v23 = vadd.f32 %v2948_v18, %v2660_v13  ;;  %v2965_v9 = vsel %vm694_vm2, %v2963_v10, 0.0  ;;  %v11908_v13 = vld [vmem:[%s15514_s1 + $0xa8] sm:$0xff]  }
0x1334   :  { %11576 = vmatpush3.bf16.msra.mxu0 %v11907_v24 }
0x1335   :  { %v2958_v28 = vsel %vm694_vm2, %v2952_v23, 0.0  ;;  %v2964_v33 = vmul.f32 %v2952_v23, %v2952_v23  ;;  %11577 = vmatprep.subr.bf16.mxu0 %v15519_v19 }
0x1336   :  { %2959 = vadd.xlane.f32.xlu1 %v2958_v28  ;;  %2966 = vadd.xlane.f32.xlu0 %v2965_v9 }
0x1337   :  { %v2968_v36 = vsel %vm694_vm2, %v2964_v33, 0.0 }
0x1338   :  { %11578 = vmatpush3.bf16.msra.mxu0 %v11908_v13 }
0x1339   :  { %11579 = vmatprep.subr.bf16.mxu0 %v15519_v19 }
0x133a   :  { %2969 = vadd.xlane.f32.xlu1 %v2968_v36 }
0x133c   :  { %11580 = vmatpush3.bf16.msra.mxu0 %v11909_v7  ;;  %v10160_v7 = vld [vmem:[%s15454_s9 + $0x12] ss:$0 sm:$0xff] }
0x13bb   :  { %v2957_v17 = vpop.xlane.xlu0 %2956 }
0x13bc   :  { %v2961_v30 = vmul.f32 0.015625, %v2957_v17 }
0x13be   :  { %v2973_v27 = vmul.f32 %v2961_v30, %v2961_v30  ;;  %v2979_v14 = vsub.f32 %v2951_v8, %v2961_v30  ;;  %v10170_v8 = vld [vmem:[%s15516_s28 + $0x5] ss:$0 sm:$0xff] }
0x13bf   :  { %v2960_v6 = vpop.xlane.xlu1 %2959  ;;  %v2967_v15 = vpop.xlane.xlu0 %2966 }
0x13c0   :  { %v2962_v16 = vmul.f32 0.015625, %v2960_v6  ;;  %v2971_v5 = vmul.f32 0.015625, %v2967_v15 }
0x13c2   :  { %v2975_v20 = vsub.f32 %v2971_v5, %v2973_v27  ;;  %v2974_v18 = vmul.f32 %v2962_v16, %v2962_v16  ;;  %v2980_v17 = vsub.f32 %v2952_v23, %v2962_v16  ;;  %v10161_v5 = vld [vmem:[%s15454_s9 + $0x13] ss:$0 sm:$0xff] }
0x13c3   :  { %v2970_v31 = vpop.xlane.xlu1 %2969 }
0x13c4   :  { %v2977_v22 = vmax.f32 %v2975_v20, 0.0  ;;  %v2972_v10 = vmul.f32 0.015625, %v2970_v31 }
0x13c6   :  { %v2981_v28 = vadd.f32 1e-05, %v2977_v22  ;;  %v2976_v9 = vsub.f32 %v2972_v10, %v2974_v18 }
0x13c8   :  { %12166 = vrsqrt.f32 %v2981_v28  ;;  %v2978_v33 = vmax.f32 %v2976_v9, 0.0 }
0x13ca   :  { %v2982_v36 = vadd.f32 1e-05, %v2978_v33 }
0x13cc   :  { %12168 = vrsqrt.f32 %v2982_v36 }
0x13d5   :  { %v12167_v24 = vpop.eup %12166 }
0x13d6   :  { %v2985_v13 = vmul.f32 %v12167_v24, %v2979_v14 }
0x13d8   :  { %v2991_v27 = vmul.f32 %v10160_v7, %v2985_v13 }
0x13d9   :  { %v12169_v6 = vpop.eup %12168 }
0x13da   :  { %v2986_v15 = vmul.f32 %v12169_v6, %v2980_v17  ;;  %v2997_v31 = vadd.f32 %v10161_v5, %v2991_v27  ;;  %v11912_v27 = vld [vmem:[%s15517_s4 + $0x174] ss:$8 sps:$4 sm:$0xff]  }
0x13db   :  { %3204 = vmatprep.subr.bf16.mxu0 %v11912_v27 }
0x13dc   :  { %v2992_v20 = vmul.f32 %v10160_v7, %v2986_v15  ;;  %v11910_v15 = vld [vmem:[%s15517_s4 + $0x170] ss:$8 sps:$4 sm:$0xff]  }
0x13de   :  { %v2998_v18 = vadd.f32 %v10161_v5, %v2992_v20  ;;  %v11915_v5 = vld [vmem:[%s15517_s4 + $0x164] ss:$8 sps:$4 sm:$0xff]   ;;  %v11913_v20 = vld [vmem:[%s15517_s4 + $0x160] ss:$8 sps:$4 sm:$0xff]  }
0x13e0   :  { %v3008_v22 = vpack.c.bf16 %v2998_v18, %v2997_v31 }
0x13e2   :  { %11582 = vmatmul.mubr.msk.bf16.vlgmr.msra.gmra.mxu0 %vm694_vm2, %v3008_v22  ;;  %v11921_v22 = vld [vmem:[%s15517_s4 + $0x144] ss:$8 sps:$4 sm:$0xff]  }
0x13e3   :  { %3228 = vmatprep.mubr.bf16.mxu0 %v15520_v32  ;;  %3205 = vmatpush1.bf16.msra.mxu0 %v11910_v15 }
0x13e4   :  { %3206 = vmatprep.subr.bf16.mxu0 %v11915_v5 }
0x13e7   :  { %3207 = vmatpush1.bf16.msra.mxu0 %v11913_v20 }
0x14a2   :  { %v3075_v23 = vpop.f32.mrf.mxu0 }
0x14a3   :  { %v3076_v30 = vadd.f32 %v10170_v8, %v3075_v23  ;;  %v11922_v23 = vld [vmem:[%s15518_s30 + $0x2f8] sm:$0xff]  }
0x14a4   :  { %v11583_v16 = vpop.f32.mrf.mxu0  ;;  %11156 = vmatprep.subr.bf16.mxu1 %v11922_v23 }
0x14a5   :  { %v13946_v10 = vadd.f32 %v3076_v30, %v2997_v31  ;;  %v11918_v31 = vld [vmem:[%s15517_s4 + $0x154] ss:$8 sps:$4 sm:$0xff]  }
0x14a6   :  { %v3078_v28 = vpop.f32.mrf.mxu0  ;;  %3208 = vmatprep.subr.bf16.mxu0 %v11918_v31  ;;  %v11923_v30 = vld [vmem:[%s15518_s30 + $0x2b8] sm:$0xff]   ;;  %v11924_v16 = vld [vmem:[%s15518_s30 + $0x2f0] sm:$0xff]  }
0x14a7   :  { %v3079_v9 = vadd.f32 %v10170_v8, %v3078_v28  ;;  %v3086_v33 = vsel %vm694_vm2, %v13946_v10, 0.0  ;;  %v3094_v36 = vmul.f32 %v13946_v10, %v13946_v10  ;;  %v11919_v8 = vld [vmem:[%s15517_s4 + $0x140] ss:$8 sps:$4 sm:$0xff]   ;;  %11157 = vmatpush3.bf16.msra.mxu1 %v11923_v30  ;;  %v11925_v28 = vld [vmem:[%s15518_s30 + $0x2b0] sm:$0xff]  }
0x14a8   :  { %3087 = vadd.xlane.f32.xlu0 %v3086_v33  ;;  %v11584_v14 = vpop.f32.mrf.mxu0  ;;  %11158 = vmatprep.subr.bf16.mxu1 %v11924_v16  ;;  %v11927_v33 = vld [vmem:[%s15518_s30 + $0x2a8] sm:$0xff]  }
0x14a9   :  { %v13952_v24 = vadd.f32 %v3079_v9, %v2998_v18  ;;  %v3096_v13 = vsel %vm694_vm2, %v3094_v36, 0.0  ;;  %v11916_v18 = vld [vmem:[%s15517_s4 + $0x150] ss:$8 sps:$4 sm:$0xff]   ;;  %v11926_v9 = vld [vmem:[%s15518_s30 + $0x2e8] sm:$0xff]   ;;  %v11928_v36 = vld [vmem:[%s15518_s30 + $0x2e0] sm:$0xff]  }
0x14aa   :  { %3209 = vmatpush1.bf16.msra.mxu0 %v11916_v18  ;;  %v11929_v14 = vld [vmem:[%s15518_s30 + $0x2a0] sm:$0xff]  }
0x14ab   :  { %v3089_v7 = vsel %vm694_vm2, %v13952_v24, 0.0  ;;  %v3095_v17 = vmul.f32 %v13952_v24, %v13952_v24  ;;  %3210 = vmatprep.subr.bf16.mxu0 %v11921_v22  ;;  %11159 = vmatpush3.bf16.msra.mxu1 %v11925_v28 }
0x14ac   :  { %3097 = vadd.xlane.f32.xlu0 %v3096_v13  ;;  %3090 = vadd.xlane.f32.xlu1 %v3089_v7  ;;  %v11930_v13 = vld [vmem:[%s15518_s30 + $0x2d8] sm:$0xff]  }
0x14ad   :  { %v3099_v6 = vsel %vm694_vm2, %v3095_v17, 0.0  ;;  %11160 = vmatprep.subr.bf16.mxu1 %v11926_v9  ;;  %v11931_v7 = vld [vmem:[%s15518_s30 + $0x298] sm:$0xff]  }
0x14ae   :  { %3211 = vmatpush1.bf16.msra.mxu0 %v11919_v8 }
0x14af   :  { %11585 = vmatprep.subr.bf16.mxu0 %v15519_v19  ;;  %11161 = vmatpush3.bf16.msra.mxu1 %v11927_v33 }
0x14b0   :  { %3100 = vadd.xlane.f32.xlu1 %v3099_v6  ;;  %11162 = vmatprep.subr.bf16.mxu1 %v11928_v36 }
0x14b3   :  { %11163 = vmatpush3.bf16.msra.mxu1 %v11929_v14 }
0x14b4   :  { %11164 = vmatprep.subr.bf16.mxu1 %v11930_v13 }
0x14b7   :  { %11165 = vmatpush3.bf16.msra.mxu1 %v11931_v7  ;;  %v10176_v7 = vld [vmem:[%s15454_s9 + $0x14] ss:$0 sm:$0xff] }
0x1531   :  { %v3088_v17 = vpop.xlane.xlu0 %3087 }
0x1532   :  { %v3092_v6 = vmul.f32 0.015625, %v3088_v17 }
0x1534   :  { %v3104_v5 = vmul.f32 %v3092_v6, %v3092_v6  ;;  %v3110_v36 = vsub.f32 %v13946_v10, %v3092_v6  ;;  %v11932_v10 = vld [vmem:[%s15518_s30 + $0x2d0] sm:$0xff]   ;;  %v11934_v6 = vld [vmem:[%s15518_s30 + $0x2c8] sm:$0xff]  }
0x1535   :  { %v3098_v15 = vpop.xlane.xlu0 %3097  ;;  %v3091_v27 = vpop.xlane.xlu1 %3090  ;;  %11166 = vmatprep.subr.bf16.mxu1 %v11932_v10 }
0x1536   :  { %v3102_v20 = vmul.f32 0.015625, %v3098_v15  ;;  %v3093_v31 = vmul.f32 0.015625, %v3091_v27 }
0x1538   :  { %v3106_v18 = vsub.f32 %v3102_v20, %v3104_v5  ;;  %v3105_v23 = vmul.f32 %v3093_v31, %v3093_v31  ;;  %v3111_v17 = vsub.f32 %v13952_v24, %v3093_v31  ;;  %v10177_v20 = vld [vmem:[%s15454_s9 + $0x15] ss:$0 sm:$0xff]  ;;  %v11935_v31 = vld [vmem:[%s15518_s30 + $0x288] sm:$0xff]  }
0x1539   :  { %v3101_v22 = vpop.xlane.xlu1 %3100  ;;  %v11933_v24 = vld [vmem:[%s15518_s30 + $0x290] sm:$0xff]  }
0x153a   :  { %v3108_v8 = vmax.f32 %v3106_v18, 0.0  ;;  %v3103_v30 = vmul.f32 0.015625, %v3101_v22  ;;  %11167 = vmatpush3.bf16.msra.mxu1 %v11933_v24 }
0x153b   :  { %11168 = vmatprep.subr.bf16.mxu1 %v11934_v6 }
0x153c   :  { %v3112_v16 = vadd.f32 1e-05, %v3108_v8  ;;  %v3107_v28 = vsub.f32 %v3103_v30, %v3105_v23  ;;  %v11936_v30 = vld [vmem:[%s15518_s30 + $0x2c0] sm:$0xff]  }
0x153e   :  { %12170 = vrsqrt.f32 %v3112_v16  ;;  %v3109_v9 = vmax.f32 %v3107_v28, 0.0  ;;  %11169 = vmatpush3.bf16.msra.mxu1 %v11935_v31  ;;  %v11937_v16 = vld [vmem:[%s15518_s30 + $0x280] sm:$0xff]  }
0x153f   :  { %11170 = vmatprep.subr.bf16.mxu1 %v11936_v30  ;;  %v10186_v28 = vld [vmem:[%s15452_s7 + $0x5] ss:$8 sm:$0x3] }
0x1540   :  { %v3113_v33 = vadd.f32 1e-05, %v3109_v9  ;;  %v10228_v30 = vld [vmem:[%s15453_s8 + $0x5] ss:$0 sm:$0xff] }
0x1542   :  { %12172 = vrsqrt.f32 %v3113_v33  ;;  %11171 = vmatpush3.bf16.msra.mxu1 %v11937_v16  ;;  %v3150_v33 = vrot.slane %v10186_v28, %v13359_v26 }
0x154b   :  { %v12171_v14 = vpop.eup %12170 }
0x154c   :  { %v3116_v13 = vmul.f32 %v12171_v14, %v3110_v36  ;;  %v3146_v36 = vrot.slane %v10186_v28, %v13362_v29 }
0x154e   :  { %v3122_v5 = vmul.f32 %v10176_v7, %v3116_v13 }
0x154f   :  { %v12173_v15 = vpop.eup %12172 }
0x1550   :  { %v3117_v27 = vmul.f32 %v12173_v15, %v3111_v17  ;;  %v3128_v22 = vadd.f32 %v10177_v20, %v3122_v5 }
0x1552   :  { %v3123_v18 = vmul.f32 %v10176_v7, %v3117_v27 }
0x1554   :  { %v3129_v8 = vadd.f32 %v10177_v20, %v3123_v18 }
0x1556   :  { %v3139_v23 = vpack.c.bf16 %v3129_v8, %v3128_v22 }
0x1558   :  { %10195 = vmatmul.mubr.msk.bf16.vlgmr.msra.gmra.mxu0 %vm694_vm2, %v3139_v23 }
0x1559   :  { %11593 = vmatprep.mubr.msk.bf16.mxu0 %vm12452_vm0, %v15519_v19 }
0x1618   :  { %v3230_v9 = vpop.f32.mrf.mxu0 }
0x1619   :  { %v3231_v15 = vadd.f32 %v3230_v9, %v3146_v36 }
0x161a   :  { %v3232_v14 = vpop.f32.mrf.mxu0 }
0x161b   :  { %v3233_v7 = vadd.f32 %v3232_v14, %v3150_v33  ;;  %v3239_v10 = vmax.f32 %v3231_v15, 0.0 }
0x161c   :  { %v3234_v13 = vpop.f32.mrf.mxu0 }
0x161d   :  { %v3235_v17 = vadd.f32 %v3234_v13, %v3146_v36  ;;  %v3240_v18 = vmax.f32 %v3233_v7, 0.0 }
0x161e   :  { %v3236_v27 = vpop.f32.mrf.mxu0 }
0x161f   :  { %v3237_v5 = vadd.f32 %v3236_v27, %v3150_v33  ;;  %v3241_v20 = vmax.f32 %v3235_v17, 0.0 }
0x1621   :  { %v3242_v23 = vmax.f32 %v3237_v5, 0.0  ;;  %v3276_v6 = vpack.c.bf16 %v3241_v20, %v3239_v10  ;;  %v11939_v10 = vld [vmem:[%s15514_s1 + $0xd0] sm:$0xff]  }
0x1623   :  { %v3277_v24 = vpack.c.bf16 %v3242_v23, %v3240_v18 }
0x1625   :  { %3411 = vmatprep.mubr.bf16.mxu1 %v3277_v24  ;;  %v11941_v24 = vld [vmem:[%s15514_s1 + $0xc0] sm:$0xff]  }
0x1626   :  { %3412 = vmatmul.mubr.bf16.vlgmr.msra.gmra.mxu1 %v3276_v6 }
0x16e6   :  { %v11172_v31 = vpop.f32.mrf.mxu1 }
0x16e8   :  { %v11173_v16 = vpop.f32.mrf.mxu1 }
0x16e9   :  { %v11174_v28 = vadd.f32 %v11173_v16, %v11172_v31 }
0x16ea   :  { %v11175_v14 = vpop.f32.mrf.mxu1 }
0x16eb   :  { %v3414_v13 = vadd.f32 %v11174_v28, %v10228_v30 }
0x16ec   :  { %v11176_v9 = vpop.f32.mrf.mxu1 }
0x16ed   :  { %v3420_v36 = vadd.f32 %v3414_v13, %v3128_v22  ;;  %v11177_v33 = vadd.f32 %v11176_v9, %v11175_v14  ;;  %v11938_v22 = vld [vmem:[%s15514_s1 + $0xd8] sm:$0xff]  }
0x16ee   :  { %11586 = vmatpush3.bf16.msra.mxu0 %v11938_v22 }
0x16ef   :  { %v3417_v17 = vadd.f32 %v11177_v33, %v10228_v30  ;;  %v3424_v7 = vsel %vm694_vm2, %v3420_v36, 0.0  ;;  %v3432_v15 = vmul.f32 %v3420_v36, %v3420_v36  ;;  %11587 = vmatprep.subr.bf16.mxu0 %v15519_v19 }
0x16f0   :  { %3425 = vadd.xlane.f32.xlu0 %v3424_v7 }
0x16f1   :  { %v3421_v27 = vadd.f32 %v3417_v17, %v3129_v8  ;;  %v3434_v20 = vsel %vm694_vm2, %v3432_v15, 0.0  ;;  %v11940_v8 = vld [vmem:[%s15514_s1 + $0xc8] sm:$0xff]  }
0x16f2   :  { %11588 = vmatpush3.bf16.msra.mxu0 %v11939_v10 }
0x16f3   :  { %v3427_v5 = vsel %vm694_vm2, %v3421_v27, 0.0  ;;  %v3433_v18 = vmul.f32 %v3421_v27, %v3421_v27  ;;  %11589 = vmatprep.subr.bf16.mxu0 %v15519_v19 }
0x16f4   :  { %3428 = vadd.xlane.f32.xlu1 %v3427_v5  ;;  %3435 = vadd.xlane.f32.xlu0 %v3434_v20 }
0x16f5   :  { %v3437_v23 = vsel %vm694_vm2, %v3433_v18, 0.0 }
0x16f6   :  { %11590 = vmatpush3.bf16.msra.mxu0 %v11940_v8 }
0x16f7   :  { %11591 = vmatprep.subr.bf16.mxu0 %v15519_v19 }
0x16f8   :  { %3438 = vadd.xlane.f32.xlu1 %v3437_v23 }
0x16fa   :  { %11592 = vmatpush3.bf16.msra.mxu0 %v11941_v24  ;;  %v10245_v24 = vld [vmem:[%s15454_s9 + $0x16] ss:$0 sm:$0xff] }
0x1779   :  { %v3426_v6 = vpop.xlane.xlu0 %3425 }
0x177a   :  { %v3430_v31 = vmul.f32 0.015625, %v3426_v6 }
0x177c   :  { %v3442_v28 = vmul.f32 %v3430_v31, %v3430_v31  ;;  %v3448_v22 = vsub.f32 %v3420_v36, %v3430_v31  ;;  %v10255_v36 = vld [vmem:[%s15516_s28 + $0x6] ss:$0 sm:$0xff] }
0x177d   :  { %v3429_v30 = vpop.xlane.xlu1 %3428  ;;  %v3436_v16 = vpop.xlane.xlu0 %3435 }
0x177e   :  { %v3431_v14 = vmul.f32 0.015625, %v3429_v30  ;;  %v3440_v13 = vmul.f32 0.015625, %v3436_v16 }
0x1780   :  { %v3444_v9 = vsub.f32 %v3440_v13, %v3442_v28  ;;  %v3443_v17 = vmul.f32 %v3431_v14, %v3431_v14  ;;  %v3449_v6 = vsub.f32 %v3421_v27, %v3431_v14  ;;  %v10246_v13 = vld [vmem:[%s15454_s9 + $0x17] ss:$0 sm:$0xff] }
0x1781   :  { %v3439_v33 = vpop.xlane.xlu1 %3438 }
0x1782   :  { %v3446_v7 = vmax.f32 %v3444_v9, 0.0  ;;  %v3441_v15 = vmul.f32 0.015625, %v3439_v33 }
0x1784   :  { %v3450_v5 = vadd.f32 1e-05, %v3446_v7  ;;  %v3445_v20 = vsub.f32 %v3441_v15, %v3443_v17 }
0x1786   :  { %12174 = vrsqrt.f32 %v3450_v5  ;;  %v3447_v18 = vmax.f32 %v3445_v20, 0.0 }
0x1788   :  { %v3451_v23 = vadd.f32 1e-05, %v3447_v18 }
0x178a   :  { %12176 = vrsqrt.f32 %v3451_v23 }
0x1793   :  { %v12175_v10 = vpop.eup %12174 }
0x1794   :  { %v3454_v8 = vmul.f32 %v12175_v10, %v3448_v22 }
0x1796   :  { %v3460_v28 = vmul.f32 %v10245_v24, %v3454_v8 }
0x1797   :  { %v12177_v30 = vpop.eup %12176 }
0x1798   :  { %v3455_v16 = vmul.f32 %v12177_v30, %v3449_v6  ;;  %v3466_v33 = vadd.f32 %v10246_v13, %v3460_v28  ;;  %v11944_v28 = vld [vmem:[%s15517_s4 + $0x1b4] ss:$8 sps:$4 sm:$0xff]  }
0x1799   :  { %3673 = vmatprep.subr.bf16.mxu0 %v11944_v28 }
0x179a   :  { %v3461_v9 = vmul.f32 %v10245_v24, %v3455_v16  ;;  %v11942_v16 = vld [vmem:[%s15517_s4 + $0x1b0] ss:$8 sps:$4 sm:$0xff]  }
0x179c   :  { %v3467_v17 = vadd.f32 %v10246_v13, %v3461_v9  ;;  %v11947_v13 = vld [vmem:[%s15517_s4 + $0x1a4] ss:$8 sps:$4 sm:$0xff]   ;;  %v11945_v9 = vld [vmem:[%s15517_s4 + $0x1a0] ss:$8 sps:$4 sm:$0xff]  }
0x179e   :  { %v3477_v7 = vpack.c.bf16 %v3467_v17, %v3466_v33 }
0x17a0   :  { %11594 = vmatmul.mubr.msk.bf16.vlgmr.msra.gmra.mxu0 %vm694_vm2, %v3477_v7  ;;  %v11953_v7 = vld [vmem:[%s15517_s4 + $0x184] ss:$8 sps:$4 sm:$0xff]  }
0x17a1   :  { %3697 = vmatprep.mubr.bf16.mxu0 %v15520_v32  ;;  %3674 = vmatpush1.bf16.msra.mxu0 %v11942_v16 }
0x17a2   :  { %3675 = vmatprep.subr.bf16.mxu0 %v11947_v13 }
0x17a5   :  { %3676 = vmatpush1.bf16.msra.mxu0 %v11945_v9 }
0x1860   :  { %v3544_v27 = vpop.f32.mrf.mxu0 }
0x1861   :  { %v3545_v31 = vadd.f32 %v10255_v36, %v3544_v27  ;;  %v11954_v27 = vld [vmem:[%s15518_s30 + $0x378] sm:$0xff]  }
0x1862   :  { %v11595_v14 = vpop.f32.mrf.mxu0  ;;  %11183 = vmatprep.subr.bf16.mxu1 %v11954_v27 }
0x1863   :  { %v14082_v15 = vadd.f32 %v3545_v31, %v3466_v33  ;;  %v11950_v33 = vld [vmem:[%s15517_s4 + $0x194] ss:$8 sps:$4 sm:$0xff]  }
0x1864   :  { %v3547_v5 = vpop.f32.mrf.mxu0  ;;  %3677 = vmatprep.subr.bf16.mxu0 %v11950_v33  ;;  %v11955_v31 = vld [vmem:[%s15518_s30 + $0x338] sm:$0xff]   ;;  %v11956_v14 = vld [vmem:[%s15518_s30 + $0x370] sm:$0xff]  }
0x1865   :  { %v3548_v20 = vadd.f32 %v10255_v36, %v3547_v5  ;;  %v3555_v18 = vsel %vm694_vm2, %v14082_v15, 0.0  ;;  %v3563_v23 = vmul.f32 %v14082_v15, %v14082_v15  ;;  %v11951_v36 = vld [vmem:[%s15517_s4 + $0x180] ss:$8 sps:$4 sm:$0xff]   ;;  %11184 = vmatpush3.bf16.msra.mxu1 %v11955_v31  ;;  %v11957_v5 = vld [vmem:[%s15518_s30 + $0x330] sm:$0xff]  }
0x1866   :  { %3556 = vadd.xlane.f32.xlu0 %v3555_v18  ;;  %v11596_v22 = vpop.f32.mrf.mxu0  ;;  %11185 = vmatprep.subr.bf16.mxu1 %v11956_v14  ;;  %v11959_v18 = vld [vmem:[%s15518_s30 + $0x328] sm:$0xff]  }
0x1867   :  { %v14088_v10 = vadd.f32 %v3548_v20, %v3467_v17  ;;  %v3565_v8 = vsel %vm694_vm2, %v3563_v23, 0.0  ;;  %v11948_v17 = vld [vmem:[%s15517_s4 + $0x190] ss:$8 sps:$4 sm:$0xff]   ;;  %v11958_v20 = vld [vmem:[%s15518_s30 + $0x368] sm:$0xff]   ;;  %v11960_v23 = vld [vmem:[%s15518_s30 + $0x360] sm:$0xff]  }
0x1868   :  { %3678 = vmatpush1.bf16.msra.mxu0 %v11948_v17  ;;  %v11961_v22 = vld [vmem:[%s15518_s30 + $0x320] sm:$0xff]  }
0x1869   :  { %v3558_v24 = vsel %vm694_vm2, %v14088_v10, 0.0  ;;  %v3564_v6 = vmul.f32 %v14088_v10, %v14088_v10  ;;  %3679 = vmatprep.subr.bf16.mxu0 %v11953_v7  ;;  %11186 = vmatpush3.bf16.msra.mxu1 %v11957_v5 }
0x186a   :  { %3566 = vadd.xlane.f32.xlu0 %v3565_v8  ;;  %3559 = vadd.xlane.f32.xlu1 %v3558_v24  ;;  %v11962_v8 = vld [vmem:[%s15518_s30 + $0x358] sm:$0xff]  }
0x186b   :  { %v3568_v30 = vsel %vm694_vm2, %v3564_v6, 0.0  ;;  %11187 = vmatprep.subr.bf16.mxu1 %v11958_v20  ;;  %v11963_v24 = vld [vmem:[%s15518_s30 + $0x318] sm:$0xff]  }
0x186c   :  { %3680 = vmatpush1.bf16.msra.mxu0 %v11951_v36 }
0x186d   :  { %11597 = vmatprep.subr.bf16.mxu0 %v15519_v19  ;;  %11188 = vmatpush3.bf16.msra.mxu1 %v11959_v18 }
0x186e   :  { %3569 = vadd.xlane.f32.xlu1 %v3568_v30  ;;  %11189 = vmatprep.subr.bf16.mxu1 %v11960_v23 }
0x1871   :  { %11190 = vmatpush3.bf16.msra.mxu1 %v11961_v22 }
0x1872   :  { %11191 = vmatprep.subr.bf16.mxu1 %v11962_v8 }
0x1875   :  { %11192 = vmatpush3.bf16.msra.mxu1 %v11963_v24  ;;  %v10261_v24 = vld [vmem:[%s15454_s9 + $0x18] ss:$0 sm:$0xff] }
0x18ef   :  { %v3557_v6 = vpop.xlane.xlu0 %3556 }
0x18f0   :  { %v3561_v30 = vmul.f32 0.015625, %v3557_v6 }
0x18f2   :  { %v3573_v13 = vmul.f32 %v3561_v30, %v3561_v30  ;;  %v3579_v23 = vsub.f32 %v14082_v15, %v3561_v30  ;;  %v11964_v15 = vld [vmem:[%s15518_s30 + $0x350] sm:$0xff]   ;;  %v11966_v30 = vld [vmem:[%s15518_s30 + $0x348] sm:$0xff]  }
0x18f3   :  { %v3567_v16 = vpop.xlane.xlu0 %3566  ;;  %v3560_v28 = vpop.xlane.xlu1 %3559  ;;  %11193 = vmatprep.subr.bf16.mxu1 %v11964_v15 }
0x18f4   :  { %v3571_v9 = vmul.f32 0.015625, %v3567_v16  ;;  %v3562_v33 = vmul.f32 0.015625, %v3560_v28 }
0x18f6   :  { %v3575_v17 = vsub.f32 %v3571_v9, %v3573_v13  ;;  %v3574_v27 = vmul.f32 %v3562_v33, %v3562_v33  ;;  %v3580_v6 = vsub.f32 %v14088_v10, %v3562_v33  ;;  %v10262_v9 = vld [vmem:[%s15454_s9 + $0x19] ss:$0 sm:$0xff]  ;;  %v11965_v10 = vld [vmem:[%s15518_s30 + $0x310] sm:$0xff]   ;;  %v11967_v33 = vld [vmem:[%s15518_s30 + $0x308] sm:$0xff]  }
0x18f7   :  { %v3570_v7 = vpop.xlane.xlu1 %3569  ;;  %11194 = vmatpush3.bf16.msra.mxu1 %v11965_v10 }
0x18f8   :  { %v3577_v36 = vmax.f32 %v3575_v17, 0.0  ;;  %v3572_v31 = vmul.f32 0.015625, %v3570_v7  ;;  %11195 = vmatprep.subr.bf16.mxu1 %v11966_v30 }
0x18fa   :  { %v3581_v14 = vadd.f32 1e-05, %v3577_v36  ;;  %v3576_v5 = vsub.f32 %v3572_v31, %v3574_v27  ;;  %v11968_v31 = vld [vmem:[%s15518_s30 + $0x340] sm:$0xff]  }
0x18fb   :  { %11196 = vmatpush3.bf16.msra.mxu1 %v11967_v33 }
0x18fc   :  { %12178 = vrsqrt.f32 %v3581_v14  ;;  %v3578_v20 = vmax.f32 %v3576_v5, 0.0  ;;  %v11969_v14 = vld [vmem:[%s15518_s30 + $0x300] sm:$0xff]   ;;  %11197 = vmatprep.subr.bf16.mxu1 %v11968_v31 }
0x18fd   :  { %v10271_v5 = vld [vmem:[%s15452_s7 + $0x6] ss:$8 sm:$0x3] }
0x18fe   :  { %v3582_v18 = vadd.f32 1e-05, %v3578_v20  ;;  %v10313_v31 = vld [vmem:[%s15453_s8 + $0x6] ss:$0 sm:$0xff] }
0x18ff   :  { %11198 = vmatpush3.bf16.msra.mxu1 %v11969_v14 }
0x1900   :  { %12180 = vrsqrt.f32 %v3582_v18  ;;  %v3619_v18 = vrot.slane %v10271_v5, %v13359_v26 }
0x1909   :  { %v12179_v22 = vpop.eup %12178 }
0x190a   :  { %v3585_v8 = vmul.f32 %v12179_v22, %v3579_v23  ;;  %v3615_v23 = vrot.slane %v10271_v5, %v13362_v29 }
0x190c   :  { %v3591_v13 = vmul.f32 %v10261_v24, %v3585_v8 }
0x190d   :  { %v12181_v16 = vpop.eup %12180 }
0x190e   :  { %v3586_v28 = vmul.f32 %v12181_v16, %v3580_v6  ;;  %v3597_v7 = vadd.f32 %v10262_v9, %v3591_v13 }
0x1910   :  { %v3592_v17 = vmul.f32 %v10261_v24, %v3586_v28 }
0x1912   :  { %v3598_v36 = vadd.f32 %v10262_v9, %v3592_v17 }
0x1914   :  { %v3608_v27 = vpack.c.bf16 %v3598_v36, %v3597_v7 }
0x1916   :  { %10280 = vmatmul.mubr.msk.bf16.vlgmr.msra.gmra.mxu0 %vm694_vm2, %v3608_v27 }
0x1917   :  { %11605 = vmatprep.mubr.msk.bf16.mxu0 %vm12452_vm0, %v15519_v19 }
0x19d6   :  { %v3699_v20 = vpop.f32.mrf.mxu0 }
0x19d7   :  { %v3700_v16 = vadd.f32 %v3699_v20, %v3615_v23 }
0x19d8   :  { %v3701_v22 = vpop.f32.mrf.mxu0 }
0x19d9   :  { %v3702_v24 = vadd.f32 %v3701_v22, %v3619_v18  ;;  %v3708_v15 = vmax.f32 %v3700_v16, 0.0 }
0x19da   :  { %v3703_v8 = vpop.f32.mrf.mxu0 }
0x19db   :  { %v3704_v6 = vadd.f32 %v3703_v8, %v3615_v23  ;;  %v3709_v17 = vmax.f32 %v3702_v24, 0.0 }
0x19dc   :  { %v3705_v28 = vpop.f32.mrf.mxu0 }
0x19dd   :  { %v3706_v13 = vadd.f32 %v3705_v28, %v3619_v18  ;;  %v3710_v9 = vmax.f32 %v3704_v6, 0.0 }
0x19df   :  { %v3711_v27 = vmax.f32 %v3706_v13, 0.0  ;;  %v3745_v30 = vpack.c.bf16 %v3710_v9, %v3708_v15  ;;  %v11971_v15 = vld [vmem:[%s15514_s1 + $0xf0] sm:$0xff]  }
0x19e1   :  { %v3746_v10 = vpack.c.bf16 %v3711_v27, %v3709_v17 }
0x19e3   :  { %3880 = vmatprep.mubr.bf16.mxu1 %v3746_v10  ;;  %v11973_v10 = vld [vmem:[%s15514_s1 + $0xe0] sm:$0xff]  }
0x19e4   :  { %3881 = vmatmul.mubr.bf16.vlgmr.msra.gmra.mxu1 %v3745_v30 }
0x1aa4   :  { %v11199_v33 = vpop.f32.mrf.mxu1 }
0x1aa6   :  { %v11200_v14 = vpop.f32.mrf.mxu1 }
0x1aa7   :  { %v11201_v5 = vadd.f32 %v11200_v14, %v11199_v33 }
0x1aa8   :  { %v11202_v22 = vpop.f32.mrf.mxu1 }
0x1aa9   :  { %v3883_v8 = vadd.f32 %v11201_v5, %v10313_v31 }
0x1aaa   :  { %v11203_v20 = vpop.f32.mrf.mxu1 }
0x1aab   :  { %v3889_v23 = vadd.f32 %v3883_v8, %v3597_v7  ;;  %v11204_v18 = vadd.f32 %v11203_v20, %v11202_v22  ;;  %v11970_v7 = vld [vmem:[%s15514_s1 + $0xf8] sm:$0xff]  }
0x1aac   :  { %11598 = vmatpush3.bf16.msra.mxu0 %v11970_v7 }
0x1aad   :  { %v3886_v6 = vadd.f32 %v11204_v18, %v10313_v31  ;;  %v3893_v24 = vsel %vm694_vm2, %v3889_v23, 0.0  ;;  %v3901_v16 = vmul.f32 %v3889_v23, %v3889_v23  ;;  %11599 = vmatprep.subr.bf16.mxu0 %v15519_v19 }
0x1aae   :  { %3894 = vadd.xlane.f32.xlu0 %v3893_v24 }
0x1aaf   :  { %v3890_v28 = vadd.f32 %v3886_v6, %v3598_v36  ;;  %v3903_v9 = vsel %vm694_vm2, %v3901_v16, 0.0  ;;  %v11972_v36 = vld [vmem:[%s15514_s1 + $0xe8] sm:$0xff]  }
0x1ab0   :  { %11600 = vmatpush3.bf16.msra.mxu0 %v11971_v15 }
0x1ab1   :  { %v3896_v13 = vsel %vm694_vm2, %v3890_v28, 0.0  ;;  %v3902_v17 = vmul.f32 %v3890_v28, %v3890_v28  ;;  %11601 = vmatprep.subr.bf16.mxu0 %v15519_v19 }
0x1ab2   :  { %3897 = vadd.xlane.f32.xlu1 %v3896_v13  ;;  %3904 = vadd.xlane.f32.xlu0 %v3903_v9 }
0x1ab3   :  { %v3906_v27 = vsel %vm694_vm2, %v3902_v17, 0.0 }
0x1ab4   :  { %11602 = vmatpush3.bf16.msra.mxu0 %v11972_v36 }
0x1ab5   :  { %11603 = vmatprep.subr.bf16.mxu0 %v15519_v19 }
0x1ab6   :  { %3907 = vadd.xlane.f32.xlu1 %v3906_v27 }
0x1ab8   :  { %11604 = vmatpush3.bf16.msra.mxu0 %v11973_v10  ;;  %v10330_v10 = vld [vmem:[%s15454_s9 + $0x1a] ss:$0 sm:$0xff] }
0x1b37   :  { %v3895_v30 = vpop.xlane.xlu0 %3894 }
0x1b38   :  { %v3899_v33 = vmul.f32 0.015625, %v3895_v30 }
0x1b3a   :  { %v3911_v5 = vmul.f32 %v3899_v33, %v3899_v33  ;;  %v3917_v7 = vsub.f32 %v3889_v23, %v3899_v33  ;;  %v10340_v23 = vld [vmem:[%s15516_s28 + $0x7] ss:$0 sm:$0xff] }
0x1b3b   :  { %v3898_v31 = vpop.xlane.xlu1 %3897  ;;  %v3905_v14 = vpop.xlane.xlu0 %3904 }
0x1b3c   :  { %v3900_v22 = vmul.f32 0.015625, %v3898_v31  ;;  %v3909_v8 = vmul.f32 0.015625, %v3905_v14 }
0x1b3e   :  { %v3913_v20 = vsub.f32 %v3909_v8, %v3911_v5  ;;  %v3912_v6 = vmul.f32 %v3900_v22, %v3900_v22  ;;  %v3918_v30 = vsub.f32 %v3890_v28, %v3900_v22  ;;  %v10331_v8 = vld [vmem:[%s15454_s9 + $0x1b] ss:$0 sm:$0xff] }
0x1b3f   :  { %v3908_v18 = vpop.xlane.xlu1 %3907 }
0x1b40   :  { %v3915_v24 = vmax.f32 %v3913_v20, 0.0  ;;  %v3910_v16 = vmul.f32 0.015625, %v3908_v18 }
0x1b42   :  { %v3919_v13 = vadd.f32 1e-05, %v3915_v24  ;;  %v3914_v9 = vsub.f32 %v3910_v16, %v3912_v6 }
0x1b44   :  { %12182 = vrsqrt.f32 %v3919_v13  ;;  %v3916_v17 = vmax.f32 %v3914_v9, 0.0 }
0x1b46   :  { %v3920_v27 = vadd.f32 1e-05, %v3916_v17 }
0x1b48   :  { %12184 = vrsqrt.f32 %v3920_v27 }
0x1b51   :  { %v12183_v15 = vpop.eup %12182 }
0x1b52   :  { %v3923_v36 = vmul.f32 %v12183_v15, %v3917_v7 }
0x1b54   :  { %v3929_v5 = vmul.f32 %v10330_v10, %v3923_v36 }
0x1b55   :  { %v12185_v31 = vpop.eup %12184 }
0x1b56   :  { %v3924_v14 = vmul.f32 %v12185_v31, %v3918_v30  ;;  %v3935_v18 = vadd.f32 %v10331_v8, %v3929_v5  ;;  %v11976_v5 = vld [vmem:[%s15517_s4 + $0x1f4] ss:$8 sps:$4 sm:$0xff]  }
0x1b57   :  { %4142 = vmatprep.subr.bf16.mxu0 %v11976_v5 }
0x1b58   :  { %v3930_v20 = vmul.f32 %v10330_v10, %v3924_v14  ;;  %v11974_v14 = vld [vmem:[%s15517_s4 + $0x1f0] ss:$8 sps:$4 sm:$0xff]  }
0x1b5a   :  { %v3936_v6 = vadd.f32 %v10331_v8, %v3930_v20  ;;  %v11979_v8 = vld [vmem:[%s15517_s4 + $0x1e4] ss:$8 sps:$4 sm:$0xff]   ;;  %v11977_v20 = vld [vmem:[%s15517_s4 + $0x1e0] ss:$8 sps:$4 sm:$0xff]  }
0x1b5c   :  { %v3946_v24 = vpack.c.bf16 %v3936_v6, %v3935_v18 }
0x1b5e   :  { %11606 = vmatmul.mubr.msk.bf16.vlgmr.msra.gmra.mxu0 %vm694_vm2, %v3946_v24  ;;  %v11985_v24 = vld [vmem:[%s15517_s4 + $0x1c4] ss:$8 sps:$4 sm:$0xff]  }
0x1b5f   :  { %4166 = vmatprep.mubr.bf16.mxu0 %v15520_v32  ;;  %4143 = vmatpush1.bf16.msra.mxu0 %v11974_v14 }
0x1b60   :  { %4144 = vmatprep.subr.bf16.mxu0 %v11979_v8 }
0x1b63   :  { %4145 = vmatpush1.bf16.msra.mxu0 %v11977_v20 }
0x1c1e   :  { %v4013_v28 = vpop.f32.mrf.mxu0 }
0x1c1f   :  { %v4014_v33 = vadd.f32 %v10340_v23, %v4013_v28  ;;  %v11986_v28 = vld [vmem:[%s15518_s30 + $0x3f8] sm:$0xff]  }
0x1c20   :  { %v11607_v22 = vpop.f32.mrf.mxu0  ;;  %11210 = vmatprep.subr.bf16.mxu1 %v11986_v28 }
0x1c21   :  { %v14218_v16 = vadd.f32 %v4014_v33, %v3935_v18  ;;  %v11982_v18 = vld [vmem:[%s15517_s4 + $0x1d4] ss:$8 sps:$4 sm:$0xff]  }
0x1c22   :  { %v4016_v13 = vpop.f32.mrf.mxu0  ;;  %4146 = vmatprep.subr.bf16.mxu0 %v11982_v18  ;;  %v11987_v33 = vld [vmem:[%s15518_s30 + $0x3b8] sm:$0xff]   ;;  %v11988_v22 = vld [vmem:[%s15518_s30 + $0x3f0] sm:$0xff]  }
0x1c23   :  { %v4017_v9 = vadd.f32 %v10340_v23, %v4016_v13  ;;  %v4024_v17 = vsel %vm694_vm2, %v14218_v16, 0.0  ;;  %v4032_v27 = vmul.f32 %v14218_v16, %v14218_v16  ;;  %v11983_v23 = vld [vmem:[%s15517_s4 + $0x1c0] ss:$8 sps:$4 sm:$0xff]   ;;  %11211 = vmatpush3.bf16.msra.mxu1 %v11987_v33  ;;  %v11989_v13 = vld [vmem:[%s15518_s30 + $0x3b0] sm:$0xff]  }
0x1c24   :  { %4025 = vadd.xlane.f32.xlu0 %v4024_v17  ;;  %v11608_v7 = vpop.f32.mrf.mxu0  ;;  %11212 = vmatprep.subr.bf16.mxu1 %v11988_v22  ;;  %v11991_v17 = vld [vmem:[%s15518_s30 + $0x3a8] sm:$0xff]  }
0x1c25   :  { %v14224_v15 = vadd.f32 %v4017_v9, %v3936_v6  ;;  %v4034_v36 = vsel %vm694_vm2, %v4032_v27, 0.0  ;;  %v11980_v6 = vld [vmem:[%s15517_s4 + $0x1d0] ss:$8 sps:$4 sm:$0xff]   ;;  %v11990_v9 = vld [vmem:[%s15518_s30 + $0x3e8] sm:$0xff]   ;;  %v11992_v27 = vld [vmem:[%s15518_s30 + $0x3e0] sm:$0xff]  }
0x1c26   :  { %4147 = vmatpush1.bf16.msra.mxu0 %v11980_v6  ;;  %v11993_v7 = vld [vmem:[%s15518_s30 + $0x3a0] sm:$0xff]  }
0x1c27   :  { %v4027_v10 = vsel %vm694_vm2, %v14224_v15, 0.0  ;;  %v4033_v30 = vmul.f32 %v14224_v15, %v14224_v15  ;;  %4148 = vmatprep.subr.bf16.mxu0 %v11985_v24  ;;  %11213 = vmatpush3.bf16.msra.mxu1 %v11989_v13 }
0x1c28   :  { %4035 = vadd.xlane.f32.xlu0 %v4034_v36  ;;  %4028 = vadd.xlane.f32.xlu1 %v4027_v10  ;;  %v11994_v36 = vld [vmem:[%s15518_s30 + $0x3d8] sm:$0xff]  }
0x1c29   :  { %v4037_v31 = vsel %vm694_vm2, %v4033_v30, 0.0  ;;  %11214 = vmatprep.subr.bf16.mxu1 %v11990_v9  ;;  %v11995_v10 = vld [vmem:[%s15518_s30 + $0x398] sm:$0xff]  }
0x1c2a   :  { %4149 = vmatpush1.bf16.msra.mxu0 %v11983_v23 }
0x1c2b   :  { %11609 = vmatprep.subr.bf16.mxu0 %v15519_v19  ;;  %11215 = vmatpush3.bf16.msra.mxu1 %v11991_v17 }
0x1c2c   :  { %4038 = vadd.xlane.f32.xlu1 %v4037_v31  ;;  %11216 = vmatprep.subr.bf16.mxu1 %v11992_v27 }
0x1c2f   :  { %11217 = vmatpush3.bf16.msra.mxu1 %v11993_v7 }
0x1c30   :  { %11218 = vmatprep.subr.bf16.mxu1 %v11994_v36 }
0x1c33   :  { %11219 = vmatpush3.bf16.msra.mxu1 %v11995_v10  ;;  %v10346_v10 = vld [vmem:[%s15454_s9 + $0x1c] ss:$0 sm:$0xff] }
0x1cad   :  { %v4026_v30 = vpop.xlane.xlu0 %4025 }
0x1cae   :  { %v4030_v31 = vmul.f32 0.015625, %v4026_v30 }
0x1cb0   :  { %v4042_v8 = vmul.f32 %v4030_v31, %v4030_v31  ;;  %v4048_v27 = vsub.f32 %v14218_v16, %v4030_v31  ;;  %v11996_v16 = vld [vmem:[%s15518_s30 + $0x3d0] sm:$0xff]   ;;  %v11998_v31 = vld [vmem:[%s15518_s30 + $0x3c8] sm:$0xff]  }
0x1cb1   :  { %v4036_v14 = vpop.xlane.xlu0 %4035  ;;  %v4029_v5 = vpop.xlane.xlu1 %4028  ;;  %11220 = vmatprep.subr.bf16.mxu1 %v11996_v16 }
0x1cb2   :  { %v4040_v20 = vmul.f32 0.015625, %v4036_v14  ;;  %v4031_v18 = vmul.f32 0.015625, %v4029_v5 }
0x1cb4   :  { %v4044_v6 = vsub.f32 %v4040_v20, %v4042_v8  ;;  %v4043_v28 = vmul.f32 %v4031_v18, %v4031_v18  ;;  %v4049_v30 = vsub.f32 %v14224_v15, %v4031_v18  ;;  %v10347_v20 = vld [vmem:[%s15454_s9 + $0x1d] ss:$0 sm:$0xff]  ;;  %v11997_v15 = vld [vmem:[%s15518_s30 + $0x390] sm:$0xff]   ;;  %v11999_v18 = vld [vmem:[%s15518_s30 + $0x388] sm:$0xff]  }
0x1cb5   :  { %v4039_v24 = vpop.xlane.xlu1 %4038  ;;  %11221 = vmatpush3.bf16.msra.mxu1 %v11997_v15 }
0x1cb6   :  { %v4046_v23 = vmax.f32 %v4044_v6, 0.0  ;;  %v4041_v33 = vmul.f32 0.015625, %v4039_v24  ;;  %11222 = vmatprep.subr.bf16.mxu1 %v11998_v31 }
0x1cb8   :  { %v4050_v22 = vadd.f32 1e-05, %v4046_v23  ;;  %v4045_v13 = vsub.f32 %v4041_v33, %v4043_v28  ;;  %v12000_v33 = vld [vmem:[%s15518_s30 + $0x3c0] sm:$0xff]  }
0x1cb9   :  { %11223 = vmatpush3.bf16.msra.mxu1 %v11999_v18 }
0x1cba   :  { %12186 = vrsqrt.f32 %v4050_v22  ;;  %v4047_v9 = vmax.f32 %v4045_v13, 0.0  ;;  %v12001_v22 = vld [vmem:[%s15518_s30 + $0x380] sm:$0xff]   ;;  %11224 = vmatprep.subr.bf16.mxu1 %v12000_v33 }
0x1cbb   :  { %v10356_v13 = vld [vmem:[%s15452_s7 + $0x7] ss:$8 sm:$0x3] }
0x1cbc   :  { %v4051_v17 = vadd.f32 1e-05, %v4047_v9  ;;  %v10398_v33 = vld [vmem:[%s15453_s8 + $0x7] ss:$0 sm:$0xff] }
0x1cbd   :  { %11225 = vmatpush3.bf16.msra.mxu1 %v12001_v22 }
0x1cbe   :  { %12188 = vrsqrt.f32 %v4051_v17  ;;  %v4088_v17 = vrot.slane %v10356_v13, %v13359_v26 }
0x1cc7   :  { %v12187_v7 = vpop.eup %12186 }
0x1cc8   :  { %v4054_v36 = vmul.f32 %v12187_v7, %v4048_v27  ;;  %v4084_v27 = vrot.slane %v10356_v13, %v13362_v29 }
0x1cca   :  { %v4060_v8 = vmul.f32 %v10346_v10, %v4054_v36 }
0x1ccb   :  { %v12189_v14 = vpop.eup %12188 }
0x1ccc   :  { %v4055_v5 = vmul.f32 %v12189_v14, %v4049_v30  ;;  %v4066_v24 = vadd.f32 %v10347_v20, %v4060_v8 }
0x1cce   :  { %v4061_v6 = vmul.f32 %v10346_v10, %v4055_v5 }
0x1cd0   :  { %v4067_v23 = vadd.f32 %v10347_v20, %v4061_v6 }
0x1cd2   :  { %v4077_v28 = vpack.c.bf16 %v4067_v23, %v4066_v24 }
0x1cd4   :  { %10365 = vmatmul.mubr.msk.bf16.vlgmr.msra.gmra.mxu0 %vm694_vm2, %v4077_v28 }
0x1cd5   :  { %11617 = vmatprep.mubr.msk.bf16.mxu0 %vm12452_vm0, %v15519_v19 }
0x1d94   :  { %v4168_v9 = vpop.f32.mrf.mxu0 }
0x1d95   :  { %v4169_v14 = vadd.f32 %v4168_v9, %v4084_v27 }
0x1d96   :  { %v4170_v7 = vpop.f32.mrf.mxu0 }
0x1d97   :  { %v4171_v10 = vadd.f32 %v4170_v7, %v4088_v17  ;;  %v4177_v16 = vmax.f32 %v4169_v14, 0.0 }
0x1d98   :  { %v4172_v36 = vpop.f32.mrf.mxu0 }
0x1d99   :  { %v4173_v30 = vadd.f32 %v4172_v36, %v4084_v27  ;;  %v4178_v6 = vmax.f32 %v4171_v10, 0.0 }
0x1d9a   :  { %v4174_v5 = vpop.f32.mrf.mxu0 }
0x1d9b   :  { %v4175_v8 = vadd.f32 %v4174_v5, %v4088_v17  ;;  %v4179_v20 = vmax.f32 %v4173_v30, 0.0 }
0x1d9d   :  { %v4180_v28 = vmax.f32 %v4175_v8, 0.0  ;;  %v4214_v31 = vpack.c.bf16 %v4179_v20, %v4177_v16  ;;  %v12003_v16 = vld [vmem:[%s15514_s1 + $0x110] sm:$0xff]  }
0x1d9f   :  { %v4215_v15 = vpack.c.bf16 %v4180_v28, %v4178_v6 }
0x1da1   :  { %4349 = vmatprep.mubr.bf16.mxu1 %v4215_v15  ;;  %v12005_v15 = vld [vmem:[%s15514_s1 + $0x100] sm:$0xff]  }
0x1da2   :  { %4350 = vmatmul.mubr.bf16.vlgmr.msra.gmra.mxu1 %v4214_v31 }
0x1e62   :  { %v11226_v18 = vpop.f32.mrf.mxu1 }
0x1e64   :  { %v11227_v22 = vpop.f32.mrf.mxu1 }
0x1e65   :  { %v11228_v13 = vadd.f32 %v11227_v22, %v11226_v18 }
0x1e66   :  { %v11229_v7 = vpop.f32.mrf.mxu1 }
0x1e67   :  { %v4352_v36 = vadd.f32 %v11228_v13, %v10398_v33 }
0x1e68   :  { %v11230_v9 = vpop.f32.mrf.mxu1 }
0x1e69   :  { %v4358_v27 = vadd.f32 %v4352_v36, %v4066_v24  ;;  %v11231_v17 = vadd.f32 %v11230_v9, %v11229_v7  ;;  %v12002_v24 = vld [vmem:[%s15514_s1 + $0x118] sm:$0xff]  }
0x1e6a   :  { %11610 = vmatpush3.bf16.msra.mxu0 %v12002_v24 }
0x1e6b   :  { %v4355_v30 = vadd.f32 %v11231_v17, %v10398_v33  ;;  %v4362_v10 = vsel %vm694_vm2, %v4358_v27, 0.0  ;;  %v4370_v14 = vmul.f32 %v4358_v27, %v4358_v27  ;;  %11611 = vmatprep.subr.bf16.mxu0 %v15519_v19 }
0x1e6c   :  { %4363 = vadd.xlane.f32.xlu0 %v4362_v10 }
0x1e6d   :  { %v4359_v5 = vadd.f32 %v4355_v30, %v4067_v23  ;;  %v4372_v20 = vsel %vm694_vm2, %v4370_v14, 0.0  ;;  %v12004_v23 = vld [vmem:[%s15514_s1 + $0x108] sm:$0xff]  }
0x1e6e   :  { %11612 = vmatpush3.bf16.msra.mxu0 %v12003_v16 }
0x1e6f   :  { %v4365_v8 = vsel %vm694_vm2, %v4359_v5, 0.0  ;;  %v4371_v6 = vmul.f32 %v4359_v5, %v4359_v5  ;;  %11613 = vmatprep.subr.bf16.mxu0 %v15519_v19 }
0x1e70   :  { %4366 = vadd.xlane.f32.xlu1 %v4365_v8  ;;  %4373 = vadd.xlane.f32.xlu0 %v4372_v20 }
0x1e71   :  { %v4375_v28 = vsel %vm694_vm2, %v4371_v6, 0.0 }
0x1e72   :  { %11614 = vmatpush3.bf16.msra.mxu0 %v12004_v23 }
0x1e73   :  { %11615 = vmatprep.subr.bf16.mxu0 %v15519_v19 }
0x1e74   :  { %4376 = vadd.xlane.f32.xlu1 %v4375_v28 }
0x1e76   :  { %11616 = vmatpush3.bf16.msra.mxu0 %v12005_v15  ;;  %v10415_v15 = vld [vmem:[%s15454_s9 + $0x1e] ss:$0 sm:$0xff] }
0x1ef5   :  { %v4364_v31 = vpop.xlane.xlu0 %4363 }
0x1ef6   :  { %v4368_v18 = vmul.f32 0.015625, %v4364_v31 }
0x1ef8   :  { %v4380_v13 = vmul.f32 %v4368_v18, %v4368_v18  ;;  %v4386_v24 = vsub.f32 %v4358_v27, %v4368_v18  ;;  %v10425_v27 = vld [vmem:[%s15516_s28 + $0x8] ss:$0 sm:$0xff] }
0x1ef9   :  { %v4367_v33 = vpop.xlane.xlu1 %4366  ;;  %v4374_v22 = vpop.xlane.xlu0 %4373 }
0x1efa   :  { %v4369_v7 = vmul.f32 0.015625, %v4367_v33  ;;  %v4378_v36 = vmul.f32 0.015625, %v4374_v22 }
0x1efc   :  { %v4382_v9 = vsub.f32 %v4378_v36, %v4380_v13  ;;  %v4381_v30 = vmul.f32 %v4369_v7, %v4369_v7  ;;  %v4387_v31 = vsub.f32 %v4359_v5, %v4369_v7  ;;  %v10416_v36 = vld [vmem:[%s15454_s9 + $0x1f] ss:$0 sm:$0xff] }
0x1efd   :  { %v4377_v17 = vpop.xlane.xlu1 %4376 }
0x1efe   :  { %v4384_v10 = vmax.f32 %v4382_v9, 0.0  ;;  %v4379_v14 = vmul.f32 0.015625, %v4377_v17 }
0x1f00   :  { %v4388_v8 = vadd.f32 1e-05, %v4384_v10  ;;  %v4383_v20 = vsub.f32 %v4379_v14, %v4381_v30 }
0x1f02   :  { %12190 = vrsqrt.f32 %v4388_v8  ;;  %v4385_v6 = vmax.f32 %v4383_v20, 0.0 }
0x1f04   :  { %v4389_v28 = vadd.f32 1e-05, %v4385_v6 }
0x1f06   :  { %12192 = vrsqrt.f32 %v4389_v28 }
0x1f0f   :  { %v12191_v16 = vpop.eup %12190 }
0x1f10   :  { %v4392_v23 = vmul.f32 %v12191_v16, %v4386_v24 }
0x1f12   :  { %v4398_v13 = vmul.f32 %v10415_v15, %v4392_v23 }
0x1f13   :  { %v12193_v33 = vpop.eup %12192 }
0x1f14   :  { %v4393_v22 = vmul.f32 %v12193_v33, %v4387_v31  ;;  %v4404_v17 = vadd.f32 %v10416_v36, %v4398_v13  ;;  %v12008_v13 = vld [vmem:[%s15517_s4 + $0x234] ss:$8 sps:$4 sm:$0xff]  }
0x1f15   :  { %4611 = vmatprep.subr.bf16.mxu0 %v12008_v13 }
0x1f16   :  { %v4399_v9 = vmul.f32 %v10415_v15, %v4393_v22  ;;  %v12006_v22 = vld [vmem:[%s15517_s4 + $0x230] ss:$8 sps:$4 sm:$0xff]  }
0x1f18   :  { %v4405_v30 = vadd.f32 %v10416_v36, %v4399_v9  ;;  %v12011_v36 = vld [vmem:[%s15517_s4 + $0x224] ss:$8 sps:$4 sm:$0xff]   ;;  %v12009_v9 = vld [vmem:[%s15517_s4 + $0x220] ss:$8 sps:$4 sm:$0xff]  }
0x1f1a   :  { %v4415_v10 = vpack.c.bf16 %v4405_v30, %v4404_v17 }
0x1f1c   :  { %11618 = vmatmul.mubr.msk.bf16.vlgmr.msra.gmra.mxu0 %vm694_vm2, %v4415_v10  ;;  %v12017_v10 = vld [vmem:[%s15517_s4 + $0x204] ss:$8 sps:$4 sm:$0xff]  }
0x1f1d   :  { %4635 = vmatprep.mubr.bf16.mxu0 %v15520_v32  ;;  %4612 = vmatpush1.bf16.msra.mxu0 %v12006_v22 }
0x1f1e   :  { %4613 = vmatprep.subr.bf16.mxu0 %v12011_v36 }
0x1f21   :  { %4614 = vmatpush1.bf16.msra.mxu0 %v12009_v9 }
0x1fdc   :  { %v4482_v5 = vpop.f32.mrf.mxu0 }
0x1fdd   :  { %v4483_v18 = vadd.f32 %v10425_v27, %v4482_v5  ;;  %v12018_v5 = vld [vmem:[%s15518_s30 + $0x478] sm:$0xff]  }
0x1fde   :  { %v11619_v7 = vpop.f32.mrf.mxu0  ;;  %11237 = vmatprep.subr.bf16.mxu1 %v12018_v5 }
0x1fdf   :  { %v14354_v14 = vadd.f32 %v4483_v18, %v4404_v17  ;;  %v12014_v17 = vld [vmem:[%s15517_s4 + $0x214] ss:$8 sps:$4 sm:$0xff]  }
0x1fe0   :  { %v4485_v8 = vpop.f32.mrf.mxu0  ;;  %4615 = vmatprep.subr.bf16.mxu0 %v12014_v17  ;;  %v12019_v18 = vld [vmem:[%s15518_s30 + $0x438] sm:$0xff]   ;;  %v12020_v7 = vld [vmem:[%s15518_s30 + $0x470] sm:$0xff]  }
0x1fe1   :  { %v4486_v20 = vadd.f32 %v10425_v27, %v4485_v8  ;;  %v4493_v6 = vsel %vm694_vm2, %v14354_v14, 0.0  ;;  %v4501_v28 = vmul.f32 %v14354_v14, %v14354_v14  ;;  %v12015_v27 = vld [vmem:[%s15517_s4 + $0x200] ss:$8 sps:$4 sm:$0xff]   ;;  %11238 = vmatpush3.bf16.msra.mxu1 %v12019_v18  ;;  %v12021_v8 = vld [vmem:[%s15518_s30 + $0x430] sm:$0xff]  }
0x1fe2   :  { %4494 = vadd.xlane.f32.xlu0 %v4493_v6  ;;  %v11620_v24 = vpop.f32.mrf.mxu0  ;;  %11239 = vmatprep.subr.bf16.mxu1 %v12020_v7  ;;  %v12023_v6 = vld [vmem:[%s15518_s30 + $0x428] sm:$0xff]  }
0x1fe3   :  { %v14360_v16 = vadd.f32 %v4486_v20, %v4405_v30  ;;  %v4503_v23 = vsel %vm694_vm2, %v4501_v28, 0.0  ;;  %v12012_v30 = vld [vmem:[%s15517_s4 + $0x210] ss:$8 sps:$4 sm:$0xff]   ;;  %v12022_v20 = vld [vmem:[%s15518_s30 + $0x468] sm:$0xff]   ;;  %v12024_v28 = vld [vmem:[%s15518_s30 + $0x460] sm:$0xff]  }
0x1fe4   :  { %4616 = vmatpush1.bf16.msra.mxu0 %v12012_v30  ;;  %v12025_v24 = vld [vmem:[%s15518_s30 + $0x420] sm:$0xff]  }
0x1fe5   :  { %v4496_v15 = vsel %vm694_vm2, %v14360_v16, 0.0  ;;  %v4502_v31 = vmul.f32 %v14360_v16, %v14360_v16  ;;  %4617 = vmatprep.subr.bf16.mxu0 %v12017_v10  ;;  %11240 = vmatpush3.bf16.msra.mxu1 %v12021_v8 }
0x1fe6   :  { %4504 = vadd.xlane.f32.xlu0 %v4503_v23  ;;  %4497 = vadd.xlane.f32.xlu1 %v4496_v15  ;;  %v12026_v23 = vld [vmem:[%s15518_s30 + $0x458] sm:$0xff]  }
0x1fe7   :  { %v4506_v33 = vsel %vm694_vm2, %v4502_v31, 0.0  ;;  %11241 = vmatprep.subr.bf16.mxu1 %v12022_v20  ;;  %v12027_v15 = vld [vmem:[%s15518_s30 + $0x418] sm:$0xff]  }
0x1fe8   :  { %4618 = vmatpush1.bf16.msra.mxu0 %v12015_v27 }
0x1fe9   :  { %11621 = vmatprep.subr.bf16.mxu0 %v15519_v19  ;;  %11242 = vmatpush3.bf16.msra.mxu1 %v12023_v6 }
0x1fea   :  { %4507 = vadd.xlane.f32.xlu1 %v4506_v33  ;;  %11243 = vmatprep.subr.bf16.mxu1 %v12024_v28 }
0x1fed   :  { %11244 = vmatpush3.bf16.msra.mxu1 %v12025_v24 }
0x1fee   :  { %11245 = vmatprep.subr.bf16.mxu1 %v12026_v23 }
0x1ff1   :  { %11246 = vmatpush3.bf16.msra.mxu1 %v12027_v15  ;;  %v10431_v15 = vld [vmem:[%s15454_s9 + $0x20] ss:$0 sm:$0xff] }
0x206b   :  { %v4495_v31 = vpop.xlane.xlu0 %4494 }
0x206c   :  { %v4499_v33 = vmul.f32 0.015625, %v4495_v31 }
0x206e   :  { %v4511_v36 = vmul.f32 %v4499_v33, %v4499_v33  ;;  %v4517_v28 = vsub.f32 %v14354_v14, %v4499_v33  ;;  %v12028_v14 = vld [vmem:[%s15518_s30 + $0x450] sm:$0xff]   ;;  %v12030_v33 = vld [vmem:[%s15518_s30 + $0x448] sm:$0xff]  }
0x206f   :  { %v4505_v22 = vpop.xlane.xlu0 %4504  ;;  %v4498_v13 = vpop.xlane.xlu1 %4497  ;;  %11247 = vmatprep.subr.bf16.mxu1 %v12028_v14 }
0x2070   :  { %v4509_v9 = vmul.f32 0.015625, %v4505_v22  ;;  %v4500_v17 = vmul.f32 0.015625, %v4498_v13 }
0x2072   :  { %v4513_v30 = vsub.f32 %v4509_v9, %v4511_v36  ;;  %v4512_v5 = vmul.f32 %v4500_v17, %v4500_v17  ;;  %v4518_v31 = vsub.f32 %v14360_v16, %v4500_v17  ;;  %v10432_v9 = vld [vmem:[%s15454_s9 + $0x21] ss:$0 sm:$0xff]  ;;  %v12029_v16 = vld [vmem:[%s15518_s30 + $0x410] sm:$0xff]   ;;  %v12031_v17 = vld [vmem:[%s15518_s30 + $0x408] sm:$0xff]  }
0x2073   :  { %v4508_v10 = vpop.xlane.xlu1 %4507  ;;  %11248 = vmatpush3.bf16.msra.mxu1 %v12029_v16 }
0x2074   :  { %v4515_v27 = vmax.f32 %v4513_v30, 0.0  ;;  %v4510_v18 = vmul.f32 0.015625, %v4508_v10  ;;  %11249 = vmatprep.subr.bf16.mxu1 %v12030_v33 }
0x2076   :  { %v4519_v7 = vadd.f32 1e-05, %v4515_v27  ;;  %v4514_v8 = vsub.f32 %v4510_v18, %v4512_v5  ;;  %v12032_v18 = vld [vmem:[%s15518_s30 + $0x440] sm:$0xff]  }
0x2077   :  { %11250 = vmatpush3.bf16.msra.mxu1 %v12031_v17 }
0x2078   :  { %12194 = vrsqrt.f32 %v4519_v7  ;;  %v4516_v20 = vmax.f32 %v4514_v8, 0.0  ;;  %v12033_v7 = vld [vmem:[%s15518_s30 + $0x400] sm:$0xff]   ;;  %11251 = vmatprep.subr.bf16.mxu1 %v12032_v18  ;;  %v10441_v8 = vld [vmem:[%s15452_s7 + $0x10] ss:$8 sm:$0x3] }
0x2079   :  { %v10483_v18 = vld [vmem:[%s15453_s8 + $0x8] ss:$0 sm:$0xff] }
0x207a   :  { %v4520_v6 = vadd.f32 1e-05, %v4516_v20 }
0x207b   :  { %11252 = vmatpush3.bf16.msra.mxu1 %v12033_v7 }
0x207c   :  { %12196 = vrsqrt.f32 %v4520_v6  ;;  %v4557_v6 = vrot.slane %v10441_v8, %v13359_v26 }
0x2085   :  { %v12195_v24 = vpop.eup %12194 }
0x2086   :  { %v4523_v23 = vmul.f32 %v12195_v24, %v4517_v28  ;;  %v4553_v28 = vrot.slane %v10441_v8, %v13362_v29 }
0x2088   :  { %v4529_v36 = vmul.f32 %v10431_v15, %v4523_v23 }
0x2089   :  { %v12197_v22 = vpop.eup %12196 }
0x208a   :  { %v4524_v13 = vmul.f32 %v12197_v22, %v4518_v31  ;;  %v4535_v10 = vadd.f32 %v10432_v9, %v4529_v36 }
0x208c   :  { %v4530_v30 = vmul.f32 %v10431_v15, %v4524_v13 }
0x208e   :  { %v4536_v27 = vadd.f32 %v10432_v9, %v4530_v30 }
0x2090   :  { %v4546_v5 = vpack.c.bf16 %v4536_v27, %v4535_v10 }
0x2092   :  { %10450 = vmatmul.mubr.msk.bf16.vlgmr.msra.gmra.mxu0 %vm694_vm2, %v4546_v5 }
0x2093   :  { %11629 = vmatprep.mubr.msk.bf16.mxu0 %vm12452_vm0, %v15519_v19 }
0x2152   :  { %v4637_v20 = vpop.f32.mrf.mxu0 }
0x2153   :  { %v4638_v22 = vadd.f32 %v4637_v20, %v4553_v28 }
0x2154   :  { %v4639_v24 = vpop.f32.mrf.mxu0 }
0x2155   :  { %v4640_v15 = vadd.f32 %v4639_v24, %v4557_v6  ;;  %v4646_v14 = vmax.f32 %v4638_v22, 0.0 }
0x2156   :  { %v4641_v23 = vpop.f32.mrf.mxu0 }
0x2157   :  { %v4642_v31 = vadd.f32 %v4641_v23, %v4553_v28  ;;  %v4647_v30 = vmax.f32 %v4640_v15, 0.0 }
0x2158   :  { %v4643_v13 = vpop.f32.mrf.mxu0 }
0x2159   :  { %v4644_v36 = vadd.f32 %v4643_v13, %v4557_v6  ;;  %v4648_v9 = vmax.f32 %v4642_v31, 0.0 }
0x215b   :  { %v4649_v5 = vmax.f32 %v4644_v36, 0.0  ;;  %v4683_v33 = vpack.c.bf16 %v4648_v9, %v4646_v14  ;;  %v12035_v14 = vld [vmem:[%s15514_s1 + $0x130] sm:$0xff]  }
0x215d   :  { %v4684_v16 = vpack.c.bf16 %v4649_v5, %v4647_v30 }
0x215f   :  { %4818 = vmatprep.mubr.bf16.mxu1 %v4684_v16  ;;  %v12037_v16 = vld [vmem:[%s15514_s1 + $0x120] sm:$0xff]  }
0x2160   :  { %4819 = vmatmul.mubr.bf16.vlgmr.msra.gmra.mxu1 %v4683_v33 }
0x2220   :  { %v11253_v17 = vpop.f32.mrf.mxu1 }
0x2222   :  { %v11254_v7 = vpop.f32.mrf.mxu1 }
0x2223   :  { %v11255_v8 = vadd.f32 %v11254_v7, %v11253_v17 }
0x2224   :  { %v11256_v24 = vpop.f32.mrf.mxu1 }
0x2225   :  { %v4821_v23 = vadd.f32 %v11255_v8, %v10483_v18 }
0x2226   :  { %v11257_v20 = vpop.f32.mrf.mxu1 }
0x2227   :  { %v4827_v28 = vadd.f32 %v4821_v23, %v4535_v10  ;;  %v11258_v6 = vadd.f32 %v11257_v20, %v11256_v24  ;;  %v12034_v10 = vld [vmem:[%s15514_s1 + $0x138] sm:$0xff]  }
0x2228   :  { %11622 = vmatpush3.bf16.msra.mxu0 %v12034_v10 }
0x2229   :  { %v4824_v31 = vadd.f32 %v11258_v6, %v10483_v18  ;;  %v4831_v15 = vsel %vm694_vm2, %v4827_v28, 0.0  ;;  %v4839_v22 = vmul.f32 %v4827_v28, %v4827_v28  ;;  %11623 = vmatprep.subr.bf16.mxu0 %v15519_v19 }
0x222a   :  { %4832 = vadd.xlane.f32.xlu0 %v4831_v15 }
0x222b   :  { %v4828_v13 = vadd.f32 %v4824_v31, %v4536_v27  ;;  %v4841_v9 = vsel %vm694_vm2, %v4839_v22, 0.0  ;;  %v12036_v27 = vld [vmem:[%s15514_s1 + $0x128] sm:$0xff]  }
0x222c   :  { %11624 = vmatpush3.bf16.msra.mxu0 %v12035_v14 }
0x222d   :  { %v4834_v36 = vsel %vm694_vm2, %v4828_v13, 0.0  ;;  %v4840_v30 = vmul.f32 %v4828_v13, %v4828_v13  ;;  %11625 = vmatprep.subr.bf16.mxu0 %v15519_v19 }
0x222e   :  { %4835 = vadd.xlane.f32.xlu1 %v4834_v36  ;;  %4842 = vadd.xlane.f32.xlu0 %v4841_v9 }
0x222f   :  { %v4844_v5 = vsel %vm694_vm2, %v4840_v30, 0.0 }
0x2230   :  { %11626 = vmatpush3.bf16.msra.mxu0 %v12036_v27 }
0x2231   :  { %11627 = vmatprep.subr.bf16.mxu0 %v15519_v19 }
0x2232   :  { %4845 = vadd.xlane.f32.xlu1 %v4844_v5 }
0x2234   :  { %11628 = vmatpush3.bf16.msra.mxu0 %v12037_v16  ;;  %v10500_v16 = vld [vmem:[%s15454_s9 + $0x22] ss:$0 sm:$0xff] }
0x22b3   :  { %v4833_v33 = vpop.xlane.xlu0 %4832 }
0x22b4   :  { %v4837_v17 = vmul.f32 0.015625, %v4833_v33 }
0x22b6   :  { %v4849_v8 = vmul.f32 %v4837_v17, %v4837_v17  ;;  %v4855_v10 = vsub.f32 %v4827_v28, %v4837_v17  ;;  %v10510_v28 = vld [vmem:[%s15516_s28 + $0x9] ss:$0 sm:$0xff] }
0x22b7   :  { %v4836_v18 = vpop.xlane.xlu1 %4835  ;;  %v4843_v7 = vpop.xlane.xlu0 %4842 }
0x22b8   :  { %v4838_v24 = vmul.f32 0.015625, %v4836_v18  ;;  %v4847_v23 = vmul.f32 0.015625, %v4843_v7 }
0x22ba   :  { %v4851_v20 = vsub.f32 %v4847_v23, %v4849_v8  ;;  %v4850_v31 = vmul.f32 %v4838_v24, %v4838_v24  ;;  %v4856_v33 = vsub.f32 %v4828_v13, %v4838_v24  ;;  %v10501_v23 = vld [vmem:[%s15454_s9 + $0x23] ss:$0 sm:$0xff] }
0x22bb   :  { %v4846_v6 = vpop.xlane.xlu1 %4845 }
0x22bc   :  { %v4853_v15 = vmax.f32 %v4851_v20, 0.0  ;;  %v4848_v22 = vmul.f32 0.015625, %v4846_v6 }
0x22be   :  { %v4857_v36 = vadd.f32 1e-05, %v4853_v15  ;;  %v4852_v9 = vsub.f32 %v4848_v22, %v4850_v31 }
0x22c0   :  { %12198 = vrsqrt.f32 %v4857_v36  ;;  %v4854_v30 = vmax.f32 %v4852_v9, 0.0 }
0x22c2   :  { %v4858_v5 = vadd.f32 1e-05, %v4854_v30 }
0x22c4   :  { %12200 = vrsqrt.f32 %v4858_v5 }
0x22cd   :  { %v12199_v14 = vpop.eup %12198 }
0x22ce   :  { %v4861_v27 = vmul.f32 %v12199_v14, %v4855_v10 }
0x22d0   :  { %v4867_v8 = vmul.f32 %v10500_v16, %v4861_v27 }
0x22d1   :  { %v12201_v18 = vpop.eup %12200 }
0x22d2   :  { %v4862_v7 = vmul.f32 %v12201_v18, %v4856_v33  ;;  %v4873_v6 = vadd.f32 %v10501_v23, %v4867_v8  ;;  %v12040_v8 = vld [vmem:[%s15517_s4 + $0x274] ss:$8 sps:$4 sm:$0xff]  }
0x22d3   :  { %5080 = vmatprep.subr.bf16.mxu0 %v12040_v8 }
0x22d4   :  { %v4868_v20 = vmul.f32 %v10500_v16, %v4862_v7  ;;  %v12038_v7 = vld [vmem:[%s15517_s4 + $0x270] ss:$8 sps:$4 sm:$0xff]  }
0x22d6   :  { %v4874_v31 = vadd.f32 %v10501_v23, %v4868_v20  ;;  %v12043_v23 = vld [vmem:[%s15517_s4 + $0x264] ss:$8 sps:$4 sm:$0xff]   ;;  %v12041_v20 = vld [vmem:[%s15517_s4 + $0x260] ss:$8 sps:$4 sm:$0xff]  }
0x22d8   :  { %v4884_v15 = vpack.c.bf16 %v4874_v31, %v4873_v6 }
0x22da   :  { %11630 = vmatmul.mubr.msk.bf16.vlgmr.msra.gmra.mxu0 %vm694_vm2, %v4884_v15  ;;  %v12049_v15 = vld [vmem:[%s15517_s4 + $0x244] ss:$8 sps:$4 sm:$0xff]  }
0x22db   :  { %5104 = vmatprep.mubr.bf16.mxu0 %v15520_v32  ;;  %5081 = vmatpush1.bf16.msra.mxu0 %v12038_v7 }
0x22dc   :  { %5082 = vmatprep.subr.bf16.mxu0 %v12043_v23 }
0x22df   :  { %5083 = vmatpush1.bf16.msra.mxu0 %v12041_v20 }
0x239a   :  { %v4951_v13 = vpop.f32.mrf.mxu0 }
0x239b   :  { %v4952_v17 = vadd.f32 %v10510_v28, %v4951_v13  ;;  %v12050_v13 = vld [vmem:[%s15518_s30 + $0x4f8] sm:$0xff]  }
0x239c   :  { %v11631_v24 = vpop.f32.mrf.mxu0  ;;  %11264 = vmatprep.subr.bf16.mxu1 %v12050_v13 }
0x239d   :  { %v14490_v22 = vadd.f32 %v4952_v17, %v4873_v6  ;;  %v12046_v6 = vld [vmem:[%s15517_s4 + $0x254] ss:$8 sps:$4 sm:$0xff]  }
0x239e   :  { %v4954_v36 = vpop.f32.mrf.mxu0  ;;  %5084 = vmatprep.subr.bf16.mxu0 %v12046_v6  ;;  %v12051_v17 = vld [vmem:[%s15518_s30 + $0x4b8] sm:$0xff]   ;;  %v12052_v24 = vld [vmem:[%s15518_s30 + $0x4f0] sm:$0xff]  }
0x239f   :  { %v4955_v9 = vadd.f32 %v10510_v28, %v4954_v36  ;;  %v4962_v30 = vsel %vm694_vm2, %v14490_v22, 0.0  ;;  %v4970_v5 = vmul.f32 %v14490_v22, %v14490_v22  ;;  %v12047_v28 = vld [vmem:[%s15517_s4 + $0x240] ss:$8 sps:$4 sm:$0xff]   ;;  %11265 = vmatpush3.bf16.msra.mxu1 %v12051_v17  ;;  %v12053_v36 = vld [vmem:[%s15518_s30 + $0x4b0] sm:$0xff]  }
0x23a0   :  { %4963 = vadd.xlane.f32.xlu0 %v4962_v30  ;;  %v11632_v10 = vpop.f32.mrf.mxu0  ;;  %11266 = vmatprep.subr.bf16.mxu1 %v12052_v24  ;;  %v12055_v30 = vld [vmem:[%s15518_s30 + $0x4a8] sm:$0xff]  }
0x23a1   :  { %v14496_v14 = vadd.f32 %v4955_v9, %v4874_v31  ;;  %v4972_v27 = vsel %vm694_vm2, %v4970_v5, 0.0  ;;  %v12044_v31 = vld [vmem:[%s15517_s4 + $0x250] ss:$8 sps:$4 sm:$0xff]   ;;  %v12054_v9 = vld [vmem:[%s15518_s30 + $0x4e8] sm:$0xff]   ;;  %v12056_v5 = vld [vmem:[%s15518_s30 + $0x4e0] sm:$0xff]  }
0x23a2   :  { %5085 = vmatpush1.bf16.msra.mxu0 %v12044_v31  ;;  %v12057_v10 = vld [vmem:[%s15518_s30 + $0x4a0] sm:$0xff]  }
0x23a3   :  { %v4965_v16 = vsel %vm694_vm2, %v14496_v14, 0.0  ;;  %v4971_v33 = vmul.f32 %v14496_v14, %v14496_v14  ;;  %5086 = vmatprep.subr.bf16.mxu0 %v12049_v15  ;;  %11267 = vmatpush3.bf16.msra.mxu1 %v12053_v36 }
0x23a4   :  { %4973 = vadd.xlane.f32.xlu0 %v4972_v27  ;;  %4966 = vadd.xlane.f32.xlu1 %v4965_v16  ;;  %v12058_v27 = vld [vmem:[%s15518_s30 + $0x4d8] sm:$0xff]  }
0x23a5   :  { %v4975_v18 = vsel %vm694_vm2, %v4971_v33, 0.0  ;;  %11268 = vmatprep.subr.bf16.mxu1 %v12054_v9  ;;  %v12059_v16 = vld [vmem:[%s15518_s30 + $0x498] sm:$0xff]  }
0x23a6   :  { %5087 = vmatpush1.bf16.msra.mxu0 %v12047_v28 }
0x23a7   :  { %11633 = vmatprep.subr.bf16.mxu0 %v15519_v19  ;;  %11269 = vmatpush3.bf16.msra.mxu1 %v12055_v30 }
0x23a8   :  { %4976 = vadd.xlane.f32.xlu1 %v4975_v18  ;;  %11270 = vmatprep.subr.bf16.mxu1 %v12056_v5 }
0x23ab   :  { %11271 = vmatpush3.bf16.msra.mxu1 %v12057_v10 }
0x23ac   :  { %11272 = vmatprep.subr.bf16.mxu1 %v12058_v27 }
0x23af   :  { %11273 = vmatpush3.bf16.msra.mxu1 %v12059_v16  ;;  %v10516_v16 = vld [vmem:[%s15454_s9 + $0x24] ss:$0 sm:$0xff] }
0x2429   :  { %v4964_v33 = vpop.xlane.xlu0 %4963 }
0x242a   :  { %v4968_v18 = vmul.f32 0.015625, %v4964_v33 }
0x242c   :  { %v4980_v23 = vmul.f32 %v4968_v18, %v4968_v18  ;;  %v4986_v5 = vsub.f32 %v14490_v22, %v4968_v18  ;;  %v12060_v22 = vld [vmem:[%s15518_s30 + $0x4d0] sm:$0xff]   ;;  %v12062_v18 = vld [vmem:[%s15518_s30 + $0x4c8] sm:$0xff]  }
0x242d   :  { %v4974_v7 = vpop.xlane.xlu0 %4973  ;;  %v4967_v8 = vpop.xlane.xlu1 %4966  ;;  %11274 = vmatprep.subr.bf16.mxu1 %v12060_v22 }
0x242e   :  { %v4978_v20 = vmul.f32 0.015625, %v4974_v7  ;;  %v4969_v6 = vmul.f32 0.015625, %v4967_v8 }
0x2430   :  { %v4982_v31 = vsub.f32 %v4978_v20, %v4980_v23  ;;  %v4981_v13 = vmul.f32 %v4969_v6, %v4969_v6  ;;  %v4987_v33 = vsub.f32 %v14496_v14, %v4969_v6  ;;  %v10517_v20 = vld [vmem:[%s15454_s9 + $0x25] ss:$0 sm:$0xff]  ;;  %v12061_v14 = vld [vmem:[%s15518_s30 + $0x490] sm:$0xff]   ;;  %v12063_v6 = vld [vmem:[%s15518_s30 + $0x488] sm:$0xff]  }
0x2431   :  { %v4977_v15 = vpop.xlane.xlu1 %4976  ;;  %11275 = vmatpush3.bf16.msra.mxu1 %v12061_v14 }
0x2432   :  { %v4984_v28 = vmax.f32 %v4982_v31, 0.0  ;;  %v4979_v17 = vmul.f32 0.015625, %v4977_v15  ;;  %11276 = vmatprep.subr.bf16.mxu1 %v12062_v18 }
0x2434   :  { %v4988_v24 = vadd.f32 1e-05, %v4984_v28  ;;  %v4983_v36 = vsub.f32 %v4979_v17, %v4981_v13  ;;  %v12064_v17 = vld [vmem:[%s15518_s30 + $0x4c0] sm:$0xff]  }
0x2435   :  { %11277 = vmatpush3.bf16.msra.mxu1 %v12063_v6 }
0x2436   :  { %12202 = vrsqrt.f32 %v4988_v24  ;;  %v4985_v9 = vmax.f32 %v4983_v36, 0.0  ;;  %v12065_v24 = vld [vmem:[%s15518_s30 + $0x480] sm:$0xff]   ;;  %11278 = vmatprep.subr.bf16.mxu1 %v12064_v17  ;;  %v10526_v36 = vld [vmem:[%s15452_s7 + $0x11] ss:$8 sm:$0x3] }
0x2437   :  { %v10568_v17 = vld [vmem:[%s15453_s8 + $0x9] ss:$0 sm:$0xff] }
0x2438   :  { %v4989_v30 = vadd.f32 1e-05, %v4985_v9 }
0x2439   :  { %11279 = vmatpush3.bf16.msra.mxu1 %v12065_v24 }
0x243a   :  { %12204 = vrsqrt.f32 %v4989_v30  ;;  %v5026_v30 = vrot.slane %v10526_v36, %v13359_v26 }
0x2443   :  { %v12203_v10 = vpop.eup %12202 }
0x2444   :  { %v4992_v27 = vmul.f32 %v12203_v10, %v4986_v5  ;;  %v5022_v5 = vrot.slane %v10526_v36, %v13362_v29 }
0x2446   :  { %v4998_v23 = vmul.f32 %v10516_v16, %v4992_v27 }
0x2447   :  { %v12205_v7 = vpop.eup %12204 }
0x2448   :  { %v4993_v8 = vmul.f32 %v12205_v7, %v4987_v33  ;;  %v5004_v15 = vadd.f32 %v10517_v20, %v4998_v23 }
0x244a   :  { %v4999_v31 = vmul.f32 %v10516_v16, %v4993_v8 }
0x244c   :  { %v5005_v28 = vadd.f32 %v10517_v20, %v4999_v31 }
0x244e   :  { %v5015_v13 = vpack.c.bf16 %v5005_v28, %v5004_v15 }
0x2450   :  { %10535 = vmatmul.mubr.msk.bf16.vlgmr.msra.gmra.mxu0 %vm694_vm2, %v5015_v13 }
0x2451   :  { %11641 = vmatprep.mubr.msk.bf16.mxu0 %vm12452_vm0, %v15519_v19 }
0x2510   :  { %v5106_v9 = vpop.f32.mrf.mxu0 }
0x2511   :  { %v5107_v7 = vadd.f32 %v5106_v9, %v5022_v5 }
0x2512   :  { %v5108_v10 = vpop.f32.mrf.mxu0 }
0x2513   :  { %v5109_v16 = vadd.f32 %v5108_v10, %v5026_v30  ;;  %v5115_v22 = vmax.f32 %v5107_v7, 0.0 }
0x2514   :  { %v5110_v27 = vpop.f32.mrf.mxu0 }
0x2515   :  { %v5111_v33 = vadd.f32 %v5110_v27, %v5022_v5  ;;  %v5116_v31 = vmax.f32 %v5109_v16, 0.0 }
0x2516   :  { %v5112_v8 = vpop.f32.mrf.mxu0 }
0x2517   :  { %v5113_v23 = vadd.f32 %v5112_v8, %v5026_v30  ;;  %v5117_v20 = vmax.f32 %v5111_v33, 0.0 }
0x2519   :  { %v5118_v13 = vmax.f32 %v5113_v23, 0.0  ;;  %v5152_v18 = vpack.c.bf16 %v5117_v20, %v5115_v22  ;;  %v12067_v22 = vld [vmem:[%s15514_s1 + $0x150] sm:$0xff]  }
0x251b   :  { %v5153_v14 = vpack.c.bf16 %v5118_v13, %v5116_v31 }
0x251d   :  { %5287 = vmatprep.mubr.bf16.mxu1 %v5153_v14  ;;  %v12069_v14 = vld [vmem:[%s15514_s1 + $0x140] sm:$0xff]  }
0x251e   :  { %5288 = vmatmul.mubr.bf16.vlgmr.msra.gmra.mxu1 %v5152_v18 }
0x25de   :  { %v11280_v6 = vpop.f32.mrf.mxu1 }
0x25e0   :  { %v11281_v24 = vpop.f32.mrf.mxu1 }
0x25e1   :  { %v11282_v36 = vadd.f32 %v11281_v24, %v11280_v6 }
0x25e2   :  { %v11283_v10 = vpop.f32.mrf.mxu1 }
0x25e3   :  { %v5290_v27 = vadd.f32 %v11282_v36, %v10568_v17 }
0x25e4   :  { %v11284_v9 = vpop.f32.mrf.mxu1 }
0x25e5   :  { %v5296_v5 = vadd.f32 %v5290_v27, %v5004_v15  ;;  %v11285_v30 = vadd.f32 %v11284_v9, %v11283_v10  ;;  %v12066_v15 = vld [vmem:[%s15514_s1 + $0x158] sm:$0xff]  }
0x25e6   :  { %11634 = vmatpush3.bf16.msra.mxu0 %v12066_v15 }
0x25e7   :  { %v5293_v33 = vadd.f32 %v11285_v30, %v10568_v17  ;;  %v5300_v16 = vsel %vm694_vm2, %v5296_v5, 0.0  ;;  %v5308_v7 = vmul.f32 %v5296_v5, %v5296_v5  ;;  %11635 = vmatprep.subr.bf16.mxu0 %v15519_v19 }
0x25e8   :  { %5301 = vadd.xlane.f32.xlu0 %v5300_v16 }
0x25e9   :  { %v5297_v8 = vadd.f32 %v5293_v33, %v5005_v28  ;;  %v5310_v20 = vsel %vm694_vm2, %v5308_v7, 0.0  ;;  %v12068_v28 = vld [vmem:[%s15514_s1 + $0x148] sm:$0xff]  }
0x25ea   :  { %11636 = vmatpush3.bf16.msra.mxu0 %v12067_v22 }
0x25eb   :  { %v5303_v23 = vsel %vm694_vm2, %v5297_v8, 0.0  ;;  %v5309_v31 = vmul.f32 %v5297_v8, %v5297_v8  ;;  %11637 = vmatprep.subr.bf16.mxu0 %v15519_v19 }
0x25ec   :  { %5304 = vadd.xlane.f32.xlu1 %v5303_v23  ;;  %5311 = vadd.xlane.f32.xlu0 %v5310_v20 }
0x25ed   :  { %v5313_v13 = vsel %vm694_vm2, %v5309_v31, 0.0 }
0x25ee   :  { %11638 = vmatpush3.bf16.msra.mxu0 %v12068_v28 }
0x25ef   :  { %11639 = vmatprep.subr.bf16.mxu0 %v15519_v19 }
0x25f0   :  { %5314 = vadd.xlane.f32.xlu1 %v5313_v13 }
0x25f2   :  { %11640 = vmatpush3.bf16.msra.mxu0 %v12069_v14  ;;  %v10585_v14 = vld [vmem:[%s15454_s9 + $0x26] ss:$0 sm:$0xff] }
0x2671   :  { %v5302_v18 = vpop.xlane.xlu0 %5301 }
0x2672   :  { %v5306_v6 = vmul.f32 0.015625, %v5302_v18 }
0x2674   :  { %v5318_v36 = vmul.f32 %v5306_v6, %v5306_v6  ;;  %v5324_v15 = vsub.f32 %v5296_v5, %v5306_v6  ;;  %v10595_v5 = vld [vmem:[%s15516_s28 + $0xa] ss:$0 sm:$0xff] }
0x2675   :  { %v5305_v17 = vpop.xlane.xlu1 %5304  ;;  %v5312_v24 = vpop.xlane.xlu0 %5311 }
0x2676   :  { %v5307_v10 = vmul.f32 0.015625, %v5305_v17  ;;  %v5316_v27 = vmul.f32 0.015625, %v5312_v24 }
0x2678   :  { %v5320_v9 = vsub.f32 %v5316_v27, %v5318_v36  ;;  %v5319_v33 = vmul.f32 %v5307_v10, %v5307_v10  ;;  %v5325_v18 = vsub.f32 %v5297_v8, %v5307_v10  ;;  %v10586_v27 = vld [vmem:[%s15454_s9 + $0x27] ss:$0 sm:$0xff] }
0x2679   :  { %v5315_v30 = vpop.xlane.xlu1 %5314 }
0x267a   :  { %v5322_v16 = vmax.f32 %v5320_v9, 0.0  ;;  %v5317_v7 = vmul.f32 0.015625, %v5315_v30 }
0x267c   :  { %v5326_v23 = vadd.f32 1e-05, %v5322_v16  ;;  %v5321_v20 = vsub.f32 %v5317_v7, %v5319_v33 }
0x267e   :  { %12206 = vrsqrt.f32 %v5326_v23  ;;  %v5323_v31 = vmax.f32 %v5321_v20, 0.0 }
0x2680   :  { %v5327_v13 = vadd.f32 1e-05, %v5323_v31 }
0x2682   :  { %12208 = vrsqrt.f32 %v5327_v13 }
0x268b   :  { %v12207_v22 = vpop.eup %12206 }
0x268c   :  { %v5330_v28 = vmul.f32 %v12207_v22, %v5324_v15 }
0x268e   :  { %v5336_v36 = vmul.f32 %v10585_v14, %v5330_v28 }
0x268f   :  { %v12209_v17 = vpop.eup %12208 }
0x2690   :  { %v5331_v24 = vmul.f32 %v12209_v17, %v5325_v18  ;;  %v5342_v30 = vadd.f32 %v10586_v27, %v5336_v36  ;;  %v12072_v36 = vld [vmem:[%s15517_s4 + $0x2b4] ss:$8 sps:$4 sm:$0xff]  }
0x2691   :  { %5549 = vmatprep.subr.bf16.mxu0 %v12072_v36 }
0x2692   :  { %v5337_v9 = vmul.f32 %v10585_v14, %v5331_v24  ;;  %v12070_v24 = vld [vmem:[%s15517_s4 + $0x2b0] ss:$8 sps:$4 sm:$0xff]  }
0x2694   :  { %v5343_v33 = vadd.f32 %v10586_v27, %v5337_v9  ;;  %v12075_v27 = vld [vmem:[%s15517_s4 + $0x2a4] ss:$8 sps:$4 sm:$0xff]   ;;  %v12073_v9 = vld [vmem:[%s15517_s4 + $0x2a0] ss:$8 sps:$4 sm:$0xff]  }
0x2696   :  { %v5353_v16 = vpack.c.bf16 %v5343_v33, %v5342_v30 }
0x2698   :  { %11642 = vmatmul.mubr.msk.bf16.vlgmr.msra.gmra.mxu0 %vm694_vm2, %v5353_v16  ;;  %v12081_v16 = vld [vmem:[%s15517_s4 + $0x284] ss:$8 sps:$4 sm:$0xff]  }
0x2699   :  { %5573 = vmatprep.mubr.bf16.mxu0 %v15520_v32  ;;  %5550 = vmatpush1.bf16.msra.mxu0 %v12070_v24 }
0x269a   :  { %5551 = vmatprep.subr.bf16.mxu0 %v12075_v27 }
0x269d   :  { %5552 = vmatpush1.bf16.msra.mxu0 %v12073_v9 }
0x2758   :  { %v5420_v8 = vpop.f32.mrf.mxu0 }
0x2759   :  { %v5421_v6 = vadd.f32 %v10595_v5, %v5420_v8  ;;  %v12082_v8 = vld [vmem:[%s15518_s30 + $0x578] sm:$0xff]  }
0x275a   :  { %v11643_v10 = vpop.f32.mrf.mxu0  ;;  %11291 = vmatprep.subr.bf16.mxu1 %v12082_v8 }
0x275b   :  { %v14626_v7 = vadd.f32 %v5421_v6, %v5342_v30  ;;  %v12078_v30 = vld [vmem:[%s15517_s4 + $0x294] ss:$8 sps:$4 sm:$0xff]  }
0x275c   :  { %v5423_v23 = vpop.f32.mrf.mxu0  ;;  %5553 = vmatprep.subr.bf16.mxu0 %v12078_v30  ;;  %v12083_v6 = vld [vmem:[%s15518_s30 + $0x538] sm:$0xff]   ;;  %v12084_v10 = vld [vmem:[%s15518_s30 + $0x570] sm:$0xff]  }
0x275d   :  { %v5424_v20 = vadd.f32 %v10595_v5, %v5423_v23  ;;  %v5431_v31 = vsel %vm694_vm2, %v14626_v7, 0.0  ;;  %v5439_v13 = vmul.f32 %v14626_v7, %v14626_v7  ;;  %v12079_v5 = vld [vmem:[%s15517_s4 + $0x280] ss:$8 sps:$4 sm:$0xff]   ;;  %11292 = vmatpush3.bf16.msra.mxu1 %v12083_v6  ;;  %v12085_v23 = vld [vmem:[%s15518_s30 + $0x530] sm:$0xff]  }
0x275e   :  { %5432 = vadd.xlane.f32.xlu0 %v5431_v31  ;;  %v11644_v15 = vpop.f32.mrf.mxu0  ;;  %11293 = vmatprep.subr.bf16.mxu1 %v12084_v10  ;;  %v12087_v31 = vld [vmem:[%s15518_s30 + $0x528] sm:$0xff]  }
0x275f   :  { %v14632_v22 = vadd.f32 %v5424_v20, %v5343_v33  ;;  %v5441_v28 = vsel %vm694_vm2, %v5439_v13, 0.0  ;;  %v12076_v33 = vld [vmem:[%s15517_s4 + $0x290] ss:$8 sps:$4 sm:$0xff]   ;;  %v12086_v20 = vld [vmem:[%s15518_s30 + $0x568] sm:$0xff]   ;;  %v12088_v13 = vld [vmem:[%s15518_s30 + $0x560] sm:$0xff]  }
0x2760   :  { %5554 = vmatpush1.bf16.msra.mxu0 %v12076_v33  ;;  %v12089_v15 = vld [vmem:[%s15518_s30 + $0x520] sm:$0xff]  }
0x2761   :  { %v5434_v14 = vsel %vm694_vm2, %v14632_v22, 0.0  ;;  %v5440_v18 = vmul.f32 %v14632_v22, %v14632_v22  ;;  %5555 = vmatprep.subr.bf16.mxu0 %v12081_v16  ;;  %11294 = vmatpush3.bf16.msra.mxu1 %v12085_v23 }
0x2762   :  { %5442 = vadd.xlane.f32.xlu0 %v5441_v28  ;;  %5435 = vadd.xlane.f32.xlu1 %v5434_v14  ;;  %v12090_v28 = vld [vmem:[%s15518_s30 + $0x558] sm:$0xff]  }
0x2763   :  { %v5444_v17 = vsel %vm694_vm2, %v5440_v18, 0.0  ;;  %11295 = vmatprep.subr.bf16.mxu1 %v12086_v20  ;;  %v12091_v14 = vld [vmem:[%s15518_s30 + $0x518] sm:$0xff]  }
0x2764   :  { %5556 = vmatpush1.bf16.msra.mxu0 %v12079_v5 }
0x2765   :  { %11645 = vmatprep.subr.bf16.mxu0 %v15519_v19  ;;  %11296 = vmatpush3.bf16.msra.mxu1 %v12087_v31 }
0x2766   :  { %5445 = vadd.xlane.f32.xlu1 %v5444_v17  ;;  %11297 = vmatprep.subr.bf16.mxu1 %v12088_v13 }
0x2769   :  { %11298 = vmatpush3.bf16.msra.mxu1 %v12089_v15 }
0x276a   :  { %11299 = vmatprep.subr.bf16.mxu1 %v12090_v28 }
0x276d   :  { %11300 = vmatpush3.bf16.msra.mxu1 %v12091_v14  ;;  %v10601_v14 = vld [vmem:[%s15454_s9 + $0x28] ss:$0 sm:$0xff] }
0x27e7   :  { %v5433_v18 = vpop.xlane.xlu0 %5432 }
0x27e8   :  { %v5437_v17 = vmul.f32 0.015625, %v5433_v18 }
0x27ea   :  { %v5449_v27 = vmul.f32 %v5437_v17, %v5437_v17  ;;  %v5455_v13 = vsub.f32 %v14626_v7, %v5437_v17  ;;  %v12092_v7 = vld [vmem:[%s15518_s30 + $0x550] sm:$0xff]   ;;  %v12094_v17 = vld [vmem:[%s15518_s30 + $0x548] sm:$0xff]  }
0x27eb   :  { %v5443_v24 = vpop.xlane.xlu0 %5442  ;;  %v5436_v36 = vpop.xlane.xlu1 %5435  ;;  %11301 = vmatprep.subr.bf16.mxu1 %v12092_v7 }
0x27ec   :  { %v5447_v9 = vmul.f32 0.015625, %v5443_v24  ;;  %v5438_v30 = vmul.f32 0.015625, %v5436_v36 }
0x27ee   :  { %v5451_v33 = vsub.f32 %v5447_v9, %v5449_v27  ;;  %v5450_v8 = vmul.f32 %v5438_v30, %v5438_v30  ;;  %v5456_v18 = vsub.f32 %v14632_v22, %v5438_v30  ;;  %v10602_v9 = vld [vmem:[%s15454_s9 + $0x29] ss:$0 sm:$0xff]  ;;  %v12093_v22 = vld [vmem:[%s15518_s30 + $0x510] sm:$0xff]  }
0x27ef   :  { %v5446_v16 = vpop.xlane.xlu1 %5445  ;;  %11302 = vmatpush3.bf16.msra.mxu1 %v12093_v22  ;;  %v12095_v30 = vld [vmem:[%s15518_s30 + $0x508] sm:$0xff]  }
0x27f0   :  { %v5453_v5 = vmax.f32 %v5451_v33, 0.0  ;;  %v5448_v6 = vmul.f32 0.015625, %v5446_v16  ;;  %11303 = vmatprep.subr.bf16.mxu1 %v12094_v17 }
0x27f2   :  { %v5457_v10 = vadd.f32 1e-05, %v5453_v5  ;;  %v5452_v23 = vsub.f32 %v5448_v6, %v5450_v8  ;;  %v12096_v6 = vld [vmem:[%s15518_s30 + $0x540] sm:$0xff]  }
0x27f3   :  { %11304 = vmatpush3.bf16.msra.mxu1 %v12095_v30 }
0x27f4   :  { %12210 = vrsqrt.f32 %v5457_v10  ;;  %v5454_v20 = vmax.f32 %v5452_v23, 0.0  ;;  %v12097_v10 = vld [vmem:[%s15518_s30 + $0x500] sm:$0xff]   ;;  %11305 = vmatprep.subr.bf16.mxu1 %v12096_v6  ;;  %v10611_v23 = vld [vmem:[%s15452_s7 + $0x12] ss:$8 sm:$0x3] }
0x27f5   :  { %v10653_v6 = vld [vmem:[%s15453_s8 + $0xa] ss:$0 sm:$0xff] }
0x27f6   :  { %v5458_v31 = vadd.f32 1e-05, %v5454_v20 }
0x27f7   :  { %11306 = vmatpush3.bf16.msra.mxu1 %v12097_v10 }
0x27f8   :  { %12212 = vrsqrt.f32 %v5458_v31  ;;  %v5495_v31 = vrot.slane %v10611_v23, %v13359_v26 }
0x2801   :  { %v12211_v15 = vpop.eup %12210 }
0x2802   :  { %v5461_v28 = vmul.f32 %v12211_v15, %v5455_v13  ;;  %v5491_v13 = vrot.slane %v10611_v23, %v13362_v29 }
0x2804   :  { %v5467_v27 = vmul.f32 %v10601_v14, %v5461_v28 }
0x2805   :  { %v12213_v24 = vpop.eup %12212 }
0x2806   :  { %v5462_v36 = vmul.f32 %v12213_v24, %v5456_v18  ;;  %v5473_v16 = vadd.f32 %v10602_v9, %v5467_v27 }
0x2808   :  { %v5468_v33 = vmul.f32 %v10601_v14, %v5462_v36 }
0x280a   :  { %v5474_v5 = vadd.f32 %v10602_v9, %v5468_v33 }
0x280c   :  { %v5484_v8 = vpack.c.bf16 %v5474_v5, %v5473_v16 }
0x280e   :  { %10620 = vmatmul.mubr.msk.bf16.vlgmr.msra.gmra.mxu0 %vm694_vm2, %v5484_v8 }
0x280f   :  { %11653 = vmatprep.mubr.msk.bf16.mxu0 %vm12452_vm0, %v15519_v19 }
0x28ce   :  { %v5575_v20 = vpop.f32.mrf.mxu0 }
0x28cf   :  { %v5576_v24 = vadd.f32 %v5575_v20, %v5491_v13 }
0x28d0   :  { %v5577_v15 = vpop.f32.mrf.mxu0 }
0x28d1   :  { %v5578_v14 = vadd.f32 %v5577_v15, %v5495_v31  ;;  %v5584_v7 = vmax.f32 %v5576_v24, 0.0 }
0x28d2   :  { %v5579_v28 = vpop.f32.mrf.mxu0 }
0x28d3   :  { %v5580_v18 = vadd.f32 %v5579_v28, %v5491_v13  ;;  %v5585_v33 = vmax.f32 %v5578_v14, 0.0 }
0x28d4   :  { %v5581_v36 = vpop.f32.mrf.mxu0 }
0x28d5   :  { %v5582_v27 = vadd.f32 %v5581_v36, %v5495_v31  ;;  %v5586_v9 = vmax.f32 %v5580_v18, 0.0 }
0x28d7   :  { %v5587_v8 = vmax.f32 %v5582_v27, 0.0  ;;  %v5621_v17 = vpack.c.bf16 %v5586_v9, %v5584_v7  ;;  %v12099_v7 = vld [vmem:[%s15514_s1 + $0x170] sm:$0xff]  }
0x28d9   :  { %v5622_v22 = vpack.c.bf16 %v5587_v8, %v5585_v33 }
0x28db   :  { %5756 = vmatprep.mubr.bf16.mxu1 %v5622_v22  ;;  %v12101_v22 = vld [vmem:[%s15514_s1 + $0x160] sm:$0xff]  }
0x28dc   :  { %5757 = vmatmul.mubr.bf16.vlgmr.msra.gmra.mxu1 %v5621_v17 }
0x299c   :  { %v11307_v30 = vpop.f32.mrf.mxu1 }
0x299e   :  { %v11308_v10 = vpop.f32.mrf.mxu1 }
0x299f   :  { %v11309_v23 = vadd.f32 %v11308_v10, %v11307_v30 }
0x29a0   :  { %v11310_v15 = vpop.f32.mrf.mxu1 }
0x29a1   :  { %v5759_v28 = vadd.f32 %v11309_v23, %v10653_v6 }
0x29a2   :  { %v11311_v20 = vpop.f32.mrf.mxu1 }
0x29a3   :  { %v5765_v13 = vadd.f32 %v5759_v28, %v5473_v16  ;;  %v11312_v31 = vadd.f32 %v11311_v20, %v11310_v15  ;;  %v12098_v16 = vld [vmem:[%s15514_s1 + $0x178] sm:$0xff]  }
0x29a4   :  { %11646 = vmatpush3.bf16.msra.mxu0 %v12098_v16 }
0x29a5   :  { %v5762_v18 = vadd.f32 %v11312_v31, %v10653_v6  ;;  %v5769_v14 = vsel %vm694_vm2, %v5765_v13, 0.0  ;;  %v5777_v24 = vmul.f32 %v5765_v13, %v5765_v13  ;;  %11647 = vmatprep.subr.bf16.mxu0 %v15519_v19 }
0x29a6   :  { %5770 = vadd.xlane.f32.xlu0 %v5769_v14 }
0x29a7   :  { %v5766_v36 = vadd.f32 %v5762_v18, %v5474_v5  ;;  %v5779_v9 = vsel %vm694_vm2, %v5777_v24, 0.0  ;;  %v12100_v5 = vld [vmem:[%s15514_s1 + $0x168] sm:$0xff]  }
0x29a8   :  { %11648 = vmatpush3.bf16.msra.mxu0 %v12099_v7 }
0x29a9   :  { %v5772_v27 = vsel %vm694_vm2, %v5766_v36, 0.0  ;;  %v5778_v33 = vmul.f32 %v5766_v36, %v5766_v36  ;;  %11649 = vmatprep.subr.bf16.mxu0 %v15519_v19 }
0x29aa   :  { %5773 = vadd.xlane.f32.xlu1 %v5772_v27  ;;  %5780 = vadd.xlane.f32.xlu0 %v5779_v9 }
0x29ab   :  { %v5782_v8 = vsel %vm694_vm2, %v5778_v33, 0.0 }
0x29ac   :  { %11650 = vmatpush3.bf16.msra.mxu0 %v12100_v5 }
0x29ad   :  { %11651 = vmatprep.subr.bf16.mxu0 %v15519_v19 }
0x29ae   :  { %5783 = vadd.xlane.f32.xlu1 %v5782_v8 }
0x29b0   :  { %11652 = vmatpush3.bf16.msra.mxu0 %v12101_v22  ;;  %v10670_v22 = vld [vmem:[%s15454_s9 + $0x2a] ss:$0 sm:$0xff] }
0x2a2f   :  { %v5771_v17 = vpop.xlane.xlu0 %5770 }
0x2a30   :  { %v5775_v30 = vmul.f32 0.015625, %v5771_v17 }
0x2a32   :  { %v5787_v23 = vmul.f32 %v5775_v30, %v5775_v30  ;;  %v5793_v16 = vsub.f32 %v5765_v13, %v5775_v30  ;;  %v10680_v13 = vld [vmem:[%s15516_s28 + $0xb] ss:$0 sm:$0xff] }
0x2a33   :  { %v5774_v6 = vpop.xlane.xlu1 %5773  ;;  %v5781_v10 = vpop.xlane.xlu0 %5780 }
0x2a34   :  { %v5776_v15 = vmul.f32 0.015625, %v5774_v6  ;;  %v5785_v28 = vmul.f32 0.015625, %v5781_v10 }
0x2a36   :  { %v5789_v20 = vsub.f32 %v5785_v28, %v5787_v23  ;;  %v5788_v18 = vmul.f32 %v5776_v15, %v5776_v15  ;;  %v5794_v17 = vsub.f32 %v5766_v36, %v5776_v15  ;;  %v10671_v28 = vld [vmem:[%s15454_s9 + $0x2b] ss:$0 sm:$0xff] }
0x2a37   :  { %v5784_v31 = vpop.xlane.xlu1 %5783 }
0x2a38   :  { %v5791_v14 = vmax.f32 %v5789_v20, 0.0  ;;  %v5786_v24 = vmul.f32 0.015625, %v5784_v31 }
0x2a3a   :  { %v5795_v27 = vadd.f32 1e-05, %v5791_v14  ;;  %v5790_v9 = vsub.f32 %v5786_v24, %v5788_v18 }
0x2a3c   :  { %12214 = vrsqrt.f32 %v5795_v27  ;;  %v5792_v33 = vmax.f32 %v5790_v9, 0.0 }
0x2a3e   :  { %v5796_v8 = vadd.f32 1e-05, %v5792_v33 }
0x2a40   :  { %12216 = vrsqrt.f32 %v5796_v8 }
0x2a49   :  { %v12215_v7 = vpop.eup %12214 }
0x2a4a   :  { %v5799_v5 = vmul.f32 %v12215_v7, %v5793_v16 }
0x2a4c   :  { %v5805_v23 = vmul.f32 %v10670_v22, %v5799_v5 }
0x2a4d   :  { %v12217_v6 = vpop.eup %12216 }
0x2a4e   :  { %v5800_v10 = vmul.f32 %v12217_v6, %v5794_v17  ;;  %v5811_v31 = vadd.f32 %v10671_v28, %v5805_v23  ;;  %v12104_v23 = vld [vmem:[%s15517_s4 + $0x2f4] ss:$8 sps:$4 sm:$0xff]  }
0x2a4f   :  { %6018 = vmatprep.subr.bf16.mxu0 %v12104_v23 }
0x2a50   :  { %v5806_v20 = vmul.f32 %v10670_v22, %v5800_v10  ;;  %v12102_v10 = vld [vmem:[%s15517_s4 + $0x2f0] ss:$8 sps:$4 sm:$0xff]  }
0x2a52   :  { %v5812_v18 = vadd.f32 %v10671_v28, %v5806_v20  ;;  %v12107_v28 = vld [vmem:[%s15517_s4 + $0x2e4] ss:$8 sps:$4 sm:$0xff]   ;;  %v12105_v20 = vld [vmem:[%s15517_s4 + $0x2e0] ss:$8 sps:$4 sm:$0xff]  }
0x2a54   :  { %v5822_v14 = vpack.c.bf16 %v5812_v18, %v5811_v31 }
0x2a56   :  { %11654 = vmatmul.mubr.msk.bf16.vlgmr.msra.gmra.mxu0 %vm694_vm2, %v5822_v14  ;;  %v12113_v14 = vld [vmem:[%s15517_s4 + $0x2c4] ss:$8 sps:$4 sm:$0xff]  }
0x2a57   :  { %6042 = vmatprep.mubr.bf16.mxu0 %v15520_v32  ;;  %6019 = vmatpush1.bf16.msra.mxu0 %v12102_v10 }
0x2a58   :  { %6020 = vmatprep.subr.bf16.mxu0 %v12107_v28 }
0x2a5b   :  { %6021 = vmatpush1.bf16.msra.mxu0 %v12105_v20 }
0x2b16   :  { %v5889_v36 = vpop.f32.mrf.mxu0 }
0x2b17   :  { %v5890_v30 = vadd.f32 %v10680_v13, %v5889_v36  ;;  %v12114_v36 = vld [vmem:[%s15518_s30 + $0x5f8] sm:$0xff]  }
0x2b18   :  { %v11655_v15 = vpop.f32.mrf.mxu0  ;;  %11318 = vmatprep.subr.bf16.mxu1 %v12114_v36 }
0x2b19   :  { %v14762_v24 = vadd.f32 %v5890_v30, %v5811_v31  ;;  %v12110_v31 = vld [vmem:[%s15517_s4 + $0x2d4] ss:$8 sps:$4 sm:$0xff]  }
0x2b1a   :  { %v5892_v27 = vpop.f32.mrf.mxu0  ;;  %6022 = vmatprep.subr.bf16.mxu0 %v12110_v31  ;;  %v12115_v30 = vld [vmem:[%s15518_s30 + $0x5b8] sm:$0xff]   ;;  %v12116_v15 = vld [vmem:[%s15518_s30 + $0x5f0] sm:$0xff]  }
0x2b1b   :  { %v5893_v9 = vadd.f32 %v10680_v13, %v5892_v27  ;;  %v5900_v33 = vsel %vm694_vm2, %v14762_v24, 0.0  ;;  %v5908_v8 = vmul.f32 %v14762_v24, %v14762_v24  ;;  %v12111_v13 = vld [vmem:[%s15517_s4 + $0x2c0] ss:$8 sps:$4 sm:$0xff]   ;;  %11319 = vmatpush3.bf16.msra.mxu1 %v12115_v30  ;;  %v12117_v27 = vld [vmem:[%s15518_s30 + $0x5b0] sm:$0xff]  }
0x2b1c   :  { %5901 = vadd.xlane.f32.xlu0 %v5900_v33  ;;  %v11656_v16 = vpop.f32.mrf.mxu0  ;;  %11320 = vmatprep.subr.bf16.mxu1 %v12116_v15  ;;  %v12119_v33 = vld [vmem:[%s15518_s30 + $0x5a8] sm:$0xff]  }
0x2b1d   :  { %v14768_v7 = vadd.f32 %v5893_v9, %v5812_v18  ;;  %v5910_v5 = vsel %vm694_vm2, %v5908_v8, 0.0  ;;  %v12108_v18 = vld [vmem:[%s15517_s4 + $0x2d0] ss:$8 sps:$4 sm:$0xff]   ;;  %v12118_v9 = vld [vmem:[%s15518_s30 + $0x5e8] sm:$0xff]   ;;  %v12120_v8 = vld [vmem:[%s15518_s30 + $0x5e0] sm:$0xff]  }
0x2b1e   :  { %6023 = vmatpush1.bf16.msra.mxu0 %v12108_v18  ;;  %v12121_v16 = vld [vmem:[%s15518_s30 + $0x5a0] sm:$0xff]  }
0x2b1f   :  { %v5903_v22 = vsel %vm694_vm2, %v14768_v7, 0.0  ;;  %v5909_v17 = vmul.f32 %v14768_v7, %v14768_v7  ;;  %6024 = vmatprep.subr.bf16.mxu0 %v12113_v14  ;;  %11321 = vmatpush3.bf16.msra.mxu1 %v12117_v27 }
0x2b20   :  { %5911 = vadd.xlane.f32.xlu0 %v5910_v5  ;;  %5904 = vadd.xlane.f32.xlu1 %v5903_v22  ;;  %v12122_v5 = vld [vmem:[%s15518_s30 + $0x5d8] sm:$0xff]  }
0x2b21   :  { %v5913_v6 = vsel %vm694_vm2, %v5909_v17, 0.0  ;;  %11322 = vmatprep.subr.bf16.mxu1 %v12118_v9  ;;  %v12123_v22 = vld [vmem:[%s15518_s30 + $0x598] sm:$0xff]  }
0x2b22   :  { %6025 = vmatpush1.bf16.msra.mxu0 %v12111_v13 }
0x2b23   :  { %11323 = vmatpush3.bf16.msra.mxu1 %v12119_v33 }
0x2b24   :  { %5914 = vadd.xlane.f32.xlu1 %v5913_v6  ;;  %11324 = vmatprep.subr.bf16.mxu1 %v12120_v8 }
0x2b27   :  { %11325 = vmatpush3.bf16.msra.mxu1 %v12121_v16 }
0x2b28   :  { %11326 = vmatprep.subr.bf16.mxu1 %v12122_v5 }
0x2b2b   :  { %11327 = vmatpush3.bf16.msra.mxu1 %v12123_v22  ;;  %v10686_v22 = vld [vmem:[%s15454_s9 + $0x2c] ss:$0 sm:$0xff] }
0x2ba5   :  { %v5902_v17 = vpop.xlane.xlu0 %5901 }
0x2ba6   :  { %v5906_v6 = vmul.f32 0.015625, %v5902_v17 }
0x2ba8   :  { %v5918_v28 = vmul.f32 %v5906_v6, %v5906_v6  ;;  %v5924_v8 = vsub.f32 %v14762_v24, %v5906_v6  ;;  %v12124_v24 = vld [vmem:[%s15518_s30 + $0x5d0] sm:$0xff]   ;;  %v12126_v6 = vld [vmem:[%s15518_s30 + $0x5c8] sm:$0xff]  }
0x2ba9   :  { %v5912_v10 = vpop.xlane.xlu0 %5911  ;;  %v5905_v23 = vpop.xlane.xlu1 %5904  ;;  %11328 = vmatprep.subr.bf16.mxu1 %v12124_v24 }
0x2baa   :  { %v5916_v20 = vmul.f32 0.015625, %v5912_v10  ;;  %v5907_v31 = vmul.f32 0.015625, %v5905_v23 }
0x2bac   :  { %v5920_v18 = vsub.f32 %v5916_v20, %v5918_v28  ;;  %v5919_v36 = vmul.f32 %v5907_v31, %v5907_v31  ;;  %v5925_v17 = vsub.f32 %v14768_v7, %v5907_v31  ;;  %v10687_v20 = vld [vmem:[%s15454_s9 + $0x2d] ss:$0 sm:$0xff]  ;;  %v12125_v7 = vld [vmem:[%s15518_s30 + $0x590] sm:$0xff]  }
0x2bad   :  { %v5915_v14 = vpop.xlane.xlu1 %5914  ;;  %11329 = vmatpush3.bf16.msra.mxu1 %v12125_v7  ;;  %v12127_v31 = vld [vmem:[%s15518_s30 + $0x588] sm:$0xff]  }
0x2bae   :  { %v5922_v13 = vmax.f32 %v5920_v18, 0.0  ;;  %v5917_v30 = vmul.f32 0.015625, %v5915_v14  ;;  %11330 = vmatprep.subr.bf16.mxu1 %v12126_v6 }
0x2bb0   :  { %v5926_v15 = vadd.f32 1e-05, %v5922_v13  ;;  %v5921_v27 = vsub.f32 %v5917_v30, %v5919_v36  ;;  %v12128_v30 = vld [vmem:[%s15518_s30 + $0x5c0] sm:$0xff]  }
0x2bb1   :  { %11331 = vmatpush3.bf16.msra.mxu1 %v12127_v31 }
0x2bb2   :  { %12218 = vrsqrt.f32 %v5926_v15  ;;  %v5923_v9 = vmax.f32 %v5921_v27, 0.0  ;;  %v12129_v15 = vld [vmem:[%s15518_s30 + $0x580] sm:$0xff]   ;;  %11332 = vmatprep.subr.bf16.mxu1 %v12128_v30  ;;  %v10696_v27 = vld [vmem:[%s15452_s7 + $0x13] ss:$8 sm:$0x3] }
0x2bb3   :  { %v10738_v30 = vld [vmem:[%s15453_s8 + $0xb] ss:$0 sm:$0xff] }
0x2bb4   :  { %v5927_v33 = vadd.f32 1e-05, %v5923_v9 }
0x2bb5   :  { %11333 = vmatpush3.bf16.msra.mxu1 %v12129_v15 }
0x2bb6   :  { %12220 = vrsqrt.f32 %v5927_v33  ;;  %v5964_v33 = vrot.slane %v10696_v27, %v13359_v26 }
0x2bbf   :  { %v12219_v16 = vpop.eup %12218 }
0x2bc0   :  { %v5930_v5 = vmul.f32 %v12219_v16, %v5924_v8  ;;  %v5960_v8 = vrot.slane %v10696_v27, %v13362_v29 }
0x2bc2   :  { %v5936_v28 = vmul.f32 %v10686_v22, %v5930_v5 }
0x2bc3   :  { %v12221_v10 = vpop.eup %12220 }
0x2bc4   :  { %v5931_v23 = vmul.f32 %v12221_v10, %v5925_v17  ;;  %v5942_v14 = vadd.f32 %v10687_v20, %v5936_v28 }
0x2bc6   :  { %v5937_v18 = vmul.f32 %v10686_v22, %v5931_v23 }
0x2bc8   :  { %v5943_v13 = vadd.f32 %v10687_v20, %v5937_v18 }
0x2bca   :  { %v5953_v36 = vpack.c.bf16 %v5943_v13, %v5942_v14 }
0x2bcc   :  { %10705 = vmatmul.mubr.msk.bf16.vlgmr.msra.gmra.mxu0 %vm694_vm2, %v5953_v36 }
0x2c8c   :  { %v6044_v9 = vpop.f32.mrf.mxu0 }
0x2c8d   :  { %v6045_v10 = vadd.f32 %v6044_v9, %v5960_v8 }
0x2c8e   :  { %v6046_v16 = vpop.f32.mrf.mxu0 }
0x2c8f   :  { %v6047_v22 = vadd.f32 %v6046_v16, %v5964_v33  ;;  %v6053_v24 = vmax.f32 %v6045_v10, 0.0 }
0x2c90   :  { %v6048_v5 = vpop.f32.mrf.mxu0 }
0x2c91   :  { %v6049_v17 = vadd.f32 %v6048_v5, %v5960_v8  ;;  %v6054_v18 = vmax.f32 %v6047_v22, 0.0 }
0x2c92   :  { %v6050_v23 = vpop.f32.mrf.mxu0 }
0x2c93   :  { %v6051_v28 = vadd.f32 %v6050_v23, %v5964_v33  ;;  %v6055_v20 = vmax.f32 %v6049_v17, 0.0 }
0x2c95   :  { %v6056_v36 = vmax.f32 %v6051_v28, 0.0  ;;  %v6090_v6 = vpack.c.bf16 %v6055_v20, %v6053_v24 }
0x2c97   :  { %v6091_v7 = vpack.c.bf16 %v6056_v36, %v6054_v18 }
0x2c99   :  { %6225 = vmatprep.mubr.bf16.mxu1 %v6091_v7 }
0x2c9a   :  { %6226 = vmatmul.mubr.bf16.vlgmr.msra.gmra.mxu1 %v6090_v6 }
0x2d5a   :  { %v11334_v31 = vpop.f32.mrf.mxu1 }
0x2d5c   :  { %v11335_v15 = vpop.f32.mrf.mxu1 }
0x2d5d   :  { %v11336_v27 = vadd.f32 %v11335_v15, %v11334_v31 }
0x2d5e   :  { %v11337_v16 = vpop.f32.mrf.mxu1 }
0x2d5f   :  { %v6228_v5 = vadd.f32 %v11336_v27, %v10738_v30 }
0x2d60   :  { %v11338_v9 = vpop.f32.mrf.mxu1 }
0x2d61   :  { %v6234_v8 = vadd.f32 %v6228_v5, %v5942_v14  ;;  %v11339_v33 = vadd.f32 %v11338_v9, %v11337_v16 }
0x2d63   :  { %v6231_v17 = vadd.f32 %v11339_v33, %v10738_v30  ;;  %v6238_v22 = vsel %vm694_vm2, %v6234_v8, 0.0  ;;  %v6246_v10 = vmul.f32 %v6234_v8, %v6234_v8 }
0x2d64   :  { %6239 = vadd.xlane.f32.xlu0 %v6238_v22 }
0x2d65   :  { %v6235_v23 = vadd.f32 %v6231_v17, %v5943_v13  ;;  %v6248_v20 = vsel %vm694_vm2, %v6246_v10, 0.0 }
0x2d67   :  { %v6241_v28 = vsel %vm694_vm2, %v6235_v23, 0.0  ;;  %v6247_v18 = vmul.f32 %v6235_v23, %v6235_v23 }
0x2d68   :  { %6242 = vadd.xlane.f32.xlu1 %v6241_v28  ;;  %6249 = vadd.xlane.f32.xlu0 %v6248_v20 }
0x2d69   :  { %v6251_v36 = vsel %vm694_vm2, %v6247_v18, 0.0  ;;  %v10755_v18 = vld [vmem:[%s15454_s9 + $0x2e] ss:$0 sm:$0xff] }
0x2d6c   :  { %6252 = vadd.xlane.f32.xlu1 %v6251_v36 }
0x2ded   :  { %v6240_v24 = vpop.xlane.xlu0 %6239 }
0x2dee   :  { %v6244_v7 = vmul.f32 0.015625, %v6240_v24  ;;  %v10756_v24 = vld [vmem:[%s15454_s9 + $0x2f] ss:$0 sm:$0xff] }
0x2df0   :  { %v6256_v31 = vmul.f32 %v6244_v7, %v6244_v7  ;;  %v6262_v28 = vsub.f32 %v6234_v8, %v6244_v7 }
0x2df1   :  { %v6243_v14 = vpop.xlane.xlu1 %6242  ;;  %v6250_v6 = vpop.xlane.xlu0 %6249 }
0x2df2   :  { %v6245_v30 = vmul.f32 0.015625, %v6243_v14  ;;  %v6254_v15 = vmul.f32 0.015625, %v6250_v6 }
0x2df4   :  { %v6258_v27 = vsub.f32 %v6254_v15, %v6256_v31  ;;  %v6257_v13 = vmul.f32 %v6245_v30, %v6245_v30  ;;  %v6263_v14 = vsub.f32 %v6235_v23, %v6245_v30 }
0x2df5   :  { %v6253_v16 = vpop.xlane.xlu1 %6252 }
0x2df6   :  { %v6260_v5 = vmax.f32 %v6258_v27, 0.0  ;;  %v6255_v9 = vmul.f32 0.015625, %v6253_v16 }
0x2df8   :  { %v6264_v33 = vadd.f32 1e-05, %v6260_v5  ;;  %v6259_v17 = vsub.f32 %v6255_v9, %v6257_v13 }
0x2dfa   :  { %12222 = vrsqrt.f32 %v6264_v33  ;;  %v6261_v22 = vmax.f32 %v6259_v17, 0.0 }
0x2dfc   :  { %v6265_v10 = vadd.f32 1e-05, %v6261_v22 }
0x2dfe   :  { %12224 = vrsqrt.f32 %v6265_v10 }
0x2e07   :  { %v12223_v20 = vpop.eup %12222 }
0x2e08   :  { %v6268_v36 = vmul.f32 %v12223_v20, %v6262_v28 }
0x2e0a   :  { %v6274_v6 = vmul.f32 %v10755_v18, %v6268_v36 }
0x2e0b   :  { %v12225_v31 = vpop.eup %12224 }
0x2e0c   :  { %v6280_v15 = vadd.f32 %v10756_v24, %v6274_v6  ;;  %v6269_v27 = vmul.f32 %v12225_v31, %v6263_v14 }
0x2e0e   :  { %v6284_v16 = vsel %vm694_vm2, %v6280_v15, 0.0  ;;  %v6275_v13 = vmul.f32 %v10755_v18, %v6269_v27  ;;  %v6292_v5 = vmul.f32 %v6280_v15, %v6280_v15 }
0x2e0f   :  { %6285 = vadd.xlane.f32.xlu0 %v6284_v16 }
0x2e10   :  { %v6281_v8 = vadd.f32 %v10756_v24, %v6275_v13  ;;  %v6294_v9 = vsel %vm694_vm2, %v6292_v5, 0.0 }
0x2e12   :  { %v6287_v7 = vsel %vm694_vm2, %v6281_v8, 0.0  ;;  %v6293_v33 = vmul.f32 %v6281_v8, %v6281_v8 }
0x2e13   :  { %6288 = vadd.xlane.f32.xlu1 %v6287_v7  ;;  %6295 = vadd.xlane.f32.xlu0 %v6294_v9 }
0x2e14   :  { %v6297_v17 = vsel %vm694_vm2, %v6293_v33, 0.0  ;;  %v10757_v33 = vld [vmem:[%s15463_s19] ss:$0 sm:$0xff] }
0x2e17   :  { %6298 = vadd.xlane.f32.xlu1 %v6297_v17 }
0x2e98   :  { %v6286_v23 = vpop.xlane.xlu0 %6285 }
0x2e99   :  { %v6290_v30 = vmul.f32 0.015625, %v6286_v23  ;;  %v10758_v23 = vld [vmem:[%s15463_s19 + $0x1] ss:$0 sm:$0xff] }
0x2e9b   :  { %v6302_v28 = vmul.f32 %v6290_v30, %v6290_v30  ;;  %v6308_v7 = vsub.f32 %v6280_v15, %v6290_v30 }
0x2e9c   :  { %v6289_v22 = vpop.xlane.xlu1 %6288  ;;  %v6296_v10 = vpop.xlane.xlu0 %6295 }
0x2e9d   :  { %v6291_v20 = vmul.f32 0.015625, %v6289_v22  ;;  %v6300_v18 = vmul.f32 0.015625, %v6296_v10 }
0x2e9f   :  { %v6304_v36 = vsub.f32 %v6300_v18, %v6302_v28  ;;  %v6303_v24 = vmul.f32 %v6291_v20, %v6291_v20  ;;  %v6309_v22 = vsub.f32 %v6281_v8, %v6291_v20 }
0x2ea0   :  { %v6299_v14 = vpop.xlane.xlu1 %6298 }
0x2ea1   :  { %v6306_v6 = vmax.f32 %v6304_v36, 0.0  ;;  %v6301_v31 = vmul.f32 0.015625, %v6299_v14 }
0x2ea3   :  { %v6310_v27 = vadd.f32 1e-05, %v6306_v6  ;;  %v6305_v16 = vsub.f32 %v6301_v31, %v6303_v24 }
0x2ea5   :  { %12226 = vrsqrt.f32 %v6310_v27  ;;  %v6307_v13 = vmax.f32 %v6305_v16, 0.0 }
0x2ea7   :  { %v6311_v5 = vadd.f32 1e-05, %v6307_v13 }
0x2ea9   :  { %12228 = vrsqrt.f32 %v6311_v5 }
0x2eb2   :  { %v12227_v9 = vpop.eup %12226 }
0x2eb3   :  { %v6314_v17 = vmul.f32 %v12227_v9, %v6308_v7 }
0x2eb5   :  { %v6320_v10 = vmul.f32 %v10757_v33, %v6314_v17 }
0x2eb6   :  { %v12229_v28 = vpop.eup %12228 }
0x2eb7   :  { %v6326_v18 = vadd.f32 %v10758_v23, %v6320_v10  ;;  %v6315_v36 = vmul.f32 %v12229_v28, %v6309_v22 }
0x2eb9   :  { %v6321_v14 = vmul.f32 %v10757_v33, %v6315_v36 }
0x2ebb   :  { %v6327_v24 = vadd.f32 %v10758_v23, %v6321_v14 }
0x2ebc   :  { %12443 = dma.done.wait [#allocation6], 3072 }
0x2ebd   :  { %12444 = vsyncadd [#allocation6], 4294964224 }
0x2ebe   :  { %12445 = dma.done.wait [#allocation6 + $0x1], 1536 }
0x2ebf   :  { %12446 = vsyncadd [#allocation6 + $0x1], 4294965760 }
0x2ec0   :  { %12447 = dma.done.wait [#allocation6 + $0x2], 6144 }
0x2ec1   :  { %12448 = vsyncadd [#allocation6 + $0x2], 4294961152 }
0x2ec2   :  { %12449 = dma.done.wait [#allocation6 + $0x3], 12288 }
0x2ec3   :  { %12450 = vsyncadd [#allocation6 + $0x3], 4294955008  ;;  %11669 = vmatprep.subr.bf16.mxu1 %v15519_v19  ;;  %11677 = vmatprep.mubr.msk.bf16.mxu1 %vm12452_vm0, %v15519_v19  ;;  %v12230_v15 = vld [vmem:[#allocation2 + $0x18] sm:$0xff]   ;;  %v12231_v8 = vld [vmem:[#allocation2 + $0x10] sm:$0xff]   ;;  %v14894_v33 = vpack.c.bf16 %v6327_v24, %v6326_v18  ;;  %s12454_s0 = smov 64   ;;  %vm9717_vm3 = vcmask 7168  }
0x2ec4   :  { %6477 = vmatprep.mubr.bf16.mxu0 %v15520_v32  ;;  %11670 = vmatpush3.bf16.msra.mxu1 %v12230_v15  ;;  %v12234_v30 = vld [vmem:[#allocation3 + $0x4c] ss:$12 sps:$4 sm:$0xff]   ;;  %v12236_v20 = vld [vmem:[#allocation3 + $0x48] ss:$12 sps:$4 sm:$0xff]   ;;  %v12239_v27 = vld [vmem:[#allocation3 + $0x30] ss:$12 sps:$4 sm:$0xff]  }
0x2ec5   :  { %11671 = vmatprep.subr.bf16.mxu1 %v15519_v19  ;;  %v12232_v6 = vld [vmem:[#allocation2 + $0x8] sm:$0xff]   ;;  %6453 = vmatprep.subr.bf16.mxu0 %v12234_v30  ;;  %v12237_v31 = vld [vmem:[#allocation3 + $0x34] ss:$12 sps:$4 sm:$0xff]   ;;  %v12242_v5 = vld [vmem:[#allocation3 + $0x18] ss:$12 sps:$4 sm:$0xff]  }
0x2ec6   :  { %6454 = vmatpush1.bf16.msra.mxu0 %v12236_v20  ;;  %v12240_v16 = vld [vmem:[#allocation3 + $0x1c] ss:$12 sps:$4 sm:$0xff]   ;;  %v12233_v13 = vld [vmem:[#allocation2] sm:$0xff]  }
0x2ec7   :  { %6455 = vmatprep.subr.bf16.mxu0 %v12237_v31  ;;  %v12243_v7 = vld [vmem:[#allocation3 + $0x4] ss:$12 sps:$4 sm:$0xff]   ;;  %v12245_v9 = vld [vmem:[#allocation3] ss:$12 sps:$4 sm:$0xff]  }
0x2ec8   :  { %11672 = vmatpush3.bf16.msra.mxu1 %v12231_v8  ;;  %v10773_v17 = vld [vmem:[%s15458_s14] ss:$0 sm:$0xff] }
0x2ec9   :  { %11673 = vmatprep.subr.bf16.mxu1 %v15519_v19 }
0x2eca   :  { %6456 = vmatpush1.bf16.msra.mxu0 %v12239_v27 }
0x2ecb   :  { %6457 = vmatprep.subr.bf16.mxu0 %v12240_v16 }
0x2ecc   :  { %11674 = vmatpush3.bf16.msra.mxu1 %v12232_v6 }
0x2ecd   :  { %11675 = vmatprep.subr.bf16.mxu1 %v15519_v19 }
0x2ece   :  { %6458 = vmatpush1.bf16.msra.mxu0 %v12242_v5 }
0x2ecf   :  { %6459 = vmatprep.subr.bf16.mxu0 %v12243_v7 }
0x2ed0   :  { %11676 = vmatpush3.bf16.msra.mxu1 %v12233_v13 }
0x2ed2   :  { %6460 = vmatpush1.bf16.msra.mxu0 %v12245_v9 }
0x2ed3   :  { %11678 = vmatmul.mubr.msk.bf16.vlgmr.msra.gmra.mxu1 %vm694_vm2, %v13248_v21  ;;  %11657 = vmatprep.subr.bf16.mxu0 %v15519_v19 }
0x2ed5   :  { %10771 = vmatmul.mubr.msk.bf16.vlgmr.msra.gmra.mxu0 %vm694_vm2, %v14894_v33 }
0x2ed6   :  { %11665 = vmatprep.mubr.msk.bf16.mxu0 %vm12452_vm0, %v15519_v19 }
0x2f93   :  { %v6600_v23 = vpop.f32.mrf.mxu1 }
0x2f94   :  { %v6601_v22 = vadd.f32 %v10773_v17, %v6600_v23 }
0x2f95   :  { %v11679_v10 = vpop.f32.mrf.mxu1 }
0x2f96   :  { %v6607_v21 = vadd.f32 %v6601_v22, %v13242_v34 }
0x2f97   :  { %v6603_v28 = vpop.f32.mrf.mxu1 }
0x2f98   :  { %v6604_v18 = vadd.f32 %v10773_v17, %v6603_v28  ;;  %v6611_v36 = vsel %vm694_vm2, %v6607_v21, 0.0  ;;  %v6619_v14 = vmul.f32 %v6607_v21, %v6607_v21 }
0x2f99   :  { %6612 = vadd.xlane.f32.xlu0 %v6611_v36  ;;  %v11680_v24 = vpop.f32.mrf.mxu1 }
0x2f9a   :  { %v6608_v15 = vadd.f32 %v6604_v18, %v13244_v35  ;;  %v6621_v8 = vsel %vm694_vm2, %v6619_v14, 0.0  ;;  %v14913_v14 = vld [vmem:[%s15459_s15] sm:$0x7] }
0x2f9b   :  { %6622 = vadd.xlane.f32.xlu1 %v6621_v8  ;;  %v6366_v8 = vrot.slane %v14913_v14, %v13362_v29 }
0x2f9c   :  { %v6614_v30 = vsel %vm694_vm2, %v6608_v15, 0.0  ;;  %v6620_v20 = vmul.f32 %v6608_v15, %v6608_v15 }
0x2f9d   :  { %6615 = vadd.xlane.f32.xlu0 %v6614_v30 }
0x2f9e   :  { %v6624_v6 = vsel %vm694_vm2, %v6620_v20, 0.0  ;;  %v6479_v20 = vpop.f32.mrf.mxu0 }
0x2f9f   :  { %6625 = vadd.xlane.f32.xlu1 %v6624_v6  ;;  %v10779_v6 = vld [vmem:[%s15462_s18] ss:$0 sm:$0xff] }
0x3022   :  { %v6613_v34 = vpop.xlane.xlu0 %6612 }
0x3023   :  { %v6617_v31 = vmul.f32 0.015625, %v6613_v34 }
0x3024   :  { %v6623_v27 = vpop.xlane.xlu1 %6622 }
0x3025   :  { %v6629_v16 = vmul.f32 %v6617_v31, %v6617_v31  ;;  %v6627_v13 = vmul.f32 0.015625, %v6623_v27  ;;  %v6635_v24 = vsub.f32 %v6607_v21, %v6617_v31  ;;  %v10780_v27 = vld [vmem:[%s15462_s18 + $0x1] ss:$0 sm:$0xff]  ;;  %v14925_v21 = vpop.f32.mrf.mxu0 }
0x3026   :  { %v6616_v5 = vpop.xlane.xlu0 %6615 }
0x3027   :  { %v6631_v7 = vsub.f32 %v6627_v13, %v6629_v16  ;;  %v6618_v9 = vmul.f32 0.015625, %v6616_v5  ;;  %v14923_v13 = vadd.f32 %v6479_v20, %v6366_v8  ;;  %v12246_v20 = vld [vmem:[#allocation3 + $0x50] ss:$12 sps:$4 sm:$0xff]  }
0x3028   :  { %v6626_v17 = vpop.xlane.xlu1 %6625  ;;  %11658 = vmatpush3.bf16.msra.mxu0 %v12246_v20 }
0x3029   :  { %v6633_v35 = vmax.f32 %v6631_v7, 0.0  ;;  %v6630_v23 = vmul.f32 %v6618_v9, %v6618_v9  ;;  %v6628_v22 = vmul.f32 0.015625, %v6626_v17  ;;  %v6636_v16 = vsub.f32 %v6608_v15, %v6618_v9  ;;  %11659 = vmatprep.subr.bf16.mxu0 %v15519_v19 }
0x302b   :  { %v6637_v10 = vadd.f32 1e-05, %v6633_v35  ;;  %v6632_v28 = vsub.f32 %v6628_v22, %v6630_v23  ;;  %v6483_v22 = vpop.f32.mrf.mxu0 }
0x302d   :  { %12366 = vrsqrt.f32 %v6637_v10  ;;  %v6634_v18 = vmax.f32 %v6632_v28, 0.0  ;;  %v14930_v10 = vadd.f32 %v6483_v22, %v6366_v8  ;;  %v12253_v22 = vld [vmem:[#allocation5 + $0x30] sm:$0xff]  }
0x302f   :  { %v6638_v36 = vadd.f32 1e-05, %v6634_v18 }
0x3031   :  { %12368 = vrsqrt.f32 %v6638_v36 }
0x303a   :  { %v12367_v30 = vpop.eup %12366 }
0x303b   :  { %v6641_v34 = vmul.f32 %v12367_v30, %v6635_v24 }
0x303d   :  { %v6647_v5 = vmul.f32 %v10779_v6, %v6641_v34  ;;  %v12248_v34 = vld [vmem:[#allocation3 + $0x20] ss:$12 sps:$4 sm:$0xff]  }
0x303e   :  { %v12369_v7 = vpop.eup %12368 }
0x303f   :  { %v6653_v31 = vadd.f32 %v10780_v27, %v6647_v5  ;;  %v6642_v17 = vmul.f32 %v12369_v7, %v6636_v16  ;;  %v10790_v16 = vcombine.high %v12714_v43, %v12719_v44  ;;  %v10789_v5 = vcombine.low %v12714_v43, %v12719_v44 }
0x3040   :  { %v10788_v7 = vcombine.high %v12704_v41, %v12709_v42  ;;  %v10785_v43 = vcombine.low %v12694_v39, %v12699_v40  ;;  %v10784_v44 = vcombine.high %v12684_v37, %v12689_v38 }
0x3041   :  { %v14928_v35 = vadd.f32 %v6653_v31, %v14923_v13  ;;  %v6648_v23 = vmul.f32 %v10779_v6, %v6642_v17  ;;  %v12247_v6 = vld [vmem:[#allocation3 + $0x38] ss:$12 sps:$4 sm:$0xff]   ;;  %v10787_v31 = vcombine.low %v12704_v41, %v12709_v42  ;;  %v10786_v17 = vcombine.high %v12694_v39, %v12699_v40  ;;  %v12254_v39 = vld [vmem:[#allocation5 + $0x68] sm:$0xff]  }
0x3042   :  { %11660 = vmatpush3.bf16.msra.mxu0 %v12247_v6  ;;  %v12250_v41 = vld [vmem:[#allocation5 + $0x78] sm:$0xff]   ;;  %v12255_v40 = vld [vmem:[#allocation5 + $0x28] sm:$0xff]  }
0x3043   :  { %v6654_v28 = vadd.f32 %v10780_v27, %v6648_v23  ;;  %v6659_v18 = vsel %vm694_vm2, %v14928_v35, 0.0  ;;  %v6667_v15 = vmul.f32 %v14928_v35, %v14928_v35  ;;  %11661 = vmatprep.subr.bf16.mxu0 %v15519_v19  ;;  %v12249_v27 = vld [vmem:[#allocation3 + $0x8] ss:$12 sps:$4 sm:$0xff]   ;;  %11350 = vmatprep.subr.bf16.mxu1 %v12250_v41  ;;  %v12251_v42 = vld [vmem:[#allocation5 + $0x38] sm:$0xff]  }
0x3044   :  { %6660 = vadd.xlane.f32.xlu0 %v6659_v18  ;;  %v12252_v23 = vld [vmem:[#allocation5 + $0x70] sm:$0xff]   ;;  %11351 = vmatpush3.bf16.msra.mxu1 %v12251_v42  ;;  %v12257_v18 = vld [vmem:[#allocation5 + $0x20] sm:$0xff]  }
0x3045   :  { %v14937_v9 = vadd.f32 %v6654_v28, %v14930_v10  ;;  %v6669_v24 = vsel %vm694_vm2, %v6667_v15, 0.0  ;;  %11352 = vmatprep.subr.bf16.mxu1 %v12252_v23  ;;  %v12256_v28 = vld [vmem:[#allocation5 + $0x60] sm:$0xff]  }
0x3046   :  { %11662 = vmatpush3.bf16.msra.mxu0 %v12248_v34  ;;  %v10781_v23 = vld [vmem:[%s15462_s18 + $0x2] ss:$0 sm:$0xff] }
0x3047   :  { %v6662_v36 = vsel %vm694_vm2, %v14937_v9, 0.0  ;;  %v6668_v8 = vmul.f32 %v14937_v9, %v14937_v9  ;;  %11663 = vmatprep.subr.bf16.mxu0 %v15519_v19 }
0x3048   :  { %6663 = vadd.xlane.f32.xlu1 %v6662_v36  ;;  %6670 = vadd.xlane.f32.xlu0 %v6669_v24 }
0x3049   :  { %v6672_v30 = vsel %vm694_vm2, %v6668_v8, 0.0  ;;  %11353 = vmatpush3.bf16.msra.mxu1 %v12253_v22 }
0x304a   :  { %11664 = vmatpush3.bf16.msra.mxu0 %v12249_v27  ;;  %11354 = vmatprep.subr.bf16.mxu1 %v12254_v39 }
0x304b   :  { %6775 = vmatprep.subr.bf16.mxu0 %v10790_v16 }
0x304c   :  { %6673 = vadd.xlane.f32.xlu1 %v6672_v30 }
0x304d   :  { %11666 = vmatmul.mubr.msk.bf16.vlgmr.msra.gmra.mxu0 %vm694_vm2, %v14894_v33  ;;  %v10783_v33 = vcombine.low %v12684_v37, %v12689_v38  ;;  %11355 = vmatpush3.bf16.msra.mxu1 %v12255_v40  ;;  %v12258_v37 = vld [vmem:[#allocation5 + $0x58] sm:$0xff]  }
0x304e   :  { %6799 = vmatprep.mubr.bf16.mxu0 %v15520_v32  ;;  %6776 = vmatpush1.bf16.msra.mxu0 %v10789_v5  ;;  %v12259_v38 = vld [vmem:[#allocation5 + $0x18] sm:$0xff]  }
0x304f   :  { %6777 = vmatprep.subr.bf16.mxu0 %v10788_v7  ;;  %11356 = vmatprep.subr.bf16.mxu1 %v12256_v28 }
0x3051   :  { %11357 = vmatpush3.bf16.msra.mxu1 %v12257_v18  ;;  %v10782_v18 = vld [vmem:[%s15462_s18 + $0x3] ss:$0 sm:$0xff] }
0x3052   :  { %6778 = vmatpush1.bf16.msra.mxu0 %v10787_v31  ;;  %11358 = vmatprep.subr.bf16.mxu1 %v12258_v37 }
0x3053   :  { %6779 = vmatprep.subr.bf16.mxu0 %v10786_v17 }
0x3055   :  { %11359 = vmatpush3.bf16.msra.mxu1 %v12259_v38 }
0x3056   :  { %6780 = vmatpush1.bf16.msra.mxu0 %v10785_v43 }
0x3057   :  { %6781 = vmatprep.subr.bf16.mxu0 %v10784_v44 }
0x305a   :  { %6782 = vmatpush1.bf16.msra.mxu0 %v10783_v33 }
0x305b   :  { %11681 = vmatprep.subr.bf16.mxu0 %v15519_v19 }
0x30cd   :  { %v6661_v15 = vpop.xlane.xlu0 %6660 }
0x30ce   :  { %v6665_v36 = vmul.f32 0.015625, %v6661_v15 }
0x30d0   :  { %v6677_v30 = vmul.f32 %v6665_v36, %v6665_v36  ;;  %v6683_v33 = vsub.f32 %v14928_v35, %v6665_v36  ;;  %v14979_v35 = vpop.f32.mrf.mxu0 }
0x30d1   :  { %v6664_v24 = vpop.xlane.xlu1 %6663  ;;  %v6671_v8 = vpop.xlane.xlu0 %6670 }
0x30d2   :  { %v6666_v20 = vmul.f32 0.015625, %v6664_v24  ;;  %v6675_v6 = vmul.f32 0.015625, %v6671_v8 }
0x30d4   :  { %v6679_v34 = vsub.f32 %v6675_v6, %v6677_v30  ;;  %v6678_v16 = vmul.f32 %v6666_v20, %v6666_v20  ;;  %v6684_v22 = vsub.f32 %v14937_v9, %v6666_v20  ;;  %v12260_v20 = vld [vmem:[#allocation5 + $0x50] sm:$0xff]  }
0x30d5   :  { %v6674_v27 = vpop.xlane.xlu1 %6673  ;;  %v12261_v6 = vld [vmem:[#allocation5 + $0x10] sm:$0xff]   ;;  %11360 = vmatprep.subr.bf16.mxu1 %v12260_v20  ;;  %v10792_v20 = vld [vmem:[%s15461_s17] ss:$0 sm:$0xff] }
0x30d6   :  { %v6681_v5 = vmax.f32 %v6679_v34, 0.0  ;;  %v6676_v7 = vmul.f32 0.015625, %v6674_v27  ;;  %11361 = vmatpush3.bf16.msra.mxu1 %v12261_v6  ;;  %v12262_v34 = vld [vmem:[#allocation5 + $0x48] sm:$0xff]  }
0x30d7   :  { %v12263_v27 = vld [vmem:[#allocation5 + $0x8] sm:$0xff]   ;;  %11362 = vmatprep.subr.bf16.mxu1 %v12262_v34 }
0x30d8   :  { %v6685_v31 = vadd.f32 1e-05, %v6681_v5  ;;  %v6680_v17 = vsub.f32 %v6676_v7, %v6678_v16  ;;  %v12264_v16 = vld [vmem:[#allocation5 + $0x40] sm:$0xff]  }
0x30d9   :  { %v12265_v5 = vld [vmem:[#allocation5] sm:$0xff]  }
0x30da   :  { %12370 = vrsqrt.f32 %v6685_v31  ;;  %v6682_v43 = vmax.f32 %v6680_v17, 0.0  ;;  %11363 = vmatpush3.bf16.msra.mxu1 %v12263_v27  ;;  %v6712_v7 = vld [vmem:[%s15460_s16] ss:$8 sm:$0x3] }
0x30db   :  { %11364 = vmatprep.subr.bf16.mxu1 %v12264_v16  ;;  %v6721_v17 = vrot.slane %v6712_v7, %v13359_v26 }
0x30dc   :  { %v6686_v44 = vadd.f32 1e-05, %v6682_v43  ;;  %v6717_v43 = vrot.slane %v6712_v7, %v13362_v29 }
0x30de   :  { %12372 = vrsqrt.f32 %v6686_v44  ;;  %11365 = vmatpush3.bf16.msra.mxu1 %v12265_v5 }
0x30e7   :  { %v12371_v41 = vpop.eup %12370 }
0x30e8   :  { %v6689_v42 = vmul.f32 %v12371_v41, %v6683_v33 }
0x30ea   :  { %v6695_v28 = vmul.f32 %v10781_v23, %v6689_v42 }
0x30eb   :  { %v12373_v39 = vpop.eup %12372 }
0x30ec   :  { %v6690_v40 = vmul.f32 %v12373_v39, %v6684_v22  ;;  %v6701_v38 = vadd.f32 %v10782_v18, %v6695_v28 }
0x30ee   :  { %v6696_v37 = vmul.f32 %v10781_v23, %v6690_v40 }
0x30f0   :  { %v6702_v15 = vadd.f32 %v10782_v18, %v6696_v37 }
0x30f2   :  { %v6711_v24 = vpack.c.bf16 %v6702_v15, %v6701_v38 }
0x30f4   :  { %10791 = vmatmul.mubr.msk.bf16.vlgmr.msra.gmra.mxu0 %vm694_vm2, %v6711_v24 }
0x30f5   :  { %11689 = vmatprep.mubr.msk.bf16.mxu0 %vm12452_vm0, %v15519_v19 }
0x310d   :  { %v14981_v36 = vpop.f32.mrf.mxu0 }
0x310f   :  { %v11667_v9 = vpop.f32.mrf.mxu0 }
0x3111   :  { %v14983_v8 = vpop.f32.mrf.mxu0 }
0x3113   :  { %v11668_v30 = vpop.f32.mrf.mxu0 }
0x31b4   :  { %v6801_v31 = vpop.f32.mrf.mxu0 }
0x31b5   :  { %v6802_v23 = vadd.f32 %v6801_v31, %v6717_v43 }
0x31b6   :  { %v6803_v44 = vpop.f32.mrf.mxu0 }
0x31b7   :  { %v6804_v41 = vadd.f32 %v6803_v44, %v6721_v17  ;;  %v6810_v37 = vmax.f32 %v6802_v23, 0.0 }
0x31b8   :  { %v6805_v33 = vpop.f32.mrf.mxu0 }
0x31b9   :  { %v6806_v42 = vadd.f32 %v6805_v33, %v6717_v43  ;;  %v6811_v28 = vmax.f32 %v6804_v41, 0.0 }
0x31ba   :  { %v6807_v22 = vpop.f32.mrf.mxu0 }
0x31bb   :  { %v6808_v39 = vadd.f32 %v6807_v22, %v6721_v17  ;;  %v6812_v40 = vmax.f32 %v6806_v42, 0.0 }
0x31bd   :  { %v6813_v18 = vmax.f32 %v6808_v39, 0.0  ;;  %v6846_v9 = vpack.c.bf16 %v6812_v40, %v6810_v37  ;;  %v12266_v39 = vld [vmem:[#allocation2 + $0x38] sm:$0xff]   ;;  %v12268_v40 = vld [vmem:[#allocation2 + $0x28] sm:$0xff]  }
0x31be   :  { %11682 = vmatpush3.bf16.msra.mxu0 %v12266_v39 }
0x31bf   :  { %v6847_v24 = vpack.c.bf16 %v6813_v18, %v6811_v28  ;;  %11683 = vmatprep.subr.bf16.mxu0 %v15519_v19 }
0x31c1   :  { %6981 = vmatprep.mubr.bf16.mxu1 %v6847_v24 }
0x31c2   :  { %6982 = vmatmul.mubr.bf16.vlgmr.msra.gmra.mxu1 %v6846_v9 }
0x3282   :  { %v11366_v30 = vpop.f32.mrf.mxu1 }
0x3284   :  { %v11367_v6 = vpop.f32.mrf.mxu1 }
0x3285   :  { %v11368_v34 = vadd.f32 %v11367_v6, %v11366_v30 }
0x3286   :  { %v11369_v27 = vpop.f32.mrf.mxu1 }
0x3287   :  { %v6984_v16 = vadd.f32 %v11368_v34, %v10792_v20 }
0x3288   :  { %v11370_v5 = vpop.f32.mrf.mxu1 }
0x3289   :  { %v6990_v7 = vadd.f32 %v6984_v16, %v6701_v38  ;;  %v11371_v31 = vadd.f32 %v11370_v5, %v11369_v27  ;;  %v12267_v38 = vld [vmem:[#allocation2 + $0x30] sm:$0xff]  }
0x328a   :  { %11684 = vmatpush3.bf16.msra.mxu0 %v12267_v38 }
0x328b   :  { %v6987_v17 = vadd.f32 %v11371_v31, %v10792_v20  ;;  %v6994_v43 = vsel %vm694_vm2, %v6990_v7, 0.0  ;;  %v7002_v44 = vmul.f32 %v6990_v7, %v6990_v7  ;;  %11685 = vmatprep.subr.bf16.mxu0 %v15519_v19 }
0x328c   :  { %6995 = vadd.xlane.f32.xlu0 %v6994_v43 }
0x328d   :  { %v6991_v33 = vadd.f32 %v6987_v17, %v6702_v15  ;;  %v7004_v42 = vsel %vm694_vm2, %v7002_v44, 0.0  ;;  %v12269_v15 = vld [vmem:[#allocation2 + $0x20] sm:$0xff]  }
0x328e   :  { %11686 = vmatpush3.bf16.msra.mxu0 %v12268_v40 }
0x328f   :  { %v6997_v41 = vsel %vm694_vm2, %v6991_v33, 0.0  ;;  %v7003_v23 = vmul.f32 %v6991_v33, %v6991_v33  ;;  %11687 = vmatprep.subr.bf16.mxu0 %v15519_v19 }
0x3290   :  { %6998 = vadd.xlane.f32.xlu1 %v6997_v41  ;;  %7005 = vadd.xlane.f32.xlu0 %v7004_v42 }
0x3291   :  { %v7007_v22 = vsel %vm694_vm2, %v7003_v23, 0.0 }
0x3292   :  { %11688 = vmatpush3.bf16.msra.mxu0 %v12269_v15 }
0x3294   :  { %7008 = vadd.xlane.f32.xlu1 %v7007_v22  ;;  %v10809_v22 = vld [vmem:[%s15462_s18 + $0x4] ss:$0 sm:$0xff] }
0x3315   :  { %v6996_v28 = vpop.xlane.xlu0 %6995 }
0x3316   :  { %v7000_v18 = vmul.f32 0.015625, %v6996_v28  ;;  %v10810_v28 = vld [vmem:[%s15462_s18 + $0x5] ss:$0 sm:$0xff] }
0x3318   :  { %v7012_v9 = vmul.f32 %v7000_v18, %v7000_v18  ;;  %v7018_v41 = vsub.f32 %v6990_v7, %v7000_v18  ;;  %v10811_v7 = vld [vmem:[%s15458_s14 + $0x1] ss:$0 sm:$0xff] }
0x3319   :  { %v6999_v37 = vpop.xlane.xlu1 %6998  ;;  %v7006_v24 = vpop.xlane.xlu0 %7005 }
0x331a   :  { %v7001_v30 = vmul.f32 0.015625, %v6999_v37  ;;  %v7010_v20 = vmul.f32 0.015625, %v7006_v24 }
0x331c   :  { %v7014_v6 = vsub.f32 %v7010_v20, %v7012_v9  ;;  %v7013_v27 = vmul.f32 %v7001_v30, %v7001_v30  ;;  %v7019_v39 = vsub.f32 %v6991_v33, %v7001_v30 }
0x331d   :  { %v7009_v34 = vpop.xlane.xlu1 %7008 }
0x331e   :  { %v7016_v16 = vmax.f32 %v7014_v6, 0.0  ;;  %v7011_v5 = vmul.f32 0.015625, %v7009_v34 }
0x3320   :  { %v7020_v31 = vadd.f32 1e-05, %v7016_v16  ;;  %v7015_v17 = vsub.f32 %v7011_v5, %v7013_v27 }
0x3322   :  { %12374 = vrsqrt.f32 %v7020_v31  ;;  %v7017_v43 = vmax.f32 %v7015_v17, 0.0 }
0x3324   :  { %v7021_v44 = vadd.f32 1e-05, %v7017_v43 }
0x3326   :  { %12376 = vrsqrt.f32 %v7021_v44 }
0x332f   :  { %v12375_v42 = vpop.eup %12374 }
0x3330   :  { %v7024_v23 = vmul.f32 %v12375_v42, %v7018_v41 }
0x3332   :  { %v7030_v15 = vmul.f32 %v10809_v22, %v7024_v23 }
0x3333   :  { %v12377_v38 = vpop.eup %12376 }
0x3334   :  { %v7025_v40 = vmul.f32 %v12377_v38, %v7019_v39  ;;  %v7036_v24 = vadd.f32 %v10810_v28, %v7030_v15 }
0x3336   :  { %v7031_v37 = vmul.f32 %v10809_v22, %v7025_v40 }
0x3338   :  { %v7037_v9 = vadd.f32 %v10810_v28, %v7031_v37 }
0x333a   :  { %v7047_v20 = vpack.c.bf16 %v7037_v9, %v7036_v24 }
0x333c   :  { %11690 = vmatmul.mubr.msk.bf16.vlgmr.msra.gmra.mxu0 %vm694_vm2, %v7047_v20 }
0x333d   :  { %7323 = vmatprep.mubr.bf16.mxu0 %v15520_v32 }
0x33fc   :  { %v7114_v33 = vpop.f32.mrf.mxu0 }
0x33fd   :  { %v7115_v18 = vadd.f32 %v10811_v7, %v7114_v33 }
0x33fe   :  { %v11691_v30 = vpop.f32.mrf.mxu0 }
0x33ff   :  { %v7121_v6 = vadd.f32 %v7115_v18, %v7036_v24 }
0x3400   :  { %v7117_v34 = vpop.f32.mrf.mxu0 }
0x3401   :  { %v7118_v27 = vadd.f32 %v10811_v7, %v7117_v34  ;;  %v7125_v16 = vsel %vm694_vm2, %v7121_v6, 0.0  ;;  %v7133_v5 = vmul.f32 %v7121_v6, %v7121_v6 }
0x3402   :  { %7126 = vadd.xlane.f32.xlu0 %v7125_v16  ;;  %v11692_v31 = vpop.f32.mrf.mxu0 }
0x3403   :  { %v7122_v17 = vadd.f32 %v7118_v27, %v7037_v9  ;;  %v7135_v43 = vsel %vm694_vm2, %v7133_v5, 0.0  ;;  %v10817_v27 = vld [vmem:[%s15462_s18 + $0x6] ss:$0 sm:$0xff]  ;;  %v10818_v5 = vld [vmem:[%s15462_s18 + $0x7] ss:$0 sm:$0xff] }
0x3405   :  { %v7128_v44 = vsel %vm694_vm2, %v7122_v17, 0.0  ;;  %v7134_v41 = vmul.f32 %v7122_v17, %v7122_v17 }
0x3406   :  { %7136 = vadd.xlane.f32.xlu0 %v7135_v43  ;;  %7129 = vadd.xlane.f32.xlu1 %v7128_v44 }
0x3407   :  { %v7138_v42 = vsel %vm694_vm2, %v7134_v41, 0.0 }
0x340a   :  { %7139 = vadd.xlane.f32.xlu1 %v7138_v42 }
0x341b   :  { %7173 = vrot.lane.b32.xlu1 %v14930_v10, %s12454_s0 }
0x341c   :  { %7171 = vrot.lane.b32.xlu0 %v14923_v13, %s12454_s0 }
0x348b   :  { %v7127_v23 = vpop.xlane.xlu0 %7126 }
0x348c   :  { %v7131_v22 = vmul.f32 0.015625, %v7127_v23 }
0x348e   :  { %v7143_v40 = vmul.f32 %v7131_v22, %v7131_v22  ;;  %v7149_v34 = vsub.f32 %v7121_v6, %v7131_v22 }
0x348f   :  { %v7137_v39 = vpop.xlane.xlu0 %7136  ;;  %v7130_v38 = vpop.xlane.xlu1 %7129 }
0x3490   :  { %v7141_v15 = vmul.f32 0.015625, %v7137_v39  ;;  %v7132_v28 = vmul.f32 0.015625, %v7130_v38 }
0x3492   :  { %v7145_v37 = vsub.f32 %v7141_v15, %v7143_v40  ;;  %v7144_v20 = vmul.f32 %v7132_v28, %v7132_v28  ;;  %v7150_v31 = vsub.f32 %v7122_v17, %v7132_v28 }
0x3493   :  { %v7140_v24 = vpop.xlane.xlu1 %7139  ;;  %v7172_v23 = vpop.permute.xlu0 %7171 }
0x3494   :  { %v7147_v9 = vmax.f32 %v7145_v37, 0.0  ;;  %v7142_v7 = vmul.f32 0.015625, %v7140_v24 }
0x3496   :  { %v7151_v33 = vadd.f32 1e-05, %v7147_v9  ;;  %v7146_v18 = vsub.f32 %v7142_v7, %v7144_v20  ;;  %v10829_v20 = vcombine.high %v12754_v51, %v12759_v52  ;;  %v10828_v7 = vcombine.low %v12754_v51, %v12759_v52 }
0x3497   :  { %v7174_v40 = vpop.permute.xlu1 %7173  ;;  %v10823_v51 = vcombine.high %v12724_v45, %v12729_v46  ;;  %v10822_v52 = vcombine.low %v12724_v45, %v12729_v46  ;;  %v12278_v45 = vld [vmem:[#allocation5 + $0xd8] sm:$0xff]  }
0x3498   :  { %12378 = vrsqrt.f32 %v7151_v33  ;;  %v7148_v30 = vmax.f32 %v7146_v18, 0.0  ;;  %v10827_v33 = vcombine.high %v12744_v49, %v12749_v50  ;;  %7299 = vmatprep.subr.bf16.mxu0 %v10829_v20  ;;  %v10826_v18 = vcombine.low %v12744_v49, %v12749_v50  ;;  %v12270_v49 = vld [vmem:[#allocation5 + $0xf8] sm:$0xff]  }
0x3499   :  { %7300 = vmatpush1.bf16.msra.mxu0 %v10828_v7  ;;  %v12271_v50 = vld [vmem:[#allocation5 + $0xb8] sm:$0xff]   ;;  %11377 = vmatprep.subr.bf16.mxu1 %v12270_v49  ;;  %v10820_v49 = vld [vmem:[%s15462_s18 + $0x9] ss:$0 sm:$0xff] }
0x349a   :  { %v7152_v10 = vadd.f32 1e-05, %v7148_v30  ;;  %7301 = vmatprep.subr.bf16.mxu0 %v10827_v33  ;;  %v10825_v30 = vcombine.high %v12734_v47, %v12739_v48  ;;  %11378 = vmatpush3.bf16.msra.mxu1 %v12271_v50  ;;  %v12279_v46 = vld [vmem:[#allocation5 + $0x98] sm:$0xff]   ;;  %v10819_v33 = vld [vmem:[%s15462_s18 + $0x8] ss:$0 sm:$0xff] }
0x349c   :  { %12380 = vrsqrt.f32 %v7152_v10  ;;  %v10824_v10 = vcombine.low %v12734_v47, %v12739_v48  ;;  %v12274_v47 = vld [vmem:[#allocation5 + $0xe8] sm:$0xff]  }
0x349d   :  { %7302 = vmatpush1.bf16.msra.mxu0 %v10826_v18  ;;  %v12275_v48 = vld [vmem:[#allocation5 + $0xa8] sm:$0xff]  }
0x349e   :  { %7303 = vmatprep.subr.bf16.mxu0 %v10825_v30 }
0x34a1   :  { %7304 = vmatpush1.bf16.msra.mxu0 %v10824_v10 }
0x34a2   :  { %7305 = vmatprep.subr.bf16.mxu0 %v10823_v51 }
0x34a5   :  { %v12379_v13 = vpop.eup %12378  ;;  %7306 = vmatpush1.bf16.msra.mxu0 %v10822_v52 }
0x34a6   :  { %v7155_v16 = vmul.f32 %v12379_v13, %v7149_v34  ;;  %11693 = vmatprep.subr.bf16.mxu0 %v15519_v19  ;;  %v12272_v34 = vld [vmem:[#allocation5 + $0xf0] sm:$0xff]  }
0x34a7   :  { %v12273_v13 = vld [vmem:[#allocation5 + $0xb0] sm:$0xff]   ;;  %11379 = vmatprep.subr.bf16.mxu1 %v12272_v34 }
0x34a8   :  { %v7161_v43 = vmul.f32 %v10817_v27, %v7155_v16  ;;  %11380 = vmatpush3.bf16.msra.mxu1 %v12273_v13  ;;  %v12277_v16 = vld [vmem:[#allocation5 + $0xa0] sm:$0xff]  }
0x34a9   :  { %v12381_v44 = vpop.eup %12380  ;;  %11381 = vmatprep.subr.bf16.mxu1 %v12274_v47 }
0x34aa   :  { %v7167_v41 = vadd.f32 %v10818_v5, %v7161_v43  ;;  %v7156_v42 = vmul.f32 %v12381_v44, %v7150_v31 }
0x34ac   :  { %v15025_v39 = vadd.f32 %v7172_v23, %v7167_v41  ;;  %v7162_v38 = vmul.f32 %v10817_v27, %v7156_v42  ;;  %v12276_v27 = vld [vmem:[#allocation5 + $0xe0] sm:$0xff]   ;;  %11382 = vmatpush3.bf16.msra.mxu1 %v12275_v48  ;;  %v12281_v48 = vld [vmem:[#allocation5 + $0x90] sm:$0xff]  }
0x34ad   :  { %11383 = vmatprep.subr.bf16.mxu1 %v12276_v27  ;;  %v12283_v27 = vld [vmem:[#allocation5 + $0x88] sm:$0xff]  }
0x34ae   :  { %v7168_v6 = vadd.f32 %v10818_v5, %v7162_v38  ;;  %v7181_v22 = vsel %vm694_vm2, %v15025_v39, 0.0  ;;  %v7189_v28 = vmul.f32 %v15025_v39, %v15025_v39 }
0x34af   :  { %7182 = vadd.xlane.f32.xlu1 %v7181_v22 }
0x34b0   :  { %v15029_v15 = vadd.f32 %v7174_v40, %v7168_v6  ;;  %v7191_v9 = vsel %vm694_vm2, %v7189_v28, 0.0  ;;  %11384 = vmatpush3.bf16.msra.mxu1 %v12277_v16  ;;  %v12284_v16 = vld [vmem:[#allocation5 + $0xc0] sm:$0xff]  }
0x34b1   :  { %11385 = vmatprep.subr.bf16.mxu1 %v12278_v45  ;;  %v12285_v45 = vld [vmem:[#allocation5 + $0x80] sm:$0xff]  }
0x34b2   :  { %v7184_v37 = vsel %vm694_vm2, %v15029_v15, 0.0  ;;  %v7190_v17 = vmul.f32 %v15029_v15, %v15029_v15 }
0x34b3   :  { %7185 = vadd.xlane.f32.xlu0 %v7184_v37 }
0x34b4   :  { %v7194_v24 = vsel %vm694_vm2, %v7190_v17, 0.0  ;;  %11386 = vmatpush3.bf16.msra.mxu1 %v12279_v46  ;;  %v10821_v46 = vld [vmem:[%s15460_s16 + $0x1] ss:$8 sm:$0x3] }
0x34b5   :  { %7195 = vadd.xlane.f32.xlu1 %v7194_v24 }
0x34b7   :  { %7192 = vadd.xlane.f32.xlu0 %v7191_v9 }
0x3538   :  { %v7183_v5 = vpop.xlane.xlu1 %7182 }
0x3539   :  { %v7187_v43 = vmul.f32 0.015625, %v7183_v5 }
0x353b   :  { %v7199_v6 = vmul.f32 %v7187_v43, %v7187_v43  ;;  %v7205_v18 = vsub.f32 %v15025_v39, %v7187_v43  ;;  %v12282_v39 = vld [vmem:[#allocation5 + $0xc8] sm:$0xff]   ;;  %v7241_v43 = vrot.slane %v10821_v46, %v13362_v29 }
0x353c   :  { %v7186_v31 = vpop.xlane.xlu0 %7185 }
0x353d   :  { %v7188_v44 = vmul.f32 0.015625, %v7186_v31  ;;  %v7245_v31 = vrot.slane %v10821_v46, %v13359_v26  ;;  %v12286_v46 = vld [vmem:[#allocation2 + $0x58] sm:$0xff]  }
0x353e   :  { %v7196_v41 = vpop.xlane.xlu1 %7195 }
0x353f   :  { %v7200_v42 = vmul.f32 %v7188_v44, %v7188_v44  ;;  %v7198_v23 = vmul.f32 0.015625, %v7196_v41  ;;  %v7206_v20 = vsub.f32 %v15029_v15, %v7188_v44  ;;  %v12280_v15 = vld [vmem:[#allocation5 + $0xd0] sm:$0xff]  }
0x3540   :  { %v7193_v38 = vpop.xlane.xlu0 %7192  ;;  %11387 = vmatprep.subr.bf16.mxu1 %v12280_v15 }
0x3541   :  { %v7202_v22 = vsub.f32 %v7198_v23, %v7200_v42  ;;  %v7197_v40 = vmul.f32 0.015625, %v7193_v38  ;;  %11388 = vmatpush3.bf16.msra.mxu1 %v12281_v48 }
0x3542   :  { %11389 = vmatprep.subr.bf16.mxu1 %v12282_v39 }
0x3543   :  { %v7204_v37 = vmax.f32 %v7202_v22, 0.0  ;;  %v7201_v17 = vsub.f32 %v7197_v40, %v7199_v6 }
0x3545   :  { %v7208_v28 = vadd.f32 1e-05, %v7204_v37  ;;  %v7203_v24 = vmax.f32 %v7201_v17, 0.0  ;;  %11390 = vmatpush3.bf16.msra.mxu1 %v12283_v27 }
0x3546   :  { %11391 = vmatprep.subr.bf16.mxu1 %v12284_v16 }
0x3547   :  { %12382 = vrsqrt.f32 %v7208_v28  ;;  %v7207_v9 = vadd.f32 1e-05, %v7203_v24 }
0x3549   :  { %12384 = vrsqrt.f32 %v7207_v9  ;;  %11392 = vmatpush3.bf16.msra.mxu1 %v12285_v45 }
0x3554   :  { %v12383_v7 = vpop.eup %12382 }
0x3555   :  { %v7212_v30 = vmul.f32 %v12383_v7, %v7206_v20  ;;  %v10831_v7 = vld [vmem:[%s15461_s17 + $0x1] ss:$0 sm:$0xff] }
0x3556   :  { %v12385_v10 = vpop.eup %12384 }
0x3557   :  { %v7211_v51 = vmul.f32 %v12385_v10, %v7205_v18  ;;  %v7218_v52 = vmul.f32 %v10819_v33, %v7212_v30 }
0x3559   :  { %v7217_v50 = vmul.f32 %v10819_v33, %v7211_v51  ;;  %v7224_v13 = vadd.f32 %v10820_v49, %v7218_v52 }
0x355b   :  { %v7223_v34 = vadd.f32 %v10820_v49, %v7217_v50 }
0x355d   :  { %v7234_v47 = vpack.c.bf16 %v7224_v13, %v7223_v34 }
0x355f   :  { %10830 = vmatmul.mubr.msk.bf16.vlgmr.msra.gmra.mxu0 %vm694_vm2, %v7234_v47 }
0x3560   :  { %11701 = vmatprep.mubr.msk.bf16.mxu0 %vm12452_vm0, %v15519_v19  ;;  %11694 = vmatpush3.bf16.msra.mxu0 %v12286_v46 }
0x3561   :  { %11695 = vmatprep.subr.bf16.mxu0 %v15519_v19 }
0x361f   :  { %v7325_v5 = vpop.f32.mrf.mxu0 }
0x3620   :  { %v7326_v38 = vadd.f32 %v7325_v5, %v7241_v43  ;;  %v12288_v5 = vld [vmem:[#allocation2 + $0x48] sm:$0xff]  }
0x3621   :  { %v7327_v44 = vpop.f32.mrf.mxu0 }
0x3622   :  { %v7328_v42 = vadd.f32 %v7327_v44, %v7245_v31  ;;  %v7334_v28 = vmax.f32 %v7326_v38, 0.0 }
0x3623   :  { %v7329_v41 = vpop.f32.mrf.mxu0 }
0x3624   :  { %v7330_v23 = vadd.f32 %v7329_v41, %v7241_v43  ;;  %v7335_v37 = vmax.f32 %v7328_v42, 0.0 }
0x3625   :  { %v7331_v6 = vpop.f32.mrf.mxu0 }
0x3626   :  { %v7332_v22 = vadd.f32 %v7331_v6, %v7245_v31  ;;  %v7336_v40 = vmax.f32 %v7330_v23, 0.0 }
0x3628   :  { %v7337_v17 = vmax.f32 %v7332_v22, 0.0  ;;  %v7371_v9 = vpack.c.bf16 %v7336_v40, %v7334_v28 }
0x362a   :  { %v7372_v24 = vpack.c.bf16 %v7337_v17, %v7335_v37 }
0x362c   :  { %7506 = vmatprep.mubr.bf16.mxu1 %v7372_v24 }
0x362d   :  { %7507 = vmatmul.mubr.bf16.vlgmr.msra.gmra.mxu1 %v7371_v9 }
0x36ed   :  { %v11393_v20 = vpop.f32.mrf.mxu1 }
0x36ef   :  { %v11394_v33 = vpop.f32.mrf.mxu1 }
0x36f0   :  { %v11395_v18 = vadd.f32 %v11394_v33, %v11393_v20 }
0x36f1   :  { %v11396_v30 = vpop.f32.mrf.mxu1 }
0x36f2   :  { %v7509_v10 = vadd.f32 %v11395_v18, %v10831_v7 }
0x36f3   :  { %v11397_v51 = vpop.f32.mrf.mxu1 }
0x36f4   :  { %v7515_v52 = vadd.f32 %v7509_v10, %v7223_v34  ;;  %v11398_v49 = vadd.f32 %v11397_v51, %v11396_v30  ;;  %v12287_v34 = vld [vmem:[#allocation2 + $0x50] sm:$0xff]   ;;  %v10848_v30 = vld [vmem:[%s15462_s18 + $0xa] ss:$0 sm:$0xff] }
0x36f5   :  { %11696 = vmatpush3.bf16.msra.mxu0 %v12287_v34 }
0x36f6   :  { %v7512_v50 = vadd.f32 %v11398_v49, %v10831_v7  ;;  %v7519_v47 = vsel %vm694_vm2, %v7515_v52, 0.0  ;;  %v7527_v15 = vmul.f32 %v7515_v52, %v7515_v52  ;;  %11697 = vmatprep.subr.bf16.mxu0 %v15519_v19 }
0x36f7   :  { %7520 = vadd.xlane.f32.xlu0 %v7519_v47  ;;  %v10849_v47 = vld [vmem:[%s15462_s18 + $0xb] ss:$0 sm:$0xff] }
0x36f8   :  { %v7516_v48 = vadd.f32 %v7512_v50, %v7224_v13  ;;  %v7529_v27 = vsel %vm694_vm2, %v7527_v15, 0.0  ;;  %v12289_v13 = vld [vmem:[#allocation2 + $0x40] sm:$0xff]  }
0x36f9   :  { %11698 = vmatpush3.bf16.msra.mxu0 %v12288_v5 }
0x36fa   :  { %v7522_v39 = vsel %vm694_vm2, %v7516_v48, 0.0  ;;  %v7528_v16 = vmul.f32 %v7516_v48, %v7516_v48  ;;  %11699 = vmatprep.subr.bf16.mxu0 %v15519_v19 }
0x36fb   :  { %7523 = vadd.xlane.f32.xlu1 %v7522_v39  ;;  %7530 = vadd.xlane.f32.xlu0 %v7529_v27 }
0x36fc   :  { %v7532_v45 = vsel %vm694_vm2, %v7528_v16, 0.0 }
0x36fd   :  { %11700 = vmatpush3.bf16.msra.mxu0 %v12289_v13 }
0x36ff   :  { %7533 = vadd.xlane.f32.xlu1 %v7532_v45 }
0x3780   :  { %v7521_v31 = vpop.xlane.xlu0 %7520 }
0x3781   :  { %v7525_v43 = vmul.f32 0.015625, %v7521_v31 }
0x3783   :  { %v7537_v42 = vmul.f32 %v7525_v43, %v7525_v43  ;;  %v7543_v7 = vsub.f32 %v7515_v52, %v7525_v43  ;;  %v10850_v52 = vld [vmem:[%s15458_s14 + $0x2] ss:$0 sm:$0xff] }
0x3784   :  { %v7524_v44 = vpop.xlane.xlu1 %7523  ;;  %v7531_v41 = vpop.xlane.xlu0 %7530 }
0x3785   :  { %v7526_v23 = vmul.f32 0.015625, %v7524_v44  ;;  %v7535_v38 = vmul.f32 0.015625, %v7531_v41 }
0x3787   :  { %v7539_v6 = vsub.f32 %v7535_v38, %v7537_v42  ;;  %v7538_v40 = vmul.f32 %v7526_v23, %v7526_v23  ;;  %v7544_v10 = vsub.f32 %v7516_v48, %v7526_v23 }
0x3788   :  { %v7534_v22 = vpop.xlane.xlu1 %7533 }
0x3789   :  { %v7541_v37 = vmax.f32 %v7539_v6, 0.0  ;;  %v7536_v17 = vmul.f32 0.015625, %v7534_v22 }
0x378b   :  { %v7545_v28 = vadd.f32 1e-05, %v7541_v37  ;;  %v7540_v24 = vsub.f32 %v7536_v17, %v7538_v40 }
0x378d   :  { %12386 = vrsqrt.f32 %v7545_v28  ;;  %v7542_v9 = vmax.f32 %v7540_v24, 0.0 }
0x378f   :  { %v7546_v20 = vadd.f32 1e-05, %v7542_v9 }
0x3791   :  { %12388 = vrsqrt.f32 %v7546_v20 }
0x379a   :  { %v12387_v33 = vpop.eup %12386 }
0x379b   :  { %v7549_v18 = vmul.f32 %v12387_v33, %v7543_v7 }
0x379d   :  { %v7555_v50 = vmul.f32 %v10848_v30, %v7549_v18 }
0x379e   :  { %v12389_v51 = vpop.eup %12388 }
0x379f   :  { %v7550_v49 = vmul.f32 %v12389_v51, %v7544_v10  ;;  %v7561_v39 = vadd.f32 %v10849_v47, %v7555_v50 }
0x37a1   :  { %v7556_v15 = vmul.f32 %v10848_v30, %v7550_v49 }
0x37a3   :  { %v7562_v27 = vadd.f32 %v10849_v47, %v7556_v15 }
0x37a5   :  { %v7572_v16 = vpack.c.bf16 %v7562_v27, %v7561_v39 }
0x37a7   :  { %11702 = vmatmul.mubr.msk.bf16.vlgmr.msra.gmra.mxu0 %vm694_vm2, %v7572_v16 }
0x37a8   :  { %7840 = vmatprep.mubr.bf16.mxu0 %v15520_v32 }
0x3867   :  { %v7639_v48 = vpop.f32.mrf.mxu0 }
0x3868   :  { %v7640_v45 = vadd.f32 %v10850_v52, %v7639_v48 }
0x3869   :  { %v11703_v46 = vpop.f32.mrf.mxu0 }
0x386a   :  { %v7646_v34 = vadd.f32 %v7640_v45, %v7561_v39  ;;  %v10856_v39 = vld [vmem:[%s15462_s18 + $0xc] ss:$0 sm:$0xff] }
0x386b   :  { %v7642_v5 = vpop.f32.mrf.mxu0 }
0x386c   :  { %v7643_v13 = vadd.f32 %v10850_v52, %v7642_v5  ;;  %v7650_v31 = vsel %vm694_vm2, %v7646_v34, 0.0  ;;  %v7658_v43 = vmul.f32 %v7646_v34, %v7646_v34  ;;  %v10857_v52 = vld [vmem:[%s15462_s18 + $0xd] ss:$0 sm:$0xff] }
0x386d   :  { %7651 = vadd.xlane.f32.xlu0 %v7650_v31  ;;  %v11704_v44 = vpop.f32.mrf.mxu0 }
0x386e   :  { %v7647_v41 = vadd.f32 %v7643_v13, %v7562_v27  ;;  %v7660_v42 = vsel %vm694_vm2, %v7658_v43, 0.0  ;;  %v6370_v27 = vrot.slane %v14913_v14, %v13359_v26 }
0x3870   :  { %v7653_v23 = vsel %vm694_vm2, %v7647_v41, 0.0  ;;  %v7659_v38 = vmul.f32 %v7647_v41, %v7647_v41  ;;  %v15106_v5 = vadd.f32 %v14925_v21, %v6370_v27  ;;  %v15112_v44 = vadd.f32 %v14979_v35, %v6370_v27 }
0x3871   :  { %7661 = vadd.xlane.f32.xlu0 %v7660_v42  ;;  %7654 = vadd.xlane.f32.xlu1 %v7653_v23 }
0x3872   :  { %v7663_v6 = vsel %vm694_vm2, %v7659_v38, 0.0 }
0x3875   :  { %7664 = vadd.xlane.f32.xlu1 %v7663_v6 }
0x38f6   :  { %v7652_v22 = vpop.xlane.xlu0 %7651 }
0x38f7   :  { %v7656_v40 = vmul.f32 0.015625, %v7652_v22  ;;  %v10868_v22 = vcombine.high %v12794_v59, %v12799_v60 }
0x38f9   :  { %v7668_v28 = vmul.f32 %v7656_v40, %v7656_v40  ;;  %v7674_v47 = vsub.f32 %v7646_v34, %v7656_v40  ;;  %v10867_v40 = vcombine.low %v12794_v59, %v12799_v60  ;;  %7816 = vmatprep.subr.bf16.mxu0 %v10868_v22  ;;  %v10862_v59 = vcombine.high %v12764_v53, %v12769_v54 }
0x38fa   :  { %v7662_v37 = vpop.xlane.xlu0 %7661  ;;  %v7655_v17 = vpop.xlane.xlu1 %7654  ;;  %v10861_v60 = vcombine.low %v12764_v53, %v12769_v54  ;;  %v12298_v53 = vld [vmem:[#allocation5 + $0x158] sm:$0xff]  }
0x38fb   :  { %v7666_v24 = vmul.f32 0.015625, %v7662_v37  ;;  %v7657_v9 = vmul.f32 0.015625, %v7655_v17  ;;  %v10866_v37 = vcombine.high %v12784_v57, %v12789_v58  ;;  %7817 = vmatpush1.bf16.msra.mxu0 %v10867_v40  ;;  %v10865_v17 = vcombine.low %v12784_v57, %v12789_v58  ;;  %v12290_v57 = vld [vmem:[#allocation5 + $0x178] sm:$0xff]  }
0x38fc   :  { %v12291_v58 = vld [vmem:[#allocation5 + $0x138] sm:$0xff]   ;;  %11404 = vmatprep.subr.bf16.mxu1 %v12290_v57  ;;  %v10860_v57 = vld [vmem:[%s15460_s16 + $0x2] ss:$8 sm:$0x3] }
0x38fd   :  { %v7670_v20 = vsub.f32 %v7666_v24, %v7668_v28  ;;  %v7669_v18 = vmul.f32 %v7657_v9, %v7657_v9  ;;  %v7675_v48 = vsub.f32 %v7647_v41, %v7657_v9  ;;  %7818 = vmatprep.subr.bf16.mxu0 %v10866_v37  ;;  %v10864_v28 = vcombine.high %v12774_v55, %v12779_v56  ;;  %v12292_v9 = vld [vmem:[#allocation5 + $0x170] sm:$0xff]   ;;  %v12299_v54 = vld [vmem:[#allocation5 + $0x118] sm:$0xff]  }
0x38fe   :  { %v7665_v7 = vpop.xlane.xlu1 %7664  ;;  %v10863_v24 = vcombine.low %v12774_v55, %v12779_v56  ;;  %11405 = vmatpush3.bf16.msra.mxu1 %v12291_v58  ;;  %v12294_v55 = vld [vmem:[#allocation5 + $0x168] sm:$0xff]  }
0x38ff   :  { %v7672_v33 = vmax.f32 %v7670_v20, 0.0  ;;  %v7667_v30 = vmul.f32 0.015625, %v7665_v7  ;;  %7819 = vmatpush1.bf16.msra.mxu0 %v10865_v17  ;;  %v12293_v20 = vld [vmem:[#allocation5 + $0x130] sm:$0xff]   ;;  %11406 = vmatprep.subr.bf16.mxu1 %v12292_v9  ;;  %v12295_v56 = vld [vmem:[#allocation5 + $0x128] sm:$0xff]   ;;  %v12296_v7 = vld [vmem:[#allocation5 + $0x160] sm:$0xff]   ;;  %v7762_v9 = vrot.slane %v10860_v57, %v13359_v26 }
0x3900   :  { %7820 = vmatprep.subr.bf16.mxu0 %v10864_v28  ;;  %v12301_v28 = vld [vmem:[#allocation5 + $0x110] sm:$0xff]  }
0x3901   :  { %v7676_v10 = vadd.f32 1e-05, %v7672_v33  ;;  %v7671_v51 = vsub.f32 %v7667_v30, %v7669_v18  ;;  %v12297_v33 = vld [vmem:[#allocation5 + $0x120] sm:$0xff]  }
0x3902   :  { %11407 = vmatpush3.bf16.msra.mxu1 %v12293_v20  ;;  %v7758_v20 = vrot.slane %v10860_v57, %v13362_v29 }
0x3903   :  { %12390 = vrsqrt.f32 %v7676_v10  ;;  %v7673_v49 = vmax.f32 %v7671_v51, 0.0  ;;  %7821 = vmatpush1.bf16.msra.mxu0 %v10863_v24  ;;  %11408 = vmatprep.subr.bf16.mxu1 %v12294_v55  ;;  %v12303_v24 = vld [vmem:[#allocation5 + $0x108] sm:$0xff]  }
0x3904   :  { %7822 = vmatprep.subr.bf16.mxu0 %v10862_v59  ;;  %v12304_v59 = vld [vmem:[#allocation5 + $0x140] sm:$0xff]  }
0x3905   :  { %v7677_v50 = vadd.f32 1e-05, %v7673_v49 }
0x3906   :  { %11409 = vmatpush3.bf16.msra.mxu1 %v12295_v56 }
0x3907   :  { %12392 = vrsqrt.f32 %v7677_v50  ;;  %7823 = vmatpush1.bf16.msra.mxu0 %v10861_v60  ;;  %11410 = vmatprep.subr.bf16.mxu1 %v12296_v7  ;;  %v12305_v60 = vld [vmem:[#allocation5 + $0x100] sm:$0xff]  }
0x3908   :  { %11705 = vmatprep.subr.bf16.mxu0 %v15519_v19 }
0x390a   :  { %11411 = vmatpush3.bf16.msra.mxu1 %v12297_v33 }
0x390b   :  { %11412 = vmatprep.subr.bf16.mxu1 %v12298_v53 }
0x390e   :  { %11413 = vmatpush3.bf16.msra.mxu1 %v12299_v54 }
0x3910   :  { %v12391_v15 = vpop.eup %12390 }
0x3911   :  { %v7680_v16 = vmul.f32 %v12391_v15, %v7674_v47 }
0x3913   :  { %v7686_v45 = vmul.f32 %v10856_v39, %v7680_v16 }
0x3914   :  { %v12393_v46 = vpop.eup %12392 }
0x3915   :  { %v7692_v34 = vadd.f32 %v10857_v52, %v7686_v45  ;;  %v7681_v13 = vmul.f32 %v12393_v46, %v7675_v48 }
0x3917   :  { %v15109_v31 = vadd.f32 %v7692_v34, %v15106_v5  ;;  %v7687_v43 = vmul.f32 %v10856_v39, %v7681_v13 }
0x3919   :  { %v7698_v14 = vsel %vm694_vm2, %v15109_v31, 0.0  ;;  %v7706_v41 = vmul.f32 %v15109_v31, %v15109_v31  ;;  %v7693_v42 = vadd.f32 %v10857_v52, %v7687_v43 }
0x391a   :  { %7699 = vadd.xlane.f32.xlu0 %v7698_v14 }
0x391b   :  { %v15119_v21 = vadd.f32 %v7693_v42, %v15112_v44  ;;  %v7708_v23 = vsel %vm694_vm2, %v7706_v41, 0.0  ;;  %v10858_v41 = vld [vmem:[%s15462_s18 + $0xe] ss:$0 sm:$0xff] }
0x391d   :  { %v7701_v38 = vsel %vm694_vm2, %v15119_v21, 0.0  ;;  %v7707_v35 = vmul.f32 %v15119_v21, %v15119_v21 }
0x391e   :  { %7709 = vadd.xlane.f32.xlu0 %v7708_v23  ;;  %7702 = vadd.xlane.f32.xlu1 %v7701_v38 }
0x391f   :  { %v7711_v6 = vsel %vm694_vm2, %v7707_v35, 0.0 }
0x3922   :  { %7712 = vadd.xlane.f32.xlu1 %v7711_v6  ;;  %v10859_v6 = vld [vmem:[%s15462_s18 + $0xf] ss:$0 sm:$0xff] }
0x39a3   :  { %v7700_v18 = vpop.xlane.xlu0 %7699 }
0x39a4   :  { %v7704_v30 = vmul.f32 0.015625, %v7700_v18 }
0x39a6   :  { %v7716_v49 = vmul.f32 %v7704_v30, %v7704_v30  ;;  %v7722_v13 = vsub.f32 %v15109_v31, %v7704_v30  ;;  %v12300_v31 = vld [vmem:[#allocation5 + $0x150] sm:$0xff]  }
0x39a7   :  { %v7710_v10 = vpop.xlane.xlu0 %7709  ;;  %v7703_v51 = vpop.xlane.xlu1 %7702  ;;  %11414 = vmatprep.subr.bf16.mxu1 %v12300_v31 }
0x39a8   :  { %v7714_v50 = vmul.f32 0.015625, %v7710_v10  ;;  %v7705_v47 = vmul.f32 0.015625, %v7703_v51  ;;  %11415 = vmatpush3.bf16.msra.mxu1 %v12301_v28 }
0x39aa   :  { %v7718_v15 = vsub.f32 %v7714_v50, %v7716_v49  ;;  %v7717_v16 = vmul.f32 %v7705_v47, %v7705_v47  ;;  %v7723_v42 = vsub.f32 %v15119_v21, %v7705_v47  ;;  %v12302_v21 = vld [vmem:[#allocation5 + $0x148] sm:$0xff]  }
0x39ab   :  { %v7713_v39 = vpop.xlane.xlu1 %7712  ;;  %11416 = vmatprep.subr.bf16.mxu1 %v12302_v21 }
0x39ac   :  { %v7720_v27 = vmax.f32 %v7718_v15, 0.0  ;;  %v7715_v52 = vmul.f32 0.015625, %v7713_v39  ;;  %11417 = vmatpush3.bf16.msra.mxu1 %v12303_v24  ;;  %v10870_v39 = vld [vmem:[%s15461_s17 + $0x2] ss:$0 sm:$0xff] }
0x39ad   :  { %11418 = vmatprep.subr.bf16.mxu1 %v12304_v59 }
0x39ae   :  { %v7724_v48 = vadd.f32 1e-05, %v7720_v27  ;;  %v7719_v45 = vsub.f32 %v7715_v52, %v7717_v16 }
0x39b0   :  { %12394 = vrsqrt.f32 %v7724_v48  ;;  %v7721_v46 = vmax.f32 %v7719_v45, 0.0  ;;  %11419 = vmatpush3.bf16.msra.mxu1 %v12305_v60 }
0x39b2   :  { %v7725_v34 = vadd.f32 1e-05, %v7721_v46 }
0x39b4   :  { %12396 = vrsqrt.f32 %v7725_v34 }
0x39bd   :  { %v12395_v43 = vpop.eup %12394 }
0x39be   :  { %v7728_v14 = vmul.f32 %v12395_v43, %v7722_v13 }
0x39c0   :  { %v7734_v35 = vmul.f32 %v10858_v41, %v7728_v14 }
0x39c1   :  { %v12397_v23 = vpop.eup %12396 }
0x39c2   :  { %v7729_v38 = vmul.f32 %v12397_v23, %v7723_v42  ;;  %v7740_v40 = vadd.f32 %v10859_v6, %v7734_v35 }
0x39c4   :  { %v7735_v22 = vmul.f32 %v10858_v41, %v7729_v38 }
0x39c6   :  { %v7741_v37 = vadd.f32 %v10859_v6, %v7735_v22  ;;  %v12306_v6 = vld [vmem:[#allocation2 + $0x78] sm:$0xff]   ;;  %v12307_v22 = vld [vmem:[#allocation2 + $0x70] sm:$0xff]  }
0x39c8   :  { %v7751_v17 = vpack.c.bf16 %v7741_v37, %v7740_v40 }
0x39ca   :  { %10869 = vmatmul.mubr.msk.bf16.vlgmr.msra.gmra.mxu0 %vm694_vm2, %v7751_v17 }
0x39cb   :  { %11713 = vmatprep.mubr.msk.bf16.mxu0 %vm12452_vm0, %v15519_v19  ;;  %11706 = vmatpush3.bf16.msra.mxu0 %v12306_v6 }
0x39cc   :  { %11707 = vmatprep.subr.bf16.mxu0 %v15519_v19 }
0x39cf   :  { %11708 = vmatpush3.bf16.msra.mxu0 %v12307_v22 }
0x39d0   :  { %11709 = vmatprep.subr.bf16.mxu0 %v15519_v19 }
0x3a8a   :  { %v7842_v58 = vpop.f32.mrf.mxu0 }
0x3a8b   :  { %v7843_v53 = vadd.f32 %v7842_v58, %v7758_v20 }
0x3a8c   :  { %v7844_v55 = vpop.f32.mrf.mxu0 }
0x3a8d   :  { %v7845_v7 = vadd.f32 %v7844_v55, %v7762_v9  ;;  %v7851_v49 = vmax.f32 %v7843_v53, 0.0 }
0x3a8e   :  { %v7846_v56 = vpop.f32.mrf.mxu0 }
0x3a8f   :  { %v7847_v33 = vadd.f32 %v7846_v56, %v7758_v20  ;;  %v7852_v10 = vmax.f32 %v7845_v7, 0.0 }
0x3a90   :  { %v7848_v54 = vpop.f32.mrf.mxu0 }
0x3a91   :  { %v7849_v18 = vadd.f32 %v7848_v54, %v7762_v9  ;;  %v7853_v30 = vmax.f32 %v7847_v33, 0.0 }
0x3a93   :  { %v7854_v51 = vmax.f32 %v7849_v18, 0.0  ;;  %v7888_v47 = vpack.c.bf16 %v7853_v30, %v7851_v49 }
0x3a95   :  { %v7889_v50 = vpack.c.bf16 %v7854_v51, %v7852_v10  ;;  %v10887_v10 = vld [vmem:[%s15462_s18 + $0x10] ss:$0 sm:$0xff] }
0x3a97   :  { %8023 = vmatprep.mubr.bf16.mxu1 %v7889_v50 }
0x3a98   :  { %8024 = vmatmul.mubr.bf16.vlgmr.msra.gmra.mxu1 %v7888_v47 }
0x3b58   :  { %v11420_v15 = vpop.f32.mrf.mxu1 }
0x3b5a   :  { %v11421_v27 = vpop.f32.mrf.mxu1 }
0x3b5b   :  { %v11422_v16 = vadd.f32 %v11421_v27, %v11420_v15  ;;  %v10888_v15 = vld [vmem:[%s15462_s18 + $0x11] ss:$0 sm:$0xff] }
0x3b5c   :  { %v11423_v52 = vpop.f32.mrf.mxu1 }
0x3b5d   :  { %v8026_v48 = vadd.f32 %v11422_v16, %v10870_v39 }
0x3b5e   :  { %v11424_v45 = vpop.f32.mrf.mxu1 }
0x3b5f   :  { %v8032_v46 = vadd.f32 %v8026_v48, %v7740_v40  ;;  %v11425_v34 = vadd.f32 %v11424_v45, %v11423_v52  ;;  %v12308_v40 = vld [vmem:[#allocation2 + $0x68] sm:$0xff]   ;;  %v10889_v48 = vld [vmem:[%s15458_s14 + $0x3] ss:$0 sm:$0xff] }
0x3b60   :  { %11710 = vmatpush3.bf16.msra.mxu0 %v12308_v40 }
0x3b61   :  { %v8029_v13 = vadd.f32 %v11425_v34, %v10870_v39  ;;  %v8036_v43 = vsel %vm694_vm2, %v8032_v46, 0.0  ;;  %v8044_v14 = vmul.f32 %v8032_v46, %v8032_v46  ;;  %11711 = vmatprep.subr.bf16.mxu0 %v15519_v19 }
0x3b62   :  { %8037 = vadd.xlane.f32.xlu0 %v8036_v43 }
0x3b63   :  { %v8033_v41 = vadd.f32 %v8029_v13, %v7741_v37  ;;  %v8046_v23 = vsel %vm694_vm2, %v8044_v14, 0.0  ;;  %v12309_v37 = vld [vmem:[#allocation2 + $0x60] sm:$0xff]  }
0x3b64   :  { %11712 = vmatpush3.bf16.msra.mxu0 %v12309_v37 }
0x3b65   :  { %v8039_v42 = vsel %vm694_vm2, %v8033_v41, 0.0  ;;  %v8045_v38 = vmul.f32 %v8033_v41, %v8033_v41 }
0x3b66   :  { %8040 = vadd.xlane.f32.xlu1 %v8039_v42  ;;  %8047 = vadd.xlane.f32.xlu0 %v8046_v23 }
0x3b67   :  { %v8049_v35 = vsel %vm694_vm2, %v8045_v38, 0.0 }
0x3b6a   :  { %8050 = vadd.xlane.f32.xlu1 %v8049_v35 }
0x3beb   :  { %v8038_v17 = vpop.xlane.xlu0 %8037 }
0x3bec   :  { %v8042_v31 = vmul.f32 0.015625, %v8038_v17 }
0x3bee   :  { %v8054_v24 = vmul.f32 %v8042_v31, %v8042_v31  ;;  %v8060_v54 = vsub.f32 %v8032_v46, %v8042_v31 }
0x3bef   :  { %v8041_v28 = vpop.xlane.xlu1 %8040  ;;  %v8048_v21 = vpop.xlane.xlu0 %8047 }
0x3bf0   :  { %v8043_v59 = vmul.f32 0.015625, %v8041_v28  ;;  %v8052_v60 = vmul.f32 0.015625, %v8048_v21 }
0x3bf2   :  { %v8056_v57 = vsub.f32 %v8052_v60, %v8054_v24  ;;  %v8055_v9 = vmul.f32 %v8043_v59, %v8043_v59  ;;  %v8061_v51 = vsub.f32 %v8033_v41, %v8043_v59 }
0x3bf3   :  { %v8051_v58 = vpop.xlane.xlu1 %8050 }
0x3bf4   :  { %v8058_v20 = vmax.f32 %v8056_v57, 0.0  ;;  %v8053_v55 = vmul.f32 0.015625, %v8051_v58 }
0x3bf6   :  { %v8062_v56 = vadd.f32 1e-05, %v8058_v20  ;;  %v8057_v7 = vsub.f32 %v8053_v55, %v8055_v9 }
0x3bf8   :  { %12398 = vrsqrt.f32 %v8062_v56  ;;  %v8059_v33 = vmax.f32 %v8057_v7, 0.0 }
0x3bfa   :  { %v8063_v53 = vadd.f32 1e-05, %v8059_v33 }
0x3bfc   :  { %12400 = vrsqrt.f32 %v8063_v53  ;;  %v10895_v53 = vld [vmem:[%s15462_s18 + $0x12] ss:$0 sm:$0xff] }
0x3c05   :  { %v12399_v18 = vpop.eup %12398 }
0x3c06   :  { %v8066_v30 = vmul.f32 %v12399_v18, %v8060_v54  ;;  %v10896_v18 = vld [vmem:[%s15462_s18 + $0x13] ss:$0 sm:$0xff] }
0x3c08   :  { %v8072_v47 = vmul.f32 %v10887_v10, %v8066_v30 }
0x3c09   :  { %v12401_v49 = vpop.eup %12400 }
0x3c0a   :  { %v8067_v50 = vmul.f32 %v12401_v49, %v8061_v51  ;;  %v8078_v27 = vadd.f32 %v10888_v15, %v8072_v47 }
0x3c0c   :  { %v8073_v39 = vmul.f32 %v10887_v10, %v8067_v50 }
0x3c0e   :  { %v8079_v16 = vadd.f32 %v10888_v15, %v8073_v39 }
0x3c10   :  { %v8089_v52 = vpack.c.bf16 %v8079_v16, %v8078_v27 }
0x3c12   :  { %11714 = vmatmul.mubr.msk.bf16.vlgmr.msra.gmra.mxu0 %vm694_vm2, %v8089_v52 }
0x3c13   :  { %8365 = vmatprep.mubr.bf16.mxu0 %v15520_v32 }
0x3cd2   :  { %v8156_v45 = vpop.f32.mrf.mxu0 }
0x3cd3   :  { %v8157_v46 = vadd.f32 %v10889_v48, %v8156_v45 }
0x3cd4   :  { %v11715_v34 = vpop.f32.mrf.mxu0 }
0x3cd5   :  { %v8163_v13 = vadd.f32 %v8157_v46, %v8078_v27 }
0x3cd6   :  { %v8159_v43 = vpop.f32.mrf.mxu0 }
0x3cd7   :  { %v8160_v14 = vadd.f32 %v10889_v48, %v8159_v43  ;;  %v8167_v41 = vsel %vm694_vm2, %v8163_v13, 0.0  ;;  %v8175_v42 = vmul.f32 %v8163_v13, %v8163_v13 }
0x3cd8   :  { %8168 = vadd.xlane.f32.xlu0 %v8167_v41  ;;  %v11716_v23 = vpop.f32.mrf.mxu0  ;;  %v10906_v41 = vcombine.low %v12834_v3, %v12839_v4 }
0x3cd9   :  { %v8164_v38 = vadd.f32 %v8160_v14, %v8079_v16  ;;  %v8177_v35 = vsel %vm694_vm2, %v8175_v42, 0.0  ;;  %v10907_v14 = vcombine.high %v12834_v3, %v12839_v4  ;;  %v10905_v42 = vcombine.high %v12824_v1, %v12829_v2 }
0x3cda   :  { %v10904_v23 = vcombine.low %v12824_v1, %v12829_v2  ;;  %v10901_v3 = vcombine.high %v12804_v61, %v12809_v62  ;;  %v10900_v4 = vcombine.low %v12804_v61, %v12809_v62  ;;  %v12310_v1 = vld [vmem:[#allocation5 + $0x1f8] sm:$0xff]  }
0x3cdb   :  { %v8170_v6 = vsel %vm694_vm2, %v8164_v38, 0.0  ;;  %v8176_v22 = vmul.f32 %v8164_v38, %v8164_v38  ;;  %8341 = vmatprep.subr.bf16.mxu0 %v10907_v14  ;;  %v12311_v2 = vld [vmem:[#allocation5 + $0x1b8] sm:$0xff]   ;;  %11431 = vmatprep.subr.bf16.mxu1 %v12310_v1 }
0x3cdc   :  { %8178 = vadd.xlane.f32.xlu0 %v8177_v35  ;;  %8171 = vadd.xlane.f32.xlu1 %v8170_v6  ;;  %v10902_v35 = vcombine.low %v12814_v63, %v12819_v0  ;;  %v12312_v6 = vld [vmem:[#allocation5 + $0x1f0] sm:$0xff]   ;;  %v12318_v61 = vld [vmem:[#allocation5 + $0x1d8] sm:$0xff]  }
0x3cdd   :  { %v8180_v40 = vsel %vm694_vm2, %v8176_v22, 0.0  ;;  %8342 = vmatpush1.bf16.msra.mxu0 %v10906_v41  ;;  %11432 = vmatpush3.bf16.msra.mxu1 %v12311_v2  ;;  %v12313_v22 = vld [vmem:[#allocation5 + $0x1b0] sm:$0xff]   ;;  %v12319_v62 = vld [vmem:[#allocation5 + $0x198] sm:$0xff]  }
0x3cde   :  { %8343 = vmatprep.subr.bf16.mxu0 %v10905_v42  ;;  %11433 = vmatprep.subr.bf16.mxu1 %v12312_v6 }
0x3ce0   :  { %8181 = vadd.xlane.f32.xlu1 %v8180_v40  ;;  %v12316_v40 = vld [vmem:[#allocation5 + $0x1e0] sm:$0xff]  }
0x3ce1   :  { %8344 = vmatpush1.bf16.msra.mxu0 %v10904_v23  ;;  %11434 = vmatpush3.bf16.msra.mxu1 %v12313_v22 }
0x3cf1   :  { %8215 = vrot.lane.b32.xlu1 %v15112_v44, %s12454_s0 }
0x3cf2   :  { %8213 = vrot.lane.b32.xlu0 %v15106_v5, %s12454_s0 }
0x3d61   :  { %v8169_v37 = vpop.xlane.xlu0 %8168 }
0x3d62   :  { %v8173_v17 = vmul.f32 0.015625, %v8169_v37  ;;  %v12317_v37 = vld [vmem:[#allocation5 + $0x1a0] sm:$0xff]  }
0x3d64   :  { %v8185_v21 = vmul.f32 %v8173_v17, %v8173_v17  ;;  %v8191_v33 = vsub.f32 %v8163_v13, %v8173_v17 }
0x3d65   :  { %v8179_v31 = vpop.xlane.xlu0 %8178  ;;  %v8172_v28 = vpop.xlane.xlu1 %8171 }
0x3d66   :  { %v8183_v24 = vmul.f32 0.015625, %v8179_v31  ;;  %v8174_v59 = vmul.f32 0.015625, %v8172_v28 }
0x3d68   :  { %v8187_v60 = vsub.f32 %v8183_v24, %v8185_v21  ;;  %v8186_v9 = vmul.f32 %v8174_v59, %v8174_v59  ;;  %v8192_v30 = vsub.f32 %v8164_v38, %v8174_v59  ;;  %v10903_v38 = vcombine.high %v12814_v63, %v12819_v0  ;;  %v12314_v63 = vld [vmem:[#allocation5 + $0x1e8] sm:$0xff]  }
0x3d69   :  { %v8182_v57 = vpop.xlane.xlu1 %8181  ;;  %v8214_v47 = vpop.permute.xlu0 %8213  ;;  %v12315_v0 = vld [vmem:[#allocation5 + $0x1a8] sm:$0xff]   ;;  %11435 = vmatprep.subr.bf16.mxu1 %v12314_v63 }
0x3d6a   :  { %v8189_v58 = vmax.f32 %v8187_v60, 0.0  ;;  %v8184_v20 = vmul.f32 0.015625, %v8182_v57  ;;  %8345 = vmatprep.subr.bf16.mxu0 %v10903_v38  ;;  %11436 = vmatpush3.bf16.msra.mxu1 %v12315_v0 }
0x3d6b   :  { %8346 = vmatpush1.bf16.msra.mxu0 %v10902_v35  ;;  %11437 = vmatprep.subr.bf16.mxu1 %v12316_v40 }
0x3d6c   :  { %v8193_v55 = vadd.f32 1e-05, %v8189_v58  ;;  %v8188_v56 = vsub.f32 %v8184_v20, %v8186_v9  ;;  %8347 = vmatprep.subr.bf16.mxu0 %v10901_v3 }
0x3d6d   :  { %v8216_v52 = vpop.permute.xlu1 %8215 }
0x3d6e   :  { %12402 = vrsqrt.f32 %v8193_v55  ;;  %v8190_v7 = vmax.f32 %v8188_v56, 0.0  ;;  %11438 = vmatpush3.bf16.msra.mxu1 %v12317_v37 }
0x3d6f   :  { %8348 = vmatpush1.bf16.msra.mxu0 %v10900_v4  ;;  %11439 = vmatprep.subr.bf16.mxu1 %v12318_v61  ;;  %v10909_v61 = vld [vmem:[%s15461_s17 + $0x3] ss:$0 sm:$0xff] }
0x3d70   :  { %v8194_v44 = vadd.f32 1e-05, %v8190_v7  ;;  %11717 = vmatprep.subr.bf16.mxu0 %v15519_v19 }
0x3d72   :  { %12404 = vrsqrt.f32 %v8194_v44  ;;  %11440 = vmatpush3.bf16.msra.mxu1 %v12319_v62 }
0x3d7b   :  { %v12403_v5 = vpop.eup %12402 }
0x3d7c   :  { %v8197_v54 = vmul.f32 %v12403_v5, %v8191_v33 }
0x3d7e   :  { %v8203_v10 = vmul.f32 %v10895_v53, %v8197_v54  ;;  %v10897_v54 = vld [vmem:[%s15462_s18 + $0x14] ss:$0 sm:$0xff] }
0x3d7f   :  { %v12405_v51 = vpop.eup %12404 }
0x3d80   :  { %v8209_v49 = vadd.f32 %v10896_v18, %v8203_v10  ;;  %v8198_v50 = vmul.f32 %v12405_v51, %v8192_v30 }
0x3d82   :  { %v15195_v15 = vadd.f32 %v8214_v47, %v8209_v49  ;;  %v8204_v39 = vmul.f32 %v10895_v53, %v8198_v50  ;;  %v10898_v50 = vld [vmem:[%s15462_s18 + $0x15] ss:$0 sm:$0xff] }
0x3d84   :  { %v8210_v27 = vadd.f32 %v10896_v18, %v8204_v39  ;;  %v8223_v16 = vsel %vm694_vm2, %v15195_v15, 0.0  ;;  %v8231_v34 = vmul.f32 %v15195_v15, %v15195_v15 }
0x3d85   :  { %8224 = vadd.xlane.f32.xlu1 %v8223_v16 }
0x3d86   :  { %v15199_v48 = vadd.f32 %v8216_v52, %v8210_v27  ;;  %v8233_v43 = vsel %vm694_vm2, %v8231_v34, 0.0  ;;  %v12320_v52 = vld [vmem:[#allocation5 + $0x1d0] sm:$0xff]   ;;  %v12325_v34 = vld [vmem:[#allocation5 + $0x180] sm:$0xff]  }
0x3d87   :  { %11441 = vmatprep.subr.bf16.mxu1 %v12320_v52 }
0x3d88   :  { %v8226_v45 = vsel %vm694_vm2, %v15199_v48, 0.0  ;;  %v8232_v46 = vmul.f32 %v15199_v48, %v15199_v48 }
0x3d89   :  { %8227 = vadd.xlane.f32.xlu0 %v8226_v45  ;;  %v12323_v45 = vld [vmem:[#allocation5 + $0x188] sm:$0xff]  }
0x3d8a   :  { %v8236_v13 = vsel %vm694_vm2, %v8232_v46, 0.0  ;;  %v12324_v46 = vld [vmem:[#allocation5 + $0x1c0] sm:$0xff]  }
0x3d8b   :  { %8237 = vadd.xlane.f32.xlu1 %v8236_v13  ;;  %v10899_v13 = vld [vmem:[%s15460_s16 + $0x3] ss:$8 sm:$0x3] }
0x3d8c   :  { %v8287_v14 = vrot.slane %v10899_v13, %v13359_v26  ;;  %v8283_v41 = vrot.slane %v10899_v13, %v13362_v29 }
0x3d8d   :  { %8234 = vadd.xlane.f32.xlu0 %v8233_v43 }
0x3e0e   :  { %v8225_v17 = vpop.xlane.xlu1 %8224 }
0x3e0f   :  { %v8229_v28 = vmul.f32 0.015625, %v8225_v17 }
0x3e11   :  { %v8241_v58 = vmul.f32 %v8229_v28, %v8229_v28  ;;  %v8247_v18 = vsub.f32 %v15195_v15, %v8229_v28  ;;  %v12322_v15 = vld [vmem:[#allocation5 + $0x1c8] sm:$0xff]  }
0x3e12   :  { %v8228_v31 = vpop.xlane.xlu0 %8227 }
0x3e13   :  { %v8230_v21 = vmul.f32 0.015625, %v8228_v31 }
0x3e14   :  { %v8238_v24 = vpop.xlane.xlu1 %8237 }
0x3e15   :  { %v8242_v59 = vmul.f32 %v8230_v21, %v8230_v21  ;;  %v8240_v60 = vmul.f32 0.015625, %v8238_v24  ;;  %v8248_v5 = vsub.f32 %v15199_v48, %v8230_v21  ;;  %v12321_v48 = vld [vmem:[#allocation5 + $0x190] sm:$0xff]  }
0x3e16   :  { %v8235_v57 = vpop.xlane.xlu0 %8234  ;;  %11442 = vmatpush3.bf16.msra.mxu1 %v12321_v48 }
0x3e17   :  { %v8244_v9 = vsub.f32 %v8240_v60, %v8242_v59  ;;  %v8239_v20 = vmul.f32 0.015625, %v8235_v57  ;;  %11443 = vmatprep.subr.bf16.mxu1 %v12322_v15 }
0x3e19   :  { %v8246_v55 = vmax.f32 %v8244_v9, 0.0  ;;  %v8243_v56 = vsub.f32 %v8239_v20, %v8241_v58 }
0x3e1a   :  { %11444 = vmatpush3.bf16.msra.mxu1 %v12323_v45 }
0x3e1b   :  { %v8250_v7 = vadd.f32 1e-05, %v8246_v55  ;;  %v8245_v44 = vmax.f32 %v8243_v56, 0.0  ;;  %11445 = vmatprep.subr.bf16.mxu1 %v12324_v46 }
0x3e1d   :  { %12406 = vrsqrt.f32 %v8250_v7  ;;  %v8249_v33 = vadd.f32 1e-05, %v8245_v44  ;;  %v12326_v44 = vld [vmem:[#allocation2 + $0x98] sm:$0xff]  }
0x3e1e   :  { %11446 = vmatpush3.bf16.msra.mxu1 %v12325_v34 }
0x3e1f   :  { %12408 = vrsqrt.f32 %v8249_v33  ;;  %v12327_v33 = vld [vmem:[#allocation2 + $0x90] sm:$0xff]  }
0x3e2a   :  { %v12407_v53 = vpop.eup %12406 }
0x3e2b   :  { %v8254_v30 = vmul.f32 %v12407_v53, %v8248_v5  ;;  %v12328_v5 = vld [vmem:[#allocation2 + $0x88] sm:$0xff]   ;;  %v12329_v53 = vld [vmem:[#allocation2 + $0x80] sm:$0xff]  }
0x3e2c   :  { %v12409_v10 = vpop.eup %12408 }
0x3e2d   :  { %v8253_v51 = vmul.f32 %v12409_v10, %v8247_v18  ;;  %v8260_v49 = vmul.f32 %v10897_v54, %v8254_v30 }
0x3e2f   :  { %v8259_v47 = vmul.f32 %v10897_v54, %v8253_v51  ;;  %v8266_v27 = vadd.f32 %v10898_v50, %v8260_v49 }
0x3e31   :  { %v8265_v39 = vadd.f32 %v10898_v50, %v8259_v47 }
0x3e33   :  { %v8276_v16 = vpack.c.bf16 %v8266_v27, %v8265_v39 }
0x3e35   :  { %10908 = vmatmul.mubr.msk.bf16.vlgmr.msra.gmra.mxu0 %vm694_vm2, %v8276_v16 }
0x3e36   :  { %11725 = vmatprep.mubr.msk.bf16.mxu0 %vm12452_vm0, %v15519_v19  ;;  %11718 = vmatpush3.bf16.msra.mxu0 %v12326_v44 }
0x3e37   :  { %11719 = vmatprep.subr.bf16.mxu0 %v15519_v19 }
0x3e3a   :  { %11720 = vmatpush3.bf16.msra.mxu0 %v12327_v33 }
0x3e3b   :  { %11721 = vmatprep.subr.bf16.mxu0 %v15519_v19 }
0x3e3e   :  { %11722 = vmatpush3.bf16.msra.mxu0 %v12328_v5 }
0x3e3f   :  { %11723 = vmatprep.subr.bf16.mxu0 %v15519_v19 }
0x3e42   :  { %11724 = vmatpush3.bf16.msra.mxu0 %v12329_v53 }
0x3ef5   :  { %v8367_v43 = vpop.f32.mrf.mxu0 }
0x3ef6   :  { %v8368_v3 = vadd.f32 %v8367_v43, %v8283_v41 }
0x3ef7   :  { %v8369_v42 = vpop.f32.mrf.mxu0 }
0x3ef8   :  { %v8370_v38 = vadd.f32 %v8369_v42, %v8287_v14  ;;  %v8376_v63 = vmax.f32 %v8368_v3, 0.0 }
0x3ef9   :  { %v8371_v23 = vpop.f32.mrf.mxu0 }
0x3efa   :  { %v8372_v35 = vadd.f32 %v8371_v23, %v8283_v41  ;;  %v8377_v6 = vmax.f32 %v8370_v38, 0.0 }
0x3efb   :  { %v8373_v4 = vpop.f32.mrf.mxu0 }
0x3efc   :  { %v8374_v1 = vadd.f32 %v8373_v4, %v8287_v14  ;;  %v8378_v2 = vmax.f32 %v8372_v35, 0.0  ;;  %v10926_v14 = vld [vmem:[%s15462_s18 + $0x16] ss:$0 sm:$0xff]  ;;  %v10927_v35 = vld [vmem:[%s15462_s18 + $0x17] ss:$0 sm:$0xff] }
0x3efe   :  { %v8379_v22 = vmax.f32 %v8374_v1, 0.0  ;;  %v8413_v40 = vpack.c.bf16 %v8378_v2, %v8376_v63 }
0x3f00   :  { %v8414_v0 = vpack.c.bf16 %v8379_v22, %v8377_v6  ;;  %v10928_v6 = vld [vmem:[%s15458_s14 + $0x4] ss:$0 sm:$0xff] }
0x3f02   :  { %8548 = vmatprep.mubr.bf16.mxu1 %v8414_v0 }
0x3f03   :  { %8549 = vmatmul.mubr.bf16.vlgmr.msra.gmra.mxu1 %v8413_v40 }
0x3fc3   :  { %v11447_v37 = vpop.f32.mrf.mxu1 }
0x3fc5   :  { %v11448_v62 = vpop.f32.mrf.mxu1 }
0x3fc6   :  { %v11449_v17 = vadd.f32 %v11448_v62, %v11447_v37 }
0x3fc7   :  { %v11450_v31 = vpop.f32.mrf.mxu1 }
0x3fc8   :  { %v8551_v28 = vadd.f32 %v11449_v17, %v10909_v61 }
0x3fc9   :  { %v11451_v21 = vpop.f32.mrf.mxu1 }
0x3fca   :  { %v8557_v24 = vadd.f32 %v8551_v28, %v8265_v39  ;;  %v11452_v59 = vadd.f32 %v11451_v21, %v11450_v31 }
0x3fcc   :  { %v8554_v60 = vadd.f32 %v11452_v59, %v10909_v61  ;;  %v8561_v57 = vsel %vm694_vm2, %v8557_v24, 0.0  ;;  %v8569_v58 = vmul.f32 %v8557_v24, %v8557_v24 }
0x3fcd   :  { %8562 = vadd.xlane.f32.xlu0 %v8561_v57 }
0x3fce   :  { %v8558_v9 = vadd.f32 %v8554_v60, %v8266_v27  ;;  %v8571_v55 = vsel %vm694_vm2, %v8569_v58, 0.0 }
0x3fd0   :  { %v8564_v20 = vsel %vm694_vm2, %v8558_v9, 0.0  ;;  %v8570_v56 = vmul.f32 %v8558_v9, %v8558_v9 }
0x3fd1   :  { %8565 = vadd.xlane.f32.xlu1 %v8564_v20  ;;  %8572 = vadd.xlane.f32.xlu0 %v8571_v55 }
0x3fd2   :  { %v8574_v7 = vsel %vm694_vm2, %v8570_v56, 0.0 }
0x3fd5   :  { %8575 = vadd.xlane.f32.xlu1 %v8574_v7 }
0x4056   :  { %v8563_v54 = vpop.xlane.xlu0 %8562 }
0x4057   :  { %v8567_v18 = vmul.f32 0.015625, %v8563_v54 }
0x4059   :  { %v8579_v51 = vmul.f32 %v8567_v18, %v8567_v18  ;;  %v8585_v34 = vsub.f32 %v8557_v24, %v8567_v18 }
0x405a   :  { %v8566_v30 = vpop.xlane.xlu1 %8565  ;;  %v8573_v10 = vpop.xlane.xlu0 %8572 }
0x405b   :  { %v8568_v49 = vmul.f32 0.015625, %v8566_v30  ;;  %v8577_v50 = vmul.f32 0.015625, %v8573_v10 }
0x405d   :  { %v8581_v47 = vsub.f32 %v8577_v50, %v8579_v51  ;;  %v8580_v27 = vmul.f32 %v8568_v49, %v8568_v49  ;;  %v8586_v41 = vsub.f32 %v8558_v9, %v8568_v49  ;;  %v6373_v49 = vsub.s32 2, %v13356_v25 }
0x405e   :  { %v8576_v39 = vpop.xlane.xlu1 %8575 }
0x405f   :  { %v8583_v16 = vmax.f32 %v8581_v47, 0.0  ;;  %v8578_v52 = vmul.f32 0.015625, %v8576_v39  ;;  %v10934_v39 = vld [vmem:[%s15462_s18 + $0x18] ss:$0 sm:$0xff] }
0x4061   :  { %v8587_v48 = vadd.f32 1e-05, %v8583_v16  ;;  %v8582_v15 = vsub.f32 %v8578_v52, %v8580_v27  ;;  %v12442_v27 = vld [vmem:[%s15459_s15] sm:$0x7] }
0x4062   :  { %v6374_v16 = vrot.slane %v12442_v27, %v6373_v49 }
0x4063   :  { %12410 = vrsqrt.f32 %v8587_v48  ;;  %v8584_v45 = vmax.f32 %v8582_v15, 0.0  ;;  %v10935_v48 = vld [vmem:[%s15462_s18 + $0x19] ss:$0 sm:$0xff] }
0x4064   :  { %v15278_v25 = vadd.f32 %v14981_v36, %v6374_v16 }
0x4065   :  { %v8588_v46 = vadd.f32 1e-05, %v8584_v45 }
0x4067   :  { %12412 = vrsqrt.f32 %v8588_v46 }
0x4070   :  { %v12411_v13 = vpop.eup %12410 }
0x4071   :  { %v8591_v43 = vmul.f32 %v12411_v13, %v8585_v34 }
0x4073   :  { %v8597_v38 = vmul.f32 %v10926_v14, %v8591_v43 }
0x4074   :  { %v12413_v42 = vpop.eup %12412 }
0x4075   :  { %v8592_v23 = vmul.f32 %v12413_v42, %v8586_v41  ;;  %v8603_v4 = vadd.f32 %v10927_v35, %v8597_v38  ;;  %v15284_v41 = vadd.f32 %v14983_v8, %v6374_v16 }
0x4077   :  { %v8598_v3 = vmul.f32 %v10926_v14, %v8592_v23 }
0x4079   :  { %v8604_v1 = vadd.f32 %v10927_v35, %v8598_v3 }
0x407b   :  { %v8614_v2 = vpack.c.bf16 %v8604_v1, %v8603_v4 }
0x407d   :  { %11726 = vmatmul.mubr.msk.bf16.vlgmr.msra.gmra.mxu0 %vm694_vm2, %v8614_v2  ;;  %v10945_v2 = vcombine.low %v12874_v11, %v12879_v12 }
0x407e   :  { %8882 = vmatprep.mubr.bf16.mxu0 %v15520_v32 }
0x413d   :  { %v8681_v22 = vpop.f32.mrf.mxu0 }
0x413e   :  { %v8682_v63 = vadd.f32 %v10928_v6, %v8681_v22  ;;  %v15522_v22 = vld [vmem:[#allocation20_spill] sm:$0xff] }
0x413f   :  { %v11727_v0 = vpop.f32.mrf.mxu0 }
0x4140   :  { %v8688_v40 = vadd.f32 %v8682_v63, %v8603_v4 }
0x4141   :  { %v8684_v37 = vpop.f32.mrf.mxu0 }
0x4142   :  { %v8685_v61 = vadd.f32 %v10928_v6, %v8684_v37  ;;  %v8692_v62 = vsel %vm694_vm2, %v8688_v40, 0.0  ;;  %v8700_v17 = vmul.f32 %v8688_v40, %v8688_v40  ;;  %v15521_v6 = vld [vmem:[#allocation21_spill] sm:$0xff]  ;;  %v15524_v37 = vld [vmem:[#allocation18_spill] sm:$0xff] }
0x4143   :  { %8693 = vadd.xlane.f32.xlu0 %v8692_v62  ;;  %v11728_v31 = vpop.f32.mrf.mxu0  ;;  %v10944_v63 = vcombine.high %v15522_v22, %v15521_v6  ;;  %v10943_v0 = vcombine.low %v15522_v22, %v15521_v6 }
0x4144   :  { %v8689_v28 = vadd.f32 %v8685_v61, %v8604_v1  ;;  %v8702_v21 = vsel %vm694_vm2, %v8700_v17, 0.0  ;;  %v10946_v1 = vcombine.high %v12874_v11, %v12879_v12  ;;  %v15525_v17 = vld [vmem:[#allocation17_spill] sm:$0xff]  ;;  %v15526_v31 = vld [vmem:[#allocation16_spill] sm:$0xff] }
0x4145   :  { %v10940_v11 = vcombine.high %v15526_v31, %v15525_v17  ;;  %v10939_v12 = vcombine.low %v15526_v31, %v15525_v17 }
0x4146   :  { %v8695_v24 = vsel %vm694_vm2, %v8689_v28, 0.0  ;;  %v8701_v59 = vmul.f32 %v8689_v28, %v8689_v28  ;;  %8858 = vmatprep.subr.bf16.mxu0 %v10946_v1  ;;  %v12345_v1 = vld [vmem:[#allocation5 + $0x200] sm:$0xff]  }
0x4147   :  { %8703 = vadd.xlane.f32.xlu0 %v8702_v21  ;;  %8696 = vadd.xlane.f32.xlu1 %v8695_v24  ;;  %v12331_v21 = vld [vmem:[#allocation5 + $0x238] sm:$0xff]   ;;  %v12332_v24 = vld [vmem:[#allocation5 + $0x270] sm:$0xff]  }
0x4148   :  { %v8705_v60 = vsel %vm694_vm2, %v8701_v59, 0.0  ;;  %8859 = vmatpush1.bf16.msra.mxu0 %v10945_v2  ;;  %v12333_v59 = vld [vmem:[#allocation5 + $0x230] sm:$0xff]   ;;  %v10938_v2 = vld [vmem:[%s15460_s16 + $0x4] ss:$8 sm:$0x3] }
0x4149   :  { %8860 = vmatprep.subr.bf16.mxu0 %v10944_v63  ;;  %v8804_v22 = vrot.slane %v10938_v2, %v13359_v26  ;;  %v8800_v63 = vrot.slane %v10938_v2, %v13362_v29 }
0x414b   :  { %8706 = vadd.xlane.f32.xlu1 %v8705_v60  ;;  %v12334_v60 = vld [vmem:[#allocation5 + $0x268] sm:$0xff]  }
0x414c   :  { %8861 = vmatpush1.bf16.msra.mxu0 %v10943_v0 }
0x41cc   :  { %v8694_v57 = vpop.xlane.xlu0 %8693 }
0x41cd   :  { %v8698_v58 = vmul.f32 0.015625, %v8694_v57  ;;  %v12335_v57 = vld [vmem:[#allocation5 + $0x228] sm:$0xff]  }
0x41cf   :  { %v8710_v55 = vmul.f32 %v8698_v58, %v8698_v58  ;;  %v8716_v50 = vsub.f32 %v8688_v40, %v8698_v58  ;;  %v15523_v40 = vld [vmem:[#allocation19_spill] sm:$0xff] }
0x41d0   :  { %v8704_v9 = vpop.xlane.xlu0 %8703  ;;  %v8697_v20 = vpop.xlane.xlu1 %8696  ;;  %v10942_v61 = vcombine.high %v15524_v37, %v15523_v40  ;;  %v10941_v62 = vcombine.low %v15524_v37, %v15523_v40  ;;  %v12336_v58 = vld [vmem:[#allocation5 + $0x260] sm:$0xff]  }
0x41d1   :  { %v8708_v56 = vmul.f32 0.015625, %v8704_v9  ;;  %v8699_v7 = vmul.f32 0.015625, %v8697_v20  ;;  %v12337_v9 = vld [vmem:[#allocation5 + $0x220] sm:$0xff]   ;;  %v12338_v20 = vld [vmem:[#allocation5 + $0x258] sm:$0xff]  }
0x41d2   :  { %8862 = vmatprep.subr.bf16.mxu0 %v10942_v61 }
0x41d3   :  { %v8712_v44 = vsub.f32 %v8708_v56, %v8710_v55  ;;  %v8711_v53 = vmul.f32 %v8699_v7, %v8699_v7  ;;  %v8717_v15 = vsub.f32 %v8689_v28, %v8699_v7  ;;  %8863 = vmatpush1.bf16.msra.mxu0 %v10941_v62  ;;  %v12330_v28 = vld [vmem:[#allocation5 + $0x278] sm:$0xff]  }
0x41d4   :  { %v8707_v33 = vpop.xlane.xlu1 %8706  ;;  %8864 = vmatprep.subr.bf16.mxu0 %v10940_v11  ;;  %11458 = vmatprep.subr.bf16.mxu1 %v12330_v28  ;;  %v12339_v55 = vld [vmem:[#allocation5 + $0x218] sm:$0xff]  }
0x41d5   :  { %v8714_v5 = vmax.f32 %v8712_v44, 0.0  ;;  %v8709_v54 = vmul.f32 0.015625, %v8707_v33  ;;  %11459 = vmatpush3.bf16.msra.mxu1 %v12331_v21 }
0x41d6   :  { %11460 = vmatprep.subr.bf16.mxu1 %v12332_v24 }
0x41d7   :  { %v8718_v18 = vadd.f32 1e-05, %v8714_v5  ;;  %v8713_v30 = vsub.f32 %v8709_v54, %v8711_v53  ;;  %8865 = vmatpush1.bf16.msra.mxu0 %v10939_v12 }
0x41d8   :  { %11729 = vmatprep.subr.bf16.mxu0 %v15519_v19 }
0x41d9   :  { %12414 = vrsqrt.f32 %v8718_v18  ;;  %v8715_v10 = vmax.f32 %v8713_v30, 0.0  ;;  %11461 = vmatpush3.bf16.msra.mxu1 %v12333_v59 }
0x41da   :  { %11462 = vmatprep.subr.bf16.mxu1 %v12334_v60 }
0x41db   :  { %v8719_v51 = vadd.f32 1e-05, %v8715_v10 }
0x41dd   :  { %12416 = vrsqrt.f32 %v8719_v51  ;;  %11463 = vmatpush3.bf16.msra.mxu1 %v12335_v57  ;;  %v10948_v57 = vld [vmem:[%s15461_s17 + $0x4] ss:$0 sm:$0xff] }
0x41de   :  { %11464 = vmatprep.subr.bf16.mxu1 %v12336_v58 }
0x41e1   :  { %11465 = vmatpush3.bf16.msra.mxu1 %v12337_v9 }
0x41e2   :  { %11466 = vmatprep.subr.bf16.mxu1 %v12338_v20 }
0x41e5   :  { %11467 = vmatpush3.bf16.msra.mxu1 %v12339_v55 }
0x41e6   :  { %v12415_v47 = vpop.eup %12414 }
0x41e7   :  { %v8722_v52 = vmul.f32 %v12415_v47, %v8716_v50 }
0x41e9   :  { %v8728_v45 = vmul.f32 %v10934_v39, %v8722_v52 }
0x41ea   :  { %v12417_v46 = vpop.eup %12416 }
0x41eb   :  { %v8734_v34 = vadd.f32 %v10935_v48, %v8728_v45  ;;  %v8723_v13 = vmul.f32 %v12417_v46, %v8717_v15  ;;  %v10936_v15 = vld [vmem:[%s15462_s18 + $0x1a] ss:$0 sm:$0xff] }
0x41ed   :  { %v15281_v43 = vadd.f32 %v8734_v34, %v15278_v25  ;;  %v8729_v14 = vmul.f32 %v10934_v39, %v8723_v13 }
0x41ef   :  { %v8740_v42 = vsel %vm694_vm2, %v15281_v43, 0.0  ;;  %v8748_v23 = vmul.f32 %v15281_v43, %v15281_v43  ;;  %v8735_v38 = vadd.f32 %v10935_v48, %v8729_v14  ;;  %v10937_v14 = vld [vmem:[%s15462_s18 + $0x1b] ss:$0 sm:$0xff] }
0x41f0   :  { %8741 = vadd.xlane.f32.xlu0 %v8740_v42 }
0x41f1   :  { %v15291_v36 = vadd.f32 %v8735_v38, %v15284_v41  ;;  %v8750_v35 = vsel %vm694_vm2, %v8748_v23, 0.0 }
0x41f3   :  { %v8743_v3 = vsel %vm694_vm2, %v15291_v36, 0.0  ;;  %v8749_v8 = vmul.f32 %v15291_v36, %v15291_v36 }
0x41f4   :  { %8751 = vadd.xlane.f32.xlu0 %v8750_v35  ;;  %8744 = vadd.xlane.f32.xlu1 %v8743_v3  ;;  %v12341_v3 = vld [vmem:[#allocation5 + $0x210] sm:$0xff]  }
0x41f5   :  { %v8753_v4 = vsel %vm694_vm2, %v8749_v8, 0.0  ;;  %v12343_v8 = vld [vmem:[#allocation5 + $0x208] sm:$0xff]  }
0x41f8   :  { %8754 = vadd.xlane.f32.xlu1 %v8753_v4  ;;  %v12344_v4 = vld [vmem:[#allocation5 + $0x240] sm:$0xff]  }
0x4279   :  { %v8742_v56 = vpop.xlane.xlu0 %8741 }
0x427a   :  { %v8746_v7 = vmul.f32 0.015625, %v8742_v56 }
0x427c   :  { %v8758_v5 = vmul.f32 %v8746_v7, %v8746_v7  ;;  %v8764_v16 = vsub.f32 %v15281_v43, %v8746_v7  ;;  %v12340_v43 = vld [vmem:[#allocation5 + $0x250] sm:$0xff]  }
0x427d   :  { %v8752_v44 = vpop.xlane.xlu0 %8751  ;;  %v8745_v33 = vpop.xlane.xlu1 %8744  ;;  %11468 = vmatprep.subr.bf16.mxu1 %v12340_v43 }
0x427e   :  { %v8756_v53 = vmul.f32 0.015625, %v8752_v44  ;;  %v8747_v54 = vmul.f32 0.015625, %v8745_v33  ;;  %11469 = vmatpush3.bf16.msra.mxu1 %v12341_v3 }
0x4280   :  { %v8760_v18 = vsub.f32 %v8756_v53, %v8758_v5  ;;  %v8759_v51 = vmul.f32 %v8747_v54, %v8747_v54  ;;  %v8765_v45 = vsub.f32 %v15291_v36, %v8747_v54  ;;  %v12342_v36 = vld [vmem:[#allocation5 + $0x248] sm:$0xff]  }
0x4281   :  { %v8755_v30 = vpop.xlane.xlu1 %8754  ;;  %11470 = vmatprep.subr.bf16.mxu1 %v12342_v36 }
0x4282   :  { %v8762_v10 = vmax.f32 %v8760_v18, 0.0  ;;  %v8757_v49 = vmul.f32 0.015625, %v8755_v30  ;;  %11471 = vmatpush3.bf16.msra.mxu1 %v12343_v8 }
0x4283   :  { %11472 = vmatprep.subr.bf16.mxu1 %v12344_v4  ;;  %v10965_v4 = vld [vmem:[%s15462_s18 + $0x1c] ss:$0 sm:$0xff] }
0x4284   :  { %v8766_v50 = vadd.f32 1e-05, %v8762_v10  ;;  %v8761_v47 = vsub.f32 %v8757_v49, %v8759_v51  ;;  %v12346_v49 = vld [vmem:[#allocation2 + $0xb8] sm:$0xff]  }
0x4286   :  { %12418 = vrsqrt.f32 %v8766_v50  ;;  %v8763_v39 = vmax.f32 %v8761_v47, 0.0  ;;  %11473 = vmatpush3.bf16.msra.mxu1 %v12345_v1  ;;  %v12347_v50 = vld [vmem:[#allocation2 + $0xb0] sm:$0xff]   ;;  %v12348_v47 = vld [vmem:[#allocation2 + $0xa8] sm:$0xff]  }
0x4288   :  { %v8767_v27 = vadd.f32 1e-05, %v8763_v39  ;;  %v12349_v39 = vld [vmem:[#allocation2 + $0xa0] sm:$0xff]  }
0x428a   :  { %12420 = vrsqrt.f32 %v8767_v27 }
0x4293   :  { %v12419_v52 = vpop.eup %12418 }
0x4294   :  { %v8770_v48 = vmul.f32 %v12419_v52, %v8764_v16 }
0x4296   :  { %v8776_v13 = vmul.f32 %v10936_v15, %v8770_v48 }
0x4297   :  { %v12421_v46 = vpop.eup %12420 }
0x4298   :  { %v8771_v34 = vmul.f32 %v12421_v46, %v8765_v45  ;;  %v8782_v23 = vadd.f32 %v10937_v14, %v8776_v13 }
0x429a   :  { %v8777_v42 = vmul.f32 %v10936_v15, %v8771_v34 }
0x429c   :  { %v8783_v38 = vadd.f32 %v10937_v14, %v8777_v42 }
0x429e   :  { %v8793_v35 = vpack.c.bf16 %v8783_v38, %v8782_v23 }
0x42a0   :  { %10947 = vmatmul.mubr.msk.bf16.vlgmr.msra.gmra.mxu0 %vm694_vm2, %v8793_v35 }
0x42a1   :  { %11737 = vmatprep.mubr.msk.bf16.mxu0 %vm12452_vm0, %v15519_v19  ;;  %11730 = vmatpush3.bf16.msra.mxu0 %v12346_v49 }
0x42a2   :  { %11731 = vmatprep.subr.bf16.mxu0 %v15519_v19 }
0x42a5   :  { %11732 = vmatpush3.bf16.msra.mxu0 %v12347_v50 }
0x42a6   :  { %11733 = vmatprep.subr.bf16.mxu0 %v15519_v19 }
0x42a9   :  { %11734 = vmatpush3.bf16.msra.mxu0 %v12348_v47 }
0x42aa   :  { %11735 = vmatprep.subr.bf16.mxu0 %v15519_v19 }
0x42ad   :  { %11736 = vmatpush3.bf16.msra.mxu0 %v12349_v39 }
0x4360   :  { %v8884_v6 = vpop.f32.mrf.mxu0 }
0x4361   :  { %v8885_v62 = vadd.f32 %v8884_v6, %v8800_v63 }
0x4362   :  { %v8886_v0 = vpop.f32.mrf.mxu0 }
0x4363   :  { %v8887_v37 = vadd.f32 %v8886_v0, %v8804_v22  ;;  %v8893_v21 = vmax.f32 %v8885_v62, 0.0  ;;  %v10967_v62 = vld [vmem:[%s15458_s14 + $0x5] ss:$0 sm:$0xff] }
0x4364   :  { %v8888_v40 = vpop.f32.mrf.mxu0 }
0x4365   :  { %v8889_v61 = vadd.f32 %v8888_v40, %v8800_v63  ;;  %v8894_v12 = vmax.f32 %v8887_v37, 0.0  ;;  %v10966_v63 = vld [vmem:[%s15462_s18 + $0x1d] ss:$0 sm:$0xff] }
0x4366   :  { %v8890_v17 = vpop.f32.mrf.mxu0 }
0x4367   :  { %v8891_v31 = vadd.f32 %v8890_v17, %v8804_v22  ;;  %v8895_v11 = vmax.f32 %v8889_v61, 0.0 }
0x4369   :  { %v8896_v28 = vmax.f32 %v8891_v31, 0.0  ;;  %v8930_v59 = vpack.c.bf16 %v8895_v11, %v8893_v21 }
0x436b   :  { %v8931_v24 = vpack.c.bf16 %v8896_v28, %v8894_v12 }
0x436d   :  { %9065 = vmatprep.mubr.bf16.mxu1 %v8931_v24 }
0x436e   :  { %9066 = vmatmul.mubr.bf16.vlgmr.msra.gmra.mxu1 %v8930_v59 }
0x442e   :  { %v11474_v60 = vpop.f32.mrf.mxu1 }
0x4430   :  { %v11475_v58 = vpop.f32.mrf.mxu1 }
0x4431   :  { %v11476_v9 = vadd.f32 %v11475_v58, %v11474_v60 }
0x4432   :  { %v11477_v20 = vpop.f32.mrf.mxu1 }
0x4433   :  { %v9068_v55 = vadd.f32 %v11476_v9, %v10948_v57 }
0x4434   :  { %v11478_v56 = vpop.f32.mrf.mxu1 }
0x4435   :  { %v9074_v7 = vadd.f32 %v9068_v55, %v8782_v23  ;;  %v11479_v44 = vadd.f32 %v11478_v56, %v11477_v20 }
0x4437   :  { %v9071_v33 = vadd.f32 %v11479_v44, %v10948_v57  ;;  %v9078_v5 = vsel %vm694_vm2, %v9074_v7, 0.0  ;;  %v9086_v53 = vmul.f32 %v9074_v7, %v9074_v7 }
0x4438   :  { %9079 = vadd.xlane.f32.xlu0 %v9078_v5 }
0x4439   :  { %v9075_v54 = vadd.f32 %v9071_v33, %v8783_v38  ;;  %v9088_v30 = vsel %vm694_vm2, %v9086_v53, 0.0 }
0x443b   :  { %v9081_v18 = vsel %vm694_vm2, %v9075_v54, 0.0  ;;  %v9087_v10 = vmul.f32 %v9075_v54, %v9075_v54 }
0x443c   :  { %9082 = vadd.xlane.f32.xlu1 %v9081_v18  ;;  %9089 = vadd.xlane.f32.xlu0 %v9088_v30 }
0x443d   :  { %v9091_v51 = vsel %vm694_vm2, %v9087_v10, 0.0 }
0x4440   :  { %9092 = vadd.xlane.f32.xlu1 %v9091_v51 }
0x44c1   :  { %v9080_v27 = vpop.xlane.xlu0 %9079 }
0x44c2   :  { %v9084_v16 = vmul.f32 0.015625, %v9080_v27  ;;  %v10973_v27 = vld [vmem:[%s15462_s18 + $0x1e] ss:$0 sm:$0xff] }
0x44c4   :  { %v9096_v15 = vmul.f32 %v9084_v16, %v9084_v16  ;;  %v9102_v19 = vsub.f32 %v9074_v7, %v9084_v16 }
0x44c5   :  { %v9083_v52 = vpop.xlane.xlu1 %9082  ;;  %v9090_v48 = vpop.xlane.xlu0 %9089 }
0x44c6   :  { %v9085_v45 = vmul.f32 0.015625, %v9083_v52  ;;  %v9094_v46 = vmul.f32 0.015625, %v9090_v48  ;;  %v10974_v52 = vld [vmem:[%s15462_s18 + $0x1f] ss:$0 sm:$0xff] }
0x44c8   :  { %v9098_v34 = vsub.f32 %v9094_v46, %v9096_v15  ;;  %v9097_v14 = vmul.f32 %v9085_v45, %v9085_v45  ;;  %v9103_v1 = vsub.f32 %v9075_v54, %v9085_v45 }
0x44c9   :  { %v9093_v13 = vpop.xlane.xlu1 %9092 }
0x44ca   :  { %v9100_v42 = vmax.f32 %v9098_v34, 0.0  ;;  %v9095_v23 = vmul.f32 0.015625, %v9093_v13 }
0x44cc   :  { %v9104_v38 = vadd.f32 1e-05, %v9100_v42  ;;  %v9099_v35 = vsub.f32 %v9095_v23, %v9097_v14 }
0x44ce   :  { %12422 = vrsqrt.f32 %v9104_v38  ;;  %v9101_v43 = vmax.f32 %v9099_v35, 0.0 }
0x44d0   :  { %v9105_v3 = vadd.f32 1e-05, %v9101_v43 }
0x44d2   :  { %12424 = vrsqrt.f32 %v9105_v3 }
0x44db   :  { %v12423_v36 = vpop.eup %12422 }
0x44dc   :  { %v9108_v8 = vmul.f32 %v12423_v36, %v9102_v19 }
0x44de   :  { %v9114_v22 = vmul.f32 %v10965_v4, %v9108_v8 }
0x44df   :  { %v12425_v2 = vpop.eup %12424 }
0x44e0   :  { %v9109_v6 = vmul.f32 %v12425_v2, %v9103_v1  ;;  %v9120_v40 = vadd.f32 %v10966_v63, %v9114_v22  ;;  %v15527_v1 = vld [vmem:[#allocation29_spill] sm:$0xff]  ;;  %v15528_v2 = vld [vmem:[#allocation28_spill] sm:$0xff] }
0x44e1   :  { %v10984_v22 = vcombine.low %v15528_v2, %v15527_v1 }
0x44e2   :  { %v9115_v0 = vmul.f32 %v10965_v4, %v9109_v6  ;;  %v10985_v6 = vcombine.high %v15528_v2, %v15527_v1 }
0x44e4   :  { %v9121_v37 = vadd.f32 %v10966_v63, %v9115_v0  ;;  %v15529_v63 = vld [vmem:[#allocation27_spill] sm:$0xff]  ;;  %v15530_v0 = vld [vmem:[#allocation26_spill] sm:$0xff]  ;;  %9383 = vmatprep.subr.bf16.mxu0 %v10985_v6 }
0x44e6   :  { %v9131_v61 = vpack.c.bf16 %v9121_v37, %v9120_v40 }
0x44e8   :  { %11738 = vmatmul.mubr.msk.bf16.vlgmr.msra.gmra.mxu0 %vm694_vm2, %v9131_v61  ;;  %v15531_v61 = vld [vmem:[#allocation25_spill] sm:$0xff] }
0x44e9   :  { %9407 = vmatprep.mubr.bf16.mxu0 %v15520_v32  ;;  %9384 = vmatpush1.bf16.msra.mxu0 %v10984_v22 }
0x45a8   :  { %v9198_v17 = vpop.f32.mrf.mxu0 }
0x45a9   :  { %v9199_v31 = vadd.f32 %v10967_v62, %v9198_v17 }
0x45aa   :  { %v11739_v11 = vpop.f32.mrf.mxu0 }
0x45ab   :  { %v9205_v12 = vadd.f32 %v9199_v31, %v9120_v40  ;;  %v10983_v40 = vcombine.high %v15530_v0, %v15529_v63  ;;  %v15533_v11 = vld [vmem:[#allocation23_spill] sm:$0xff] }
0x45ac   :  { %v9201_v28 = vpop.f32.mrf.mxu0 }
0x45ad   :  { %v9202_v21 = vadd.f32 %v10967_v62, %v9201_v28  ;;  %v9209_v24 = vsel %vm694_vm2, %v9205_v12, 0.0  ;;  %v9217_v59 = vmul.f32 %v9205_v12, %v9205_v12  ;;  %9385 = vmatprep.subr.bf16.mxu0 %v10983_v40  ;;  %v15532_v62 = vld [vmem:[#allocation24_spill] sm:$0xff] }
0x45ae   :  { %9210 = vadd.xlane.f32.xlu0 %v9209_v24  ;;  %v11740_v60 = vpop.f32.mrf.mxu0  ;;  %v10981_v17 = vcombine.high %v15532_v62, %v15531_v61  ;;  %v10980_v31 = vcombine.low %v15532_v62, %v15531_v61  ;;  %v12350_v24 = vld [vmem:[#allocation5 + $0x2f8] sm:$0xff]  }
0x45af   :  { %v9206_v57 = vadd.f32 %v9202_v21, %v9121_v37  ;;  %v9219_v58 = vsel %vm694_vm2, %v9217_v59, 0.0  ;;  %v10982_v37 = vcombine.low %v15530_v0, %v15529_v63  ;;  %v12351_v59 = vld [vmem:[#allocation5 + $0x2b8] sm:$0xff]   ;;  %v12352_v60 = vld [vmem:[#allocation5 + $0x2f0] sm:$0xff]   ;;  %11485 = vmatprep.subr.bf16.mxu1 %v12350_v24 }
0x45b0   :  { %11486 = vmatpush3.bf16.msra.mxu1 %v12351_v59 }
0x45b1   :  { %v9212_v32 = vsel %vm694_vm2, %v9206_v57, 0.0  ;;  %v9218_v9 = vmul.f32 %v9206_v57, %v9206_v57  ;;  %9386 = vmatpush1.bf16.msra.mxu0 %v10982_v37  ;;  %11487 = vmatprep.subr.bf16.mxu1 %v12352_v60 }
0x45b2   :  { %9220 = vadd.xlane.f32.xlu0 %v9219_v58  ;;  %9213 = vadd.xlane.f32.xlu1 %v9212_v32  ;;  %v12354_v58 = vld [vmem:[#allocation5 + $0x2e8] sm:$0xff]  }
0x45b3   :  { %v9222_v20 = vsel %vm694_vm2, %v9218_v9, 0.0  ;;  %9387 = vmatprep.subr.bf16.mxu0 %v10981_v17  ;;  %v12355_v32 = vld [vmem:[#allocation5 + $0x2a8] sm:$0xff]   ;;  %v12356_v9 = vld [vmem:[#allocation5 + $0x2e0] sm:$0xff]  }
0x45b5   :  { %9388 = vmatpush1.bf16.msra.mxu0 %v10980_v31 }
0x45b6   :  { %9223 = vadd.xlane.f32.xlu1 %v9222_v20  ;;  %v12357_v20 = vld [vmem:[#allocation5 + $0x2a0] sm:$0xff]  }
0x45c7   :  { %9257 = vrot.lane.b32.xlu1 %v15284_v41, %s12454_s0 }
0x45c8   :  { %9255 = vrot.lane.b32.xlu0 %v15278_v25, %s12454_s0 }
0x4637   :  { %v9211_v55 = vpop.xlane.xlu0 %9210 }
0x4638   :  { %v9215_v56 = vmul.f32 0.015625, %v9211_v55  ;;  %v12358_v55 = vld [vmem:[#allocation5 + $0x2d8] sm:$0xff]  }
0x463a   :  { %v9227_v33 = vmul.f32 %v9215_v56, %v9215_v56  ;;  %v9233_v39 = vsub.f32 %v9205_v12, %v9215_v56  ;;  %v15534_v12 = vld [vmem:[#allocation22_spill] sm:$0xff] }
0x463b   :  { %v9221_v7 = vpop.xlane.xlu0 %9220  ;;  %v9214_v44 = vpop.xlane.xlu1 %9213  ;;  %v10979_v28 = vcombine.high %v15534_v12, %v15533_v11  ;;  %v10978_v21 = vcombine.low %v15534_v12, %v15533_v11  ;;  %v12359_v56 = vld [vmem:[#allocation5 + $0x298] sm:$0xff]  }
0x463c   :  { %v9225_v5 = vmul.f32 0.015625, %v9221_v7  ;;  %v9216_v53 = vmul.f32 0.015625, %v9214_v44 }
0x463d   :  { %9389 = vmatprep.subr.bf16.mxu0 %v10979_v28 }
0x463e   :  { %v9229_v54 = vsub.f32 %v9225_v5, %v9227_v33  ;;  %v9228_v10 = vmul.f32 %v9216_v53, %v9216_v53  ;;  %v9234_v48 = vsub.f32 %v9206_v57, %v9216_v53  ;;  %9390 = vmatpush1.bf16.msra.mxu0 %v10978_v21  ;;  %v12353_v57 = vld [vmem:[#allocation5 + $0x2b0] sm:$0xff]  }
0x463f   :  { %v9224_v18 = vpop.xlane.xlu1 %9223  ;;  %v9256_v13 = vpop.permute.xlu0 %9255  ;;  %11488 = vmatpush3.bf16.msra.mxu1 %v12353_v57 }
0x4640   :  { %v9231_v30 = vmax.f32 %v9229_v54, 0.0  ;;  %v9226_v51 = vmul.f32 0.015625, %v9224_v18  ;;  %11489 = vmatprep.subr.bf16.mxu1 %v12354_v58 }
0x4642   :  { %v9235_v49 = vadd.f32 1e-05, %v9231_v30  ;;  %v9230_v50 = vsub.f32 %v9226_v51, %v9228_v10 }
0x4643   :  { %v9258_v35 = vpop.permute.xlu1 %9257  ;;  %11490 = vmatpush3.bf16.msra.mxu1 %v12355_v32 }
0x4644   :  { %12426 = vrsqrt.f32 %v9235_v49  ;;  %v9232_v47 = vmax.f32 %v9230_v50, 0.0  ;;  %11491 = vmatprep.subr.bf16.mxu1 %v12356_v9 }
0x4646   :  { %v9236_v41 = vadd.f32 1e-05, %v9232_v47 }
0x4647   :  { %11492 = vmatpush3.bf16.msra.mxu1 %v12357_v20 }
0x4648   :  { %12428 = vrsqrt.f32 %v9236_v41  ;;  %11493 = vmatprep.subr.bf16.mxu1 %v12358_v55 }
0x464b   :  { %11494 = vmatpush3.bf16.msra.mxu1 %v12359_v56 }
0x4651   :  { %v12427_v25 = vpop.eup %12426 }
0x4652   :  { %v9239_v16 = vmul.f32 %v12427_v25, %v9233_v39 }
0x4654   :  { %v9245_v15 = vmul.f32 %v10973_v27, %v9239_v16 }
0x4655   :  { %v12429_v45 = vpop.eup %12428 }
0x4656   :  { %v9251_v46 = vadd.f32 %v10974_v52, %v9245_v15  ;;  %v9240_v34 = vmul.f32 %v12429_v45, %v9234_v48 }
0x4658   :  { %v15367_v14 = vadd.f32 %v9256_v13, %v9251_v46  ;;  %v9246_v42 = vmul.f32 %v10973_v27, %v9240_v34  ;;  %v10976_v13 = vld [vmem:[%s15462_s18 + $0x21] ss:$0 sm:$0xff] }
0x465a   :  { %v9252_v23 = vadd.f32 %v10974_v52, %v9246_v42  ;;  %v9265_v38 = vsel %vm694_vm2, %v15367_v14, 0.0  ;;  %v9273_v36 = vmul.f32 %v15367_v14, %v15367_v14  ;;  %v10975_v52 = vld [vmem:[%s15462_s18 + $0x20] ss:$0 sm:$0xff] }
0x465b   :  { %9266 = vadd.xlane.f32.xlu1 %v9265_v38 }
0x465c   :  { %v15371_v43 = vadd.f32 %v9258_v35, %v9252_v23  ;;  %v9275_v4 = vsel %vm694_vm2, %v9273_v36, 0.0  ;;  %v12364_v36 = vld [vmem:[#allocation5 + $0x2c0] sm:$0xff]  }
0x465e   :  { %v9268_v3 = vsel %vm694_vm2, %v15371_v43, 0.0  ;;  %v9274_v19 = vmul.f32 %v15371_v43, %v15371_v43 }
0x465f   :  { %9269 = vadd.xlane.f32.xlu0 %v9268_v3  ;;  %v12361_v3 = vld [vmem:[#allocation5 + $0x290] sm:$0xff]  }
0x4660   :  { %v9278_v8 = vsel %vm694_vm2, %v9274_v19, 0.0  ;;  %v12362_v19 = vld [vmem:[#allocation5 + $0x2c8] sm:$0xff]  }
0x4661   :  { %9279 = vadd.xlane.f32.xlu1 %v9278_v8  ;;  %v12365_v8 = vld [vmem:[#allocation5 + $0x280] sm:$0xff]  }
0x4663   :  { %9276 = vadd.xlane.f32.xlu0 %v9275_v4  ;;  %v10977_v4 = vld [vmem:[%s15460_s16 + $0x5] ss:$8 sm:$0x3] }
0x4664   :  { %v9329_v2 = vrot.slane %v10977_v4, %v13359_v26  ;;  %v9325_v6 = vrot.slane %v10977_v4, %v13362_v29  ;;  %v10987_v26 = vld [vmem:[%s15461_s17 + $0x5] ss:$0 sm:$0xff] }
0x46e4   :  { %v9267_v7 = vpop.xlane.xlu1 %9266 }
0x46e5   :  { %v9271_v33 = vmul.f32 0.015625, %v9267_v7 }
0x46e7   :  { %v9283_v10 = vmul.f32 %v9271_v33, %v9271_v33  ;;  %v9289_v48 = vsub.f32 %v15367_v14, %v9271_v33  ;;  %v12363_v14 = vld [vmem:[#allocation5 + $0x288] sm:$0xff]  }
0x46e8   :  { %v9270_v44 = vpop.xlane.xlu0 %9269 }
0x46e9   :  { %v9272_v5 = vmul.f32 0.015625, %v9270_v44 }
0x46ea   :  { %v9280_v53 = vpop.xlane.xlu1 %9279 }
0x46eb   :  { %v9284_v54 = vmul.f32 %v9272_v5, %v9272_v5  ;;  %v9282_v18 = vmul.f32 0.015625, %v9280_v53  ;;  %v9290_v27 = vsub.f32 %v15371_v43, %v9272_v5  ;;  %v12360_v43 = vld [vmem:[#allocation5 + $0x2d0] sm:$0xff]  }
0x46ec   :  { %v9277_v30 = vpop.xlane.xlu0 %9276  ;;  %11495 = vmatprep.subr.bf16.mxu1 %v12360_v43 }
0x46ed   :  { %v9286_v51 = vsub.f32 %v9282_v18, %v9284_v54  ;;  %v9281_v49 = vmul.f32 0.015625, %v9277_v30  ;;  %11496 = vmatpush3.bf16.msra.mxu1 %v12361_v3 }
0x46ee   :  { %11497 = vmatprep.subr.bf16.mxu1 %v12362_v19 }
0x46ef   :  { %v9288_v50 = vmax.f32 %v9286_v51, 0.0  ;;  %v9285_v47 = vsub.f32 %v9281_v49, %v9283_v10 }
0x46f1   :  { %v9292_v41 = vadd.f32 1e-05, %v9288_v50  ;;  %v9287_v39 = vmax.f32 %v9285_v47, 0.0  ;;  %11498 = vmatpush3.bf16.msra.mxu1 %v12363_v14 }
0x46f2   :  { %11499 = vmatprep.subr.bf16.mxu1 %v12364_v36 }
0x46f3   :  { %12430 = vrsqrt.f32 %v9292_v41  ;;  %v9291_v25 = vadd.f32 1e-05, %v9287_v39 }
0x46f5   :  { %12432 = vrsqrt.f32 %v9291_v25  ;;  %11500 = vmatpush3.bf16.msra.mxu1 %v12365_v8 }
0x4700   :  { %v12431_v16 = vpop.eup %12430 }
0x4701   :  { %v9296_v15 = vmul.f32 %v12431_v16, %v9290_v27 }
0x4702   :  { %v12433_v45 = vpop.eup %12432 }
0x4703   :  { %v9295_v46 = vmul.f32 %v12433_v45, %v9289_v48  ;;  %v9302_v34 = vmul.f32 %v10975_v52, %v9296_v15 }
0x4705   :  { %v9301_v42 = vmul.f32 %v10975_v52, %v9295_v46  ;;  %v9308_v38 = vadd.f32 %v10976_v13, %v9302_v34  ;;  %v11004_v34 = vld [vmem:[%s15462_s18 + $0x22] ss:$0 sm:$0xff] }
0x4707   :  { %v9307_v23 = vadd.f32 %v10976_v13, %v9301_v42  ;;  %v11005_v42 = vld [vmem:[%s15462_s18 + $0x23] ss:$0 sm:$0xff] }
0x4709   :  { %v9318_v35 = vpack.c.bf16 %v9308_v38, %v9307_v23 }
0x470b   :  { %10986 = vmatmul.mubr.msk.bf16.vlgmr.msra.gmra.mxu0 %vm694_vm2, %v9318_v35 }
0x47cb   :  { %v9409_v1 = vpop.f32.mrf.mxu0 }
0x47cc   :  { %v9410_v37 = vadd.f32 %v9409_v1, %v9325_v6 }
0x47cd   :  { %v9411_v22 = vpop.f32.mrf.mxu0 }
0x47ce   :  { %v9412_v0 = vadd.f32 %v9411_v22, %v9329_v2  ;;  %v9418_v12 = vmax.f32 %v9410_v37, 0.0 }
0x47cf   :  { %v9413_v63 = vpop.f32.mrf.mxu0 }
0x47d0   :  { %v9414_v40 = vadd.f32 %v9413_v63, %v9325_v6  ;;  %v9419_v31 = vmax.f32 %v9412_v0, 0.0 }
0x47d1   :  { %v9415_v61 = vpop.f32.mrf.mxu0 }
0x47d2   :  { %v9416_v62 = vadd.f32 %v9415_v61, %v9329_v2  ;;  %v9420_v17 = vmax.f32 %v9414_v40, 0.0 }
0x47d4   :  { %v9421_v11 = vmax.f32 %v9416_v62, 0.0  ;;  %v9455_v21 = vpack.c.bf16 %v9420_v17, %v9418_v12 }
0x47d6   :  { %v9456_v28 = vpack.c.bf16 %v9421_v11, %v9419_v31 }
0x47d8   :  { %9590 = vmatprep.mubr.bf16.mxu1 %v9456_v28 }
0x47d9   :  { %9591 = vmatmul.mubr.bf16.vlgmr.msra.gmra.mxu1 %v9455_v21 }
0x4899   :  { %v11501_v24 = vpop.f32.mrf.mxu1 }
0x489b   :  { %v11502_v29 = vpop.f32.mrf.mxu1 }
0x489c   :  { %v11503_v59 = vadd.f32 %v11502_v29, %v11501_v24 }
0x489d   :  { %v11504_v60 = vpop.f32.mrf.mxu1 }
0x489e   :  { %v9593_v57 = vadd.f32 %v11503_v59, %v10987_v26 }
0x489f   :  { %v11505_v58 = vpop.f32.mrf.mxu1 }
0x48a0   :  { %v9599_v32 = vadd.f32 %v9593_v57, %v9307_v23  ;;  %v11506_v9 = vadd.f32 %v11505_v58, %v11504_v60  ;;  %v11006_v57 = vld [vmem:[%s15463_s19 + $0x2] ss:$0 sm:$0xff] }
0x48a2   :  { %v9596_v20 = vadd.f32 %v11506_v9, %v10987_v26  ;;  %v9603_v55 = vsel %vm694_vm2, %v9599_v32, 0.0  ;;  %v9611_v56 = vmul.f32 %v9599_v32, %v9599_v32 }
0x48a3   :  { %9604 = vadd.xlane.f32.xlu0 %v9603_v55 }
0x48a4   :  { %v9600_v7 = vadd.f32 %v9596_v20, %v9308_v38  ;;  %v9613_v33 = vsel %vm694_vm2, %v9611_v56, 0.0  ;;  %v11008_v56 = vld [vmem:[%s15464_s20] ss:$0 sm:$0xff] }
0x48a6   :  { %v9606_v44 = vsel %vm694_vm2, %v9600_v7, 0.0  ;;  %v9612_v5 = vmul.f32 %v9600_v7, %v9600_v7 }
0x48a7   :  { %9607 = vadd.xlane.f32.xlu1 %v9606_v44  ;;  %9614 = vadd.xlane.f32.xlu0 %v9613_v33 }
0x48a8   :  { %v9616_v53 = vsel %vm694_vm2, %v9612_v5, 0.0 }
0x48ab   :  { %9617 = vadd.xlane.f32.xlu1 %v9616_v53 }
0x492c   :  { %v9605_v54 = vpop.xlane.xlu0 %9604 }
0x492d   :  { %v9609_v18 = vmul.f32 0.015625, %v9605_v54 }
0x492f   :  { %v9621_v51 = vmul.f32 %v9609_v18, %v9609_v18  ;;  %v9627_v45 = vsub.f32 %v9599_v32, %v9609_v18  ;;  %v11007_v32 = vld [vmem:[%s15463_s19 + $0x3] ss:$0 sm:$0xff] }
0x4930   :  { %v9608_v30 = vpop.xlane.xlu1 %9607  ;;  %v9615_v10 = vpop.xlane.xlu0 %9614 }
0x4931   :  { %v9610_v49 = vmul.f32 0.015625, %v9608_v30  ;;  %v9619_v50 = vmul.f32 0.015625, %v9615_v10  ;;  %v11009_v10 = vld [vmem:[#allocation7] ss:$0 sm:$0xff] }
0x4933   :  { %v9623_v47 = vsub.f32 %v9619_v50, %v9621_v51  ;;  %v9622_v39 = vmul.f32 %v9610_v49, %v9610_v49  ;;  %v9628_v23 = vsub.f32 %v9600_v7, %v9610_v49 }
0x4934   :  { %v9618_v41 = vpop.xlane.xlu1 %9617 }
0x4935   :  { %v9625_v25 = vmax.f32 %v9623_v47, 0.0  ;;  %v9620_v27 = vmul.f32 0.015625, %v9618_v41 }
0x4937   :  { %v9629_v16 = vadd.f32 1e-05, %v9625_v25  ;;  %v9624_v52 = vsub.f32 %v9620_v27, %v9622_v39 }
0x4939   :  { %12434 = vrsqrt.f32 %v9629_v16  ;;  %v9626_v48 = vmax.f32 %v9624_v52, 0.0 }
0x493b   :  { %v9630_v15 = vadd.f32 1e-05, %v9626_v48 }
0x493d   :  { %12436 = vrsqrt.f32 %v9630_v15 }
0x4946   :  { %v12435_v46 = vpop.eup %12434 }
0x4947   :  { %v9633_v13 = vmul.f32 %v12435_v46, %v9627_v45 }
0x4949   :  { %v9639_v38 = vmul.f32 %v11004_v34, %v9633_v13 }
0x494a   :  { %v12437_v35 = vpop.eup %12436 }
0x494b   :  { %v9645_v43 = vadd.f32 %v11005_v42, %v9639_v38  ;;  %v9634_v3 = vmul.f32 %v12437_v35, %v9628_v23 }
0x494d   :  { %v9649_v19 = vsel %vm694_vm2, %v9645_v43, 0.0  ;;  %v9640_v14 = vmul.f32 %v11004_v34, %v9634_v3  ;;  %v9657_v36 = vmul.f32 %v9645_v43, %v9645_v43 }
0x494e   :  { %9650 = vadd.xlane.f32.xlu0 %v9649_v19 }
0x494f   :  { %v9646_v8 = vadd.f32 %v11005_v42, %v9640_v14  ;;  %v9659_v1 = vsel %vm694_vm2, %v9657_v36, 0.0 }
0x4951   :  { %v9652_v4 = vsel %vm694_vm2, %v9646_v8, 0.0  ;;  %v9658_v2 = vmul.f32 %v9646_v8, %v9646_v8 }
0x4952   :  { %9653 = vadd.xlane.f32.xlu1 %v9652_v4  ;;  %9660 = vadd.xlane.f32.xlu0 %v9659_v1 }
0x4953   :  { %v9662_v6 = vsel %vm694_vm2, %v9658_v2, 0.0 }
0x4956   :  { %9663 = vadd.xlane.f32.xlu1 %v9662_v6 }
0x49d7   :  { %v9651_v22 = vpop.xlane.xlu0 %9650 }
0x49d8   :  { %v9655_v63 = vmul.f32 0.015625, %v9651_v22 }
0x49da   :  { %v9667_v37 = vmul.f32 %v9655_v63, %v9655_v63  ;;  %v9673_v59 = vsub.f32 %v9645_v43, %v9655_v63 }
0x49db   :  { %v9654_v0 = vpop.xlane.xlu1 %9653  ;;  %v9661_v40 = vpop.xlane.xlu0 %9660 }
0x49dc   :  { %v9656_v61 = vmul.f32 0.015625, %v9654_v0  ;;  %v9665_v62 = vmul.f32 0.015625, %v9661_v40 }
0x49de   :  { %v9669_v17 = vsub.f32 %v9665_v62, %v9667_v37  ;;  %v9668_v11 = vmul.f32 %v9656_v61, %v9656_v61  ;;  %v9674_v9 = vsub.f32 %v9646_v8, %v9656_v61 }
0x49df   :  { %v9664_v31 = vpop.xlane.xlu1 %9663 }
0x49e0   :  { %v9671_v12 = vmax.f32 %v9669_v17, 0.0  ;;  %v9666_v28 = vmul.f32 0.015625, %v9664_v31 }
0x49e2   :  { %v9675_v21 = vadd.f32 1e-05, %v9671_v12  ;;  %v9670_v24 = vsub.f32 %v9666_v28, %v9668_v11 }
0x49e4   :  { %12438 = vrsqrt.f32 %v9675_v21  ;;  %v9672_v26 = vmax.f32 %v9670_v24, 0.0 }
0x49e6   :  { %v9676_v29 = vadd.f32 1e-05, %v9672_v26 }
0x49e8   :  { %12440 = vrsqrt.f32 %v9676_v29 }
0x49f1   :  { %v12439_v60 = vpop.eup %12438 }
0x49f2   :  { %v9679_v58 = vmul.f32 %v12439_v60, %v9673_v59 }
0x49f4   :  { %v9685_v20 = vmul.f32 %v11006_v57, %v9679_v58 }
0x49f5   :  { %v12441_v55 = vpop.eup %12440 }
0x49f6   :  { %v9691_v7 = vadd.f32 %v11007_v32, %v9685_v20  ;;  %v9680_v44 = vmul.f32 %v12441_v55, %v9674_v9 }
0x49f8   :  { %v9700_v33 = vmul.f32 %v11008_v56, %v9691_v7  ;;  %v9686_v5 = vmul.f32 %v11006_v57, %v9680_v44 }
0x49fa   :  { %v9702_v53 = vsel %vm694_vm2, %v9700_v33, 0.0  ;;  %v9692_v54 = vadd.f32 %v11007_v32, %v9686_v5 }
0x49fb   :  { %9703 = vadd.xlane.f32.xlu0 %v9702_v53 }
0x49fc   :  { %v9701_v18 = vmul.f32 %v11008_v56, %v9692_v54 }
0x49fe   :  { %v9705_v30 = vsel %vm694_vm2, %v9701_v18, 0.0 }
0x49ff   :  { %9706 = vadd.xlane.f32.xlu1 %v9705_v30 }
0x4a84   :  { %v9704_v51 = vpop.xlane.xlu0 %9703 }
0x4a85   :  { %v9715_v49 = vadd.f32 %v11009_v10, %v9704_v51 }
0x4a87   :  { %9718 = vst.msk [vmem:[%s15466_s22] sm:$0xff] %vm9717_vm3, %v9715_v49 }
0x4a88   :  { %v9707_v50 = vpop.xlane.xlu1 %9706 }
0x4a89   :  { %v9716_v47 = vadd.f32 %v11009_v10, %v9707_v50 }
0x4a8b   :  { %9719 = vst.msk [vmem:[%s15466_s22 + $0x8] sm:$0xff] %vm9717_vm3, %v9716_v47 }
0x4a8c   :  { %9724 = vsyncmov [#allocation6] }
0x4a8f   :  { %s9725_s5 = vpop.sfrf %9724 }
0x4a90   :  { %p11010_p0 = scmp.ne.s32.totalorder %s9725_s5, 0 }
0x4a92   :  { %9729 = shalt.err (%p11010_p0)  }
0x4a93   :  { %9731 = vsyncmov [#allocation6 + $0x1] }
0x4a96   :  { %s9732_s10 = vpop.sfrf %9731 }
0x4a97   :  { %p11011_p1 = scmp.ne.s32.totalorder %s9732_s10, 0 }
0x4a99   :  { %9736 = shalt.err (%p11011_p1)  }
0x4a9a   :  { %9738 = vsyncmov [#allocation6 + $0x2] }
0x4a9d   :  { %s9739_s24 = vpop.sfrf %9738 }
0x4a9e   :  { %p11012_p2 = scmp.ne.s32.totalorder %s9739_s24, 0 }
0x4aa0   :  { %9743 = shalt.err (%p11012_p2)  }
0x4aa1   :  { %9745 = vsyncmov [#allocation6 + $0x3] }
0x4aa4   :  { %s9746_s21 = vpop.sfrf %9745 }
0x4aa5   :  { %p11013_p3 = scmp.ne.s32.totalorder %s9746_s21, 0 }
0x4aa7   :  { %9750 = shalt.err (%p11013_p3)  }

</bundles_post_ra>
